<compile_context>
chip_gen: v7x
topology: tpu7x:2x2x1
jax: 0.10.0
libtpu: 0.0.40
codegen_flags: <defaults>
</compile_context>

<pallas_src>
import functools

import numpy as np

import jax
import jax.numpy as jnp
from jax.experimental import pallas as pl
from jax.experimental.pallas import tpu as pltpu


def _rup(v, m):
    return -(-v // m) * m


# ----------------------------------------------------------------------------
# Fused kernel
# ----------------------------------------------------------------------------
def _nature_cnn_kernel(x_ref, a1_ref, b1_ref, w2_ref, b2_ref, w3_ref, b3_ref,
                       wl_ref, bl_ref, wh_ref, bh_ref,
                       o_ref,
                       act1_ref, *, dims):
    s1, s2 = dims["s1"], dims["s2"]
    oh1, ow1 = dims["oh1"], dims["ow1"]
    oh2, ow2 = dims["oh2"], dims["ow2"]
    c1, c2 = dims["c1"], dims["c2"]
    k1 = a1_ref.shape[0]
    k2 = w2_ref.shape[0]
    tb = o_ref.shape[0]

    # ---- conv1 + ReLU: im2col folded into a1[ki] -----------------------------
    # act1 row layout: lane = oj * c1 + channel (lane-dense, one wide store/row).
    for oi in range(oh1):
        acc = jnp.zeros((tb, ow1 * c1), jnp.float32)
        for ki in range(k1):
            acc = acc + jnp.dot(x_ref[s1 * oi + ki], a1_ref[ki],
                                preferred_element_type=jnp.float32)
        act1_ref[oi] = jnp.maximum(acc + b1_ref[...], 0.0)

    # ---- conv2 + ReLU and conv3 + ReLU, fused per conv2 output position ------
    # conv3's output is 1x1 (asserted at init), so its receptive field is all of
    # conv2's output: accumulate each ReLU'd conv2 position straight into hid3.
    hid3 = jnp.zeros((tb, w3_ref.shape[2]), jnp.float32)
    for oi in range(oh2):
        for oj in range(ow2):
            acc2 = jnp.zeros((tb, c2), jnp.float32)
            lane0 = s2 * oj * c1
            for ki in range(k2):
                acc2 = acc2 + jnp.dot(
                    act1_ref[s2 * oi + ki, :, lane0:lane0 + k2 * c1],
                    w2_ref[ki], preferred_element_type=jnp.float32)
            a2 = jnp.maximum(acc2 + b2_ref[...], 0.0)
            hid3 = hid3 + jnp.dot(a2, w3_ref[oi * ow2 + oj],
                                  preferred_element_type=jnp.float32)
    hid3 = jnp.maximum(hid3 + b3_ref[...], 0.0)

    # ---- 512-unit linear (no activation in the reference model) --------------
    hid = jnp.dot(hid3, wl_ref[...], preferred_element_type=jnp.float32) + bl_ref[...]

    # ---- output head (zero-padded to 128 lanes: single lane-dense HBM store) -
    out = jnp.dot(hid, wh_ref[...], preferred_element_type=jnp.float32) + bh_ref[...]
    o_ref[...] = out.astype(o_ref.dtype)


def _fused_forward(xt, params, tb):
    """xt: (H, B_pad, W*C) f32, B_pad % tb == 0  ->  (B_pad, n_pad) f32."""
    h0, b_pad, wc = xt.shape
    d = params["dims"]
    n_pad = d["n_pad"]

    operands = (xt, params["a1"], params["b1"], params["w2r"], params["b2"],
                params["w3b"], params["b3"], params["lin_w"], params["lin_b"],
                params["head_w"], params["head_b"])

    def full_spec(a):                    # VMEM-resident weight, constant index
        zeros = (0,) * a.ndim
        return pl.BlockSpec(a.shape, lambda i, z=zeros: z)

    in_specs = [pl.BlockSpec((h0, tb, wc), lambda i: (0, i, 0))]
    in_specs += [full_spec(a) for a in operands[1:]]

    # Explicit VMEM budget (with (8,128) tile padding): pipelined input block is
    # double-buffered, weights counted double-buffered too, plus the act1
    # scratch and output blocks; generous margin, capped under v7x's 64 MiB.
    def padded_bytes(shape):
        s = (1,) * (2 - len(shape)) + tuple(shape)
        lead = 1
        for v in s[:-2]:
            lead *= v
        return lead * _rup(s[-2], 8) * _rup(s[-1], 128) * 4

    vmem_bytes = 2 * padded_bytes((h0, tb, wc))
    vmem_bytes += 2 * sum(padded_bytes(a.shape) for a in operands[1:])
    vmem_bytes += padded_bytes((d["oh1"], tb, d["ow1"] * d["c1"]))
    vmem_bytes += 2 * padded_bytes((tb, n_pad))
    vmem_limit = int(min(max(2 * vmem_bytes + (8 << 20), 32 << 20), 64 << 20))

    kernel = functools.partial(_nature_cnn_kernel, dims=d)
    return pl.pallas_call(
        kernel,
        out_shape=jax.ShapeDtypeStruct((b_pad, n_pad), jnp.float32),
        grid=(b_pad // tb,),
        in_specs=in_specs,
        out_specs=pl.BlockSpec((tb, n_pad), lambda i: (i, 0)),
        scratch_shapes=[
            pltpu.VMEM((d["oh1"], tb, d["ow1"] * d["c1"]), jnp.float32),  # act1
        ],
        compiler_params=pltpu.CompilerParams(
            dimension_semantics=("parallel",),
            vmem_limit_bytes=vmem_limit),
    )(*operands)


# ----------------------------------------------------------------------------
# Parameters (orthogonal weights, zero biases -> orthogonal_init), with all
# kernel-side GEMM layouts (folded im2col, per-tap blocks) built once here.
# ----------------------------------------------------------------------------
def init_params(key, input_shape=(36, 36, 4), output_units=6):
    h0, w0, c0 = input_shape              # permute=True: (H, W, C)
    conv_cfg = [(c0, 32, 8, 4), (32, 64, 4, 2), (64, 64, 3, 1)]
    ortho = jax.nn.initializers.orthogonal()
    keys = jax.random.split(key, len(conv_cfg) + 2)

    conv_w_oihw, conv_b, spatial = [], [], []
    h, w = h0, w0
    for i, (cin, cout, k, s) in enumerate(conv_cfg):
        w2d = ortho(keys[i], (cout, cin * k * k), jnp.float32)
        conv_w_oihw.append(w2d.reshape(cout, cin, k, k))      # PyTorch OIHW
        conv_b.append(jnp.zeros((cout,), jnp.float32))
        h = (h - k) // s + 1
        w = (w - k) // s + 1
        spatial.append((h, w))
    (oh1, ow1), (oh2, ow2), (oh3, ow3) = spatial
    c1, c2, c3 = (cfg[1] for cfg in conv_cfg)
    k1, s1 = conv_cfg[0][2], conv_cfg[0][3]
    k2, s2 = conv_cfg[1][2], conv_cfg[1][3]

    assert oh3 == 1 and ow3 == 1, (
        "fused kernel assumes conv3 output is 1x1 (true for 36x36 inputs); "
        f"got {oh3}x{ow3}")

    # conv1: fold im2col into per-kernel-row matrices.  a1[ki] maps an input row
    # (lane = w*cin + ci) to a lane-dense act1 row (lane = oj*c1 + co).
    w1 = np.asarray(conv_w_oihw[0])                           # (c1, c0, k1, k1)
    a1 = np.zeros((k1, w0 * c0, ow1 * c1), np.float32)
    for ki in range(k1):
        for oj in range(ow1):
            for kj in range(k1):
                col = oj * s1 + kj
                a1[ki, col * c0:(col + 1) * c0, oj * c1:(oj + 1) * c1] = \
                    w1[:, :, ki, kj].T
    b1 = jnp.tile(conv_b[0], (ow1,))[None, :]                 # (1, ow1*c1)

    # conv2: one (k2*c1, c2) GEMM block per kernel row; its LHS is a 128-lane
    # contiguous slice of an act1 row, so no patch buffer is ever built.
    w2 = np.asarray(conv_w_oihw[1])                           # (c2, c1, k2, k2)
    w2r = np.zeros((k2, k2 * c1, c2), np.float32)
    for ki in range(k2):
        for kj in range(k2):
            w2r[ki, kj * c1:(kj + 1) * c1, :] = w2[:, :, ki, kj].T
    b2 = conv_b[1][None, :]

    # conv3: 1x1 output -> one (c2, c3) block per conv2 output position.
    w3 = np.asarray(conv_w_oihw[2])                           # (c3, c2, 3, 3)
    w3b = np.zeros((oh2 * ow2, c2, c3), np.float32)
    for oi in range(oh2):
        for oj in range(ow2):
            w3b[oi * ow2 + oj] = w3[:, :, oi, oj].T
    b3 = conv_b[2][None, :]

    # 512-unit linear.  PyTorch flattens NCHW; with a 1x1 spatial map that is
    # just the channel order, so a plain transpose is the correct GEMM layout.
    in_features = oh3 * ow3 * c3
    lin_w_t = ortho(keys[-2], (512, in_features), jnp.float32)
    lin_w = lin_w_t.T                                         # (in_features, 512)
    lin_b = jnp.zeros((1, 512), jnp.float32)

    # Output head, zero-padded to a lane-dense (multiple-of-128) width.
    n_pad = max(128, _rup(output_units, 128))
    head_w_t = ortho(keys[-1], (output_units, 512), jnp.float32)
    head_w = jnp.zeros((512, n_pad), jnp.float32).at[:, :output_units].set(head_w_t.T)
    head_b = jnp.zeros((1, n_pad), jnp.float32)

    dims = dict(k1=k1, s1=s1, k2=k2, s2=s2, oh1=oh1, ow1=ow1,
                oh2=oh2, ow2=ow2, c1=c1, c2=c2, c3=c3, n_pad=n_pad)
    return {
        "a1": jnp.asarray(a1), "b1": b1,
        "w2r": jnp.asarray(w2r), "b2": b2,
        "w3b": jnp.asarray(w3b), "b3": b3,
        "lin_w": lin_w, "lin_b": lin_b,
        "head_w": head_w, "head_b": head_b,
        "num_out": output_units, "dims": dims,
        # reference-only (PyTorch-native layouts)
        "conv_w_oihw": conv_w_oihw, "conv_b": conv_b,
        "conv_meta": [(k, s) for (_, _, k, s) in conv_cfg],
        "lin_w_t": lin_w_t, "head_w_t": head_w_t,
    }


# ----------------------------------------------------------------------------
# Forward (default config: single output head, no noisy / dueling / nbins)
# ----------------------------------------------------------------------------
def forward_pallas(params, x, *, batch_tile=64):
    # broadcast_inputs(ndims=4)
    expand = 4 - x.ndim
    if expand:
        x = x[(None,) * expand]
    if x.dtype == jnp.uint8:
        x = x.astype(jnp.float32) / 255.0
    x = x.astype(jnp.float32)

    b, h, w, c = x.shape
    # Batch tile: as large as the per-generation VMEM budget allows (default 64
    # fits v5e/v6e/v7x scoped limits with the layouts above), rounded to a
    # multiple of 8, and split so the grid has >=2 steps when the batch is big
    # enough for the "parallel" axis to shard across v7x's two TensorCores.
    tb = min(_rup(max(batch_tile, 8), 8), _rup(b, 8))
    if b >= 16 and _rup(b, tb) // tb < 2:
        tb = _rup(-(-b // 2), 8)
    b_pad = _rup(b, tb)
    if b_pad != b:
        x = jnp.pad(x, ((0, b_pad - b), (0, 0), (0, 0), (0, 0)))

    # (B, H, W, C) -> (H, B_pad, W*C): batch becomes the sublane axis of every
    # in-kernel tile and W*C the lane axis, so all kernel loads/stores are
    # contiguous lane-dense slabs and the input block is not lane-padded.
    xt = jnp.transpose(x, (1, 0, 2, 3)).reshape(h, b_pad, w * c)

    out_full = _fused_forward(xt, params, tb)
    out = out_full[:b, :params["num_out"]]
    if expand:
        out = out.reshape(out.shape[expand:])
    return out


# ----------------------------------------------------------------------------
# Pure-JAX reference (mirrors the PyTorch NCHW path) for a correctness check.
# ----------------------------------------------------------------------------
def forward_ref(params, x):
    x = jnp.transpose(x.astype(jnp.float32), (0, 3, 1, 2))   # NHWC -> NCHW
    for w_oihw, bias, (k, s) in zip(params["conv_w_oihw"], params["conv_b"],
                                    params["conv_meta"]):
        x = jax.lax.conv_general_dilated(
            x, w_oihw, (s, s), "VALID",
            dimension_numbers=("NCHW", "OIHW", "NCHW"))
        x = jnp.maximum(x + bias.reshape(1, -1, 1, 1), 0.0)
    x = x.reshape(x.shape[0], -1)                            # NCHW flatten
    x = x @ params["lin_w_t"].T + params["lin_b"][0]
    n = params["num_out"]
    x = x @ params["head_w_t"].T + params["head_b"][0, :n]
    return x


if __name__ == "__main__":
    key = jax.random.PRNGKey(0)
    k_param, k_input = jax.random.split(key)

    # Small shapes consistent with the conv stack (36 -> 8 -> 3 -> 1 spatially).
    INPUT_SHAPE = (36, 36, 4)     # (H, W, C), permute=True convention
    BATCH = 2
    OUTPUT_UNITS = 6

    params = init_params(k_param, input_shape=INPUT_SHAPE,
                         output_units=OUTPUT_UNITS)
    x = jax.random.uniform(k_input, (BATCH,) + INPUT_SHAPE, dtype=jnp.float32)

    fwd = jax.jit(lambda inp: forward_pallas(params, inp))
    out = jax.block_until_ready(fwd(x))
    assert out.shape == (BATCH, OUTPUT_UNITS), out.shape

    ref = jax.block_until_ready(forward_ref(params, x))
    assert jnp.allclose(out, ref, atol=1e-3, rtol=1e-3), \
        float(jnp.max(jnp.abs(out - ref)))

    print("KERNEL_OK")
</pallas_src>

<mosaic_0001>
module attributes {stable_mosaic.version = 11 : i64} {
  func.func @_nature_cnn_kernel(%arg0: i32, %arg1: memref<36x8x144xf32, #tpu.memory_space<vmem>>, %arg2: memref<8x144x256xf32, #tpu.memory_space<vmem>>, %arg3: memref<1x256xf32, #tpu.memory_space<vmem>>, %arg4: memref<4x128x64xf32, #tpu.memory_space<vmem>>, %arg5: memref<1x64xf32, #tpu.memory_space<vmem>>, %arg6: memref<9x64x64xf32, #tpu.memory_space<vmem>>, %arg7: memref<1x64xf32, #tpu.memory_space<vmem>>, %arg8: memref<64x512xf32, #tpu.memory_space<vmem>>, %arg9: memref<1x512xf32, #tpu.memory_space<vmem>>, %arg10: memref<512x128xf32, #tpu.memory_space<vmem>>, %arg11: memref<1x128xf32, #tpu.memory_space<vmem>>, %arg12: memref<8x128xf32, #tpu.memory_space<vmem>>, %arg13: memref<8x8x256xf32, #tpu.memory_space<vmem>>) attributes {dimension_semantics = [#tpu.dimension_semantics<parallel>], iteration_bounds = array<i64: 1>, scalar_prefetch = 0 : i64, scratch_operands = 1 : i64, tpu.core_type = #tpu.core_type<tc>, window_params = [{transform_indices = @transform_0, window_bounds = array<i64: 36, 8, 144>}, {pipeline_mode = #tpu.pipeline_mode<synchronous>, transform_indices = @transform_1, window_bounds = array<i64: 8, 144, 256>}, {pipeline_mode = #tpu.pipeline_mode<synchronous>, transform_indices = @transform_2, window_bounds = array<i64: 1, 256>}, {pipeline_mode = #tpu.pipeline_mode<synchronous>, transform_indices = @transform_3, window_bounds = array<i64: 4, 128, 64>}, {pipeline_mode = #tpu.pipeline_mode<synchronous>, transform_indices = @transform_4, window_bounds = array<i64: 1, 64>}, {pipeline_mode = #tpu.pipeline_mode<synchronous>, transform_indices = @transform_5, window_bounds = array<i64: 9, 64, 64>}, {pipeline_mode = #tpu.pipeline_mode<synchronous>, transform_indices = @transform_6, window_bounds = array<i64: 1, 64>}, {pipeline_mode = #tpu.pipeline_mode<synchronous>, transform_indices = @transform_7, window_bounds = array<i64: 64, 512>}, {pipeline_mode = #tpu.pipeline_mode<synchronous>, transform_indices = @transform_8, window_bounds = array<i64: 1, 512>}, {pipeline_mode = #tpu.pipeline_mode<synchronous>, transform_indices = @transform_9, window_bounds = array<i64: 512, 128>}, {pipeline_mode = #tpu.pipeline_mode<synchronous>, transform_indices = @transform_10, window_bounds = array<i64: 1, 128>}, {transform_indices = @transform_11, window_bounds = array<i64: 8, 128>}]} {
    %cst = arith.constant 0.000000e+00 : f32
    %0 = vector.broadcast %cst : f32 to vector<8x256xf32>
    %c0 = arith.constant 0 : index
    %c0_0 = arith.constant 0 : index
    %c0_1 = arith.constant 0 : index
    %1 = vector.load %arg1[%c0, %c0_0, %c0_1] : memref<36x8x144xf32, #tpu.memory_space<vmem>>, vector<1x8x144xf32>
    %2 = vector.shape_cast %1 : vector<1x8x144xf32> to vector<8x144xf32>
    %c0_2 = arith.constant 0 : index
    %c0_3 = arith.constant 0 : index
    %c0_4 = arith.constant 0 : index
    %3 = vector.load %arg2[%c0_2, %c0_3, %c0_4] : memref<8x144x256xf32, #tpu.memory_space<vmem>>, vector<1x144x256xf32>
    %4 = vector.shape_cast %3 : vector<1x144x256xf32> to vector<144x256xf32>
    %cst_5 = arith.constant dense<0.000000e+00> : vector<8x256xf32>
    %5 = tpu.matmul %2, %4, %cst_5 {dimension_numbers = #tpu.dot_dimension_numbers<[1], [0], [0], [1], [0, 0, 1, 1], [], []>} : vector<8x144xf32>, vector<144x256xf32>, vector<8x256xf32> -> vector<8x256xf32>
    %6 = arith.addf %0, %5 : vector<8x256xf32>
    %c1 = arith.constant 1 : index
    %c0_6 = arith.constant 0 : index
    %c0_7 = arith.constant 0 : index
    %7 = vector.load %arg1[%c1, %c0_6, %c0_7] : memref<36x8x144xf32, #tpu.memory_space<vmem>>, vector<1x8x144xf32>
    %8 = vector.shape_cast %7 : vector<1x8x144xf32> to vector<8x144xf32>
    %c1_8 = arith.constant 1 : index
    %c0_9 = arith.constant 0 : index
    %c0_10 = arith.constant 0 : index
    %9 = vector.load %arg2[%c1_8, %c0_9, %c0_10] : memref<8x144x256xf32, #tpu.memory_space<vmem>>, vector<1x144x256xf32>
    %10 = vector.shape_cast %9 : vector<1x144x256xf32> to vector<144x256xf32>
    %cst_11 = arith.constant dense<0.000000e+00> : vector<8x256xf32>
    %11 = tpu.matmul %8, %10, %cst_11 {dimension_numbers = #tpu.dot_dimension_numbers<[1], [0], [0], [1], [0, 0, 1, 1], [], []>} : vector<8x144xf32>, vector<144x256xf32>, vector<8x256xf32> -> vector<8x256xf32>
    %12 = arith.addf %6, %11 : vector<8x256xf32>
    %c2 = arith.constant 2 : index
    %c0_12 = arith.constant 0 : index
    %c0_13 = arith.constant 0 : index
    %13 = vector.load %arg1[%c2, %c0_12, %c0_13] : memref<36x8x144xf32, #tpu.memory_space<vmem>>, vector<1x8x144xf32>
    %14 = vector.shape_cast %13 : vector<1x8x144xf32> to vector<8x144xf32>
    %c2_14 = arith.constant 2 : index
    %c0_15 = arith.constant 0 : index
    %c0_16 = arith.constant 0 : index
    %15 = vector.load %arg2[%c2_14, %c0_15, %c0_16] : memref<8x144x256xf32, #tpu.memory_space<vmem>>, vector<1x144x256xf32>
    %16 = vector.shape_cast %15 : vector<1x144x256xf32> to vector<144x256xf32>
    %cst_17 = arith.constant dense<0.000000e+00> : vector<8x256xf32>
    %17 = tpu.matmul %14, %16, %cst_17 {dimension_numbers = #tpu.dot_dimension_numbers<[1], [0], [0], [1], [0, 0, 1, 1], [], []>} : vector<8x144xf32>, vector<144x256xf32>, vector<8x256xf32> -> vector<8x256xf32>
    %18 = arith.addf %12, %17 : vector<8x256xf32>
    %c3 = arith.constant 3 : index
    %c0_18 = arith.constant 0 : index
    %c0_19 = arith.constant 0 : index
    %19 = vector.load %arg1[%c3, %c0_18, %c0_19] : memref<36x8x144xf32, #tpu.memory_space<vmem>>, vector<1x8x144xf32>
    %20 = vector.shape_cast %19 : vector<1x8x144xf32> to vector<8x144xf32>
    %c3_20 = arith.constant 3 : index
    %c0_21 = arith.constant 0 : index
    %c0_22 = arith.constant 0 : index
    %21 = vector.load %arg2[%c3_20, %c0_21, %c0_22] : memref<8x144x256xf32, #tpu.memory_space<vmem>>, vector<1x144x256xf32>
    %22 = vector.shape_cast %21 : vector<1x144x256xf32> to vector<144x256xf32>
    %cst_23 = arith.constant dense<0.000000e+00> : vector<8x256xf32>
    %23 = tpu.matmul %20, %22, %cst_23 {dimension_numbers = #tpu.dot_dimension_numbers<[1], [0], [0], [1], [0, 0, 1, 1], [], []>} : vector<8x144xf32>, vector<144x256xf32>, vector<8x256xf32> -> vector<8x256xf32>
    %24 = arith.addf %18, %23 : vector<8x256xf32>
    %c4 = arith.constant 4 : index
    %c0_24 = arith.constant 0 : index
    %c0_25 = arith.constant 0 : index
    %25 = vector.load %arg1[%c4, %c0_24, %c0_25] : memref<36x8x144xf32, #tpu.memory_space<vmem>>, vector<1x8x144xf32>
    %26 = vector.shape_cast %25 : vector<1x8x144xf32> to vector<8x144xf32>
    %c4_26 = arith.constant 4 : index
    %c0_27 = arith.constant 0 : index
    %c0_28 = arith.constant 0 : index
    %27 = vector.load %arg2[%c4_26, %c0_27, %c0_28] : memref<8x144x256xf32, #tpu.memory_space<vmem>>, vector<1x144x256xf32>
    %28 = vector.shape_cast %27 : vector<1x144x256xf32> to vector<144x256xf32>
    %cst_29 = arith.constant dense<0.000000e+00> : vector<8x256xf32>
    %29 = tpu.matmul %26, %28, %cst_29 {dimension_numbers = #tpu.dot_dimension_numbers<[1], [0], [0], [1], [0, 0, 1, 1], [], []>} : vector<8x144xf32>, vector<144x256xf32>, vector<8x256xf32> -> vector<8x256xf32>
    %30 = arith.addf %24, %29 : vector<8x256xf32>
    %c5 = arith.constant 5 : index
    %c0_30 = arith.constant 0 : index
    %c0_31 = arith.constant 0 : index
    %31 = vector.load %arg1[%c5, %c0_30, %c0_31] : memref<36x8x144xf32, #tpu.memory_space<vmem>>, vector<1x8x144xf32>
    %32 = vector.shape_cast %31 : vector<1x8x144xf32> to vector<8x144xf32>
    %c5_32 = arith.constant 5 : index
    %c0_33 = arith.constant 0 : index
    %c0_34 = arith.constant 0 : index
    %33 = vector.load %arg2[%c5_32, %c0_33, %c0_34] : memref<8x144x256xf32, #tpu.memory_space<vmem>>, vector<1x144x256xf32>
    %34 = vector.shape_cast %33 : vector<1x144x256xf32> to vector<144x256xf32>
    %cst_35 = arith.constant dense<0.000000e+00> : vector<8x256xf32>
    %35 = tpu.matmul %32, %34, %cst_35 {dimension_numbers = #tpu.dot_dimension_numbers<[1], [0], [0], [1], [0, 0, 1, 1], [], []>} : vector<8x144xf32>, vector<144x256xf32>, vector<8x256xf32> -> vector<8x256xf32>
    %36 = arith.addf %30, %35 : vector<8x256xf32>
    %c6 = arith.constant 6 : index
    %c0_36 = arith.constant 0 : index
    %c0_37 = arith.constant 0 : index
    %37 = vector.load %arg1[%c6, %c0_36, %c0_37] : memref<36x8x144xf32, #tpu.memory_space<vmem>>, vector<1x8x144xf32>
    %38 = vector.shape_cast %37 : vector<1x8x144xf32> to vector<8x144xf32>
    %c6_38 = arith.constant 6 : index
    %c0_39 = arith.constant 0 : index
    %c0_40 = arith.constant 0 : index
    %39 = vector.load %arg2[%c6_38, %c0_39, %c0_40] : memref<8x144x256xf32, #tpu.memory_space<vmem>>, vector<1x144x256xf32>
    %40 = vector.shape_cast %39 : vector<1x144x256xf32> to vector<144x256xf32>
    %cst_41 = arith.constant dense<0.000000e+00> : vector<8x256xf32>
    %41 = tpu.matmul %38, %40, %cst_41 {dimension_numbers = #tpu.dot_dimension_numbers<[1], [0], [0], [1], [0, 0, 1, 1], [], []>} : vector<8x144xf32>, vector<144x256xf32>, vector<8x256xf32> -> vector<8x256xf32>
    %42 = arith.addf %36, %41 : vector<8x256xf32>
    %c7 = arith.constant 7 : index
    %c0_42 = arith.constant 0 : index
    %c0_43 = arith.constant 0 : index
    %43 = vector.load %arg1[%c7, %c0_42, %c0_43] : memref<36x8x144xf32, #tpu.memory_space<vmem>>, vector<1x8x144xf32>
    %44 = vector.shape_cast %43 : vector<1x8x144xf32> to vector<8x144xf32>
    %c7_44 = arith.constant 7 : index
    %c0_45 = arith.constant 0 : index
    %c0_46 = arith.constant 0 : index
    %45 = vector.load %arg2[%c7_44, %c0_45, %c0_46] : memref<8x144x256xf32, #tpu.memory_space<vmem>>, vector<1x144x256xf32>
    %46 = vector.shape_cast %45 : vector<1x144x256xf32> to vector<144x256xf32>
    %cst_47 = arith.constant dense<0.000000e+00> : vector<8x256xf32>
    %47 = tpu.matmul %44, %46, %cst_47 {dimension_numbers = #tpu.dot_dimension_numbers<[1], [0], [0], [1], [0, 0, 1, 1], [], []>} : vector<8x144xf32>, vector<144x256xf32>, vector<8x256xf32> -> vector<8x256xf32>
    %48 = arith.addf %42, %47 : vector<8x256xf32>
    %c0_48 = arith.constant 0 : index
    %c0_49 = arith.constant 0 : index
    %49 = vector.load %arg3[%c0_48, %c0_49] : memref<1x256xf32, #tpu.memory_space<vmem>>, vector<1x256xf32>
    %50 = vector.broadcast %49 : vector<1x256xf32> to vector<8x256xf32>
    %51 = arith.addf %48, %50 : vector<8x256xf32>
    %cst_50 = arith.constant 0.000000e+00 : f32
    %52 = vector.broadcast %cst_50 : f32 to vector<8x256xf32>
    %53 = arith.maximumf %51, %52 : vector<8x256xf32>
    %c0_51 = arith.constant 0 : index
    %c0_52 = arith.constant 0 : index
    %c0_53 = arith.constant 0 : index
    %54 = vector.load %arg13[%c0_51, %c0_52, %c0_53] : memref<8x8x256xf32, #tpu.memory_space<vmem>>, vector<1x8x256xf32>
    %55 = vector.shape_cast %54 : vector<1x8x256xf32> to vector<8x256xf32>
    %56 = vector.shape_cast %53 : vector<8x256xf32> to vector<1x8x256xf32>
    tpu.vector_store %arg13[%c0_51, %c0_52, %c0_53], %56 {strides = array<i32>} : memref<8x8x256xf32, #tpu.memory_space<vmem>>, vector<1x8x256xf32>,
    %cst_54 = arith.constant 0.000000e+00 : f32
    %57 = vector.broadcast %cst_54 : f32 to vector<8x256xf32>
    %c4_55 = arith.constant 4 : index
    %c0_56 = arith.constant 0 : index
    %c0_57 = arith.constant 0 : index
    %58 = vector.load %arg1[%c4_55, %c0_56, %c0_57] : memref<36x8x144xf32, #tpu.memory_space<vmem>>, vector<1x8x144xf32>
    %59 = vector.shape_cast %58 : vector<1x8x144xf32> to vector<8x144xf32>
    %c0_58 = arith.constant 0 : index
    %c0_59 = arith.constant 0 : index
    %c0_60 = arith.constant 0 : index
    %60 = vector.load %arg2[%c0_58, %c0_59, %c0_60] : memref<8x144x256xf32, #tpu.memory_space<vmem>>, vector<1x144x256xf32>
    %61 = vector.shape_cast %60 : vector<1x144x256xf32> to vector<144x256xf32>
    %cst_61 = arith.constant dense<0.000000e+00> : vector<8x256xf32>
    %62 = tpu.matmul %59, %61, %cst_61 {dimension_numbers = #tpu.dot_dimension_numbers<[1], [0], [0], [1], [0, 0, 1, 1], [], []>} : vector<8x144xf32>, vector<144x256xf32>, vector<8x256xf32> -> vector<8x256xf32>
    %63 = arith.addf %57, %62 : vector<8x256xf32>
    %c5_62 = arith.constant 5 : index
    %c0_63 = arith.constant 0 : index
    %c0_64 = arith.constant 0 : index
    %64 = vector.load %arg1[%c5_62, %c0_63, %c0_64] : memref<36x8x144xf32, #tpu.memory_space<vmem>>, vector<1x8x144xf32>
    %65 = vector.shape_cast %64 : vector<1x8x144xf32> to vector<8x144xf32>
    %c1_65 = arith.constant 1 : index
    %c0_66 = arith.constant 0 : index
    %c0_67 = arith.constant 0 : index
    %66 = vector.load %arg2[%c1_65, %c0_66, %c0_67] : memref<8x144x256xf32, #tpu.memory_space<vmem>>, vector<1x144x256xf32>
    %67 = vector.shape_cast %66 : vector<1x144x256xf32> to vector<144x256xf32>
    %cst_68 = arith.constant dense<0.000000e+00> : vector<8x256xf32>
    %68 = tpu.matmul %65, %67, %cst_68 {dimension_numbers = #tpu.dot_dimension_numbers<[1], [0], [0], [1], [0, 0, 1, 1], [], []>} : vector<8x144xf32>, vector<144x256xf32>, vector<8x256xf32> -> vector<8x256xf32>
    %69 = arith.addf %63, %68 : vector<8x256xf32>
    %c6_69 = arith.constant 6 : index
    %c0_70 = arith.constant 0 : index
    %c0_71 = arith.constant 0 : index
    %70 = vector.load %arg1[%c6_69, %c0_70, %c0_71] : memref<36x8x144xf32, #tpu.memory_space<vmem>>, vector<1x8x144xf32>
    %71 = vector.shape_cast %70 : vector<1x8x144xf32> to vector<8x144xf32>
    %c2_72 = arith.constant 2 : index
    %c0_73 = arith.constant 0 : index
    %c0_74 = arith.constant 0 : index
    %72 = vector.load %arg2[%c2_72, %c0_73, %c0_74] : memref<8x144x256xf32, #tpu.memory_space<vmem>>, vector<1x144x256xf32>
    %73 = vector.shape_cast %72 : vector<1x144x256xf32> to vector<144x256xf32>
    %cst_75 = arith.constant dense<0.000000e+00> : vector<8x256xf32>
    %74 = tpu.matmul %71, %73, %cst_75 {dimension_numbers = #tpu.dot_dimension_numbers<[1], [0], [0], [1], [0, 0, 1, 1], [], []>} : vector<8x144xf32>, vector<144x256xf32>, vector<8x256xf32> -> vector<8x256xf32>
    %75 = arith.addf %69, %74 : vector<8x256xf32>
    %c7_76 = arith.constant 7 : index
    %c0_77 = arith.constant 0 : index
    %c0_78 = arith.constant 0 : index
    %76 = vector.load %arg1[%c7_76, %c0_77, %c0_78] : memref<36x8x144xf32, #tpu.memory_space<vmem>>, vector<1x8x144xf32>
    %77 = vector.shape_cast %76 : vector<1x8x144xf32> to vector<8x144xf32>
    %c3_79 = arith.constant 3 : index
    %c0_80 = arith.constant 0 : index
    %c0_81 = arith.constant 0 : index
    %78 = vector.load %arg2[%c3_79, %c0_80, %c0_81] : memref<8x144x256xf32, #tpu.memory_space<vmem>>, vector<1x144x256xf32>
    %79 = vector.shape_cast %78 : vector<1x144x256xf32> to vector<144x256xf32>
    %cst_82 = arith.constant dense<0.000000e+00> : vector<8x256xf32>
    %80 = tpu.matmul %77, %79, %cst_82 {dimension_numbers = #tpu.dot_dimension_numbers<[1], [0], [0], [1], [0, 0, 1, 1], [], []>} : vector<8x144xf32>, vector<144x256xf32>, vector<8x256xf32> -> vector<8x256xf32>
    %81 = arith.addf %75, %80 : vector<8x256xf32>
    %c8 = arith.constant 8 : index
    %c0_83 = arith.constant 0 : index
    %c0_84 = arith.constant 0 : index
    %82 = vector.load %arg1[%c8, %c0_83, %c0_84] : memref<36x8x144xf32, #tpu.memory_space<vmem>>, vector<1x8x144xf32>
    %83 = vector.shape_cast %82 : vector<1x8x144xf32> to vector<8x144xf32>
    %c4_85 = arith.constant 4 : index
    %c0_86 = arith.constant 0 : index
    %c0_87 = arith.constant 0 : index
    %84 = vector.load %arg2[%c4_85, %c0_86, %c0_87] : memref<8x144x256xf32, #tpu.memory_space<vmem>>, vector<1x144x256xf32>
    %85 = vector.shape_cast %84 : vector<1x144x256xf32> to vector<144x256xf32>
    %cst_88 = arith.constant dense<0.000000e+00> : vector<8x256xf32>
    %86 = tpu.matmul %83, %85, %cst_88 {dimension_numbers = #tpu.dot_dimension_numbers<[1], [0], [0], [1], [0, 0, 1, 1], [], []>} : vector<8x144xf32>, vector<144x256xf32>, vector<8x256xf32> -> vector<8x256xf32>
    %87 = arith.addf %81, %86 : vector<8x256xf32>
    %c9 = arith.constant 9 : index
    %c0_89 = arith.constant 0 : index
    %c0_90 = arith.constant 0 : index
    %88 = vector.load %arg1[%c9, %c0_89, %c0_90] : memref<36x8x144xf32, #tpu.memory_space<vmem>>, vector<1x8x144xf32>
    %89 = vector.shape_cast %88 : vector<1x8x144xf32> to vector<8x144xf32>
    %c5_91 = arith.constant 5 : index
    %c0_92 = arith.constant 0 : index
    %c0_93 = arith.constant 0 : index
    %90 = vector.load %arg2[%c5_91, %c0_92, %c0_93] : memref<8x144x256xf32, #tpu.memory_space<vmem>>, vector<1x144x256xf32>
    %91 = vector.shape_cast %90 : vector<1x144x256xf32> to vector<144x256xf32>
    %cst_94 = arith.constant dense<0.000000e+00> : vector<8x256xf32>
    %92 = tpu.matmul %89, %91, %cst_94 {dimension_numbers = #tpu.dot_dimension_numbers<[1], [0], [0], [1], [0, 0, 1, 1], [], []>} : vector<8x144xf32>, vector<144x256xf32>, vector<8x256xf32> -> vector<8x256xf32>
    %93 = arith.addf %87, %92 : vector<8x256xf32>
    %c10 = arith.constant 10 : index
    %c0_95 = arith.constant 0 : index
    %c0_96 = arith.constant 0 : index
    %94 = vector.load %arg1[%c10, %c0_95, %c0_96] : memref<36x8x144xf32, #tpu.memory_space<vmem>>, vector<1x8x144xf32>
    %95 = vector.shape_cast %94 : vector<1x8x144xf32> to vector<8x144xf32>
    %c6_97 = arith.constant 6 : index
    %c0_98 = arith.constant 0 : index
    %c0_99 = arith.constant 0 : index
    %96 = vector.load %arg2[%c6_97, %c0_98, %c0_99] : memref<8x144x256xf32, #tpu.memory_space<vmem>>, vector<1x144x256xf32>
    %97 = vector.shape_cast %96 : vector<1x144x256xf32> to vector<144x256xf32>
    %cst_100 = arith.constant dense<0.000000e+00> : vector<8x256xf32>
    %98 = tpu.matmul %95, %97, %cst_100 {dimension_numbers = #tpu.dot_dimension_numbers<[1], [0], [0], [1], [0, 0, 1, 1], [], []>} : vector<8x144xf32>, vector<144x256xf32>, vector<8x256xf32> -> vector<8x256xf32>
    %99 = arith.addf %93, %98 : vector<8x256xf32>
    %c11 = arith.constant 11 : index
    %c0_101 = arith.constant 0 : index
    %c0_102 = arith.constant 0 : index
    %100 = vector.load %arg1[%c11, %c0_101, %c0_102] : memref<36x8x144xf32, #tpu.memory_space<vmem>>, vector<1x8x144xf32>
    %101 = vector.shape_cast %100 : vector<1x8x144xf32> to vector<8x144xf32>
    %c7_103 = arith.constant 7 : index
    %c0_104 = arith.constant 0 : index
    %c0_105 = arith.constant 0 : index
    %102 = vector.load %arg2[%c7_103, %c0_104, %c0_105] : memref<8x144x256xf32, #tpu.memory_space<vmem>>, vector<1x144x256xf32>
    %103 = vector.shape_cast %102 : vector<1x144x256xf32> to vector<144x256xf32>
    %cst_106 = arith.constant dense<0.000000e+00> : vector<8x256xf32>
    %104 = tpu.matmul %101, %103, %cst_106 {dimension_numbers = #tpu.dot_dimension_numbers<[1], [0], [0], [1], [0, 0, 1, 1], [], []>} : vector<8x144xf32>, vector<144x256xf32>, vector<8x256xf32> -> vector<8x256xf32>
    %105 = arith.addf %99, %104 : vector<8x256xf32>
    %c0_107 = arith.constant 0 : index
    %c0_108 = arith.constant 0 : index
    %106 = vector.load %arg3[%c0_107, %c0_108] : memref<1x256xf32, #tpu.memory_space<vmem>>, vector<1x256xf32>
    %107 = vector.broadcast %106 : vector<1x256xf32> to vector<8x256xf32>
    %108 = arith.addf %105, %107 : vector<8x256xf32>
    %cst_109 = arith.constant 0.000000e+00 : f32
    %109 = vector.broadcast %cst_109 : f32 to vector<8x256xf32>
    %110 = arith.maximumf %108, %109 : vector<8x256xf32>
    %c1_110 = arith.constant 1 : index
    %c0_111 = arith.constant 0 : index
    %c0_112 = arith.constant 0 : index
    %111 = vector.load %arg13[%c1_110, %c0_111, %c0_112] : memref<8x8x256xf32, #tpu.memory_space<vmem>>, vector<1x8x256xf32>
    %112 = vector.shape_cast %111 : vector<1x8x256xf32> to vector<8x256xf32>
    %113 = vector.shape_cast %110 : vector<8x256xf32> to vector<1x8x256xf32>
    tpu.vector_store %arg13[%c1_110, %c0_111, %c0_112], %113 {strides = array<i32>} : memref<8x8x256xf32, #tpu.memory_space<vmem>>, vector<1x8x256xf32>,
    %cst_113 = arith.constant 0.000000e+00 : f32
    %114 = vector.broadcast %cst_113 : f32 to vector<8x256xf32>
    %c8_114 = arith.constant 8 : index
    %c0_115 = arith.constant 0 : index
    %c0_116 = arith.constant 0 : index
    %115 = vector.load %arg1[%c8_114, %c0_115, %c0_116] : memref<36x8x144xf32, #tpu.memory_space<vmem>>, vector<1x8x144xf32>
    %116 = vector.shape_cast %115 : vector<1x8x144xf32> to vector<8x144xf32>
    %c0_117 = arith.constant 0 : index
    %c0_118 = arith.constant 0 : index
    %c0_119 = arith.constant 0 : index
    %117 = vector.load %arg2[%c0_117, %c0_118, %c0_119] : memref<8x144x256xf32, #tpu.memory_space<vmem>>, vector<1x144x256xf32>
    %118 = vector.shape_cast %117 : vector<1x144x256xf32> to vector<144x256xf32>
    %cst_120 = arith.constant dense<0.000000e+00> : vector<8x256xf32>
    %119 = tpu.matmul %116, %118, %cst_120 {dimension_numbers = #tpu.dot_dimension_numbers<[1], [0], [0], [1], [0, 0, 1, 1], [], []>} : vector<8x144xf32>, vector<144x256xf32>, vector<8x256xf32> -> vector<8x256xf32>
    %120 = arith.addf %114, %119 : vector<8x256xf32>
    %c9_121 = arith.constant 9 : index
    %c0_122 = arith.constant 0 : index
    %c0_123 = arith.constant 0 : index
    %121 = vector.load %arg1[%c9_121, %c0_122, %c0_123] : memref<36x8x144xf32, #tpu.memory_space<vmem>>, vector<1x8x144xf32>
    %122 = vector.shape_cast %121 : vector<1x8x144xf32> to vector<8x144xf32>
    %c1_124 = arith.constant 1 : index
    %c0_125 = arith.constant 0 : index
    %c0_126 = arith.constant 0 : index
    %123 = vector.load %arg2[%c1_124, %c0_125, %c0_126] : memref<8x144x256xf32, #tpu.memory_space<vmem>>, vector<1x144x256xf32>
    %124 = vector.shape_cast %123 : vector<1x144x256xf32> to vector<144x256xf32>
    %cst_127 = arith.constant dense<0.000000e+00> : vector<8x256xf32>
    %125 = tpu.matmul %122, %124, %cst_127 {dimension_numbers = #tpu.dot_dimension_numbers<[1], [0], [0], [1], [0, 0, 1, 1], [], []>} : vector<8x144xf32>, vector<144x256xf32>, vector<8x256xf32> -> vector<8x256xf32>
    %126 = arith.addf %120, %125 : vector<8x256xf32>
    %c10_128 = arith.constant 10 : index
    %c0_129 = arith.constant 0 : index
    %c0_130 = arith.constant 0 : index
    %127 = vector.load %arg1[%c10_128, %c0_129, %c0_130] : memref<36x8x144xf32, #tpu.memory_space<vmem>>, vector<1x8x144xf32>
    %128 = vector.shape_cast %127 : vector<1x8x144xf32> to vector<8x144xf32>
    %c2_131 = arith.constant 2 : index
    %c0_132 = arith.constant 0 : index
    %c0_133 = arith.constant 0 : index
    %129 = vector.load %arg2[%c2_131, %c0_132, %c0_133] : memref<8x144x256xf32, #tpu.memory_space<vmem>>, vector<1x144x256xf32>
    %130 = vector.shape_cast %129 : vector<1x144x256xf32> to vector<144x256xf32>
    %cst_134 = arith.constant dense<0.000000e+00> : vector<8x256xf32>
    %131 = tpu.matmul %128, %130, %cst_134 {dimension_numbers = #tpu.dot_dimension_numbers<[1], [0], [0], [1], [0, 0, 1, 1], [], []>} : vector<8x144xf32>, vector<144x256xf32>, vector<8x256xf32> -> vector<8x256xf32>
    %132 = arith.addf %126, %131 : vector<8x256xf32>
    %c11_135 = arith.constant 11 : index
    %c0_136 = arith.constant 0 : index
    %c0_137 = arith.constant 0 : index
    %133 = vector.load %arg1[%c11_135, %c0_136, %c0_137] : memref<36x8x144xf32, #tpu.memory_space<vmem>>, vector<1x8x144xf32>
    %134 = vector.shape_cast %133 : vector<1x8x144xf32> to vector<8x144xf32>
    %c3_138 = arith.constant 3 : index
    %c0_139 = arith.constant 0 : index
    %c0_140 = arith.constant 0 : index
    %135 = vector.load %arg2[%c3_138, %c0_139, %c0_140] : memref<8x144x256xf32, #tpu.memory_space<vmem>>, vector<1x144x256xf32>
    %136 = vector.shape_cast %135 : vector<1x144x256xf32> to vector<144x256xf32>
    %cst_141 = arith.constant dense<0.000000e+00> : vector<8x256xf32>
    %137 = tpu.matmul %134, %136, %cst_141 {dimension_numbers = #tpu.dot_dimension_numbers<[1], [0], [0], [1], [0, 0, 1, 1], [], []>} : vector<8x144xf32>, vector<144x256xf32>, vector<8x256xf32> -> vector<8x256xf32>
    %138 = arith.addf %132, %137 : vector<8x256xf32>
    %c12 = arith.constant 12 : index
    %c0_142 = arith.constant 0 : index
    %c0_143 = arith.constant 0 : index
    %139 = vector.load %arg1[%c12, %c0_142, %c0_143] : memref<36x8x144xf32, #tpu.memory_space<vmem>>, vector<1x8x144xf32>
    %140 = vector.shape_cast %139 : vector<1x8x144xf32> to vector<8x144xf32>
    %c4_144 = arith.constant 4 : index
    %c0_145 = arith.constant 0 : index
    %c0_146 = arith.constant 0 : index
    %141 = vector.load %arg2[%c4_144, %c0_145, %c0_146] : memref<8x144x256xf32, #tpu.memory_space<vmem>>, vector<1x144x256xf32>
    %142 = vector.shape_cast %141 : vector<1x144x256xf32> to vector<144x256xf32>
    %cst_147 = arith.constant dense<0.000000e+00> : vector<8x256xf32>
    %143 = tpu.matmul %140, %142, %cst_147 {dimension_numbers = #tpu.dot_dimension_numbers<[1], [0], [0], [1], [0, 0, 1, 1], [], []>} : vector<8x144xf32>, vector<144x256xf32>, vector<8x256xf32> -> vector<8x256xf32>
    %144 = arith.addf %138, %143 : vector<8x256xf32>
    %c13 = arith.constant 13 : index
    %c0_148 = arith.constant 0 : index
    %c0_149 = arith.constant 0 : index
    %145 = vector.load %arg1[%c13, %c0_148, %c0_149] : memref<36x8x144xf32, #tpu.memory_space<vmem>>, vector<1x8x144xf32>
    %146 = vector.shape_cast %145 : vector<1x8x144xf32> to vector<8x144xf32>
    %c5_150 = arith.constant 5 : index
    %c0_151 = arith.constant 0 : index
    %c0_152 = arith.constant 0 : index
    %147 = vector.load %arg2[%c5_150, %c0_151, %c0_152] : memref<8x144x256xf32, #tpu.memory_space<vmem>>, vector<1x144x256xf32>
    %148 = vector.shape_cast %147 : vector<1x144x256xf32> to vector<144x256xf32>
    %cst_153 = arith.constant dense<0.000000e+00> : vector<8x256xf32>
    %149 = tpu.matmul %146, %148, %cst_153 {dimension_numbers = #tpu.dot_dimension_numbers<[1], [0], [0], [1], [0, 0, 1, 1], [], []>} : vector<8x144xf32>, vector<144x256xf32>, vector<8x256xf32> -> vector<8x256xf32>
    %150 = arith.addf %144, %149 : vector<8x256xf32>
    %c14 = arith.constant 14 : index
    %c0_154 = arith.constant 0 : index
    %c0_155 = arith.constant 0 : index
    %151 = vector.load %arg1[%c14, %c0_154, %c0_155] : memref<36x8x144xf32, #tpu.memory_space<vmem>>, vector<1x8x144xf32>
    %152 = vector.shape_cast %151 : vector<1x8x144xf32> to vector<8x144xf32>
    %c6_156 = arith.constant 6 : index
    %c0_157 = arith.constant 0 : index
    %c0_158 = arith.constant 0 : index
    %153 = vector.load %arg2[%c6_156, %c0_157, %c0_158] : memref<8x144x256xf32, #tpu.memory_space<vmem>>, vector<1x144x256xf32>
    %154 = vector.shape_cast %153 : vector<1x144x256xf32> to vector<144x256xf32>
    %cst_159 = arith.constant dense<0.000000e+00> : vector<8x256xf32>
    %155 = tpu.matmul %152, %154, %cst_159 {dimension_numbers = #tpu.dot_dimension_numbers<[1], [0], [0], [1], [0, 0, 1, 1], [], []>} : vector<8x144xf32>, vector<144x256xf32>, vector<8x256xf32> -> vector<8x256xf32>
    %156 = arith.addf %150, %155 : vector<8x256xf32>
    %c15 = arith.constant 15 : index
    %c0_160 = arith.constant 0 : index
    %c0_161 = arith.constant 0 : index
    %157 = vector.load %arg1[%c15, %c0_160, %c0_161] : memref<36x8x144xf32, #tpu.memory_space<vmem>>, vector<1x8x144xf32>
    %158 = vector.shape_cast %157 : vector<1x8x144xf32> to vector<8x144xf32>
    %c7_162 = arith.constant 7 : index
    %c0_163 = arith.constant 0 : index
    %c0_164 = arith.constant 0 : index
    %159 = vector.load %arg2[%c7_162, %c0_163, %c0_164] : memref<8x144x256xf32, #tpu.memory_space<vmem>>, vector<1x144x256xf32>
    %160 = vector.shape_cast %159 : vector<1x144x256xf32> to vector<144x256xf32>
    %cst_165 = arith.constant dense<0.000000e+00> : vector<8x256xf32>
    %161 = tpu.matmul %158, %160, %cst_165 {dimension_numbers = #tpu.dot_dimension_numbers<[1], [0], [0], [1], [0, 0, 1, 1], [], []>} : vector<8x144xf32>, vector<144x256xf32>, vector<8x256xf32> -> vector<8x256xf32>
    %162 = arith.addf %156, %161 : vector<8x256xf32>
    %c0_166 = arith.constant 0 : index
    %c0_167 = arith.constant 0 : index
    %163 = vector.load %arg3[%c0_166, %c0_167] : memref<1x256xf32, #tpu.memory_space<vmem>>, vector<1x256xf32>
    %164 = vector.broadcast %163 : vector<1x256xf32> to vector<8x256xf32>
    %165 = arith.addf %162, %164 : vector<8x256xf32>
    %cst_168 = arith.constant 0.000000e+00 : f32
    %166 = vector.broadcast %cst_168 : f32 to vector<8x256xf32>
    %167 = arith.maximumf %165, %166 : vector<8x256xf32>
    %c2_169 = arith.constant 2 : index
    %c0_170 = arith.constant 0 : index
    %c0_171 = arith.constant 0 : index
    %168 = vector.load %arg13[%c2_169, %c0_170, %c0_171] : memref<8x8x256xf32, #tpu.memory_space<vmem>>, vector<1x8x256xf32>
    %169 = vector.shape_cast %168 : vector<1x8x256xf32> to vector<8x256xf32>
    %170 = vector.shape_cast %167 : vector<8x256xf32> to vector<1x8x256xf32>
    tpu.vector_store %arg13[%c2_169, %c0_170, %c0_171], %170 {strides = array<i32>} : memref<8x8x256xf32, #tpu.memory_space<vmem>>, vector<1x8x256xf32>,
    %cst_172 = arith.constant 0.000000e+00 : f32
    %171 = vector.broadcast %cst_172 : f32 to vector<8x256xf32>
    %c12_173 = arith.constant 12 : index
    %c0_174 = arith.constant 0 : index
    %c0_175 = arith.constant 0 : index
    %172 = vector.load %arg1[%c12_173, %c0_174, %c0_175] : memref<36x8x144xf32, #tpu.memory_space<vmem>>, vector<1x8x144xf32>
    %173 = vector.shape_cast %172 : vector<1x8x144xf32> to vector<8x144xf32>
    %c0_176 = arith.constant 0 : index
    %c0_177 = arith.constant 0 : index
    %c0_178 = arith.constant 0 : index
    %174 = vector.load %arg2[%c0_176, %c0_177, %c0_178] : memref<8x144x256xf32, #tpu.memory_space<vmem>>, vector<1x144x256xf32>
    %175 = vector.shape_cast %174 : vector<1x144x256xf32> to vector<144x256xf32>
    %cst_179 = arith.constant dense<0.000000e+00> : vector<8x256xf32>
    %176 = tpu.matmul %173, %175, %cst_179 {dimension_numbers = #tpu.dot_dimension_numbers<[1], [0], [0], [1], [0, 0, 1, 1], [], []>} : vector<8x144xf32>, vector<144x256xf32>, vector<8x256xf32> -> vector<8x256xf32>
    %177 = arith.addf %171, %176 : vector<8x256xf32>
    %c13_180 = arith.constant 13 : index
    %c0_181 = arith.constant 0 : index
    %c0_182 = arith.constant 0 : index
    %178 = vector.load %arg1[%c13_180, %c0_181, %c0_182] : memref<36x8x144xf32, #tpu.memory_space<vmem>>, vector<1x8x144xf32>
    %179 = vector.shape_cast %178 : vector<1x8x144xf32> to vector<8x144xf32>
    %c1_183 = arith.constant 1 : index
    %c0_184 = arith.constant 0 : index
    %c0_185 = arith.constant 0 : index
    %180 = vector.load %arg2[%c1_183, %c0_184, %c0_185] : memref<8x144x256xf32, #tpu.memory_space<vmem>>, vector<1x144x256xf32>
    %181 = vector.shape_cast %180 : vector<1x144x256xf32> to vector<144x256xf32>
    %cst_186 = arith.constant dense<0.000000e+00> : vector<8x256xf32>
    %182 = tpu.matmul %179, %181, %cst_186 {dimension_numbers = #tpu.dot_dimension_numbers<[1], [0], [0], [1], [0, 0, 1, 1], [], []>} : vector<8x144xf32>, vector<144x256xf32>, vector<8x256xf32> -> vector<8x256xf32>
    %183 = arith.addf %177, %182 : vector<8x256xf32>
    %c14_187 = arith.constant 14 : index
    %c0_188 = arith.constant 0 : index
    %c0_189 = arith.constant 0 : index
    %184 = vector.load %arg1[%c14_187, %c0_188, %c0_189] : memref<36x8x144xf32, #tpu.memory_space<vmem>>, vector<1x8x144xf32>
    %185 = vector.shape_cast %184 : vector<1x8x144xf32> to vector<8x144xf32>
    %c2_190 = arith.constant 2 : index
    %c0_191 = arith.constant 0 : index
    %c0_192 = arith.constant 0 : index
    %186 = vector.load %arg2[%c2_190, %c0_191, %c0_192] : memref<8x144x256xf32, #tpu.memory_space<vmem>>, vector<1x144x256xf32>
    %187 = vector.shape_cast %186 : vector<1x144x256xf32> to vector<144x256xf32>
    %cst_193 = arith.constant dense<0.000000e+00> : vector<8x256xf32>
    %188 = tpu.matmul %185, %187, %cst_193 {dimension_numbers = #tpu.dot_dimension_numbers<[1], [0], [0], [1], [0, 0, 1, 1], [], []>} : vector<8x144xf32>, vector<144x256xf32>, vector<8x256xf32> -> vector<8x256xf32>
    %189 = arith.addf %183, %188 : vector<8x256xf32>
    %c15_194 = arith.constant 15 : index
    %c0_195 = arith.constant 0 : index
    %c0_196 = arith.constant 0 : index
    %190 = vector.load %arg1[%c15_194, %c0_195, %c0_196] : memref<36x8x144xf32, #tpu.memory_space<vmem>>, vector<1x8x144xf32>
    %191 = vector.shape_cast %190 : vector<1x8x144xf32> to vector<8x144xf32>
    %c3_197 = arith.constant 3 : index
    %c0_198 = arith.constant 0 : index
    %c0_199 = arith.constant 0 : index
    %192 = vector.load %arg2[%c3_197, %c0_198, %c0_199] : memref<8x144x256xf32, #tpu.memory_space<vmem>>, vector<1x144x256xf32>
    %193 = vector.shape_cast %192 : vector<1x144x256xf32> to vector<144x256xf32>
    %cst_200 = arith.constant dense<0.000000e+00> : vector<8x256xf32>
    %194 = tpu.matmul %191, %193, %cst_200 {dimension_numbers = #tpu.dot_dimension_numbers<[1], [0], [0], [1], [0, 0, 1, 1], [], []>} : vector<8x144xf32>, vector<144x256xf32>, vector<8x256xf32> -> vector<8x256xf32>
    %195 = arith.addf %189, %194 : vector<8x256xf32>
    %c16 = arith.constant 16 : index
    %c0_201 = arith.constant 0 : index
    %c0_202 = arith.constant 0 : index
    %196 = vector.load %arg1[%c16, %c0_201, %c0_202] : memref<36x8x144xf32, #tpu.memory_space<vmem>>, vector<1x8x144xf32>
    %197 = vector.shape_cast %196 : vector<1x8x144xf32> to vector<8x144xf32>
    %c4_203 = arith.constant 4 : index
    %c0_204 = arith.constant 0 : index
    %c0_205 = arith.constant 0 : index
    %198 = vector.load %arg2[%c4_203, %c0_204, %c0_205] : memref<8x144x256xf32, #tpu.memory_space<vmem>>, vector<1x144x256xf32>
    %199 = vector.shape_cast %198 : vector<1x144x256xf32> to vector<144x256xf32>
    %cst_206 = arith.constant dense<0.000000e+00> : vector<8x256xf32>
    %200 = tpu.matmul %197, %199, %cst_206 {dimension_numbers = #tpu.dot_dimension_numbers<[1], [0], [0], [1], [0, 0, 1, 1], [], []>} : vector<8x144xf32>, vector<144x256xf32>, vector<8x256xf32> -> vector<8x256xf32>
    %201 = arith.addf %195, %200 : vector<8x256xf32>
    %c17 = arith.constant 17 : index
    %c0_207 = arith.constant 0 : index
    %c0_208 = arith.constant 0 : index
    %202 = vector.load %arg1[%c17, %c0_207, %c0_208] : memref<36x8x144xf32, #tpu.memory_space<vmem>>, vector<1x8x144xf32>
    %203 = vector.shape_cast %202 : vector<1x8x144xf32> to vector<8x144xf32>
    %c5_209 = arith.constant 5 : index
    %c0_210 = arith.constant 0 : index
    %c0_211 = arith.constant 0 : index
    %204 = vector.load %arg2[%c5_209, %c0_210, %c0_211] : memref<8x144x256xf32, #tpu.memory_space<vmem>>, vector<1x144x256xf32>
    %205 = vector.shape_cast %204 : vector<1x144x256xf32> to vector<144x256xf32>
    %cst_212 = arith.constant dense<0.000000e+00> : vector<8x256xf32>
    %206 = tpu.matmul %203, %205, %cst_212 {dimension_numbers = #tpu.dot_dimension_numbers<[1], [0], [0], [1], [0, 0, 1, 1], [], []>} : vector<8x144xf32>, vector<144x256xf32>, vector<8x256xf32> -> vector<8x256xf32>
    %207 = arith.addf %201, %206 : vector<8x256xf32>
    %c18 = arith.constant 18 : index
    %c0_213 = arith.constant 0 : index
    %c0_214 = arith.constant 0 : index
    %208 = vector.load %arg1[%c18, %c0_213, %c0_214] : memref<36x8x144xf32, #tpu.memory_space<vmem>>, vector<1x8x144xf32>
    %209 = vector.shape_cast %208 : vector<1x8x144xf32> to vector<8x144xf32>
    %c6_215 = arith.constant 6 : index
    %c0_216 = arith.constant 0 : index
    %c0_217 = arith.constant 0 : index
    %210 = vector.load %arg2[%c6_215, %c0_216, %c0_217] : memref<8x144x256xf32, #tpu.memory_space<vmem>>, vector<1x144x256xf32>
    %211 = vector.shape_cast %210 : vector<1x144x256xf32> to vector<144x256xf32>
    %cst_218 = arith.constant dense<0.000000e+00> : vector<8x256xf32>
    %212 = tpu.matmul %209, %211, %cst_218 {dimension_numbers = #tpu.dot_dimension_numbers<[1], [0], [0], [1], [0, 0, 1, 1], [], []>} : vector<8x144xf32>, vector<144x256xf32>, vector<8x256xf32> -> vector<8x256xf32>
    %213 = arith.addf %207, %212 : vector<8x256xf32>
    %c19 = arith.constant 19 : index
    %c0_219 = arith.constant 0 : index
    %c0_220 = arith.constant 0 : index
    %214 = vector.load %arg1[%c19, %c0_219, %c0_220] : memref<36x8x144xf32, #tpu.memory_space<vmem>>, vector<1x8x144xf32>
    %215 = vector.shape_cast %214 : vector<1x8x144xf32> to vector<8x144xf32>
    %c7_221 = arith.constant 7 : index
    %c0_222 = arith.constant 0 : index
    %c0_223 = arith.constant 0 : index
    %216 = vector.load %arg2[%c7_221, %c0_222, %c0_223] : memref<8x144x256xf32, #tpu.memory_space<vmem>>, vector<1x144x256xf32>
    %217 = vector.shape_cast %216 : vector<1x144x256xf32> to vector<144x256xf32>
    %cst_224 = arith.constant dense<0.000000e+00> : vector<8x256xf32>
    %218 = tpu.matmul %215, %217, %cst_224 {dimension_numbers = #tpu.dot_dimension_numbers<[1], [0], [0], [1], [0, 0, 1, 1], [], []>} : vector<8x144xf32>, vector<144x256xf32>, vector<8x256xf32> -> vector<8x256xf32>
    %219 = arith.addf %213, %218 : vector<8x256xf32>
    %c0_225 = arith.constant 0 : index
    %c0_226 = arith.constant 0 : index
    %220 = vector.load %arg3[%c0_225, %c0_226] : memref<1x256xf32, #tpu.memory_space<vmem>>, vector<1x256xf32>
    %221 = vector.broadcast %220 : vector<1x256xf32> to vector<8x256xf32>
    %222 = arith.addf %219, %221 : vector<8x256xf32>
    %cst_227 = arith.constant 0.000000e+00 : f32
    %223 = vector.broadcast %cst_227 : f32 to vector<8x256xf32>
    %224 = arith.maximumf %222, %223 : vector<8x256xf32>
    %c3_228 = arith.constant 3 : index
    %c0_229 = arith.constant 0 : index
    %c0_230 = arith.constant 0 : index
    %225 = vector.load %arg13[%c3_228, %c0_229, %c0_230] : memref<8x8x256xf32, #tpu.memory_space<vmem>>, vector<1x8x256xf32>
    %226 = vector.shape_cast %225 : vector<1x8x256xf32> to vector<8x256xf32>
    %227 = vector.shape_cast %224 : vector<8x256xf32> to vector<1x8x256xf32>
    tpu.vector_store %arg13[%c3_228, %c0_229, %c0_230], %227 {strides = array<i32>} : memref<8x8x256xf32, #tpu.memory_space<vmem>>, vector<1x8x256xf32>,
    %cst_231 = arith.constant 0.000000e+00 : f32
    %228 = vector.broadcast %cst_231 : f32 to vector<8x256xf32>
    %c16_232 = arith.constant 16 : index
    %c0_233 = arith.constant 0 : index
    %c0_234 = arith.constant 0 : index
    %229 = vector.load %arg1[%c16_232, %c0_233, %c0_234] : memref<36x8x144xf32, #tpu.memory_space<vmem>>, vector<1x8x144xf32>
    %230 = vector.shape_cast %229 : vector<1x8x144xf32> to vector<8x144xf32>
    %c0_235 = arith.constant 0 : index
    %c0_236 = arith.constant 0 : index
    %c0_237 = arith.constant 0 : index
    %231 = vector.load %arg2[%c0_235, %c0_236, %c0_237] : memref<8x144x256xf32, #tpu.memory_space<vmem>>, vector<1x144x256xf32>
    %232 = vector.shape_cast %231 : vector<1x144x256xf32> to vector<144x256xf32>
    %cst_238 = arith.constant dense<0.000000e+00> : vector<8x256xf32>
    %233 = tpu.matmul %230, %232, %cst_238 {dimension_numbers = #tpu.dot_dimension_numbers<[1], [0], [0], [1], [0, 0, 1, 1], [], []>} : vector<8x144xf32>, vector<144x256xf32>, vector<8x256xf32> -> vector<8x256xf32>
    %234 = arith.addf %228, %233 : vector<8x256xf32>
    %c17_239 = arith.constant 17 : index
    %c0_240 = arith.constant 0 : index
    %c0_241 = arith.constant 0 : index
    %235 = vector.load %arg1[%c17_239, %c0_240, %c0_241] : memref<36x8x144xf32, #tpu.memory_space<vmem>>, vector<1x8x144xf32>
    %236 = vector.shape_cast %235 : vector<1x8x144xf32> to vector<8x144xf32>
    %c1_242 = arith.constant 1 : index
    %c0_243 = arith.constant 0 : index
    %c0_244 = arith.constant 0 : index
    %237 = vector.load %arg2[%c1_242, %c0_243, %c0_244] : memref<8x144x256xf32, #tpu.memory_space<vmem>>, vector<1x144x256xf32>
    %238 = vector.shape_cast %237 : vector<1x144x256xf32> to vector<144x256xf32>
    %cst_245 = arith.constant dense<0.000000e+00> : vector<8x256xf32>
    %239 = tpu.matmul %236, %238, %cst_245 {dimension_numbers = #tpu.dot_dimension_numbers<[1], [0], [0], [1], [0, 0, 1, 1], [], []>} : vector<8x144xf32>, vector<144x256xf32>, vector<8x256xf32> -> vector<8x256xf32>
    %240 = arith.addf %234, %239 : vector<8x256xf32>
    %c18_246 = arith.constant 18 : index
    %c0_247 = arith.constant 0 : index
    %c0_248 = arith.constant 0 : index
    %241 = vector.load %arg1[%c18_246, %c0_247, %c0_248] : memref<36x8x144xf32, #tpu.memory_space<vmem>>, vector<1x8x144xf32>
    %242 = vector.shape_cast %241 : vector<1x8x144xf32> to vector<8x144xf32>
    %c2_249 = arith.constant 2 : index
    %c0_250 = arith.constant 0 : index
    %c0_251 = arith.constant 0 : index
    %243 = vector.load %arg2[%c2_249, %c0_250, %c0_251] : memref<8x144x256xf32, #tpu.memory_space<vmem>>, vector<1x144x256xf32>
    %244 = vector.shape_cast %243 : vector<1x144x256xf32> to vector<144x256xf32>
    %cst_252 = arith.constant dense<0.000000e+00> : vector<8x256xf32>
    %245 = tpu.matmul %242, %244, %cst_252 {dimension_numbers = #tpu.dot_dimension_numbers<[1], [0], [0], [1], [0, 0, 1, 1], [], []>} : vector<8x144xf32>, vector<144x256xf32>, vector<8x256xf32> -> vector<8x256xf32>
    %246 = arith.addf %240, %245 : vector<8x256xf32>
    %c19_253 = arith.constant 19 : index
    %c0_254 = arith.constant 0 : index
    %c0_255 = arith.constant 0 : index
    %247 = vector.load %arg1[%c19_253, %c0_254, %c0_255] : memref<36x8x144xf32, #tpu.memory_space<vmem>>, vector<1x8x144xf32>
    %248 = vector.shape_cast %247 : vector<1x8x144xf32> to vector<8x144xf32>
    %c3_256 = arith.constant 3 : index
    %c0_257 = arith.constant 0 : index
    %c0_258 = arith.constant 0 : index
    %249 = vector.load %arg2[%c3_256, %c0_257, %c0_258] : memref<8x144x256xf32, #tpu.memory_space<vmem>>, vector<1x144x256xf32>
    %250 = vector.shape_cast %249 : vector<1x144x256xf32> to vector<144x256xf32>
    %cst_259 = arith.constant dense<0.000000e+00> : vector<8x256xf32>
    %251 = tpu.matmul %248, %250, %cst_259 {dimension_numbers = #tpu.dot_dimension_numbers<[1], [0], [0], [1], [0, 0, 1, 1], [], []>} : vector<8x144xf32>, vector<144x256xf32>, vector<8x256xf32> -> vector<8x256xf32>
    %252 = arith.addf %246, %251 : vector<8x256xf32>
    %c20 = arith.constant 20 : index
    %c0_260 = arith.constant 0 : index
    %c0_261 = arith.constant 0 : index
    %253 = vector.load %arg1[%c20, %c0_260, %c0_261] : memref<36x8x144xf32, #tpu.memory_space<vmem>>, vector<1x8x144xf32>
    %254 = vector.shape_cast %253 : vector<1x8x144xf32> to vector<8x144xf32>
    %c4_262 = arith.constant 4 : index
    %c0_263 = arith.constant 0 : index
    %c0_264 = arith.constant 0 : index
    %255 = vector.load %arg2[%c4_262, %c0_263, %c0_264] : memref<8x144x256xf32, #tpu.memory_space<vmem>>, vector<1x144x256xf32>
    %256 = vector.shape_cast %255 : vector<1x144x256xf32> to vector<144x256xf32>
    %cst_265 = arith.constant dense<0.000000e+00> : vector<8x256xf32>
    %257 = tpu.matmul %254, %256, %cst_265 {dimension_numbers = #tpu.dot_dimension_numbers<[1], [0], [0], [1], [0, 0, 1, 1], [], []>} : vector<8x144xf32>, vector<144x256xf32>, vector<8x256xf32> -> vector<8x256xf32>
    %258 = arith.addf %252, %257 : vector<8x256xf32>
    %c21 = arith.constant 21 : index
    %c0_266 = arith.constant 0 : index
    %c0_267 = arith.constant 0 : index
    %259 = vector.load %arg1[%c21, %c0_266, %c0_267] : memref<36x8x144xf32, #tpu.memory_space<vmem>>, vector<1x8x144xf32>
    %260 = vector.shape_cast %259 : vector<1x8x144xf32> to vector<8x144xf32>
    %c5_268 = arith.constant 5 : index
    %c0_269 = arith.constant 0 : index
    %c0_270 = arith.constant 0 : index
    %261 = vector.load %arg2[%c5_268, %c0_269, %c0_270] : memref<8x144x256xf32, #tpu.memory_space<vmem>>, vector<1x144x256xf32>
    %262 = vector.shape_cast %261 : vector<1x144x256xf32> to vector<144x256xf32>
    %cst_271 = arith.constant dense<0.000000e+00> : vector<8x256xf32>
    %263 = tpu.matmul %260, %262, %cst_271 {dimension_numbers = #tpu.dot_dimension_numbers<[1], [0], [0], [1], [0, 0, 1, 1], [], []>} : vector<8x144xf32>, vector<144x256xf32>, vector<8x256xf32> -> vector<8x256xf32>
    %264 = arith.addf %258, %263 : vector<8x256xf32>
    %c22 = arith.constant 22 : index
    %c0_272 = arith.constant 0 : index
    %c0_273 = arith.constant 0 : index
    %265 = vector.load %arg1[%c22, %c0_272, %c0_273] : memref<36x8x144xf32, #tpu.memory_space<vmem>>, vector<1x8x144xf32>
    %266 = vector.shape_cast %265 : vector<1x8x144xf32> to vector<8x144xf32>
    %c6_274 = arith.constant 6 : index
    %c0_275 = arith.constant 0 : index
    %c0_276 = arith.constant 0 : index
    %267 = vector.load %arg2[%c6_274, %c0_275, %c0_276] : memref<8x144x256xf32, #tpu.memory_space<vmem>>, vector<1x144x256xf32>
    %268 = vector.shape_cast %267 : vector<1x144x256xf32> to vector<144x256xf32>
    %cst_277 = arith.constant dense<0.000000e+00> : vector<8x256xf32>
    %269 = tpu.matmul %266, %268, %cst_277 {dimension_numbers = #tpu.dot_dimension_numbers<[1], [0], [0], [1], [0, 0, 1, 1], [], []>} : vector<8x144xf32>, vector<144x256xf32>, vector<8x256xf32> -> vector<8x256xf32>
    %270 = arith.addf %264, %269 : vector<8x256xf32>
    %c23 = arith.constant 23 : index
    %c0_278 = arith.constant 0 : index
    %c0_279 = arith.constant 0 : index
    %271 = vector.load %arg1[%c23, %c0_278, %c0_279] : memref<36x8x144xf32, #tpu.memory_space<vmem>>, vector<1x8x144xf32>
    %272 = vector.shape_cast %271 : vector<1x8x144xf32> to vector<8x144xf32>
    %c7_280 = arith.constant 7 : index
    %c0_281 = arith.constant 0 : index
    %c0_282 = arith.constant 0 : index
    %273 = vector.load %arg2[%c7_280, %c0_281, %c0_282] : memref<8x144x256xf32, #tpu.memory_space<vmem>>, vector<1x144x256xf32>
    %274 = vector.shape_cast %273 : vector<1x144x256xf32> to vector<144x256xf32>
    %cst_283 = arith.constant dense<0.000000e+00> : vector<8x256xf32>
    %275 = tpu.matmul %272, %274, %cst_283 {dimension_numbers = #tpu.dot_dimension_numbers<[1], [0], [0], [1], [0, 0, 1, 1], [], []>} : vector<8x144xf32>, vector<144x256xf32>, vector<8x256xf32> -> vector<8x256xf32>
    %276 = arith.addf %270, %275 : vector<8x256xf32>
    %c0_284 = arith.constant 0 : index
    %c0_285 = arith.constant 0 : index
    %277 = vector.load %arg3[%c0_284, %c0_285] : memref<1x256xf32, #tpu.memory_space<vmem>>, vector<1x256xf32>
    %278 = vector.broadcast %277 : vector<1x256xf32> to vector<8x256xf32>
    %279 = arith.addf %276, %278 : vector<8x256xf32>
    %cst_286 = arith.constant 0.000000e+00 : f32
    %280 = vector.broadcast %cst_286 : f32 to vector<8x256xf32>
    %281 = arith.maximumf %279, %280 : vector<8x256xf32>
    %c4_287 = arith.constant 4 : index
    %c0_288 = arith.constant 0 : index
    %c0_289 = arith.constant 0 : index
    %282 = vector.load %arg13[%c4_287, %c0_288, %c0_289] : memref<8x8x256xf32, #tpu.memory_space<vmem>>, vector<1x8x256xf32>
    %283 = vector.shape_cast %282 : vector<1x8x256xf32> to vector<8x256xf32>
    %284 = vector.shape_cast %281 : vector<8x256xf32> to vector<1x8x256xf32>
    tpu.vector_store %arg13[%c4_287, %c0_288, %c0_289], %284 {strides = array<i32>} : memref<8x8x256xf32, #tpu.memory_space<vmem>>, vector<1x8x256xf32>,
    %cst_290 = arith.constant 0.000000e+00 : f32
    %285 = vector.broadcast %cst_290 : f32 to vector<8x256xf32>
    %c20_291 = arith.constant 20 : index
    %c0_292 = arith.constant 0 : index
    %c0_293 = arith.constant 0 : index
    %286 = vector.load %arg1[%c20_291, %c0_292, %c0_293] : memref<36x8x144xf32, #tpu.memory_space<vmem>>, vector<1x8x144xf32>
    %287 = vector.shape_cast %286 : vector<1x8x144xf32> to vector<8x144xf32>
    %c0_294 = arith.constant 0 : index
    %c0_295 = arith.constant 0 : index
    %c0_296 = arith.constant 0 : index
    %288 = vector.load %arg2[%c0_294, %c0_295, %c0_296] : memref<8x144x256xf32, #tpu.memory_space<vmem>>, vector<1x144x256xf32>
    %289 = vector.shape_cast %288 : vector<1x144x256xf32> to vector<144x256xf32>
    %cst_297 = arith.constant dense<0.000000e+00> : vector<8x256xf32>
    %290 = tpu.matmul %287, %289, %cst_297 {dimension_numbers = #tpu.dot_dimension_numbers<[1], [0], [0], [1], [0, 0, 1, 1], [], []>} : vector<8x144xf32>, vector<144x256xf32>, vector<8x256xf32> -> vector<8x256xf32>
    %291 = arith.addf %285, %290 : vector<8x256xf32>
    %c21_298 = arith.constant 21 : index
    %c0_299 = arith.constant 0 : index
    %c0_300 = arith.constant 0 : index
    %292 = vector.load %arg1[%c21_298, %c0_299, %c0_300] : memref<36x8x144xf32, #tpu.memory_space<vmem>>, vector<1x8x144xf32>
    %293 = vector.shape_cast %292 : vector<1x8x144xf32> to vector<8x144xf32>
    %c1_301 = arith.constant 1 : index
    %c0_302 = arith.constant 0 : index
    %c0_303 = arith.constant 0 : index
    %294 = vector.load %arg2[%c1_301, %c0_302, %c0_303] : memref<8x144x256xf32, #tpu.memory_space<vmem>>, vector<1x144x256xf32>
    %295 = vector.shape_cast %294 : vector<1x144x256xf32> to vector<144x256xf32>
    %cst_304 = arith.constant dense<0.000000e+00> : vector<8x256xf32>
    %296 = tpu.matmul %293, %295, %cst_304 {dimension_numbers = #tpu.dot_dimension_numbers<[1], [0], [0], [1], [0, 0, 1, 1], [], []>} : vector<8x144xf32>, vector<144x256xf32>, vector<8x256xf32> -> vector<8x256xf32>
    %297 = arith.addf %291, %296 : vector<8x256xf32>
    %c22_305 = arith.constant 22 : index
    %c0_306 = arith.constant 0 : index
    %c0_307 = arith.constant 0 : index
    %298 = vector.load %arg1[%c22_305, %c0_306, %c0_307] : memref<36x8x144xf32, #tpu.memory_space<vmem>>, vector<1x8x144xf32>
    %299 = vector.shape_cast %298 : vector<1x8x144xf32> to vector<8x144xf32>
    %c2_308 = arith.constant 2 : index
    %c0_309 = arith.constant 0 : index
    %c0_310 = arith.constant 0 : index
    %300 = vector.load %arg2[%c2_308, %c0_309, %c0_310] : memref<8x144x256xf32, #tpu.memory_space<vmem>>, vector<1x144x256xf32>
    %301 = vector.shape_cast %300 : vector<1x144x256xf32> to vector<144x256xf32>
    %cst_311 = arith.constant dense<0.000000e+00> : vector<8x256xf32>
    %302 = tpu.matmul %299, %301, %cst_311 {dimension_numbers = #tpu.dot_dimension_numbers<[1], [0], [0], [1], [0, 0, 1, 1], [], []>} : vector<8x144xf32>, vector<144x256xf32>, vector<8x256xf32> -> vector<8x256xf32>
    %303 = arith.addf %297, %302 : vector<8x256xf32>
    %c23_312 = arith.constant 23 : index
    %c0_313 = arith.constant 0 : index
    %c0_314 = arith.constant 0 : index
    %304 = vector.load %arg1[%c23_312, %c0_313, %c0_314] : memref<36x8x144xf32, #tpu.memory_space<vmem>>, vector<1x8x144xf32>
    %305 = vector.shape_cast %304 : vector<1x8x144xf32> to vector<8x144xf32>
    %c3_315 = arith.constant 3 : index
    %c0_316 = arith.constant 0 : index
    %c0_317 = arith.constant 0 : index
    %306 = vector.load %arg2[%c3_315, %c0_316, %c0_317] : memref<8x144x256xf32, #tpu.memory_space<vmem>>, vector<1x144x256xf32>
    %307 = vector.shape_cast %306 : vector<1x144x256xf32> to vector<144x256xf32>
    %cst_318 = arith.constant dense<0.000000e+00> : vector<8x256xf32>
    %308 = tpu.matmul %305, %307, %cst_318 {dimension_numbers = #tpu.dot_dimension_numbers<[1], [0], [0], [1], [0, 0, 1, 1], [], []>} : vector<8x144xf32>, vector<144x256xf32>, vector<8x256xf32> -> vector<8x256xf32>
    %309 = arith.addf %303, %308 : vector<8x256xf32>
    %c24 = arith.constant 24 : index
    %c0_319 = arith.constant 0 : index
    %c0_320 = arith.constant 0 : index
    %310 = vector.load %arg1[%c24, %c0_319, %c0_320] : memref<36x8x144xf32, #tpu.memory_space<vmem>>, vector<1x8x144xf32>
    %311 = vector.shape_cast %310 : vector<1x8x144xf32> to vector<8x144xf32>
    %c4_321 = arith.constant 4 : index
    %c0_322 = arith.constant 0 : index
    %c0_323 = arith.constant 0 : index
    %312 = vector.load %arg2[%c4_321, %c0_322, %c0_323] : memref<8x144x256xf32, #tpu.memory_space<vmem>>, vector<1x144x256xf32>
    %313 = vector.shape_cast %312 : vector<1x144x256xf32> to vector<144x256xf32>
    %cst_324 = arith.constant dense<0.000000e+00> : vector<8x256xf32>
    %314 = tpu.matmul %311, %313, %cst_324 {dimension_numbers = #tpu.dot_dimension_numbers<[1], [0], [0], [1], [0, 0, 1, 1], [], []>} : vector<8x144xf32>, vector<144x256xf32>, vector<8x256xf32> -> vector<8x256xf32>
    %315 = arith.addf %309, %314 : vector<8x256xf32>
    %c25 = arith.constant 25 : index
    %c0_325 = arith.constant 0 : index
    %c0_326 = arith.constant 0 : index
    %316 = vector.load %arg1[%c25, %c0_325, %c0_326] : memref<36x8x144xf32, #tpu.memory_space<vmem>>, vector<1x8x144xf32>
    %317 = vector.shape_cast %316 : vector<1x8x144xf32> to vector<8x144xf32>
    %c5_327 = arith.constant 5 : index
    %c0_328 = arith.constant 0 : index
    %c0_329 = arith.constant 0 : index
    %318 = vector.load %arg2[%c5_327, %c0_328, %c0_329] : memref<8x144x256xf32, #tpu.memory_space<vmem>>, vector<1x144x256xf32>
    %319 = vector.shape_cast %318 : vector<1x144x256xf32> to vector<144x256xf32>
    %cst_330 = arith.constant dense<0.000000e+00> : vector<8x256xf32>
    %320 = tpu.matmul %317, %319, %cst_330 {dimension_numbers = #tpu.dot_dimension_numbers<[1], [0], [0], [1], [0, 0, 1, 1], [], []>} : vector<8x144xf32>, vector<144x256xf32>, vector<8x256xf32> -> vector<8x256xf32>
    %321 = arith.addf %315, %320 : vector<8x256xf32>
    %c26 = arith.constant 26 : index
    %c0_331 = arith.constant 0 : index
    %c0_332 = arith.constant 0 : index
    %322 = vector.load %arg1[%c26, %c0_331, %c0_332] : memref<36x8x144xf32, #tpu.memory_space<vmem>>, vector<1x8x144xf32>
    %323 = vector.shape_cast %322 : vector<1x8x144xf32> to vector<8x144xf32>
    %c6_333 = arith.constant 6 : index
    %c0_334 = arith.constant 0 : index
    %c0_335 = arith.constant 0 : index
    %324 = vector.load %arg2[%c6_333, %c0_334, %c0_335] : memref<8x144x256xf32, #tpu.memory_space<vmem>>, vector<1x144x256xf32>
    %325 = vector.shape_cast %324 : vector<1x144x256xf32> to vector<144x256xf32>
    %cst_336 = arith.constant dense<0.000000e+00> : vector<8x256xf32>
    %326 = tpu.matmul %323, %325, %cst_336 {dimension_numbers = #tpu.dot_dimension_numbers<[1], [0], [0], [1], [0, 0, 1, 1], [], []>} : vector<8x144xf32>, vector<144x256xf32>, vector<8x256xf32> -> vector<8x256xf32>
    %327 = arith.addf %321, %326 : vector<8x256xf32>
    %c27 = arith.constant 27 : index
    %c0_337 = arith.constant 0 : index
    %c0_338 = arith.constant 0 : index
    %328 = vector.load %arg1[%c27, %c0_337, %c0_338] : memref<36x8x144xf32, #tpu.memory_space<vmem>>, vector<1x8x144xf32>
    %329 = vector.shape_cast %328 : vector<1x8x144xf32> to vector<8x144xf32>
    %c7_339 = arith.constant 7 : index
    %c0_340 = arith.constant 0 : index
    %c0_341 = arith.constant 0 : index
    %330 = vector.load %arg2[%c7_339, %c0_340, %c0_341] : memref<8x144x256xf32, #tpu.memory_space<vmem>>, vector<1x144x256xf32>
    %331 = vector.shape_cast %330 : vector<1x144x256xf32> to vector<144x256xf32>
    %cst_342 = arith.constant dense<0.000000e+00> : vector<8x256xf32>
    %332 = tpu.matmul %329, %331, %cst_342 {dimension_numbers = #tpu.dot_dimension_numbers<[1], [0], [0], [1], [0, 0, 1, 1], [], []>} : vector<8x144xf32>, vector<144x256xf32>, vector<8x256xf32> -> vector<8x256xf32>
    %333 = arith.addf %327, %332 : vector<8x256xf32>
    %c0_343 = arith.constant 0 : index
    %c0_344 = arith.constant 0 : index
    %334 = vector.load %arg3[%c0_343, %c0_344] : memref<1x256xf32, #tpu.memory_space<vmem>>, vector<1x256xf32>
    %335 = vector.broadcast %334 : vector<1x256xf32> to vector<8x256xf32>
    %336 = arith.addf %333, %335 : vector<8x256xf32>
    %cst_345 = arith.constant 0.000000e+00 : f32
    %337 = vector.broadcast %cst_345 : f32 to vector<8x256xf32>
    %338 = arith.maximumf %336, %337 : vector<8x256xf32>
    %c5_346 = arith.constant 5 : index
    %c0_347 = arith.constant 0 : index
    %c0_348 = arith.constant 0 : index
    %339 = vector.load %arg13[%c5_346, %c0_347, %c0_348] : memref<8x8x256xf32, #tpu.memory_space<vmem>>, vector<1x8x256xf32>
    %340 = vector.shape_cast %339 : vector<1x8x256xf32> to vector<8x256xf32>
    %341 = vector.shape_cast %338 : vector<8x256xf32> to vector<1x8x256xf32>
    tpu.vector_store %arg13[%c5_346, %c0_347, %c0_348], %341 {strides = array<i32>} : memref<8x8x256xf32, #tpu.memory_space<vmem>>, vector<1x8x256xf32>,
    %cst_349 = arith.constant 0.000000e+00 : f32
    %342 = vector.broadcast %cst_349 : f32 to vector<8x256xf32>
    %c24_350 = arith.constant 24 : index
    %c0_351 = arith.constant 0 : index
    %c0_352 = arith.constant 0 : index
    %343 = vector.load %arg1[%c24_350, %c0_351, %c0_352] : memref<36x8x144xf32, #tpu.memory_space<vmem>>, vector<1x8x144xf32>
    %344 = vector.shape_cast %343 : vector<1x8x144xf32> to vector<8x144xf32>
    %c0_353 = arith.constant 0 : index
    %c0_354 = arith.constant 0 : index
    %c0_355 = arith.constant 0 : index
    %345 = vector.load %arg2[%c0_353, %c0_354, %c0_355] : memref<8x144x256xf32, #tpu.memory_space<vmem>>, vector<1x144x256xf32>
    %346 = vector.shape_cast %345 : vector<1x144x256xf32> to vector<144x256xf32>
    %cst_356 = arith.constant dense<0.000000e+00> : vector<8x256xf32>
    %347 = tpu.matmul %344, %346, %cst_356 {dimension_numbers = #tpu.dot_dimension_numbers<[1], [0], [0], [1], [0, 0, 1, 1], [], []>} : vector<8x144xf32>, vector<144x256xf32>, vector<8x256xf32> -> vector<8x256xf32>
    %348 = arith.addf %342, %347 : vector<8x256xf32>
    %c25_357 = arith.constant 25 : index
    %c0_358 = arith.constant 0 : index
    %c0_359 = arith.constant 0 : index
    %349 = vector.load %arg1[%c25_357, %c0_358, %c0_359] : memref<36x8x144xf32, #tpu.memory_space<vmem>>, vector<1x8x144xf32>
    %350 = vector.shape_cast %349 : vector<1x8x144xf32> to vector<8x144xf32>
    %c1_360 = arith.constant 1 : index
    %c0_361 = arith.constant 0 : index
    %c0_362 = arith.constant 0 : index
    %351 = vector.load %arg2[%c1_360, %c0_361, %c0_362] : memref<8x144x256xf32, #tpu.memory_space<vmem>>, vector<1x144x256xf32>
    %352 = vector.shape_cast %351 : vector<1x144x256xf32> to vector<144x256xf32>
    %cst_363 = arith.constant dense<0.000000e+00> : vector<8x256xf32>
    %353 = tpu.matmul %350, %352, %cst_363 {dimension_numbers = #tpu.dot_dimension_numbers<[1], [0], [0], [1], [0, 0, 1, 1], [], []>} : vector<8x144xf32>, vector<144x256xf32>, vector<8x256xf32> -> vector<8x256xf32>
    %354 = arith.addf %348, %353 : vector<8x256xf32>
    %c26_364 = arith.constant 26 : index
    %c0_365 = arith.constant 0 : index
    %c0_366 = arith.constant 0 : index
    %355 = vector.load %arg1[%c26_364, %c0_365, %c0_366] : memref<36x8x144xf32, #tpu.memory_space<vmem>>, vector<1x8x144xf32>
    %356 = vector.shape_cast %355 : vector<1x8x144xf32> to vector<8x144xf32>
    %c2_367 = arith.constant 2 : index
    %c0_368 = arith.constant 0 : index
    %c0_369 = arith.constant 0 : index
    %357 = vector.load %arg2[%c2_367, %c0_368, %c0_369] : memref<8x144x256xf32, #tpu.memory_space<vmem>>, vector<1x144x256xf32>
    %358 = vector.shape_cast %357 : vector<1x144x256xf32> to vector<144x256xf32>
    %cst_370 = arith.constant dense<0.000000e+00> : vector<8x256xf32>
    %359 = tpu.matmul %356, %358, %cst_370 {dimension_numbers = #tpu.dot_dimension_numbers<[1], [0], [0], [1], [0, 0, 1, 1], [], []>} : vector<8x144xf32>, vector<144x256xf32>, vector<8x256xf32> -> vector<8x256xf32>
    %360 = arith.addf %354, %359 : vector<8x256xf32>
    %c27_371 = arith.constant 27 : index
    %c0_372 = arith.constant 0 : index
    %c0_373 = arith.constant 0 : index
    %361 = vector.load %arg1[%c27_371, %c0_372, %c0_373] : memref<36x8x144xf32, #tpu.memory_space<vmem>>, vector<1x8x144xf32>
    %362 = vector.shape_cast %361 : vector<1x8x144xf32> to vector<8x144xf32>
    %c3_374 = arith.constant 3 : index
    %c0_375 = arith.constant 0 : index
    %c0_376 = arith.constant 0 : index
    %363 = vector.load %arg2[%c3_374, %c0_375, %c0_376] : memref<8x144x256xf32, #tpu.memory_space<vmem>>, vector<1x144x256xf32>
    %364 = vector.shape_cast %363 : vector<1x144x256xf32> to vector<144x256xf32>
    %cst_377 = arith.constant dense<0.000000e+00> : vector<8x256xf32>
    %365 = tpu.matmul %362, %364, %cst_377 {dimension_numbers = #tpu.dot_dimension_numbers<[1], [0], [0], [1], [0, 0, 1, 1], [], []>} : vector<8x144xf32>, vector<144x256xf32>, vector<8x256xf32> -> vector<8x256xf32>
    %366 = arith.addf %360, %365 : vector<8x256xf32>
    %c28 = arith.constant 28 : index
    %c0_378 = arith.constant 0 : index
    %c0_379 = arith.constant 0 : index
    %367 = vector.load %arg1[%c28, %c0_378, %c0_379] : memref<36x8x144xf32, #tpu.memory_space<vmem>>, vector<1x8x144xf32>
    %368 = vector.shape_cast %367 : vector<1x8x144xf32> to vector<8x144xf32>
    %c4_380 = arith.constant 4 : index
    %c0_381 = arith.constant 0 : index
    %c0_382 = arith.constant 0 : index
    %369 = vector.load %arg2[%c4_380, %c0_381, %c0_382] : memref<8x144x256xf32, #tpu.memory_space<vmem>>, vector<1x144x256xf32>
    %370 = vector.shape_cast %369 : vector<1x144x256xf32> to vector<144x256xf32>
    %cst_383 = arith.constant dense<0.000000e+00> : vector<8x256xf32>
    %371 = tpu.matmul %368, %370, %cst_383 {dimension_numbers = #tpu.dot_dimension_numbers<[1], [0], [0], [1], [0, 0, 1, 1], [], []>} : vector<8x144xf32>, vector<144x256xf32>, vector<8x256xf32> -> vector<8x256xf32>
    %372 = arith.addf %366, %371 : vector<8x256xf32>
    %c29 = arith.constant 29 : index
    %c0_384 = arith.constant 0 : index
    %c0_385 = arith.constant 0 : index
    %373 = vector.load %arg1[%c29, %c0_384, %c0_385] : memref<36x8x144xf32, #tpu.memory_space<vmem>>, vector<1x8x144xf32>
    %374 = vector.shape_cast %373 : vector<1x8x144xf32> to vector<8x144xf32>
    %c5_386 = arith.constant 5 : index
    %c0_387 = arith.constant 0 : index
    %c0_388 = arith.constant 0 : index
    %375 = vector.load %arg2[%c5_386, %c0_387, %c0_388] : memref<8x144x256xf32, #tpu.memory_space<vmem>>, vector<1x144x256xf32>
    %376 = vector.shape_cast %375 : vector<1x144x256xf32> to vector<144x256xf32>
    %cst_389 = arith.constant dense<0.000000e+00> : vector<8x256xf32>
    %377 = tpu.matmul %374, %376, %cst_389 {dimension_numbers = #tpu.dot_dimension_numbers<[1], [0], [0], [1], [0, 0, 1, 1], [], []>} : vector<8x144xf32>, vector<144x256xf32>, vector<8x256xf32> -> vector<8x256xf32>
    %378 = arith.addf %372, %377 : vector<8x256xf32>
    %c30 = arith.constant 30 : index
    %c0_390 = arith.constant 0 : index
    %c0_391 = arith.constant 0 : index
    %379 = vector.load %arg1[%c30, %c0_390, %c0_391] : memref<36x8x144xf32, #tpu.memory_space<vmem>>, vector<1x8x144xf32>
    %380 = vector.shape_cast %379 : vector<1x8x144xf32> to vector<8x144xf32>
    %c6_392 = arith.constant 6 : index
    %c0_393 = arith.constant 0 : index
    %c0_394 = arith.constant 0 : index
    %381 = vector.load %arg2[%c6_392, %c0_393, %c0_394] : memref<8x144x256xf32, #tpu.memory_space<vmem>>, vector<1x144x256xf32>
    %382 = vector.shape_cast %381 : vector<1x144x256xf32> to vector<144x256xf32>
    %cst_395 = arith.constant dense<0.000000e+00> : vector<8x256xf32>
    %383 = tpu.matmul %380, %382, %cst_395 {dimension_numbers = #tpu.dot_dimension_numbers<[1], [0], [0], [1], [0, 0, 1, 1], [], []>} : vector<8x144xf32>, vector<144x256xf32>, vector<8x256xf32> -> vector<8x256xf32>
    %384 = arith.addf %378, %383 : vector<8x256xf32>
    %c31 = arith.constant 31 : index
    %c0_396 = arith.constant 0 : index
    %c0_397 = arith.constant 0 : index
    %385 = vector.load %arg1[%c31, %c0_396, %c0_397] : memref<36x8x144xf32, #tpu.memory_space<vmem>>, vector<1x8x144xf32>
    %386 = vector.shape_cast %385 : vector<1x8x144xf32> to vector<8x144xf32>
    %c7_398 = arith.constant 7 : index
    %c0_399 = arith.constant 0 : index
    %c0_400 = arith.constant 0 : index
    %387 = vector.load %arg2[%c7_398, %c0_399, %c0_400] : memref<8x144x256xf32, #tpu.memory_space<vmem>>, vector<1x144x256xf32>
    %388 = vector.shape_cast %387 : vector<1x144x256xf32> to vector<144x256xf32>
    %cst_401 = arith.constant dense<0.000000e+00> : vector<8x256xf32>
    %389 = tpu.matmul %386, %388, %cst_401 {dimension_numbers = #tpu.dot_dimension_numbers<[1], [0], [0], [1], [0, 0, 1, 1], [], []>} : vector<8x144xf32>, vector<144x256xf32>, vector<8x256xf32> -> vector<8x256xf32>
    %390 = arith.addf %384, %389 : vector<8x256xf32>
    %c0_402 = arith.constant 0 : index
    %c0_403 = arith.constant 0 : index
    %391 = vector.load %arg3[%c0_402, %c0_403] : memref<1x256xf32, #tpu.memory_space<vmem>>, vector<1x256xf32>
    %392 = vector.broadcast %391 : vector<1x256xf32> to vector<8x256xf32>
    %393 = arith.addf %390, %392 : vector<8x256xf32>
    %cst_404 = arith.constant 0.000000e+00 : f32
    %394 = vector.broadcast %cst_404 : f32 to vector<8x256xf32>
    %395 = arith.maximumf %393, %394 : vector<8x256xf32>
    %c6_405 = arith.constant 6 : index
    %c0_406 = arith.constant 0 : index
    %c0_407 = arith.constant 0 : index
    %396 = vector.load %arg13[%c6_405, %c0_406, %c0_407] : memref<8x8x256xf32, #tpu.memory_space<vmem>>, vector<1x8x256xf32>
    %397 = vector.shape_cast %396 : vector<1x8x256xf32> to vector<8x256xf32>
    %398 = vector.shape_cast %395 : vector<8x256xf32> to vector<1x8x256xf32>
    tpu.vector_store %arg13[%c6_405, %c0_406, %c0_407], %398 {strides = array<i32>} : memref<8x8x256xf32, #tpu.memory_space<vmem>>, vector<1x8x256xf32>,
    %cst_408 = arith.constant 0.000000e+00 : f32
    %399 = vector.broadcast %cst_408 : f32 to vector<8x256xf32>
    %c28_409 = arith.constant 28 : index
    %c0_410 = arith.constant 0 : index
    %c0_411 = arith.constant 0 : index
    %400 = vector.load %arg1[%c28_409, %c0_410, %c0_411] : memref<36x8x144xf32, #tpu.memory_space<vmem>>, vector<1x8x144xf32>
    %401 = vector.shape_cast %400 : vector<1x8x144xf32> to vector<8x144xf32>
    %c0_412 = arith.constant 0 : index
    %c0_413 = arith.constant 0 : index
    %c0_414 = arith.constant 0 : index
    %402 = vector.load %arg2[%c0_412, %c0_413, %c0_414] : memref<8x144x256xf32, #tpu.memory_space<vmem>>, vector<1x144x256xf32>
    %403 = vector.shape_cast %402 : vector<1x144x256xf32> to vector<144x256xf32>
    %cst_415 = arith.constant dense<0.000000e+00> : vector<8x256xf32>
    %404 = tpu.matmul %401, %403, %cst_415 {dimension_numbers = #tpu.dot_dimension_numbers<[1], [0], [0], [1], [0, 0, 1, 1], [], []>} : vector<8x144xf32>, vector<144x256xf32>, vector<8x256xf32> -> vector<8x256xf32>
    %405 = arith.addf %399, %404 : vector<8x256xf32>
    %c29_416 = arith.constant 29 : index
    %c0_417 = arith.constant 0 : index
    %c0_418 = arith.constant 0 : index
    %406 = vector.load %arg1[%c29_416, %c0_417, %c0_418] : memref<36x8x144xf32, #tpu.memory_space<vmem>>, vector<1x8x144xf32>
    %407 = vector.shape_cast %406 : vector<1x8x144xf32> to vector<8x144xf32>
    %c1_419 = arith.constant 1 : index
    %c0_420 = arith.constant 0 : index
    %c0_421 = arith.constant 0 : index
    %408 = vector.load %arg2[%c1_419, %c0_420, %c0_421] : memref<8x144x256xf32, #tpu.memory_space<vmem>>, vector<1x144x256xf32>
    %409 = vector.shape_cast %408 : vector<1x144x256xf32> to vector<144x256xf32>
    %cst_422 = arith.constant dense<0.000000e+00> : vector<8x256xf32>
    %410 = tpu.matmul %407, %409, %cst_422 {dimension_numbers = #tpu.dot_dimension_numbers<[1], [0], [0], [1], [0, 0, 1, 1], [], []>} : vector<8x144xf32>, vector<144x256xf32>, vector<8x256xf32> -> vector<8x256xf32>
    %411 = arith.addf %405, %410 : vector<8x256xf32>
    %c30_423 = arith.constant 30 : index
    %c0_424 = arith.constant 0 : index
    %c0_425 = arith.constant 0 : index
    %412 = vector.load %arg1[%c30_423, %c0_424, %c0_425] : memref<36x8x144xf32, #tpu.memory_space<vmem>>, vector<1x8x144xf32>
    %413 = vector.shape_cast %412 : vector<1x8x144xf32> to vector<8x144xf32>
    %c2_426 = arith.constant 2 : index
    %c0_427 = arith.constant 0 : index
    %c0_428 = arith.constant 0 : index
    %414 = vector.load %arg2[%c2_426, %c0_427, %c0_428] : memref<8x144x256xf32, #tpu.memory_space<vmem>>, vector<1x144x256xf32>
    %415 = vector.shape_cast %414 : vector<1x144x256xf32> to vector<144x256xf32>
    %cst_429 = arith.constant dense<0.000000e+00> : vector<8x256xf32>
    %416 = tpu.matmul %413, %415, %cst_429 {dimension_numbers = #tpu.dot_dimension_numbers<[1], [0], [0], [1], [0, 0, 1, 1], [], []>} : vector<8x144xf32>, vector<144x256xf32>, vector<8x256xf32> -> vector<8x256xf32>
    %417 = arith.addf %411, %416 : vector<8x256xf32>
    %c31_430 = arith.constant 31 : index
    %c0_431 = arith.constant 0 : index
    %c0_432 = arith.constant 0 : index
    %418 = vector.load %arg1[%c31_430, %c0_431, %c0_432] : memref<36x8x144xf32, #tpu.memory_space<vmem>>, vector<1x8x144xf32>
    %419 = vector.shape_cast %418 : vector<1x8x144xf32> to vector<8x144xf32>
    %c3_433 = arith.constant 3 : index
    %c0_434 = arith.constant 0 : index
    %c0_435 = arith.constant 0 : index
    %420 = vector.load %arg2[%c3_433, %c0_434, %c0_435] : memref<8x144x256xf32, #tpu.memory_space<vmem>>, vector<1x144x256xf32>
    %421 = vector.shape_cast %420 : vector<1x144x256xf32> to vector<144x256xf32>
    %cst_436 = arith.constant dense<0.000000e+00> : vector<8x256xf32>
    %422 = tpu.matmul %419, %421, %cst_436 {dimension_numbers = #tpu.dot_dimension_numbers<[1], [0], [0], [1], [0, 0, 1, 1], [], []>} : vector<8x144xf32>, vector<144x256xf32>, vector<8x256xf32> -> vector<8x256xf32>
    %423 = arith.addf %417, %422 : vector<8x256xf32>
    %c32 = arith.constant 32 : index
    %c0_437 = arith.constant 0 : index
    %c0_438 = arith.constant 0 : index
    %424 = vector.load %arg1[%c32, %c0_437, %c0_438] : memref<36x8x144xf32, #tpu.memory_space<vmem>>, vector<1x8x144xf32>
    %425 = vector.shape_cast %424 : vector<1x8x144xf32> to vector<8x144xf32>
    %c4_439 = arith.constant 4 : index
    %c0_440 = arith.constant 0 : index
    %c0_441 = arith.constant 0 : index
    %426 = vector.load %arg2[%c4_439, %c0_440, %c0_441] : memref<8x144x256xf32, #tpu.memory_space<vmem>>, vector<1x144x256xf32>
    %427 = vector.shape_cast %426 : vector<1x144x256xf32> to vector<144x256xf32>
    %cst_442 = arith.constant dense<0.000000e+00> : vector<8x256xf32>
    %428 = tpu.matmul %425, %427, %cst_442 {dimension_numbers = #tpu.dot_dimension_numbers<[1], [0], [0], [1], [0, 0, 1, 1], [], []>} : vector<8x144xf32>, vector<144x256xf32>, vector<8x256xf32> -> vector<8x256xf32>
    %429 = arith.addf %423, %428 : vector<8x256xf32>
    %c33 = arith.constant 33 : index
    %c0_443 = arith.constant 0 : index
    %c0_444 = arith.constant 0 : index
    %430 = vector.load %arg1[%c33, %c0_443, %c0_444] : memref<36x8x144xf32, #tpu.memory_space<vmem>>, vector<1x8x144xf32>
    %431 = vector.shape_cast %430 : vector<1x8x144xf32> to vector<8x144xf32>
    %c5_445 = arith.constant 5 : index
    %c0_446 = arith.constant 0 : index
    %c0_447 = arith.constant 0 : index
    %432 = vector.load %arg2[%c5_445, %c0_446, %c0_447] : memref<8x144x256xf32, #tpu.memory_space<vmem>>, vector<1x144x256xf32>
    %433 = vector.shape_cast %432 : vector<1x144x256xf32> to vector<144x256xf32>
    %cst_448 = arith.constant dense<0.000000e+00> : vector<8x256xf32>
    %434 = tpu.matmul %431, %433, %cst_448 {dimension_numbers = #tpu.dot_dimension_numbers<[1], [0], [0], [1], [0, 0, 1, 1], [], []>} : vector<8x144xf32>, vector<144x256xf32>, vector<8x256xf32> -> vector<8x256xf32>
    %435 = arith.addf %429, %434 : vector<8x256xf32>
    %c34 = arith.constant 34 : index
    %c0_449 = arith.constant 0 : index
    %c0_450 = arith.constant 0 : index
    %436 = vector.load %arg1[%c34, %c0_449, %c0_450] : memref<36x8x144xf32, #tpu.memory_space<vmem>>, vector<1x8x144xf32>
    %437 = vector.shape_cast %436 : vector<1x8x144xf32> to vector<8x144xf32>
    %c6_451 = arith.constant 6 : index
    %c0_452 = arith.constant 0 : index
    %c0_453 = arith.constant 0 : index
    %438 = vector.load %arg2[%c6_451, %c0_452, %c0_453] : memref<8x144x256xf32, #tpu.memory_space<vmem>>, vector<1x144x256xf32>
    %439 = vector.shape_cast %438 : vector<1x144x256xf32> to vector<144x256xf32>
    %cst_454 = arith.constant dense<0.000000e+00> : vector<8x256xf32>
    %440 = tpu.matmul %437, %439, %cst_454 {dimension_numbers = #tpu.dot_dimension_numbers<[1], [0], [0], [1], [0, 0, 1, 1], [], []>} : vector<8x144xf32>, vector<144x256xf32>, vector<8x256xf32> -> vector<8x256xf32>
    %441 = arith.addf %435, %440 : vector<8x256xf32>
    %c35 = arith.constant 35 : index
    %c0_455 = arith.constant 0 : index
    %c0_456 = arith.constant 0 : index
    %442 = vector.load %arg1[%c35, %c0_455, %c0_456] : memref<36x8x144xf32, #tpu.memory_space<vmem>>, vector<1x8x144xf32>
    %443 = vector.shape_cast %442 : vector<1x8x144xf32> to vector<8x144xf32>
    %c7_457 = arith.constant 7 : index
    %c0_458 = arith.constant 0 : index
    %c0_459 = arith.constant 0 : index
    %444 = vector.load %arg2[%c7_457, %c0_458, %c0_459] : memref<8x144x256xf32, #tpu.memory_space<vmem>>, vector<1x144x256xf32>
    %445 = vector.shape_cast %444 : vector<1x144x256xf32> to vector<144x256xf32>
    %cst_460 = arith.constant dense<0.000000e+00> : vector<8x256xf32>
    %446 = tpu.matmul %443, %445, %cst_460 {dimension_numbers = #tpu.dot_dimension_numbers<[1], [0], [0], [1], [0, 0, 1, 1], [], []>} : vector<8x144xf32>, vector<144x256xf32>, vector<8x256xf32> -> vector<8x256xf32>
    %447 = arith.addf %441, %446 : vector<8x256xf32>
    %c0_461 = arith.constant 0 : index
    %c0_462 = arith.constant 0 : index
    %448 = vector.load %arg3[%c0_461, %c0_462] : memref<1x256xf32, #tpu.memory_space<vmem>>, vector<1x256xf32>
    %449 = vector.broadcast %448 : vector<1x256xf32> to vector<8x256xf32>
    %450 = arith.addf %447, %449 : vector<8x256xf32>
    %cst_463 = arith.constant 0.000000e+00 : f32
    %451 = vector.broadcast %cst_463 : f32 to vector<8x256xf32>
    %452 = arith.maximumf %450, %451 : vector<8x256xf32>
    %c7_464 = arith.constant 7 : index
    %c0_465 = arith.constant 0 : index
    %c0_466 = arith.constant 0 : index
    %453 = vector.load %arg13[%c7_464, %c0_465, %c0_466] : memref<8x8x256xf32, #tpu.memory_space<vmem>>, vector<1x8x256xf32>
    %454 = vector.shape_cast %453 : vector<1x8x256xf32> to vector<8x256xf32>
    %455 = vector.shape_cast %452 : vector<8x256xf32> to vector<1x8x256xf32>
    tpu.vector_store %arg13[%c7_464, %c0_465, %c0_466], %455 {strides = array<i32>} : memref<8x8x256xf32, #tpu.memory_space<vmem>>, vector<1x8x256xf32>,
    %cst_467 = arith.constant 0.000000e+00 : f32
    %456 = vector.broadcast %cst_467 : f32 to vector<8x64xf32>
    %cst_468 = arith.constant 0.000000e+00 : f32
    %457 = vector.broadcast %cst_468 : f32 to vector<8x64xf32>
    %c0_469 = arith.constant 0 : index
    %c0_470 = arith.constant 0 : index
    %c0_471 = arith.constant 0 : index
    %458 = vector.load %arg13[%c0_469, %c0_470, %c0_471] : memref<8x8x256xf32, #tpu.memory_space<vmem>>, vector<1x8x128xf32>
    %459 = vector.shape_cast %458 : vector<1x8x128xf32> to vector<8x128xf32>
    %c0_472 = arith.constant 0 : index
    %c0_473 = arith.constant 0 : index
    %c0_474 = arith.constant 0 : index
    %460 = vector.load %arg4[%c0_472, %c0_473, %c0_474] : memref<4x128x64xf32, #tpu.memory_space<vmem>>, vector<1x128x64xf32>
    %461 = vector.shape_cast %460 : vector<1x128x64xf32> to vector<128x64xf32>
    %cst_475 = arith.constant dense<0.000000e+00> : vector<8x64xf32>
    %462 = tpu.matmul %459, %461, %cst_475 {dimension_numbers = #tpu.dot_dimension_numbers<[1], [0], [0], [1], [0, 0, 1, 1], [], []>} : vector<8x128xf32>, vector<128x64xf32>, vector<8x64xf32> -> vector<8x64xf32>
    %463 = arith.addf %457, %462 : vector<8x64xf32>
    %c1_476 = arith.constant 1 : index
    %c0_477 = arith.constant 0 : index
    %c0_478 = arith.constant 0 : index
    %464 = vector.load %arg13[%c1_476, %c0_477, %c0_478] : memref<8x8x256xf32, #tpu.memory_space<vmem>>, vector<1x8x128xf32>
    %465 = vector.shape_cast %464 : vector<1x8x128xf32> to vector<8x128xf32>
    %c1_479 = arith.constant 1 : index
    %c0_480 = arith.constant 0 : index
    %c0_481 = arith.constant 0 : index
    %466 = vector.load %arg4[%c1_479, %c0_480, %c0_481] : memref<4x128x64xf32, #tpu.memory_space<vmem>>, vector<1x128x64xf32>
    %467 = vector.shape_cast %466 : vector<1x128x64xf32> to vector<128x64xf32>
    %cst_482 = arith.constant dense<0.000000e+00> : vector<8x64xf32>
    %468 = tpu.matmul %465, %467, %cst_482 {dimension_numbers = #tpu.dot_dimension_numbers<[1], [0], [0], [1], [0, 0, 1, 1], [], []>} : vector<8x128xf32>, vector<128x64xf32>, vector<8x64xf32> -> vector<8x64xf32>
    %469 = arith.addf %463, %468 : vector<8x64xf32>
    %c2_483 = arith.constant 2 : index
    %c0_484 = arith.constant 0 : index
    %c0_485 = arith.constant 0 : index
    %470 = vector.load %arg13[%c2_483, %c0_484, %c0_485] : memref<8x8x256xf32, #tpu.memory_space<vmem>>, vector<1x8x128xf32>
    %471 = vector.shape_cast %470 : vector<1x8x128xf32> to vector<8x128xf32>
    %c2_486 = arith.constant 2 : index
    %c0_487 = arith.constant 0 : index
    %c0_488 = arith.constant 0 : index
    %472 = vector.load %arg4[%c2_486, %c0_487, %c0_488] : memref<4x128x64xf32, #tpu.memory_space<vmem>>, vector<1x128x64xf32>
    %473 = vector.shape_cast %472 : vector<1x128x64xf32> to vector<128x64xf32>
    %cst_489 = arith.constant dense<0.000000e+00> : vector<8x64xf32>
    %474 = tpu.matmul %471, %473, %cst_489 {dimension_numbers = #tpu.dot_dimension_numbers<[1], [0], [0], [1], [0, 0, 1, 1], [], []>} : vector<8x128xf32>, vector<128x64xf32>, vector<8x64xf32> -> vector<8x64xf32>
    %475 = arith.addf %469, %474 : vector<8x64xf32>
    %c3_490 = arith.constant 3 : index
    %c0_491 = arith.constant 0 : index
    %c0_492 = arith.constant 0 : index
    %476 = vector.load %arg13[%c3_490, %c0_491, %c0_492] : memref<8x8x256xf32, #tpu.memory_space<vmem>>, vector<1x8x128xf32>
    %477 = vector.shape_cast %476 : vector<1x8x128xf32> to vector<8x128xf32>
    %c3_493 = arith.constant 3 : index
    %c0_494 = arith.constant 0 : index
    %c0_495 = arith.constant 0 : index
    %478 = vector.load %arg4[%c3_493, %c0_494, %c0_495] : memref<4x128x64xf32, #tpu.memory_space<vmem>>, vector<1x128x64xf32>
    %479 = vector.shape_cast %478 : vector<1x128x64xf32> to vector<128x64xf32>
    %cst_496 = arith.constant dense<0.000000e+00> : vector<8x64xf32>
    %480 = tpu.matmul %477, %479, %cst_496 {dimension_numbers = #tpu.dot_dimension_numbers<[1], [0], [0], [1], [0, 0, 1, 1], [], []>} : vector<8x128xf32>, vector<128x64xf32>, vector<8x64xf32> -> vector<8x64xf32>
    %481 = arith.addf %475, %480 : vector<8x64xf32>
    %c0_497 = arith.constant 0 : index
    %c0_498 = arith.constant 0 : index
    %482 = vector.load %arg5[%c0_497, %c0_498] : memref<1x64xf32, #tpu.memory_space<vmem>>, vector<1x64xf32>
    %483 = vector.broadcast %482 : vector<1x64xf32> to vector<8x64xf32>
    %484 = arith.addf %481, %483 : vector<8x64xf32>
    %cst_499 = arith.constant 0.000000e+00 : f32
    %485 = vector.broadcast %cst_499 : f32 to vector<8x64xf32>
    %486 = arith.maximumf %484, %485 : vector<8x64xf32>
    %c0_500 = arith.constant 0 : index
    %c0_501 = arith.constant 0 : index
    %c0_502 = arith.constant 0 : index
    %487 = vector.load %arg6[%c0_500, %c0_501, %c0_502] : memref<9x64x64xf32, #tpu.memory_space<vmem>>, vector<1x64x64xf32>
    %488 = vector.shape_cast %487 : vector<1x64x64xf32> to vector<64x64xf32>
    %cst_503 = arith.constant dense<0.000000e+00> : vector<8x64xf32>
    %489 = tpu.matmul %486, %488, %cst_503 {dimension_numbers = #tpu.dot_dimension_numbers<[1], [0], [0], [1], [0, 0, 1, 1], [], []>} : vector<8x64xf32>, vector<64x64xf32>, vector<8x64xf32> -> vector<8x64xf32>
    %490 = arith.addf %456, %489 : vector<8x64xf32>
    %cst_504 = arith.constant 0.000000e+00 : f32
    %491 = vector.broadcast %cst_504 : f32 to vector<8x64xf32>
    %c0_505 = arith.constant 0 : index
    %c0_506 = arith.constant 0 : index
    %c64 = arith.constant 64 : index
    %492 = vector.load %arg13[%c0_505, %c0_506, %c64] : memref<8x8x256xf32, #tpu.memory_space<vmem>>, vector<1x8x128xf32>
    %493 = vector.shape_cast %492 : vector<1x8x128xf32> to vector<8x128xf32>
    %c0_507 = arith.constant 0 : index
    %c0_508 = arith.constant 0 : index
    %c0_509 = arith.constant 0 : index
    %494 = vector.load %arg4[%c0_507, %c0_508, %c0_509] : memref<4x128x64xf32, #tpu.memory_space<vmem>>, vector<1x128x64xf32>
    %495 = vector.shape_cast %494 : vector<1x128x64xf32> to vector<128x64xf32>
    %cst_510 = arith.constant dense<0.000000e+00> : vector<8x64xf32>
    %496 = tpu.matmul %493, %495, %cst_510 {dimension_numbers = #tpu.dot_dimension_numbers<[1], [0], [0], [1], [0, 0, 1, 1], [], []>} : vector<8x128xf32>, vector<128x64xf32>, vector<8x64xf32> -> vector<8x64xf32>
    %497 = arith.addf %491, %496 : vector<8x64xf32>
    %c1_511 = arith.constant 1 : index
    %c0_512 = arith.constant 0 : index
    %c64_513 = arith.constant 64 : index
    %498 = vector.load %arg13[%c1_511, %c0_512, %c64_513] : memref<8x8x256xf32, #tpu.memory_space<vmem>>, vector<1x8x128xf32>
    %499 = vector.shape_cast %498 : vector<1x8x128xf32> to vector<8x128xf32>
    %c1_514 = arith.constant 1 : index
    %c0_515 = arith.constant 0 : index
    %c0_516 = arith.constant 0 : index
    %500 = vector.load %arg4[%c1_514, %c0_515, %c0_516] : memref<4x128x64xf32, #tpu.memory_space<vmem>>, vector<1x128x64xf32>
    %501 = vector.shape_cast %500 : vector<1x128x64xf32> to vector<128x64xf32>
    %cst_517 = arith.constant dense<0.000000e+00> : vector<8x64xf32>
    %502 = tpu.matmul %499, %501, %cst_517 {dimension_numbers = #tpu.dot_dimension_numbers<[1], [0], [0], [1], [0, 0, 1, 1], [], []>} : vector<8x128xf32>, vector<128x64xf32>, vector<8x64xf32> -> vector<8x64xf32>
    %503 = arith.addf %497, %502 : vector<8x64xf32>
    %c2_518 = arith.constant 2 : index
    %c0_519 = arith.constant 0 : index
    %c64_520 = arith.constant 64 : index
    %504 = vector.load %arg13[%c2_518, %c0_519, %c64_520] : memref<8x8x256xf32, #tpu.memory_space<vmem>>, vector<1x8x128xf32>
    %505 = vector.shape_cast %504 : vector<1x8x128xf32> to vector<8x128xf32>
    %c2_521 = arith.constant 2 : index
    %c0_522 = arith.constant 0 : index
    %c0_523 = arith.constant 0 : index
    %506 = vector.load %arg4[%c2_521, %c0_522, %c0_523] : memref<4x128x64xf32, #tpu.memory_space<vmem>>, vector<1x128x64xf32>
    %507 = vector.shape_cast %506 : vector<1x128x64xf32> to vector<128x64xf32>
    %cst_524 = arith.constant dense<0.000000e+00> : vector<8x64xf32>
    %508 = tpu.matmul %505, %507, %cst_524 {dimension_numbers = #tpu.dot_dimension_numbers<[1], [0], [0], [1], [0, 0, 1, 1], [], []>} : vector<8x128xf32>, vector<128x64xf32>, vector<8x64xf32> -> vector<8x64xf32>
    %509 = arith.addf %503, %508 : vector<8x64xf32>
    %c3_525 = arith.constant 3 : index
    %c0_526 = arith.constant 0 : index
    %c64_527 = arith.constant 64 : index
    %510 = vector.load %arg13[%c3_525, %c0_526, %c64_527] : memref<8x8x256xf32, #tpu.memory_space<vmem>>, vector<1x8x128xf32>
    %511 = vector.shape_cast %510 : vector<1x8x128xf32> to vector<8x128xf32>
    %c3_528 = arith.constant 3 : index
    %c0_529 = arith.constant 0 : index
    %c0_530 = arith.constant 0 : index
    %512 = vector.load %arg4[%c3_528, %c0_529, %c0_530] : memref<4x128x64xf32, #tpu.memory_space<vmem>>, vector<1x128x64xf32>
    %513 = vector.shape_cast %512 : vector<1x128x64xf32> to vector<128x64xf32>
    %cst_531 = arith.constant dense<0.000000e+00> : vector<8x64xf32>
    %514 = tpu.matmul %511, %513, %cst_531 {dimension_numbers = #tpu.dot_dimension_numbers<[1], [0], [0], [1], [0, 0, 1, 1], [], []>} : vector<8x128xf32>, vector<128x64xf32>, vector<8x64xf32> -> vector<8x64xf32>
    %515 = arith.addf %509, %514 : vector<8x64xf32>
    %c0_532 = arith.constant 0 : index
    %c0_533 = arith.constant 0 : index
    %516 = vector.load %arg5[%c0_532, %c0_533] : memref<1x64xf32, #tpu.memory_space<vmem>>, vector<1x64xf32>
    %517 = vector.broadcast %516 : vector<1x64xf32> to vector<8x64xf32>
    %518 = arith.addf %515, %517 : vector<8x64xf32>
    %cst_534 = arith.constant 0.000000e+00 : f32
    %519 = vector.broadcast %cst_534 : f32 to vector<8x64xf32>
    %520 = arith.maximumf %518, %519 : vector<8x64xf32>
    %c1_535 = arith.constant 1 : index
    %c0_536 = arith.constant 0 : index
    %c0_537 = arith.constant 0 : index
    %521 = vector.load %arg6[%c1_535, %c0_536, %c0_537] : memref<9x64x64xf32, #tpu.memory_space<vmem>>, vector<1x64x64xf32>
    %522 = vector.shape_cast %521 : vector<1x64x64xf32> to vector<64x64xf32>
    %cst_538 = arith.constant dense<0.000000e+00> : vector<8x64xf32>
    %523 = tpu.matmul %520, %522, %cst_538 {dimension_numbers = #tpu.dot_dimension_numbers<[1], [0], [0], [1], [0, 0, 1, 1], [], []>} : vector<8x64xf32>, vector<64x64xf32>, vector<8x64xf32> -> vector<8x64xf32>
    %524 = arith.addf %490, %523 : vector<8x64xf32>
    %cst_539 = arith.constant 0.000000e+00 : f32
    %525 = vector.broadcast %cst_539 : f32 to vector<8x64xf32>
    %c0_540 = arith.constant 0 : index
    %c0_541 = arith.constant 0 : index
    %c128 = arith.constant 128 : index
    %526 = vector.load %arg13[%c0_540, %c0_541, %c128] : memref<8x8x256xf32, #tpu.memory_space<vmem>>, vector<1x8x128xf32>
    %527 = vector.shape_cast %526 : vector<1x8x128xf32> to vector<8x128xf32>
    %c0_542 = arith.constant 0 : index
    %c0_543 = arith.constant 0 : index
    %c0_544 = arith.constant 0 : index
    %528 = vector.load %arg4[%c0_542, %c0_543, %c0_544] : memref<4x128x64xf32, #tpu.memory_space<vmem>>, vector<1x128x64xf32>
    %529 = vector.shape_cast %528 : vector<1x128x64xf32> to vector<128x64xf32>
    %cst_545 = arith.constant dense<0.000000e+00> : vector<8x64xf32>
    %530 = tpu.matmul %527, %529, %cst_545 {dimension_numbers = #tpu.dot_dimension_numbers<[1], [0], [0], [1], [0, 0, 1, 1], [], []>} : vector<8x128xf32>, vector<128x64xf32>, vector<8x64xf32> -> vector<8x64xf32>
    %531 = arith.addf %525, %530 : vector<8x64xf32>
    %c1_546 = arith.constant 1 : index
    %c0_547 = arith.constant 0 : index
    %c128_548 = arith.constant 128 : index
    %532 = vector.load %arg13[%c1_546, %c0_547, %c128_548] : memref<8x8x256xf32, #tpu.memory_space<vmem>>, vector<1x8x128xf32>
    %533 = vector.shape_cast %532 : vector<1x8x128xf32> to vector<8x128xf32>
    %c1_549 = arith.constant 1 : index
    %c0_550 = arith.constant 0 : index
    %c0_551 = arith.constant 0 : index
    %534 = vector.load %arg4[%c1_549, %c0_550, %c0_551] : memref<4x128x64xf32, #tpu.memory_space<vmem>>, vector<1x128x64xf32>
    %535 = vector.shape_cast %534 : vector<1x128x64xf32> to vector<128x64xf32>
    %cst_552 = arith.constant dense<0.000000e+00> : vector<8x64xf32>
    %536 = tpu.matmul %533, %535, %cst_552 {dimension_numbers = #tpu.dot_dimension_numbers<[1], [0], [0], [1], [0, 0, 1, 1], [], []>} : vector<8x128xf32>, vector<128x64xf32>, vector<8x64xf32> -> vector<8x64xf32>
    %537 = arith.addf %531, %536 : vector<8x64xf32>
    %c2_553 = arith.constant 2 : index
    %c0_554 = arith.constant 0 : index
    %c128_555 = arith.constant 128 : index
    %538 = vector.load %arg13[%c2_553, %c0_554, %c128_555] : memref<8x8x256xf32, #tpu.memory_space<vmem>>, vector<1x8x128xf32>
    %539 = vector.shape_cast %538 : vector<1x8x128xf32> to vector<8x128xf32>
    %c2_556 = arith.constant 2 : index
    %c0_557 = arith.constant 0 : index
    %c0_558 = arith.constant 0 : index
    %540 = vector.load %arg4[%c2_556, %c0_557, %c0_558] : memref<4x128x64xf32, #tpu.memory_space<vmem>>, vector<1x128x64xf32>
    %541 = vector.shape_cast %540 : vector<1x128x64xf32> to vector<128x64xf32>
    %cst_559 = arith.constant dense<0.000000e+00> : vector<8x64xf32>
    %542 = tpu.matmul %539, %541, %cst_559 {dimension_numbers = #tpu.dot_dimension_numbers<[1], [0], [0], [1], [0, 0, 1, 1], [], []>} : vector<8x128xf32>, vector<128x64xf32>, vector<8x64xf32> -> vector<8x64xf32>
    %543 = arith.addf %537, %542 : vector<8x64xf32>
    %c3_560 = arith.constant 3 : index
    %c0_561 = arith.constant 0 : index
    %c128_562 = arith.constant 128 : index
    %544 = vector.load %arg13[%c3_560, %c0_561, %c128_562] : memref<8x8x256xf32, #tpu.memory_space<vmem>>, vector<1x8x128xf32>
    %545 = vector.shape_cast %544 : vector<1x8x128xf32> to vector<8x128xf32>
    %c3_563 = arith.constant 3 : index
    %c0_564 = arith.constant 0 : index
    %c0_565 = arith.constant 0 : index
    %546 = vector.load %arg4[%c3_563, %c0_564, %c0_565] : memref<4x128x64xf32, #tpu.memory_space<vmem>>, vector<1x128x64xf32>
    %547 = vector.shape_cast %546 : vector<1x128x64xf32> to vector<128x64xf32>
    %cst_566 = arith.constant dense<0.000000e+00> : vector<8x64xf32>
    %548 = tpu.matmul %545, %547, %cst_566 {dimension_numbers = #tpu.dot_dimension_numbers<[1], [0], [0], [1], [0, 0, 1, 1], [], []>} : vector<8x128xf32>, vector<128x64xf32>, vector<8x64xf32> -> vector<8x64xf32>
    %549 = arith.addf %543, %548 : vector<8x64xf32>
    %c0_567 = arith.constant 0 : index
    %c0_568 = arith.constant 0 : index
    %550 = vector.load %arg5[%c0_567, %c0_568] : memref<1x64xf32, #tpu.memory_space<vmem>>, vector<1x64xf32>
    %551 = vector.broadcast %550 : vector<1x64xf32> to vector<8x64xf32>
    %552 = arith.addf %549, %551 : vector<8x64xf32>
    %cst_569 = arith.constant 0.000000e+00 : f32
    %553 = vector.broadcast %cst_569 : f32 to vector<8x64xf32>
    %554 = arith.maximumf %552, %553 : vector<8x64xf32>
    %c2_570 = arith.constant 2 : index
    %c0_571 = arith.constant 0 : index
    %c0_572 = arith.constant 0 : index
    %555 = vector.load %arg6[%c2_570, %c0_571, %c0_572] : memref<9x64x64xf32, #tpu.memory_space<vmem>>, vector<1x64x64xf32>
    %556 = vector.shape_cast %555 : vector<1x64x64xf32> to vector<64x64xf32>
    %cst_573 = arith.constant dense<0.000000e+00> : vector<8x64xf32>
    %557 = tpu.matmul %554, %556, %cst_573 {dimension_numbers = #tpu.dot_dimension_numbers<[1], [0], [0], [1], [0, 0, 1, 1], [], []>} : vector<8x64xf32>, vector<64x64xf32>, vector<8x64xf32> -> vector<8x64xf32>
    %558 = arith.addf %524, %557 : vector<8x64xf32>
    %cst_574 = arith.constant 0.000000e+00 : f32
    %559 = vector.broadcast %cst_574 : f32 to vector<8x64xf32>
    %c2_575 = arith.constant 2 : index
    %c0_576 = arith.constant 0 : index
    %c0_577 = arith.constant 0 : index
    %560 = vector.load %arg13[%c2_575, %c0_576, %c0_577] : memref<8x8x256xf32, #tpu.memory_space<vmem>>, vector<1x8x128xf32>
    %561 = vector.shape_cast %560 : vector<1x8x128xf32> to vector<8x128xf32>
    %c0_578 = arith.constant 0 : index
    %c0_579 = arith.constant 0 : index
    %c0_580 = arith.constant 0 : index
    %562 = vector.load %arg4[%c0_578, %c0_579, %c0_580] : memref<4x128x64xf32, #tpu.memory_space<vmem>>, vector<1x128x64xf32>
    %563 = vector.shape_cast %562 : vector<1x128x64xf32> to vector<128x64xf32>
    %cst_581 = arith.constant dense<0.000000e+00> : vector<8x64xf32>
    %564 = tpu.matmul %561, %563, %cst_581 {dimension_numbers = #tpu.dot_dimension_numbers<[1], [0], [0], [1], [0, 0, 1, 1], [], []>} : vector<8x128xf32>, vector<128x64xf32>, vector<8x64xf32> -> vector<8x64xf32>
    %565 = arith.addf %559, %564 : vector<8x64xf32>
    %c3_582 = arith.constant 3 : index
    %c0_583 = arith.constant 0 : index
    %c0_584 = arith.constant 0 : index
    %566 = vector.load %arg13[%c3_582, %c0_583, %c0_584] : memref<8x8x256xf32, #tpu.memory_space<vmem>>, vector<1x8x128xf32>
    %567 = vector.shape_cast %566 : vector<1x8x128xf32> to vector<8x128xf32>
    %c1_585 = arith.constant 1 : index
    %c0_586 = arith.constant 0 : index
    %c0_587 = arith.constant 0 : index
    %568 = vector.load %arg4[%c1_585, %c0_586, %c0_587] : memref<4x128x64xf32, #tpu.memory_space<vmem>>, vector<1x128x64xf32>
    %569 = vector.shape_cast %568 : vector<1x128x64xf32> to vector<128x64xf32>
    %cst_588 = arith.constant dense<0.000000e+00> : vector<8x64xf32>
    %570 = tpu.matmul %567, %569, %cst_588 {dimension_numbers = #tpu.dot_dimension_numbers<[1], [0], [0], [1], [0, 0, 1, 1], [], []>} : vector<8x128xf32>, vector<128x64xf32>, vector<8x64xf32> -> vector<8x64xf32>
    %571 = arith.addf %565, %570 : vector<8x64xf32>
    %c4_589 = arith.constant 4 : index
    %c0_590 = arith.constant 0 : index
    %c0_591 = arith.constant 0 : index
    %572 = vector.load %arg13[%c4_589, %c0_590, %c0_591] : memref<8x8x256xf32, #tpu.memory_space<vmem>>, vector<1x8x128xf32>
    %573 = vector.shape_cast %572 : vector<1x8x128xf32> to vector<8x128xf32>
    %c2_592 = arith.constant 2 : index
    %c0_593 = arith.constant 0 : index
    %c0_594 = arith.constant 0 : index
    %574 = vector.load %arg4[%c2_592, %c0_593, %c0_594] : memref<4x128x64xf32, #tpu.memory_space<vmem>>, vector<1x128x64xf32>
    %575 = vector.shape_cast %574 : vector<1x128x64xf32> to vector<128x64xf32>
    %cst_595 = arith.constant dense<0.000000e+00> : vector<8x64xf32>
    %576 = tpu.matmul %573, %575, %cst_595 {dimension_numbers = #tpu.dot_dimension_numbers<[1], [0], [0], [1], [0, 0, 1, 1], [], []>} : vector<8x128xf32>, vector<128x64xf32>, vector<8x64xf32> -> vector<8x64xf32>
    %577 = arith.addf %571, %576 : vector<8x64xf32>
    %c5_596 = arith.constant 5 : index
    %c0_597 = arith.constant 0 : index
    %c0_598 = arith.constant 0 : index
    %578 = vector.load %arg13[%c5_596, %c0_597, %c0_598] : memref<8x8x256xf32, #tpu.memory_space<vmem>>, vector<1x8x128xf32>
    %579 = vector.shape_cast %578 : vector<1x8x128xf32> to vector<8x128xf32>
    %c3_599 = arith.constant 3 : index
    %c0_600 = arith.constant 0 : index
    %c0_601 = arith.constant 0 : index
    %580 = vector.load %arg4[%c3_599, %c0_600, %c0_601] : memref<4x128x64xf32, #tpu.memory_space<vmem>>, vector<1x128x64xf32>
    %581 = vector.shape_cast %580 : vector<1x128x64xf32> to vector<128x64xf32>
    %cst_602 = arith.constant dense<0.000000e+00> : vector<8x64xf32>
    %582 = tpu.matmul %579, %581, %cst_602 {dimension_numbers = #tpu.dot_dimension_numbers<[1], [0], [0], [1], [0, 0, 1, 1], [], []>} : vector<8x128xf32>, vector<128x64xf32>, vector<8x64xf32> -> vector<8x64xf32>
    %583 = arith.addf %577, %582 : vector<8x64xf32>
    %c0_603 = arith.constant 0 : index
    %c0_604 = arith.constant 0 : index
    %584 = vector.load %arg5[%c0_603, %c0_604] : memref<1x64xf32, #tpu.memory_space<vmem>>, vector<1x64xf32>
    %585 = vector.broadcast %584 : vector<1x64xf32> to vector<8x64xf32>
    %586 = arith.addf %583, %585 : vector<8x64xf32>
    %cst_605 = arith.constant 0.000000e+00 : f32
    %587 = vector.broadcast %cst_605 : f32 to vector<8x64xf32>
    %588 = arith.maximumf %586, %587 : vector<8x64xf32>
    %c3_606 = arith.constant 3 : index
    %c0_607 = arith.constant 0 : index
    %c0_608 = arith.constant 0 : index
    %589 = vector.load %arg6[%c3_606, %c0_607, %c0_608] : memref<9x64x64xf32, #tpu.memory_space<vmem>>, vector<1x64x64xf32>
    %590 = vector.shape_cast %589 : vector<1x64x64xf32> to vector<64x64xf32>
    %cst_609 = arith.constant dense<0.000000e+00> : vector<8x64xf32>
    %591 = tpu.matmul %588, %590, %cst_609 {dimension_numbers = #tpu.dot_dimension_numbers<[1], [0], [0], [1], [0, 0, 1, 1], [], []>} : vector<8x64xf32>, vector<64x64xf32>, vector<8x64xf32> -> vector<8x64xf32>
    %592 = arith.addf %558, %591 : vector<8x64xf32>
    %cst_610 = arith.constant 0.000000e+00 : f32
    %593 = vector.broadcast %cst_610 : f32 to vector<8x64xf32>
    %c2_611 = arith.constant 2 : index
    %c0_612 = arith.constant 0 : index
    %c64_613 = arith.constant 64 : index
    %594 = vector.load %arg13[%c2_611, %c0_612, %c64_613] : memref<8x8x256xf32, #tpu.memory_space<vmem>>, vector<1x8x128xf32>
    %595 = vector.shape_cast %594 : vector<1x8x128xf32> to vector<8x128xf32>
    %c0_614 = arith.constant 0 : index
    %c0_615 = arith.constant 0 : index
    %c0_616 = arith.constant 0 : index
    %596 = vector.load %arg4[%c0_614, %c0_615, %c0_616] : memref<4x128x64xf32, #tpu.memory_space<vmem>>, vector<1x128x64xf32>
    %597 = vector.shape_cast %596 : vector<1x128x64xf32> to vector<128x64xf32>
    %cst_617 = arith.constant dense<0.000000e+00> : vector<8x64xf32>
    %598 = tpu.matmul %595, %597, %cst_617 {dimension_numbers = #tpu.dot_dimension_numbers<[1], [0], [0], [1], [0, 0, 1, 1], [], []>} : vector<8x128xf32>, vector<128x64xf32>, vector<8x64xf32> -> vector<8x64xf32>
    %599 = arith.addf %593, %598 : vector<8x64xf32>
    %c3_618 = arith.constant 3 : index
    %c0_619 = arith.constant 0 : index
    %c64_620 = arith.constant 64 : index
    %600 = vector.load %arg13[%c3_618, %c0_619, %c64_620] : memref<8x8x256xf32, #tpu.memory_space<vmem>>, vector<1x8x128xf32>
    %601 = vector.shape_cast %600 : vector<1x8x128xf32> to vector<8x128xf32>
    %c1_621 = arith.constant 1 : index
    %c0_622 = arith.constant 0 : index
    %c0_623 = arith.constant 0 : index
    %602 = vector.load %arg4[%c1_621, %c0_622, %c0_623] : memref<4x128x64xf32, #tpu.memory_space<vmem>>, vector<1x128x64xf32>
    %603 = vector.shape_cast %602 : vector<1x128x64xf32> to vector<128x64xf32>
    %cst_624 = arith.constant dense<0.000000e+00> : vector<8x64xf32>
    %604 = tpu.matmul %601, %603, %cst_624 {dimension_numbers = #tpu.dot_dimension_numbers<[1], [0], [0], [1], [0, 0, 1, 1], [], []>} : vector<8x128xf32>, vector<128x64xf32>, vector<8x64xf32> -> vector<8x64xf32>
    %605 = arith.addf %599, %604 : vector<8x64xf32>
    %c4_625 = arith.constant 4 : index
    %c0_626 = arith.constant 0 : index
    %c64_627 = arith.constant 64 : index
    %606 = vector.load %arg13[%c4_625, %c0_626, %c64_627] : memref<8x8x256xf32, #tpu.memory_space<vmem>>, vector<1x8x128xf32>
    %607 = vector.shape_cast %606 : vector<1x8x128xf32> to vector<8x128xf32>
    %c2_628 = arith.constant 2 : index
    %c0_629 = arith.constant 0 : index
    %c0_630 = arith.constant 0 : index
    %608 = vector.load %arg4[%c2_628, %c0_629, %c0_630] : memref<4x128x64xf32, #tpu.memory_space<vmem>>, vector<1x128x64xf32>
    %609 = vector.shape_cast %608 : vector<1x128x64xf32> to vector<128x64xf32>
    %cst_631 = arith.constant dense<0.000000e+00> : vector<8x64xf32>
    %610 = tpu.matmul %607, %609, %cst_631 {dimension_numbers = #tpu.dot_dimension_numbers<[1], [0], [0], [1], [0, 0, 1, 1], [], []>} : vector<8x128xf32>, vector<128x64xf32>, vector<8x64xf32> -> vector<8x64xf32>
    %611 = arith.addf %605, %610 : vector<8x64xf32>
    %c5_632 = arith.constant 5 : index
    %c0_633 = arith.constant 0 : index
    %c64_634 = arith.constant 64 : index
    %612 = vector.load %arg13[%c5_632, %c0_633, %c64_634] : memref<8x8x256xf32, #tpu.memory_space<vmem>>, vector<1x8x128xf32>
    %613 = vector.shape_cast %612 : vector<1x8x128xf32> to vector<8x128xf32>
    %c3_635 = arith.constant 3 : index
    %c0_636 = arith.constant 0 : index
    %c0_637 = arith.constant 0 : index
    %614 = vector.load %arg4[%c3_635, %c0_636, %c0_637] : memref<4x128x64xf32, #tpu.memory_space<vmem>>, vector<1x128x64xf32>
    %615 = vector.shape_cast %614 : vector<1x128x64xf32> to vector<128x64xf32>
    %cst_638 = arith.constant dense<0.000000e+00> : vector<8x64xf32>
    %616 = tpu.matmul %613, %615, %cst_638 {dimension_numbers = #tpu.dot_dimension_numbers<[1], [0], [0], [1], [0, 0, 1, 1], [], []>} : vector<8x128xf32>, vector<128x64xf32>, vector<8x64xf32> -> vector<8x64xf32>
    %617 = arith.addf %611, %616 : vector<8x64xf32>
    %c0_639 = arith.constant 0 : index
    %c0_640 = arith.constant 0 : index
    %618 = vector.load %arg5[%c0_639, %c0_640] : memref<1x64xf32, #tpu.memory_space<vmem>>, vector<1x64xf32>
    %619 = vector.broadcast %618 : vector<1x64xf32> to vector<8x64xf32>
    %620 = arith.addf %617, %619 : vector<8x64xf32>
    %cst_641 = arith.constant 0.000000e+00 : f32
    %621 = vector.broadcast %cst_641 : f32 to vector<8x64xf32>
    %622 = arith.maximumf %620, %621 : vector<8x64xf32>
    %c4_642 = arith.constant 4 : index
    %c0_643 = arith.constant 0 : index
    %c0_644 = arith.constant 0 : index
    %623 = vector.load %arg6[%c4_642, %c0_643, %c0_644] : memref<9x64x64xf32, #tpu.memory_space<vmem>>, vector<1x64x64xf32>
    %624 = vector.shape_cast %623 : vector<1x64x64xf32> to vector<64x64xf32>
    %cst_645 = arith.constant dense<0.000000e+00> : vector<8x64xf32>
    %625 = tpu.matmul %622, %624, %cst_645 {dimension_numbers = #tpu.dot_dimension_numbers<[1], [0], [0], [1], [0, 0, 1, 1], [], []>} : vector<8x64xf32>, vector<64x64xf32>, vector<8x64xf32> -> vector<8x64xf32>
    %626 = arith.addf %592, %625 : vector<8x64xf32>
    %cst_646 = arith.constant 0.000000e+00 : f32
    %627 = vector.broadcast %cst_646 : f32 to vector<8x64xf32>
    %c2_647 = arith.constant 2 : index
    %c0_648 = arith.constant 0 : index
    %c128_649 = arith.constant 128 : index
    %628 = vector.load %arg13[%c2_647, %c0_648, %c128_649] : memref<8x8x256xf32, #tpu.memory_space<vmem>>, vector<1x8x128xf32>
    %629 = vector.shape_cast %628 : vector<1x8x128xf32> to vector<8x128xf32>
    %c0_650 = arith.constant 0 : index
    %c0_651 = arith.constant 0 : index
    %c0_652 = arith.constant 0 : index
    %630 = vector.load %arg4[%c0_650, %c0_651, %c0_652] : memref<4x128x64xf32, #tpu.memory_space<vmem>>, vector<1x128x64xf32>
    %631 = vector.shape_cast %630 : vector<1x128x64xf32> to vector<128x64xf32>
    %cst_653 = arith.constant dense<0.000000e+00> : vector<8x64xf32>
    %632 = tpu.matmul %629, %631, %cst_653 {dimension_numbers = #tpu.dot_dimension_numbers<[1], [0], [0], [1], [0, 0, 1, 1], [], []>} : vector<8x128xf32>, vector<128x64xf32>, vector<8x64xf32> -> vector<8x64xf32>
    %633 = arith.addf %627, %632 : vector<8x64xf32>
    %c3_654 = arith.constant 3 : index
    %c0_655 = arith.constant 0 : index
    %c128_656 = arith.constant 128 : index
    %634 = vector.load %arg13[%c3_654, %c0_655, %c128_656] : memref<8x8x256xf32, #tpu.memory_space<vmem>>, vector<1x8x128xf32>
    %635 = vector.shape_cast %634 : vector<1x8x128xf32> to vector<8x128xf32>
    %c1_657 = arith.constant 1 : index
    %c0_658 = arith.constant 0 : index
    %c0_659 = arith.constant 0 : index
    %636 = vector.load %arg4[%c1_657, %c0_658, %c0_659] : memref<4x128x64xf32, #tpu.memory_space<vmem>>, vector<1x128x64xf32>
    %637 = vector.shape_cast %636 : vector<1x128x64xf32> to vector<128x64xf32>
    %cst_660 = arith.constant dense<0.000000e+00> : vector<8x64xf32>
    %638 = tpu.matmul %635, %637, %cst_660 {dimension_numbers = #tpu.dot_dimension_numbers<[1], [0], [0], [1], [0, 0, 1, 1], [], []>} : vector<8x128xf32>, vector<128x64xf32>, vector<8x64xf32> -> vector<8x64xf32>
    %639 = arith.addf %633, %638 : vector<8x64xf32>
    %c4_661 = arith.constant 4 : index
    %c0_662 = arith.constant 0 : index
    %c128_663 = arith.constant 128 : index
    %640 = vector.load %arg13[%c4_661, %c0_662, %c128_663] : memref<8x8x256xf32, #tpu.memory_space<vmem>>, vector<1x8x128xf32>
    %641 = vector.shape_cast %640 : vector<1x8x128xf32> to vector<8x128xf32>
    %c2_664 = arith.constant 2 : index
    %c0_665 = arith.constant 0 : index
    %c0_666 = arith.constant 0 : index
    %642 = vector.load %arg4[%c2_664, %c0_665, %c0_666] : memref<4x128x64xf32, #tpu.memory_space<vmem>>, vector<1x128x64xf32>
    %643 = vector.shape_cast %642 : vector<1x128x64xf32> to vector<128x64xf32>
    %cst_667 = arith.constant dense<0.000000e+00> : vector<8x64xf32>
    %644 = tpu.matmul %641, %643, %cst_667 {dimension_numbers = #tpu.dot_dimension_numbers<[1], [0], [0], [1], [0, 0, 1, 1], [], []>} : vector<8x128xf32>, vector<128x64xf32>, vector<8x64xf32> -> vector<8x64xf32>
    %645 = arith.addf %639, %644 : vector<8x64xf32>
    %c5_668 = arith.constant 5 : index
    %c0_669 = arith.constant 0 : index
    %c128_670 = arith.constant 128 : index
    %646 = vector.load %arg13[%c5_668, %c0_669, %c128_670] : memref<8x8x256xf32, #tpu.memory_space<vmem>>, vector<1x8x128xf32>
    %647 = vector.shape_cast %646 : vector<1x8x128xf32> to vector<8x128xf32>
    %c3_671 = arith.constant 3 : index
    %c0_672 = arith.constant 0 : index
    %c0_673 = arith.constant 0 : index
    %648 = vector.load %arg4[%c3_671, %c0_672, %c0_673] : memref<4x128x64xf32, #tpu.memory_space<vmem>>, vector<1x128x64xf32>
    %649 = vector.shape_cast %648 : vector<1x128x64xf32> to vector<128x64xf32>
    %cst_674 = arith.constant dense<0.000000e+00> : vector<8x64xf32>
    %650 = tpu.matmul %647, %649, %cst_674 {dimension_numbers = #tpu.dot_dimension_numbers<[1], [0], [0], [1], [0, 0, 1, 1], [], []>} : vector<8x128xf32>, vector<128x64xf32>, vector<8x64xf32> -> vector<8x64xf32>
    %651 = arith.addf %645, %650 : vector<8x64xf32>
    %c0_675 = arith.constant 0 : index
    %c0_676 = arith.constant 0 : index
    %652 = vector.load %arg5[%c0_675, %c0_676] : memref<1x64xf32, #tpu.memory_space<vmem>>, vector<1x64xf32>
    %653 = vector.broadcast %652 : vector<1x64xf32> to vector<8x64xf32>
    %654 = arith.addf %651, %653 : vector<8x64xf32>
    %cst_677 = arith.constant 0.000000e+00 : f32
    %655 = vector.broadcast %cst_677 : f32 to vector<8x64xf32>
    %656 = arith.maximumf %654, %655 : vector<8x64xf32>
    %c5_678 = arith.constant 5 : index
    %c0_679 = arith.constant 0 : index
    %c0_680 = arith.constant 0 : index
    %657 = vector.load %arg6[%c5_678, %c0_679, %c0_680] : memref<9x64x64xf32, #tpu.memory_space<vmem>>, vector<1x64x64xf32>
    %658 = vector.shape_cast %657 : vector<1x64x64xf32> to vector<64x64xf32>
    %cst_681 = arith.constant dense<0.000000e+00> : vector<8x64xf32>
    %659 = tpu.matmul %656, %658, %cst_681 {dimension_numbers = #tpu.dot_dimension_numbers<[1], [0], [0], [1], [0, 0, 1, 1], [], []>} : vector<8x64xf32>, vector<64x64xf32>, vector<8x64xf32> -> vector<8x64xf32>
    %660 = arith.addf %626, %659 : vector<8x64xf32>
    %cst_682 = arith.constant 0.000000e+00 : f32
    %661 = vector.broadcast %cst_682 : f32 to vector<8x64xf32>
    %c4_683 = arith.constant 4 : index
    %c0_684 = arith.constant 0 : index
    %c0_685 = arith.constant 0 : index
    %662 = vector.load %arg13[%c4_683, %c0_684, %c0_685] : memref<8x8x256xf32, #tpu.memory_space<vmem>>, vector<1x8x128xf32>
    %663 = vector.shape_cast %662 : vector<1x8x128xf32> to vector<8x128xf32>
    %c0_686 = arith.constant 0 : index
    %c0_687 = arith.constant 0 : index
    %c0_688 = arith.constant 0 : index
    %664 = vector.load %arg4[%c0_686, %c0_687, %c0_688] : memref<4x128x64xf32, #tpu.memory_space<vmem>>, vector<1x128x64xf32>
    %665 = vector.shape_cast %664 : vector<1x128x64xf32> to vector<128x64xf32>
    %cst_689 = arith.constant dense<0.000000e+00> : vector<8x64xf32>
    %666 = tpu.matmul %663, %665, %cst_689 {dimension_numbers = #tpu.dot_dimension_numbers<[1], [0], [0], [1], [0, 0, 1, 1], [], []>} : vector<8x128xf32>, vector<128x64xf32>, vector<8x64xf32> -> vector<8x64xf32>
    %667 = arith.addf %661, %666 : vector<8x64xf32>
    %c5_690 = arith.constant 5 : index
    %c0_691 = arith.constant 0 : index
    %c0_692 = arith.constant 0 : index
    %668 = vector.load %arg13[%c5_690, %c0_691, %c0_692] : memref<8x8x256xf32, #tpu.memory_space<vmem>>, vector<1x8x128xf32>
    %669 = vector.shape_cast %668 : vector<1x8x128xf32> to vector<8x128xf32>
    %c1_693 = arith.constant 1 : index
    %c0_694 = arith.constant 0 : index
    %c0_695 = arith.constant 0 : index
    %670 = vector.load %arg4[%c1_693, %c0_694, %c0_695] : memref<4x128x64xf32, #tpu.memory_space<vmem>>, vector<1x128x64xf32>
    %671 = vector.shape_cast %670 : vector<1x128x64xf32> to vector<128x64xf32>
    %cst_696 = arith.constant dense<0.000000e+00> : vector<8x64xf32>
    %672 = tpu.matmul %669, %671, %cst_696 {dimension_numbers = #tpu.dot_dimension_numbers<[1], [0], [0], [1], [0, 0, 1, 1], [], []>} : vector<8x128xf32>, vector<128x64xf32>, vector<8x64xf32> -> vector<8x64xf32>
    %673 = arith.addf %667, %672 : vector<8x64xf32>
    %c6_697 = arith.constant 6 : index
    %c0_698 = arith.constant 0 : index
    %c0_699 = arith.constant 0 : index
    %674 = vector.load %arg13[%c6_697, %c0_698, %c0_699] : memref<8x8x256xf32, #tpu.memory_space<vmem>>, vector<1x8x128xf32>
    %675 = vector.shape_cast %674 : vector<1x8x128xf32> to vector<8x128xf32>
    %c2_700 = arith.constant 2 : index
    %c0_701 = arith.constant 0 : index
    %c0_702 = arith.constant 0 : index
    %676 = vector.load %arg4[%c2_700, %c0_701, %c0_702] : memref<4x128x64xf32, #tpu.memory_space<vmem>>, vector<1x128x64xf32>
    %677 = vector.shape_cast %676 : vector<1x128x64xf32> to vector<128x64xf32>
    %cst_703 = arith.constant dense<0.000000e+00> : vector<8x64xf32>
    %678 = tpu.matmul %675, %677, %cst_703 {dimension_numbers = #tpu.dot_dimension_numbers<[1], [0], [0], [1], [0, 0, 1, 1], [], []>} : vector<8x128xf32>, vector<128x64xf32>, vector<8x64xf32> -> vector<8x64xf32>
    %679 = arith.addf %673, %678 : vector<8x64xf32>
    %c7_704 = arith.constant 7 : index
    %c0_705 = arith.constant 0 : index
    %c0_706 = arith.constant 0 : index
    %680 = vector.load %arg13[%c7_704, %c0_705, %c0_706] : memref<8x8x256xf32, #tpu.memory_space<vmem>>, vector<1x8x128xf32>
    %681 = vector.shape_cast %680 : vector<1x8x128xf32> to vector<8x128xf32>
    %c3_707 = arith.constant 3 : index
    %c0_708 = arith.constant 0 : index
    %c0_709 = arith.constant 0 : index
    %682 = vector.load %arg4[%c3_707, %c0_708, %c0_709] : memref<4x128x64xf32, #tpu.memory_space<vmem>>, vector<1x128x64xf32>
    %683 = vector.shape_cast %682 : vector<1x128x64xf32> to vector<128x64xf32>
    %cst_710 = arith.constant dense<0.000000e+00> : vector<8x64xf32>
    %684 = tpu.matmul %681, %683, %cst_710 {dimension_numbers = #tpu.dot_dimension_numbers<[1], [0], [0], [1], [0, 0, 1, 1], [], []>} : vector<8x128xf32>, vector<128x64xf32>, vector<8x64xf32> -> vector<8x64xf32>
    %685 = arith.addf %679, %684 : vector<8x64xf32>
    %c0_711 = arith.constant 0 : index
    %c0_712 = arith.constant 0 : index
    %686 = vector.load %arg5[%c0_711, %c0_712] : memref<1x64xf32, #tpu.memory_space<vmem>>, vector<1x64xf32>
    %687 = vector.broadcast %686 : vector<1x64xf32> to vector<8x64xf32>
    %688 = arith.addf %685, %687 : vector<8x64xf32>
    %cst_713 = arith.constant 0.000000e+00 : f32
    %689 = vector.broadcast %cst_713 : f32 to vector<8x64xf32>
    %690 = arith.maximumf %688, %689 : vector<8x64xf32>
    %c6_714 = arith.constant 6 : index
    %c0_715 = arith.constant 0 : index
    %c0_716 = arith.constant 0 : index
    %691 = vector.load %arg6[%c6_714, %c0_715, %c0_716] : memref<9x64x64xf32, #tpu.memory_space<vmem>>, vector<1x64x64xf32>
    %692 = vector.shape_cast %691 : vector<1x64x64xf32> to vector<64x64xf32>
    %cst_717 = arith.constant dense<0.000000e+00> : vector<8x64xf32>
    %693 = tpu.matmul %690, %692, %cst_717 {dimension_numbers = #tpu.dot_dimension_numbers<[1], [0], [0], [1], [0, 0, 1, 1], [], []>} : vector<8x64xf32>, vector<64x64xf32>, vector<8x64xf32> -> vector<8x64xf32>
    %694 = arith.addf %660, %693 : vector<8x64xf32>
    %cst_718 = arith.constant 0.000000e+00 : f32
    %695 = vector.broadcast %cst_718 : f32 to vector<8x64xf32>
    %c4_719 = arith.constant 4 : index
    %c0_720 = arith.constant 0 : index
    %c64_721 = arith.constant 64 : index
    %696 = vector.load %arg13[%c4_719, %c0_720, %c64_721] : memref<8x8x256xf32, #tpu.memory_space<vmem>>, vector<1x8x128xf32>
    %697 = vector.shape_cast %696 : vector<1x8x128xf32> to vector<8x128xf32>
    %c0_722 = arith.constant 0 : index
    %c0_723 = arith.constant 0 : index
    %c0_724 = arith.constant 0 : index
    %698 = vector.load %arg4[%c0_722, %c0_723, %c0_724] : memref<4x128x64xf32, #tpu.memory_space<vmem>>, vector<1x128x64xf32>
    %699 = vector.shape_cast %698 : vector<1x128x64xf32> to vector<128x64xf32>
    %cst_725 = arith.constant dense<0.000000e+00> : vector<8x64xf32>
    %700 = tpu.matmul %697, %699, %cst_725 {dimension_numbers = #tpu.dot_dimension_numbers<[1], [0], [0], [1], [0, 0, 1, 1], [], []>} : vector<8x128xf32>, vector<128x64xf32>, vector<8x64xf32> -> vector<8x64xf32>
    %701 = arith.addf %695, %700 : vector<8x64xf32>
    %c5_726 = arith.constant 5 : index
    %c0_727 = arith.constant 0 : index
    %c64_728 = arith.constant 64 : index
    %702 = vector.load %arg13[%c5_726, %c0_727, %c64_728] : memref<8x8x256xf32, #tpu.memory_space<vmem>>, vector<1x8x128xf32>
    %703 = vector.shape_cast %702 : vector<1x8x128xf32> to vector<8x128xf32>
    %c1_729 = arith.constant 1 : index
    %c0_730 = arith.constant 0 : index
    %c0_731 = arith.constant 0 : index
    %704 = vector.load %arg4[%c1_729, %c0_730, %c0_731] : memref<4x128x64xf32, #tpu.memory_space<vmem>>, vector<1x128x64xf32>
    %705 = vector.shape_cast %704 : vector<1x128x64xf32> to vector<128x64xf32>
    %cst_732 = arith.constant dense<0.000000e+00> : vector<8x64xf32>
    %706 = tpu.matmul %703, %705, %cst_732 {dimension_numbers = #tpu.dot_dimension_numbers<[1], [0], [0], [1], [0, 0, 1, 1], [], []>} : vector<8x128xf32>, vector<128x64xf32>, vector<8x64xf32> -> vector<8x64xf32>
    %707 = arith.addf %701, %706 : vector<8x64xf32>
    %c6_733 = arith.constant 6 : index
    %c0_734 = arith.constant 0 : index
    %c64_735 = arith.constant 64 : index
    %708 = vector.load %arg13[%c6_733, %c0_734, %c64_735] : memref<8x8x256xf32, #tpu.memory_space<vmem>>, vector<1x8x128xf32>
    %709 = vector.shape_cast %708 : vector<1x8x128xf32> to vector<8x128xf32>
    %c2_736 = arith.constant 2 : index
    %c0_737 = arith.constant 0 : index
    %c0_738 = arith.constant 0 : index
    %710 = vector.load %arg4[%c2_736, %c0_737, %c0_738] : memref<4x128x64xf32, #tpu.memory_space<vmem>>, vector<1x128x64xf32>
    %711 = vector.shape_cast %710 : vector<1x128x64xf32> to vector<128x64xf32>
    %cst_739 = arith.constant dense<0.000000e+00> : vector<8x64xf32>
    %712 = tpu.matmul %709, %711, %cst_739 {dimension_numbers = #tpu.dot_dimension_numbers<[1], [0], [0], [1], [0, 0, 1, 1], [], []>} : vector<8x128xf32>, vector<128x64xf32>, vector<8x64xf32> -> vector<8x64xf32>
    %713 = arith.addf %707, %712 : vector<8x64xf32>
    %c7_740 = arith.constant 7 : index
    %c0_741 = arith.constant 0 : index
    %c64_742 = arith.constant 64 : index
    %714 = vector.load %arg13[%c7_740, %c0_741, %c64_742] : memref<8x8x256xf32, #tpu.memory_space<vmem>>, vector<1x8x128xf32>
    %715 = vector.shape_cast %714 : vector<1x8x128xf32> to vector<8x128xf32>
    %c3_743 = arith.constant 3 : index
    %c0_744 = arith.constant 0 : index
    %c0_745 = arith.constant 0 : index
    %716 = vector.load %arg4[%c3_743, %c0_744, %c0_745] : memref<4x128x64xf32, #tpu.memory_space<vmem>>, vector<1x128x64xf32>
    %717 = vector.shape_cast %716 : vector<1x128x64xf32> to vector<128x64xf32>
    %cst_746 = arith.constant dense<0.000000e+00> : vector<8x64xf32>
    %718 = tpu.matmul %715, %717, %cst_746 {dimension_numbers = #tpu.dot_dimension_numbers<[1], [0], [0], [1], [0, 0, 1, 1], [], []>} : vector<8x128xf32>, vector<128x64xf32>, vector<8x64xf32> -> vector<8x64xf32>
    %719 = arith.addf %713, %718 : vector<8x64xf32>
    %c0_747 = arith.constant 0 : index
    %c0_748 = arith.constant 0 : index
    %720 = vector.load %arg5[%c0_747, %c0_748] : memref<1x64xf32, #tpu.memory_space<vmem>>, vector<1x64xf32>
    %721 = vector.broadcast %720 : vector<1x64xf32> to vector<8x64xf32>
    %722 = arith.addf %719, %721 : vector<8x64xf32>
    %cst_749 = arith.constant 0.000000e+00 : f32
    %723 = vector.broadcast %cst_749 : f32 to vector<8x64xf32>
    %724 = arith.maximumf %722, %723 : vector<8x64xf32>
    %c7_750 = arith.constant 7 : index
    %c0_751 = arith.constant 0 : index
    %c0_752 = arith.constant 0 : index
    %725 = vector.load %arg6[%c7_750, %c0_751, %c0_752] : memref<9x64x64xf32, #tpu.memory_space<vmem>>, vector<1x64x64xf32>
    %726 = vector.shape_cast %725 : vector<1x64x64xf32> to vector<64x64xf32>
    %cst_753 = arith.constant dense<0.000000e+00> : vector<8x64xf32>
    %727 = tpu.matmul %724, %726, %cst_753 {dimension_numbers = #tpu.dot_dimension_numbers<[1], [0], [0], [1], [0, 0, 1, 1], [], []>} : vector<8x64xf32>, vector<64x64xf32>, vector<8x64xf32> -> vector<8x64xf32>
    %728 = arith.addf %694, %727 : vector<8x64xf32>
    %cst_754 = arith.constant 0.000000e+00 : f32
    %729 = vector.broadcast %cst_754 : f32 to vector<8x64xf32>
    %c4_755 = arith.constant 4 : index
    %c0_756 = arith.constant 0 : index
    %c128_757 = arith.constant 128 : index
    %730 = vector.load %arg13[%c4_755, %c0_756, %c128_757] : memref<8x8x256xf32, #tpu.memory_space<vmem>>, vector<1x8x128xf32>
    %731 = vector.shape_cast %730 : vector<1x8x128xf32> to vector<8x128xf32>
    %c0_758 = arith.constant 0 : index
    %c0_759 = arith.constant 0 : index
    %c0_760 = arith.constant 0 : index
    %732 = vector.load %arg4[%c0_758, %c0_759, %c0_760] : memref<4x128x64xf32, #tpu.memory_space<vmem>>, vector<1x128x64xf32>
    %733 = vector.shape_cast %732 : vector<1x128x64xf32> to vector<128x64xf32>
    %cst_761 = arith.constant dense<0.000000e+00> : vector<8x64xf32>
    %734 = tpu.matmul %731, %733, %cst_761 {dimension_numbers = #tpu.dot_dimension_numbers<[1], [0], [0], [1], [0, 0, 1, 1], [], []>} : vector<8x128xf32>, vector<128x64xf32>, vector<8x64xf32> -> vector<8x64xf32>
    %735 = arith.addf %729, %734 : vector<8x64xf32>
    %c5_762 = arith.constant 5 : index
    %c0_763 = arith.constant 0 : index
    %c128_764 = arith.constant 128 : index
    %736 = vector.load %arg13[%c5_762, %c0_763, %c128_764] : memref<8x8x256xf32, #tpu.memory_space<vmem>>, vector<1x8x128xf32>
    %737 = vector.shape_cast %736 : vector<1x8x128xf32> to vector<8x128xf32>
    %c1_765 = arith.constant 1 : index
    %c0_766 = arith.constant 0 : index
    %c0_767 = arith.constant 0 : index
    %738 = vector.load %arg4[%c1_765, %c0_766, %c0_767] : memref<4x128x64xf32, #tpu.memory_space<vmem>>, vector<1x128x64xf32>
    %739 = vector.shape_cast %738 : vector<1x128x64xf32> to vector<128x64xf32>
    %cst_768 = arith.constant dense<0.000000e+00> : vector<8x64xf32>
    %740 = tpu.matmul %737, %739, %cst_768 {dimension_numbers = #tpu.dot_dimension_numbers<[1], [0], [0], [1], [0, 0, 1, 1], [], []>} : vector<8x128xf32>, vector<128x64xf32>, vector<8x64xf32> -> vector<8x64xf32>
    %741 = arith.addf %735, %740 : vector<8x64xf32>
    %c6_769 = arith.constant 6 : index
    %c0_770 = arith.constant 0 : index
    %c128_771 = arith.constant 128 : index
    %742 = vector.load %arg13[%c6_769, %c0_770, %c128_771] : memref<8x8x256xf32, #tpu.memory_space<vmem>>, vector<1x8x128xf32>
    %743 = vector.shape_cast %742 : vector<1x8x128xf32> to vector<8x128xf32>
    %c2_772 = arith.constant 2 : index
    %c0_773 = arith.constant 0 : index
    %c0_774 = arith.constant 0 : index
    %744 = vector.load %arg4[%c2_772, %c0_773, %c0_774] : memref<4x128x64xf32, #tpu.memory_space<vmem>>, vector<1x128x64xf32>
    %745 = vector.shape_cast %744 : vector<1x128x64xf32> to vector<128x64xf32>
    %cst_775 = arith.constant dense<0.000000e+00> : vector<8x64xf32>
    %746 = tpu.matmul %743, %745, %cst_775 {dimension_numbers = #tpu.dot_dimension_numbers<[1], [0], [0], [1], [0, 0, 1, 1], [], []>} : vector<8x128xf32>, vector<128x64xf32>, vector<8x64xf32> -> vector<8x64xf32>
    %747 = arith.addf %741, %746 : vector<8x64xf32>
    %c7_776 = arith.constant 7 : index
    %c0_777 = arith.constant 0 : index
    %c128_778 = arith.constant 128 : index
    %748 = vector.load %arg13[%c7_776, %c0_777, %c128_778] : memref<8x8x256xf32, #tpu.memory_space<vmem>>, vector<1x8x128xf32>
    %749 = vector.shape_cast %748 : vector<1x8x128xf32> to vector<8x128xf32>
    %c3_779 = arith.constant 3 : index
    %c0_780 = arith.constant 0 : index
    %c0_781 = arith.constant 0 : index
    %750 = vector.load %arg4[%c3_779, %c0_780, %c0_781] : memref<4x128x64xf32, #tpu.memory_space<vmem>>, vector<1x128x64xf32>
    %751 = vector.shape_cast %750 : vector<1x128x64xf32> to vector<128x64xf32>
    %cst_782 = arith.constant dense<0.000000e+00> : vector<8x64xf32>
    %752 = tpu.matmul %749, %751, %cst_782 {dimension_numbers = #tpu.dot_dimension_numbers<[1], [0], [0], [1], [0, 0, 1, 1], [], []>} : vector<8x128xf32>, vector<128x64xf32>, vector<8x64xf32> -> vector<8x64xf32>
    %753 = arith.addf %747, %752 : vector<8x64xf32>
    %c0_783 = arith.constant 0 : index
    %c0_784 = arith.constant 0 : index
    %754 = vector.load %arg5[%c0_783, %c0_784] : memref<1x64xf32, #tpu.memory_space<vmem>>, vector<1x64xf32>
    %755 = vector.broadcast %754 : vector<1x64xf32> to vector<8x64xf32>
    %756 = arith.addf %753, %755 : vector<8x64xf32>
    %cst_785 = arith.constant 0.000000e+00 : f32
    %757 = vector.broadcast %cst_785 : f32 to vector<8x64xf32>
    %758 = arith.maximumf %756, %757 : vector<8x64xf32>
    %c8_786 = arith.constant 8 : index
    %c0_787 = arith.constant 0 : index
    %c0_788 = arith.constant 0 : index
    %759 = vector.load %arg6[%c8_786, %c0_787, %c0_788] : memref<9x64x64xf32, #tpu.memory_space<vmem>>, vector<1x64x64xf32>
    %760 = vector.shape_cast %759 : vector<1x64x64xf32> to vector<64x64xf32>
    %cst_789 = arith.constant dense<0.000000e+00> : vector<8x64xf32>
    %761 = tpu.matmul %758, %760, %cst_789 {dimension_numbers = #tpu.dot_dimension_numbers<[1], [0], [0], [1], [0, 0, 1, 1], [], []>} : vector<8x64xf32>, vector<64x64xf32>, vector<8x64xf32> -> vector<8x64xf32>
    %762 = arith.addf %728, %761 : vector<8x64xf32>
    %c0_790 = arith.constant 0 : index
    %c0_791 = arith.constant 0 : index
    %763 = vector.load %arg7[%c0_790, %c0_791] : memref<1x64xf32, #tpu.memory_space<vmem>>, vector<1x64xf32>
    %764 = vector.broadcast %763 : vector<1x64xf32> to vector<8x64xf32>
    %765 = arith.addf %762, %764 : vector<8x64xf32>
    %cst_792 = arith.constant 0.000000e+00 : f32
    %766 = vector.broadcast %cst_792 : f32 to vector<8x64xf32>
    %767 = arith.maximumf %765, %766 : vector<8x64xf32>
    %c0_793 = arith.constant 0 : index
    %c0_794 = arith.constant 0 : index
    %768 = vector.load %arg8[%c0_793, %c0_794] : memref<64x512xf32, #tpu.memory_space<vmem>>, vector<64x512xf32>
    %cst_795 = arith.constant dense<0.000000e+00> : vector<8x512xf32>
    %769 = tpu.matmul %767, %768, %cst_795 {dimension_numbers = #tpu.dot_dimension_numbers<[1], [0], [0], [1], [0, 0, 1, 1], [], []>} : vector<8x64xf32>, vector<64x512xf32>, vector<8x512xf32> -> vector<8x512xf32>
    %c0_796 = arith.constant 0 : index
    %c0_797 = arith.constant 0 : index
    %770 = vector.load %arg9[%c0_796, %c0_797] : memref<1x512xf32, #tpu.memory_space<vmem>>, vector<1x512xf32>
    %771 = vector.broadcast %770 : vector<1x512xf32> to vector<8x512xf32>
    %772 = arith.addf %769, %771 : vector<8x512xf32>
    %c0_798 = arith.constant 0 : index
    %c0_799 = arith.constant 0 : index
    %773 = vector.load %arg10[%c0_798, %c0_799] : memref<512x128xf32, #tpu.memory_space<vmem>>, vector<512x128xf32>
    %cst_800 = arith.constant dense<0.000000e+00> : vector<8x128xf32>
    %774 = tpu.matmul %772, %773, %cst_800 {dimension_numbers = #tpu.dot_dimension_numbers<[1], [0], [0], [1], [0, 0, 1, 1], [], []>} : vector<8x512xf32>, vector<512x128xf32>, vector<8x128xf32> -> vector<8x128xf32>
    %c0_801 = arith.constant 0 : index
    %c0_802 = arith.constant 0 : index
    %775 = vector.load %arg11[%c0_801, %c0_802] : memref<1x128xf32, #tpu.memory_space<vmem>>, vector<1x128xf32>
    %776 = vector.broadcast %775 : vector<1x128xf32> to vector<8x128xf32>
    %777 = arith.addf %774, %776 : vector<8x128xf32>
    %c0_803 = arith.constant 0 : index
    %c0_804 = arith.constant 0 : index
    %778 = vector.load %arg12[%c0_803, %c0_804] : memref<8x128xf32, #tpu.memory_space<vmem>>, vector<8x128xf32>
    tpu.vector_store %arg12[%c0_803, %c0_804], %777 {strides = array<i32>} : memref<8x128xf32, #tpu.memory_space<vmem>>, vector<8x128xf32>,
    return
  }
  func.func @transform_0(%arg0: i32) -> (i32, i32, i32) {
    %c0_i32 = arith.constant 0 : i32
    %c0_i32_0 = arith.constant 0 : i32
    %c0_i32_1 = arith.constant 0 : i32
    return %c0_i32, %arg0, %c0_i32_0 : i32, i32, i32
  }
  func.func @transform_1(%arg0: i32) -> (i32, i32, i32) {
    %c0_i32 = arith.constant 0 : i32
    %c0_i32_0 = arith.constant 0 : i32
    %c0_i32_1 = arith.constant 0 : i32
    %c0_i32_2 = arith.constant 0 : i32
    return %c0_i32, %c0_i32_0, %c0_i32_1 : i32, i32, i32
  }
  func.func @transform_2(%arg0: i32) -> (i32, i32) {
    %c0_i32 = arith.constant 0 : i32
    %c0_i32_0 = arith.constant 0 : i32
    %c0_i32_1 = arith.constant 0 : i32
    return %c0_i32, %c0_i32_0 : i32, i32
  }
  func.func @transform_3(%arg0: i32) -> (i32, i32, i32) {
    %c0_i32 = arith.constant 0 : i32
    %c0_i32_0 = arith.constant 0 : i32
    %c0_i32_1 = arith.constant 0 : i32
    %c0_i32_2 = arith.constant 0 : i32
    return %c0_i32, %c0_i32_0, %c0_i32_1 : i32, i32, i32
  }
  func.func @transform_4(%arg0: i32) -> (i32, i32) {
    %c0_i32 = arith.constant 0 : i32
    %c0_i32_0 = arith.constant 0 : i32
    %c0_i32_1 = arith.constant 0 : i32
    return %c0_i32, %c0_i32_0 : i32, i32
  }
  func.func @transform_5(%arg0: i32) -> (i32, i32, i32) {
    %c0_i32 = arith.constant 0 : i32
    %c0_i32_0 = arith.constant 0 : i32
    %c0_i32_1 = arith.constant 0 : i32
    %c0_i32_2 = arith.constant 0 : i32
    return %c0_i32, %c0_i32_0, %c0_i32_1 : i32, i32, i32
  }
  func.func @transform_6(%arg0: i32) -> (i32, i32) {
    %c0_i32 = arith.constant 0 : i32
    %c0_i32_0 = arith.constant 0 : i32
    %c0_i32_1 = arith.constant 0 : i32
    return %c0_i32, %c0_i32_0 : i32, i32
  }
  func.func @transform_7(%arg0: i32) -> (i32, i32) {
    %c0_i32 = arith.constant 0 : i32
    %c0_i32_0 = arith.constant 0 : i32
    %c0_i32_1 = arith.constant 0 : i32
    return %c0_i32, %c0_i32_0 : i32, i32
  }
  func.func @transform_8(%arg0: i32) -> (i32, i32) {
    %c0_i32 = arith.constant 0 : i32
    %c0_i32_0 = arith.constant 0 : i32
    %c0_i32_1 = arith.constant 0 : i32
    return %c0_i32, %c0_i32_0 : i32, i32
  }
  func.func @transform_9(%arg0: i32) -> (i32, i32) {
    %c0_i32 = arith.constant 0 : i32
    %c0_i32_0 = arith.constant 0 : i32
    %c0_i32_1 = arith.constant 0 : i32
    return %c0_i32, %c0_i32_0 : i32, i32
  }
  func.func @transform_10(%arg0: i32) -> (i32, i32) {
    %c0_i32 = arith.constant 0 : i32
    %c0_i32_0 = arith.constant 0 : i32
    %c0_i32_1 = arith.constant 0 : i32
    return %c0_i32, %c0_i32_0 : i32, i32
  }
  func.func @transform_11(%arg0: i32) -> (i32, i32) {
    %c0_i32 = arith.constant 0 : i32
    %c0_i32_0 = arith.constant 0 : i32
    return %arg0, %c0_i32 : i32, i32
  }
}

</mosaic_0001>

<bundles_post_ra>
// kernel: _lambda_.1
= control target key start
LH: loop header
LB: loop body
LE: loop exit
PB: predicated region body
PF: predicated region fallthrough
CT: control target
= control target key end

     0   :  { %vm116_vm0 = vcmask 130048   ;;  %s19438_s17 = smov 64   ;;  %vm19440_vm1 = vmmov 0   ;;  %vm7876_vm2 = vcmask 523264   ;;  %s25160_s1 = inlined_call_operand.vmem [shape: f32[8,144,256], index: 1, kind: input, shape index: {}]   ;;  %s25161_s0 = inlined_call_operand.vmem [shape: f32[36,8,144], index: 0, kind: input, shape index: {}]   ;;  %s25162_s2 = inlined_call_operand.vmem [shape: f32[1,256], index: 2, kind: input, shape index: {}]   ;;  %s25163_s3 = inlined_call_operand.vmem [shape: f32[4,128,64], index: 3, kind: input, shape index: {}]   ;;  %s25164_s5 = inlined_call_operand.vmem [shape: f32[9,64,64], index: 5, kind: input, shape index: {}]   ;;  %s25165_s4 = inlined_call_operand.vmem [shape: f32[1,64], index: 4, kind: input, shape index: {}, may-alias: {4,6}]   ;;  %s25166_s7 = inlined_call_operand.vmem [shape: f32[64,512], index: 7, kind: input, shape index: {}]   ;;  %s25167_s9 = inlined_call_operand.vmem [shape: f32[512,128], index: 9, kind: input, shape index: {}]   ;;  %s25168_s6 = inlined_call_operand.vmem [shape: f32[1,64], index: 6, kind: input, shape index: {}, may-alias: {4,6}]   ;;  %s25169_s8 = inlined_call_operand.vmem [shape: f32[1,512], index: 8, kind: input, shape index: {}]   ;;  %s25170_s10 = inlined_call_operand.vmem [shape: f32[1,128], index: 10, kind: input, shape index: {}]   ;;  %s25171_s11 = inlined_call_operand.vmem [shape: f32[8,128], index: 11, kind: output, shape index: {}]  }
   0x1   :  { %v11386_v0 = vld [vmem:[%s25160_s1 + $0x128] sm:$0xff]  ;;  %v11388_v1 = vld [vmem:[%s25160_s1 + $0x138] sm:$0xff]  ;;  %v11385_v2 = vld [vmem:[%s25160_s1 + $0x120] sm:$0xff] }
   0x2   :  { %v15909_v3 = vpack.c.bf16 %v11388_v1, %v11386_v0  ;;  %v11387_v4 = vld [vmem:[%s25160_s1 + $0x130] sm:$0xff]  ;;  %v11390_v5 = vld [vmem:[%s25160_s1 + $0x148] sm:$0xff]  ;;  %v11392_v6 = vld [vmem:[%s25160_s1 + $0x158] sm:$0xff] }
   0x3   :  { %v15911_v7 = vpack.c.bf16 %v11387_v4, %v11385_v2  ;;  %v15913_v8 = vpack.c.bf16 %v11392_v6, %v11390_v5  ;;  %v11389_v9 = vld [vmem:[%s25160_s1 + $0x140] sm:$0xff]  ;;  %v11391_v10 = vld [vmem:[%s25160_s1 + $0x150] sm:$0xff]  ;;  %v11394_v11 = vld [vmem:[%s25160_s1 + $0x168] sm:$0xff] }
   0x4   :  { %15910 = vmatprep.subr.bf16.mxu0 %v15909_v3  ;;  %16198 = vmatprep.subr.bf16.mxu1 %v15909_v3  ;;  %v11396_v12 = vld [vmem:[%s25160_s1 + $0x178] sm:$0xff]  ;;  %v15915_v13 = vpack.c.bf16 %v11391_v10, %v11389_v9  ;;  %v11393_v15 = vld [vmem:[%s25160_s1 + $0x160] sm:$0xff]  ;;  %v11395_v16 = vld [vmem:[%s25160_s1 + $0x170] sm:$0xff] }
   0x5   :  { %15912 = vmatpush1.bf16.msra.mxu0 %v15911_v7  ;;  %16200 = vmatpush1.bf16.msra.mxu1 %v15911_v7  ;;  %v15917_v14 = vpack.c.bf16 %v11396_v12, %v11394_v11  ;;  %v11398_v17 = vld [vmem:[%s25160_s1 + $0x188] sm:$0xff]  ;;  %v11400_v18 = vld [vmem:[%s25160_s1 + $0x198] sm:$0xff]  ;;  %v15919_v19 = vpack.c.bf16 %v11395_v16, %v11393_v15  ;;  %v11397_v21 = vld [vmem:[%s25160_s1 + $0x180] sm:$0xff] }
   0x6   :  { %15914 = vmatprep.subr.bf16.mxu0 %v15913_v8  ;;  %16202 = vmatprep.subr.bf16.mxu1 %v15913_v8  ;;  %v15921_v20 = vpack.c.bf16 %v11400_v18, %v11398_v17  ;;  %v11399_v22 = vld [vmem:[%s25160_s1 + $0x190] sm:$0xff]  ;;  %v11402_v23 = vld [vmem:[%s25160_s1 + $0x1a8] sm:$0xff]  ;;  %v11404_v24 = vld [vmem:[%s25160_s1 + $0x1b8] sm:$0xff] }
   0x7   :  { %v15923_v25 = vpack.c.bf16 %v11399_v22, %v11397_v21  ;;  %v11384_v26 = vld [vmem:[%s25161_s0 + $0x18] sm:$0xff]  ;;  %v15925_v27 = vpack.c.bf16 %v11404_v24, %v11402_v23  ;;  %v11401_v28 = vld [vmem:[%s25160_s1 + $0x1a0] sm:$0xff]  ;;  %v11403_v29 = vld [vmem:[%s25160_s1 + $0x1b0] sm:$0xff] }
   0x8   :  { %v11660_v30 = vld [vmem:[%s25161_s0 + $0x58] sm:$0xff]  ;;  %v11406_v31 = vld [vmem:[%s25160_s1 + $0x1c8] sm:$0xff]  ;;  %11421 = vmatprep.mubr.msk.f32.mxu0 %vm116_vm0, %v11384_v26  ;;  %v15927_v33 = vpack.c.bf16 %v11403_v29, %v11401_v28  ;;  %v11405_v35 = vld [vmem:[%s25160_s1 + $0x1c0] sm:$0xff] }
   0x9   :  { %15916 = vmatpush1.bf16.msra.mxu0 %v15915_v13  ;;  %16204 = vmatpush1.bf16.msra.mxu1 %v15915_v13  ;;  %v11408_v32 = vld [vmem:[%s25160_s1 + $0x1d8] sm:$0xff]  ;;  %v11407_v36 = vld [vmem:[%s25160_s1 + $0x1d0] sm:$0xff]  ;;  %v11410_v37 = vld [vmem:[%s25160_s1 + $0x1e8] sm:$0xff] }
   0xa   :  { %15918 = vmatprep.subr.bf16.mxu0 %v15917_v14  ;;  %16206 = vmatprep.subr.bf16.mxu1 %v15917_v14  ;;  %v15929_v34 = vpack.c.bf16 %v11408_v32, %v11406_v31  ;;  %v11412_v38 = vld [vmem:[%s25160_s1 + $0x1f8] sm:$0xff]  ;;  %v15931_v39 = vpack.c.bf16 %v11407_v36, %v11405_v35  ;;  %v11409_v41 = vld [vmem:[%s25160_s1 + $0x1e0] sm:$0xff]  ;;  %v11411_v42 = vld [vmem:[%s25160_s1 + $0x1f0] sm:$0xff] }
   0xb   :  { %11697 = vmatprep.mubr.msk.f32.mxu1 %vm116_vm0, %v11660_v30  ;;  %v15933_v40 = vpack.c.bf16 %v11412_v38, %v11410_v37  ;;  %v11414_v43 = vld [vmem:[%s25160_s1 + $0x208] sm:$0xff]  ;;  %v11416_v44 = vld [vmem:[%s25160_s1 + $0x218] sm:$0xff]  ;;  %v15935_v45 = vpack.c.bf16 %v11411_v42, %v11409_v41  ;;  %v11413_v47 = vld [vmem:[%s25160_s1 + $0x200] sm:$0xff] }
   0xc   :  { %v15937_v46 = vpack.c.bf16 %v11416_v44, %v11414_v43  ;;  %v11415_v48 = vld [vmem:[%s25160_s1 + $0x210] sm:$0xff]  ;;  %v11418_v49 = vld [vmem:[%s25160_s1 + $0x228] sm:$0xff]  ;;  %v11420_v50 = vld [vmem:[%s25160_s1 + $0x238] sm:$0xff] }
   0xd   :  { %15920 = vmatpush1.bf16.msra.mxu0 %v15919_v19  ;;  %16208 = vmatpush1.bf16.msra.mxu1 %v15919_v19  ;;  %v15939_v51 = vpack.c.bf16 %v11415_v48, %v11413_v47  ;;  %v15941_v52 = vpack.c.bf16 %v11420_v50, %v11418_v49  ;;  %v11417_v53 = vld [vmem:[%s25160_s1 + $0x220] sm:$0xff]  ;;  %v11419_v54 = vld [vmem:[%s25160_s1 + $0x230] sm:$0xff]  ;;  %v41_v55 = vld [vmem:[%s25160_s1 + $0x8] sm:$0xff] }
   0xe   :  { %15922 = vmatprep.subr.bf16.mxu0 %v15921_v20  ;;  %16210 = vmatprep.subr.bf16.mxu1 %v15921_v20  ;;  %v43_v56 = vld [vmem:[%s25160_s1 + $0x18] sm:$0xff]  ;;  %v15943_v57 = vpack.c.bf16 %v11419_v54, %v11417_v53  ;;  %v40_v59 = vld [vmem:[%s25160_s1] sm:$0xff]  ;;  %v42_v60 = vld [vmem:[%s25160_s1 + $0x10] sm:$0xff] }
   0xf   :  { %v15945_v58 = vpack.c.bf16 %v43_v56, %v41_v55  ;;  %v45_v61 = vld [vmem:[%s25160_s1 + $0x28] sm:$0xff]  ;;  %v47_v62 = vld [vmem:[%s25160_s1 + $0x38] sm:$0xff]  ;;  %v11383_v63 = vld [vmem:[%s25161_s0 + $0x10] sm:$0xff]  ;;  %v15947_v0 = vpack.c.bf16 %v42_v60, %v40_v59 }
  0x10   :  { %v11659_v1 = vld [vmem:[%s25161_s0 + $0x50] sm:$0xff]  ;;  %v15949_v2 = vpack.c.bf16 %v47_v62, %v45_v61  ;;  %v44_v3 = vld [vmem:[%s25160_s1 + $0x20] sm:$0xff]  ;;  %v49_v5 = vld [vmem:[%s25160_s1 + $0x48] sm:$0xff] }
  0x11   :  { %15924 = vmatpush1.bf16.msra.mxu0 %v15923_v25  ;;  %16212 = vmatpush1.bf16.msra.mxu1 %v15923_v25  ;;  %v46_v4 = vld [vmem:[%s25160_s1 + $0x30] sm:$0xff]  ;;  %v51_v6 = vld [vmem:[%s25160_s1 + $0x58] sm:$0xff]  ;;  %v39_v7 = vld [vmem:[%s25161_s0 + $0x8] sm:$0xff] }
  0x12   :  { %15926 = vmatprep.subr.bf16.mxu0 %v15925_v27  ;;  %16214 = vmatprep.subr.bf16.mxu1 %v15925_v27  ;;  %v19660_v8 = vld [vmem:[%s25161_s0 + $0x48] sm:$0xff]  ;;  %v15951_v9 = vpack.c.bf16 %v46_v4, %v44_v3  ;;  %v15953_v10 = vpack.c.bf16 %v51_v6, %v49_v5  ;;  %v48_v11 = vld [vmem:[%s25160_s1 + $0x40] sm:$0xff]  ;;  %v50_v12 = vld [vmem:[%s25160_s1 + $0x50] sm:$0xff] }
  0x13   :  { %v53_v13 = vld [vmem:[%s25160_s1 + $0x68] sm:$0xff]  ;;  %v55_v14 = vld [vmem:[%s25160_s1 + $0x78] sm:$0xff]  ;;  %v15955_v15 = vpack.c.bf16 %v50_v12, %v48_v11  ;;  %v52_v17 = vld [vmem:[%s25160_s1 + $0x60] sm:$0xff] }
  0x14   :  { %v15957_v16 = vpack.c.bf16 %v55_v14, %v53_v13  ;;  %v54_v18 = vld [vmem:[%s25160_s1 + $0x70] sm:$0xff]  ;;  %v57_v19 = vld [vmem:[%s25160_s1 + $0x88] sm:$0xff]  ;;  %v59_v20 = vld [vmem:[%s25160_s1 + $0x98] sm:$0xff] }
  0x15   :  { %15928 = vmatpush1.bf16.msra.mxu0 %v15927_v33  ;;  %16216 = vmatpush1.bf16.msra.mxu1 %v15927_v33  ;;  %v15959_v21 = vpack.c.bf16 %v54_v18, %v52_v17  ;;  %v15961_v22 = vpack.c.bf16 %v59_v20, %v57_v19  ;;  %v56_v23 = vld [vmem:[%s25160_s1 + $0x80] sm:$0xff]  ;;  %v58_v24 = vld [vmem:[%s25160_s1 + $0x90] sm:$0xff]  ;;  %v61_v25 = vld [vmem:[%s25160_s1 + $0xa8] sm:$0xff] }
  0x16   :  { %15930 = vmatprep.subr.bf16.mxu0 %v15929_v34  ;;  %16218 = vmatprep.subr.bf16.mxu1 %v15929_v34  ;;  %v63_v26 = vld [vmem:[%s25160_s1 + $0xb8] sm:$0xff]  ;;  %v15963_v27 = vpack.c.bf16 %v58_v24, %v56_v23  ;;  %v60_v29 = vld [vmem:[%s25160_s1 + $0xa0] sm:$0xff]  ;;  %v62_v30 = vld [vmem:[%s25160_s1 + $0xb0] sm:$0xff] }
  0x17   :  { %v15965_v28 = vpack.c.bf16 %v63_v26, %v61_v25  ;;  %v65_v31 = vld [vmem:[%s25160_s1 + $0xc8] sm:$0xff]  ;;  %v67_v32 = vld [vmem:[%s25160_s1 + $0xd8] sm:$0xff]  ;;  %v15967_v33 = vpack.c.bf16 %v62_v30, %v60_v29  ;;  %v64_v35 = vld [vmem:[%s25160_s1 + $0xc0] sm:$0xff] }
  0x18   :  { %v15969_v34 = vpack.c.bf16 %v67_v32, %v65_v31  ;;  %v66_v36 = vld [vmem:[%s25160_s1 + $0xd0] sm:$0xff]  ;;  %v69_v37 = vld [vmem:[%s25160_s1 + $0xe8] sm:$0xff]  ;;  %v71_v38 = vld [vmem:[%s25160_s1 + $0xf8] sm:$0xff] }
  0x19   :  { %15932 = vmatpush1.bf16.msra.mxu0 %v15931_v39  ;;  %16220 = vmatpush1.bf16.msra.mxu1 %v15931_v39  ;;  %v15971_v39 = vpack.c.bf16 %v66_v36, %v64_v35  ;;  %v68_v41 = vld [vmem:[%s25160_s1 + $0xe0] sm:$0xff]  ;;  %v70_v42 = vld [vmem:[%s25160_s1 + $0xf0] sm:$0xff]  ;;  %v73_v43 = vld [vmem:[%s25160_s1 + $0x108] sm:$0xff] }
  0x1a   :  { %15934 = vmatprep.subr.bf16.mxu0 %v15933_v40  ;;  %16222 = vmatprep.subr.bf16.mxu1 %v15933_v40  ;;  %v15973_v40 = vpack.c.bf16 %v71_v38, %v69_v37  ;;  %v75_v44 = vld [vmem:[%s25160_s1 + $0x118] sm:$0xff]  ;;  %v72_v47 = vld [vmem:[%s25160_s1 + $0x100] sm:$0xff]  ;;  %v74_v48 = vld [vmem:[%s25160_s1 + $0x110] sm:$0xff] }
  0x1b   :  { %v11426_v49 = vld [vmem:[%s25160_s1 + $0x248] sm:$0xff]  ;;  %v11428_v50 = vld [vmem:[%s25160_s1 + $0x258] sm:$0xff]  ;;  %v11425_v53 = vld [vmem:[%s25160_s1 + $0x240] sm:$0xff] }
  0x1c   :  { %v11427_v54 = vld [vmem:[%s25160_s1 + $0x250] sm:$0xff]  ;;  %v11430_v55 = vld [vmem:[%s25160_s1 + $0x268] sm:$0xff]  ;;  %v11432_v56 = vld [vmem:[%s25160_s1 + $0x278] sm:$0xff] }
  0x1d   :  { %15936 = vmatpush1.bf16.msra.mxu0 %v15935_v45  ;;  %16224 = vmatpush1.bf16.msra.mxu1 %v15935_v45  ;;  %v15975_v45 = vpack.c.bf16 %v70_v42, %v68_v41  ;;  %v19767_v59 = vld [vmem:[%s25161_s0 + $0x40] sm:$0xff]  ;;  %v15985_v60 = vpack.c.bf16 %v11432_v56, %v11430_v55  ;;  %v11431_v62 = vld [vmem:[%s25160_s1 + $0x270] sm:$0xff]  ;;  %v11442_v14 = vld [vmem:[%s25160_s1 + $0x2c8] sm:$0xff] }
  0x1e   :  { %15938 = vmatprep.subr.bf16.mxu0 %v15937_v46  ;;  %16226 = vmatprep.subr.bf16.mxu1 %v15937_v46  ;;  %v15977_v46 = vpack.c.bf16 %v75_v44, %v73_v43  ;;  %v11429_v61 = vld [vmem:[%s25160_s1 + $0x260] sm:$0xff]  ;;  %v11435_v6 = vld [vmem:[%s25160_s1 + $0x290] sm:$0xff]  ;;  %v11446_v20 = vld [vmem:[%s25160_s1 + $0x2e8] sm:$0xff] }
  0x1f   :  { %v15987_v3 = vpack.c.bf16 %v11431_v62, %v11429_v61  ;;  %v11433_v5 = vld [vmem:[%s25160_s1 + $0x280] sm:$0xff]  ;;  %v11439_v13 = vld [vmem:[%s25160_s1 + $0x2b0] sm:$0xff]  ;;  %v11450_v26 = vld [vmem:[%s25160_s1 + $0x308] sm:$0xff] }
  0x20   :  { %v11437_v12 = vld [vmem:[%s25160_s1 + $0x2a0] sm:$0xff]  ;;  %v11443_v19 = vld [vmem:[%s25160_s1 + $0x2d0] sm:$0xff]  ;;  %v11454_v32 = vld [vmem:[%s25160_s1 + $0x328] sm:$0xff] }
  0x21   :  { %15940 = vmatpush1.bf16.msra.mxu0 %v15939_v51  ;;  %16228 = vmatpush1.bf16.msra.mxu1 %v15939_v51  ;;  %v15979_v51 = vpack.c.bf16 %v74_v48, %v72_v47  ;;  %v11441_v18 = vld [vmem:[%s25160_s1 + $0x2c0] sm:$0xff]  ;;  %v11447_v25 = vld [vmem:[%s25160_s1 + $0x2f0] sm:$0xff]  ;;  %v11458_v38 = vld [vmem:[%s25160_s1 + $0x348] sm:$0xff] }
  0x22   :  { %15942 = vmatprep.subr.bf16.mxu0 %v15941_v52  ;;  %16230 = vmatprep.subr.bf16.mxu1 %v15941_v52  ;;  %v15981_v52 = vpack.c.bf16 %v11428_v50, %v11426_v49  ;;  %v11445_v24 = vld [vmem:[%s25160_s1 + $0x2e0] sm:$0xff]  ;;  %v11451_v31 = vld [vmem:[%s25160_s1 + $0x310] sm:$0xff]  ;;  %v11465_v44 = vld [vmem:[%s25160_s1 + $0x368] sm:$0xff] }
  0x23   :  { %v11449_v30 = vld [vmem:[%s25160_s1 + $0x300] sm:$0xff]  ;;  %v11455_v37 = vld [vmem:[%s25160_s1 + $0x330] sm:$0xff]  ;;  %v11469_v50 = vld [vmem:[%s25160_s1 + $0x388] sm:$0xff] }
  0x24   :  { %v11453_v36 = vld [vmem:[%s25160_s1 + $0x320] sm:$0xff]  ;;  %v11459_v43 = vld [vmem:[%s25160_s1 + $0x350] sm:$0xff]  ;;  %v11463_v61 = vld [vmem:[%s25161_s0 + $0x38] sm:$0xff] }
  0x25   :  { %15944 = vmatpush1.bf16.msra.mxu0 %v15943_v57  ;;  %16232 = vmatpush1.bf16.msra.mxu1 %v15943_v57  ;;  %v38_v57 = vld [vmem:[%s25161_s0] sm:$0xff]  ;;  %v11466_v49 = vld [vmem:[%s25160_s1 + $0x370] sm:$0xff]  ;;  %v11739_v62 = vld [vmem:[%s25161_s0 + $0x78] sm:$0xff] }
  0x26   :  { %15946 = vmatprep.subr.bf16.mxu0 %v15945_v58  ;;  %16234 = vmatprep.subr.bf16.mxu1 %v15945_v58  ;;  %v15983_v58 = vpack.c.bf16 %v11427_v54, %v11425_v53  ;;  %v11457_v42 = vld [vmem:[%s25160_s1 + $0x340] sm:$0xff] }
  0x27   :  { %v11464_v48 = vld [vmem:[%s25160_s1 + $0x360] sm:$0xff] }
  0x28   :  { %185 = vmatmul.mubr.f32.vlgmr.msra.gmra.mrb[0].mxu0 %v11383_v63  ;;  %1123 = vmatmul.mubr.f32.vlgmr.msra.gmra.mrb[0].mxu1 %v11659_v1  ;;  %v11434_v63 = vld [vmem:[%s25160_s1 + $0x288] sm:$0xff]  ;;  %v16019_v53 = vpack.c.bf16 %v11466_v49, %v11464_v48  ;;  %v11699_v54 = vld [vmem:[%s25161_s0 + $0x60] sm:$0xff]  ;;  %v11462_v48 = vld [vmem:[%s25161_s0 + $0x30] sm:$0xff] }
  0x29   :  { %15948 = vmatpush1.bf16.msra.mxu0 %v15947_v0  ;;  %16236 = vmatpush1.bf16.msra.mxu1 %v15947_v0  ;;  %v11436_v0 = vld [vmem:[%s25160_s1 + $0x298] sm:$0xff]  ;;  %v11424_v1 = vld [vmem:[%s25161_s0 + $0x28] sm:$0xff]  ;;  %v11468_v56 = vld [vmem:[%s25160_s1 + $0x380] sm:$0xff] }
  0x2a   :  { %15950 = vmatprep.subr.bf16.mxu0 %v15949_v2  ;;  %16238 = vmatprep.subr.bf16.mxu1 %v15949_v2  ;;  %v11700_v2 = vld [vmem:[%s25161_s0 + $0x68] sm:$0xff]  ;;  %v15989_v4 = vpack.c.bf16 %v11436_v0, %v11434_v63 }
  0x2b   :  { %11422 = vmatprep.mubr.msk.f32.mxu0 %vm116_vm0, %v39_v7  ;;  %11698 = vmatprep.mubr.msk.f32.mxu1 %vm116_vm0, %v19660_v8  ;;  %v11438_v7 = vld [vmem:[%s25160_s1 + $0x2a8] sm:$0xff] }
  0x2d   :  { %15952 = vmatpush1.bf16.msra.mxu0 %v15951_v9  ;;  %16240 = vmatpush1.bf16.msra.mxu1 %v15951_v9  ;;  %v11440_v9 = vld [vmem:[%s25160_s1 + $0x2b8] sm:$0xff] }
  0x2e   :  { %15954 = vmatprep.subr.bf16.mxu0 %v15953_v10  ;;  %16242 = vmatprep.subr.bf16.mxu1 %v15953_v10  ;;  %v15991_v10 = vpack.c.bf16 %v11435_v6, %v11433_v5  ;;  %v15993_v11 = vpack.c.bf16 %v11440_v9, %v11438_v7  ;;  %v11476_v7 = vld [vmem:[%s25160_s1 + $0x3c0] sm:$0xff]  ;;  %v11478_v9 = vld [vmem:[%s25160_s1 + $0x3d0] sm:$0xff] }
  0x31   :  { %15956 = vmatpush1.bf16.msra.mxu0 %v15955_v15  ;;  %16244 = vmatpush1.bf16.msra.mxu1 %v15955_v15  ;;  %v11444_v15 = vld [vmem:[%s25160_s1 + $0x2d8] sm:$0xff] }
  0x32   :  { %15958 = vmatprep.subr.bf16.mxu0 %v15957_v16  ;;  %16246 = vmatprep.subr.bf16.mxu1 %v15957_v16  ;;  %v15995_v16 = vpack.c.bf16 %v11439_v13, %v11437_v12  ;;  %v15997_v17 = vpack.c.bf16 %v11444_v15, %v11442_v14  ;;  %v16031_v12 = vpack.c.bf16 %v11478_v9, %v11476_v7  ;;  %v11480_v14 = vld [vmem:[%s25160_s1 + $0x3e0] sm:$0xff]  ;;  %v11482_v15 = vld [vmem:[%s25160_s1 + $0x3f0] sm:$0xff] }
  0x33   :  { %v11519_v7 = vld [vmem:[%s25160_s1 + $0x500] sm:$0xff]  ;;  %v11521_v9 = vld [vmem:[%s25160_s1 + $0x510] sm:$0xff] }
  0x35   :  { %15960 = vmatpush1.bf16.msra.mxu0 %v15959_v21  ;;  %16248 = vmatpush1.bf16.msra.mxu1 %v15959_v21  ;;  %v11448_v21 = vld [vmem:[%s25160_s1 + $0x2f8] sm:$0xff] }
  0x36   :  { %15962 = vmatprep.subr.bf16.mxu0 %v15961_v22  ;;  %16250 = vmatprep.subr.bf16.mxu1 %v15961_v22  ;;  %v15999_v22 = vpack.c.bf16 %v11443_v19, %v11441_v18  ;;  %v16001_v23 = vpack.c.bf16 %v11448_v21, %v11446_v20  ;;  %v16035_v18 = vpack.c.bf16 %v11482_v15, %v11480_v14  ;;  %v11484_v20 = vld [vmem:[%s25160_s1 + $0x400] sm:$0xff]  ;;  %v11486_v21 = vld [vmem:[%s25160_s1 + $0x410] sm:$0xff] }
  0x37   :  { %v11523_v14 = vld [vmem:[%s25160_s1 + $0x520] sm:$0xff]  ;;  %v11525_v15 = vld [vmem:[%s25160_s1 + $0x530] sm:$0xff] }
  0x39   :  { %15964 = vmatpush1.bf16.msra.mxu0 %v15963_v27  ;;  %16252 = vmatpush1.bf16.msra.mxu1 %v15963_v27  ;;  %v11452_v27 = vld [vmem:[%s25160_s1 + $0x318] sm:$0xff] }
  0x3a   :  { %15966 = vmatprep.subr.bf16.mxu0 %v15965_v28  ;;  %16254 = vmatprep.subr.bf16.mxu1 %v15965_v28  ;;  %v16003_v28 = vpack.c.bf16 %v11447_v25, %v11445_v24  ;;  %v16005_v29 = vpack.c.bf16 %v11452_v27, %v11450_v26  ;;  %v16039_v24 = vpack.c.bf16 %v11486_v21, %v11484_v20  ;;  %v11488_v26 = vld [vmem:[%s25160_s1 + $0x420] sm:$0xff]  ;;  %v11490_v27 = vld [vmem:[%s25160_s1 + $0x430] sm:$0xff] }
  0x3b   :  { %v11527_v20 = vld [vmem:[%s25160_s1 + $0x540] sm:$0xff]  ;;  %v11529_v21 = vld [vmem:[%s25160_s1 + $0x550] sm:$0xff] }
  0x3d   :  { %15968 = vmatpush1.bf16.msra.mxu0 %v15967_v33  ;;  %16256 = vmatpush1.bf16.msra.mxu1 %v15967_v33  ;;  %v11456_v33 = vld [vmem:[%s25160_s1 + $0x338] sm:$0xff] }
  0x3e   :  { %15970 = vmatprep.subr.bf16.mxu0 %v15969_v34  ;;  %16258 = vmatprep.subr.bf16.mxu1 %v15969_v34  ;;  %v16007_v34 = vpack.c.bf16 %v11451_v31, %v11449_v30  ;;  %v16009_v35 = vpack.c.bf16 %v11456_v33, %v11454_v32  ;;  %v16043_v30 = vpack.c.bf16 %v11490_v27, %v11488_v26  ;;  %v11492_v32 = vld [vmem:[%s25160_s1 + $0x440] sm:$0xff]  ;;  %v11494_v33 = vld [vmem:[%s25160_s1 + $0x450] sm:$0xff] }
  0x3f   :  { %v11531_v26 = vld [vmem:[%s25160_s1 + $0x560] sm:$0xff]  ;;  %v11533_v27 = vld [vmem:[%s25160_s1 + $0x570] sm:$0xff] }
  0x41   :  { %15972 = vmatpush1.bf16.msra.mxu0 %v15971_v39  ;;  %16260 = vmatpush1.bf16.msra.mxu1 %v15971_v39  ;;  %v11460_v39 = vld [vmem:[%s25160_s1 + $0x358] sm:$0xff] }
  0x42   :  { %15974 = vmatprep.subr.bf16.mxu0 %v15973_v40  ;;  %16262 = vmatprep.subr.bf16.mxu1 %v15973_v40  ;;  %v16011_v40 = vpack.c.bf16 %v11455_v37, %v11453_v36  ;;  %v16013_v41 = vpack.c.bf16 %v11460_v39, %v11458_v38  ;;  %v16047_v36 = vpack.c.bf16 %v11494_v33, %v11492_v32  ;;  %v11496_v38 = vld [vmem:[%s25160_s1 + $0x460] sm:$0xff]  ;;  %v11498_v39 = vld [vmem:[%s25160_s1 + $0x470] sm:$0xff] }
  0x43   :  { %v11535_v32 = vld [vmem:[%s25160_s1 + $0x580] sm:$0xff]  ;;  %v11537_v33 = vld [vmem:[%s25160_s1 + $0x590] sm:$0xff] }
  0x45   :  { %15976 = vmatpush1.bf16.msra.mxu0 %v15975_v45  ;;  %16264 = vmatpush1.bf16.msra.mxu1 %v15975_v45  ;;  %v11467_v45 = vld [vmem:[%s25160_s1 + $0x378] sm:$0xff] }
  0x46   :  { %15978 = vmatprep.subr.bf16.mxu0 %v15977_v46  ;;  %16266 = vmatprep.subr.bf16.mxu1 %v15977_v46  ;;  %v16015_v46 = vpack.c.bf16 %v11459_v43, %v11457_v42  ;;  %v16017_v47 = vpack.c.bf16 %v11467_v45, %v11465_v44  ;;  %v16051_v42 = vpack.c.bf16 %v11498_v39, %v11496_v38  ;;  %v11503_v44 = vld [vmem:[%s25160_s1 + $0x480] sm:$0xff]  ;;  %v11505_v45 = vld [vmem:[%s25160_s1 + $0x490] sm:$0xff] }
  0x47   :  { %v16055_v49 = vpack.c.bf16 %v11505_v45, %v11503_v44  ;;  %v11542_v38 = vld [vmem:[%s25160_s1 + $0x5a0] sm:$0xff]  ;;  %v11544_v39 = vld [vmem:[%s25160_s1 + $0x5b0] sm:$0xff] }
  0x48   :  { %v11546_v45 = vld [vmem:[%s25160_s1 + $0x5c0] sm:$0xff] }
  0x49   :  { %15980 = vmatpush1.bf16.msra.mxu0 %v15979_v51  ;;  %16268 = vmatpush1.bf16.msra.mxu1 %v15979_v51  ;;  %v11471_v51 = vld [vmem:[%s25160_s1 + $0x398] sm:$0xff] }
  0x4a   :  { %15982 = vmatprep.subr.bf16.mxu0 %v15981_v52  ;;  %16270 = vmatprep.subr.bf16.mxu1 %v15981_v52  ;;  %v11423_v52 = vld [vmem:[%s25161_s0 + $0x20] sm:$0xff]  ;;  %v16021_v55 = vpack.c.bf16 %v11471_v51, %v11469_v50  ;;  %v11738_v50 = vld [vmem:[%s25161_s0 + $0x70] sm:$0xff] }
  0x4c   :  { %259 = vmatmul.mubr.f32.vlgmr.msra.gmra.mrb[0].mxu0 %v38_v57  ;;  %1197 = vmatmul.mubr.f32.vlgmr.msra.gmra.mrb[0].mxu1 %v19767_v59  ;;  %v11470_v57 = vld [vmem:[%s25160_s1 + $0x390] sm:$0xff] }
  0x4d   :  { %15984 = vmatpush1.bf16.msra.mxu0 %v15983_v58  ;;  %16272 = vmatpush1.bf16.msra.mxu1 %v15983_v58  ;;  %v11473_v58 = vld [vmem:[%s25160_s1 + $0x3a8] sm:$0xff]  ;;  %v16023_v63 = vpack.c.bf16 %v11470_v57, %v11468_v56 }
  0x4e   :  { %15986 = vmatprep.subr.bf16.mxu0 %v15985_v60  ;;  %16274 = vmatprep.subr.bf16.mxu1 %v15985_v60  ;;  %v11475_v60 = vld [vmem:[%s25160_s1 + $0x3b8] sm:$0xff]  ;;  %v11778_v56 = vld [vmem:[%s25161_s0 + $0x88] sm:$0xff] }
  0x4f   :  { %11461 = vmatprep.mubr.msk.f32.mxu0 %vm116_vm0, %v11424_v1  ;;  %11737 = vmatprep.mubr.msk.f32.mxu1 %vm116_vm0, %v11700_v2  ;;  %v16025_v0 = vpack.c.bf16 %v11475_v60, %v11473_v58  ;;  %v11472_v1 = vld [vmem:[%s25160_s1 + $0x3a0] sm:$0xff]  ;;  %v11474_v2 = vld [vmem:[%s25160_s1 + $0x3b0] sm:$0xff] }
  0x50   :  { %v16027_v5 = vpack.c.bf16 %v11474_v2, %v11472_v1  ;;  %v11511_v60 = vld [vmem:[%s25160_s1 + $0x4c0] sm:$0xff] }
  0x51   :  { %15988 = vmatpush1.bf16.msra.mxu0 %v15987_v3  ;;  %16276 = vmatpush1.bf16.msra.mxu1 %v15987_v3  ;;  %v11477_v3 = vld [vmem:[%s25160_s1 + $0x3c8] sm:$0xff]  ;;  %v11515_v2 = vld [vmem:[%s25160_s1 + $0x4e0] sm:$0xff] }
  0x52   :  { %15990 = vmatprep.subr.bf16.mxu0 %v15989_v4  ;;  %16278 = vmatprep.subr.bf16.mxu1 %v15989_v4  ;;  %v11479_v4 = vld [vmem:[%s25160_s1 + $0x3d8] sm:$0xff] }
  0x53   :  { %v16029_v6 = vpack.c.bf16 %v11479_v4, %v11477_v3  ;;  %v11517_v3 = vld [vmem:[%s25160_s1 + $0x4f0] sm:$0xff]  ;;  %v11522_v4 = vld [vmem:[%s25160_s1 + $0x518] sm:$0xff] }
  0x55   :  { %15992 = vmatpush1.bf16.msra.mxu0 %v15991_v10  ;;  %16280 = vmatpush1.bf16.msra.mxu1 %v15991_v10  ;;  %v11481_v10 = vld [vmem:[%s25160_s1 + $0x3e8] sm:$0xff] }
  0x56   :  { %15994 = vmatprep.subr.bf16.mxu0 %v15993_v11  ;;  %16282 = vmatprep.subr.bf16.mxu1 %v15993_v11  ;;  %v11483_v11 = vld [vmem:[%s25160_s1 + $0x3f8] sm:$0xff] }
  0x57   :  { %v16033_v13 = vpack.c.bf16 %v11483_v11, %v11481_v10  ;;  %v11524_v10 = vld [vmem:[%s25160_s1 + $0x528] sm:$0xff]  ;;  %v11526_v11 = vld [vmem:[%s25160_s1 + $0x538] sm:$0xff] }
  0x59   :  { %15996 = vmatpush1.bf16.msra.mxu0 %v15995_v16  ;;  %16284 = vmatpush1.bf16.msra.mxu1 %v15995_v16  ;;  %v11485_v16 = vld [vmem:[%s25160_s1 + $0x408] sm:$0xff] }
  0x5a   :  { %15998 = vmatprep.subr.bf16.mxu0 %v15997_v17  ;;  %16286 = vmatprep.subr.bf16.mxu1 %v15997_v17  ;;  %v11487_v17 = vld [vmem:[%s25160_s1 + $0x418] sm:$0xff] }
  0x5b   :  { %v16037_v19 = vpack.c.bf16 %v11487_v17, %v11485_v16  ;;  %v11528_v16 = vld [vmem:[%s25160_s1 + $0x548] sm:$0xff]  ;;  %v11530_v17 = vld [vmem:[%s25160_s1 + $0x558] sm:$0xff] }
  0x5d   :  { %16000 = vmatpush1.bf16.msra.mxu0 %v15999_v22  ;;  %16288 = vmatpush1.bf16.msra.mxu1 %v15999_v22  ;;  %v11489_v22 = vld [vmem:[%s25160_s1 + $0x428] sm:$0xff] }
  0x5e   :  { %16002 = vmatprep.subr.bf16.mxu0 %v16001_v23  ;;  %16290 = vmatprep.subr.bf16.mxu1 %v16001_v23  ;;  %v11491_v23 = vld [vmem:[%s25160_s1 + $0x438] sm:$0xff] }
  0x5f   :  { %v16041_v25 = vpack.c.bf16 %v11491_v23, %v11489_v22  ;;  %v11532_v22 = vld [vmem:[%s25160_s1 + $0x568] sm:$0xff]  ;;  %v11534_v23 = vld [vmem:[%s25160_s1 + $0x578] sm:$0xff] }
  0x61   :  { %16004 = vmatpush1.bf16.msra.mxu0 %v16003_v28  ;;  %16292 = vmatpush1.bf16.msra.mxu1 %v16003_v28  ;;  %v11493_v28 = vld [vmem:[%s25160_s1 + $0x448] sm:$0xff] }
  0x62   :  { %16006 = vmatprep.subr.bf16.mxu0 %v16005_v29  ;;  %16294 = vmatprep.subr.bf16.mxu1 %v16005_v29  ;;  %v11495_v29 = vld [vmem:[%s25160_s1 + $0x458] sm:$0xff] }
  0x63   :  { %v16045_v31 = vpack.c.bf16 %v11495_v29, %v11493_v28  ;;  %v11536_v28 = vld [vmem:[%s25160_s1 + $0x588] sm:$0xff]  ;;  %v11538_v29 = vld [vmem:[%s25160_s1 + $0x598] sm:$0xff] }
  0x65   :  { %16008 = vmatpush1.bf16.msra.mxu0 %v16007_v34  ;;  %16296 = vmatpush1.bf16.msra.mxu1 %v16007_v34  ;;  %v11497_v34 = vld [vmem:[%s25160_s1 + $0x468] sm:$0xff] }
  0x66   :  { %16010 = vmatprep.subr.bf16.mxu0 %v16009_v35  ;;  %16298 = vmatprep.subr.bf16.mxu1 %v16009_v35  ;;  %v11499_v35 = vld [vmem:[%s25160_s1 + $0x478] sm:$0xff] }
  0x67   :  { %v16049_v37 = vpack.c.bf16 %v11499_v35, %v11497_v34  ;;  %v11543_v34 = vld [vmem:[%s25160_s1 + $0x5a8] sm:$0xff]  ;;  %v11545_v35 = vld [vmem:[%s25160_s1 + $0x5b8] sm:$0xff] }
  0x69   :  { %16012 = vmatpush1.bf16.msra.mxu0 %v16011_v40  ;;  %16300 = vmatpush1.bf16.msra.mxu1 %v16011_v40  ;;  %v11504_v40 = vld [vmem:[%s25160_s1 + $0x488] sm:$0xff] }
  0x6a   :  { %16014 = vmatprep.subr.bf16.mxu0 %v16013_v41  ;;  %16302 = vmatprep.subr.bf16.mxu1 %v16013_v41  ;;  %v11506_v41 = vld [vmem:[%s25160_s1 + $0x498] sm:$0xff] }
  0x6b   :  { %v16053_v43 = vpack.c.bf16 %v11506_v41, %v11504_v40  ;;  %v11547_v40 = vld [vmem:[%s25160_s1 + $0x5c8] sm:$0xff]  ;;  %v11549_v41 = vld [vmem:[%s25160_s1 + $0x5d8] sm:$0xff] }
  0x6c   :  { %v16093_v44 = vpack.c.bf16 %v11549_v41, %v11547_v40  ;;  %v11587_v40 = vld [vmem:[%s25160_s1 + $0x6f0] sm:$0xff]  ;;  %v11590_v41 = vld [vmem:[%s25160_s1 + $0x708] sm:$0xff] }
  0x6d   :  { %16016 = vmatpush1.bf16.msra.mxu0 %v16015_v46  ;;  %16304 = vmatpush1.bf16.msra.mxu1 %v16015_v46  ;;  %v11508_v46 = vld [vmem:[%s25160_s1 + $0x4a8] sm:$0xff] }
  0x6e   :  { %16018 = vmatprep.subr.bf16.mxu0 %v16017_v47  ;;  %16306 = vmatprep.subr.bf16.mxu1 %v16017_v47  ;;  %v11510_v47 = vld [vmem:[%s25160_s1 + $0x4b8] sm:$0xff] }
  0x6f   :  { %v16057_v51 = vpack.c.bf16 %v11510_v47, %v11508_v46  ;;  %v11548_v46 = vld [vmem:[%s25160_s1 + $0x5d0] sm:$0xff]  ;;  %v11551_v47 = vld [vmem:[%s25160_s1 + $0x5e8] sm:$0xff] }
  0x70   :  { %373 = vmatmul.mubr.f32.vlgmr.msra.gmra.mrb[0].mxu0 %v11423_v52  ;;  %1309 = vmatmul.mubr.f32.vlgmr.msra.gmra.mrb[0].mxu1 %v11699_v54  ;;  %v11507_v52 = vld [vmem:[%s25160_s1 + $0x4a0] sm:$0xff]  ;;  %v11512_v54 = vld [vmem:[%s25160_s1 + $0x4c8] sm:$0xff] }
  0x71   :  { %16020 = vmatpush1.bf16.msra.mxu0 %v16019_v53  ;;  %16308 = vmatpush1.bf16.msra.mxu1 %v16019_v53  ;;  %v11509_v53 = vld [vmem:[%s25160_s1 + $0x4b0] sm:$0xff] }
  0x72   :  { %16022 = vmatprep.subr.bf16.mxu0 %v16021_v55  ;;  %16310 = vmatprep.subr.bf16.mxu1 %v16021_v55  ;;  %v11514_v55 = vld [vmem:[%s25160_s1 + $0x4d8] sm:$0xff]  ;;  %v16059_v57 = vpack.c.bf16 %v11509_v53, %v11507_v52  ;;  %v11552_v53 = vld [vmem:[%s25160_s1 + $0x5f0] sm:$0xff] }
  0x73   :  { %11500 = vmatprep.mubr.msk.f32.mxu0 %vm116_vm0, %v11463_v61  ;;  %11776 = vmatprep.mubr.msk.f32.mxu1 %vm116_vm0, %v11739_v62  ;;  %v16061_v58 = vpack.c.bf16 %v11514_v55, %v11512_v54  ;;  %v11513_v61 = vld [vmem:[%s25160_s1 + $0x4d0] sm:$0xff]  ;;  %v11516_v62 = vld [vmem:[%s25160_s1 + $0x4e8] sm:$0xff]  ;;  %v11557_v55 = vld [vmem:[%s25160_s1 + $0x618] sm:$0xff] }
  0x74   :  { %v11555_v54 = vld [vmem:[%s25160_s1 + $0x608] sm:$0xff] }
  0x75   :  { %16024 = vmatpush1.bf16.msra.mxu0 %v16023_v63  ;;  %16312 = vmatpush1.bf16.msra.mxu1 %v16023_v63  ;;  %v11518_v63 = vld [vmem:[%s25160_s1 + $0x4f8] sm:$0xff] }
  0x76   :  { %16026 = vmatprep.subr.bf16.mxu0 %v16025_v0  ;;  %16314 = vmatprep.subr.bf16.mxu1 %v16025_v0  ;;  %v16063_v0 = vpack.c.bf16 %v11513_v61, %v11511_v60  ;;  %v16065_v1 = vpack.c.bf16 %v11518_v63, %v11516_v62  ;;  %v11556_v60 = vld [vmem:[%s25160_s1 + $0x610] sm:$0xff]  ;;  %v11559_v61 = vld [vmem:[%s25160_s1 + $0x628] sm:$0xff]  ;;  %v11561_v62 = vld [vmem:[%s25160_s1 + $0x638] sm:$0xff] }
  0x79   :  { %16028 = vmatpush1.bf16.msra.mxu0 %v16027_v5  ;;  %16316 = vmatpush1.bf16.msra.mxu1 %v16027_v5  ;;  %v16067_v5 = vpack.c.bf16 %v11517_v3, %v11515_v2  ;;  %v11560_v2 = vld [vmem:[%s25160_s1 + $0x630] sm:$0xff]  ;;  %v11563_v3 = vld [vmem:[%s25160_s1 + $0x648] sm:$0xff] }
  0x7a   :  { %16030 = vmatprep.subr.bf16.mxu0 %v16029_v6  ;;  %16318 = vmatprep.subr.bf16.mxu1 %v16029_v6 }
  0x7d   :  { %16032 = vmatpush1.bf16.msra.mxu0 %v16031_v12  ;;  %16320 = vmatpush1.bf16.msra.mxu1 %v16031_v12  ;;  %v16071_v12 = vpack.c.bf16 %v11521_v9, %v11519_v7  ;;  %v11564_v7 = vld [vmem:[%s25160_s1 + $0x650] sm:$0xff]  ;;  %v11567_v9 = vld [vmem:[%s25160_s1 + $0x668] sm:$0xff] }
  0x7e   :  { %16034 = vmatprep.subr.bf16.mxu0 %v16033_v13  ;;  %16322 = vmatprep.subr.bf16.mxu1 %v16033_v13  ;;  %v16073_v13 = vpack.c.bf16 %v11526_v11, %v11524_v10  ;;  %v11569_v10 = vld [vmem:[%s25160_s1 + $0x678] sm:$0xff] }
  0x81   :  { %16036 = vmatpush1.bf16.msra.mxu0 %v16035_v18  ;;  %16324 = vmatpush1.bf16.msra.mxu1 %v16035_v18  ;;  %v16075_v18 = vpack.c.bf16 %v11525_v15, %v11523_v14  ;;  %v11568_v14 = vld [vmem:[%s25160_s1 + $0x670] sm:$0xff]  ;;  %v11571_v15 = vld [vmem:[%s25160_s1 + $0x688] sm:$0xff] }
  0x82   :  { %16038 = vmatprep.subr.bf16.mxu0 %v16037_v19  ;;  %16326 = vmatprep.subr.bf16.mxu1 %v16037_v19  ;;  %v16077_v19 = vpack.c.bf16 %v11530_v17, %v11528_v16  ;;  %v11573_v16 = vld [vmem:[%s25160_s1 + $0x698] sm:$0xff] }
  0x85   :  { %16040 = vmatpush1.bf16.msra.mxu0 %v16039_v24  ;;  %16328 = vmatpush1.bf16.msra.mxu1 %v16039_v24  ;;  %v16079_v24 = vpack.c.bf16 %v11529_v21, %v11527_v20  ;;  %v11572_v20 = vld [vmem:[%s25160_s1 + $0x690] sm:$0xff]  ;;  %v11575_v21 = vld [vmem:[%s25160_s1 + $0x6a8] sm:$0xff] }
  0x86   :  { %16042 = vmatprep.subr.bf16.mxu0 %v16041_v25  ;;  %16330 = vmatprep.subr.bf16.mxu1 %v16041_v25  ;;  %v16081_v25 = vpack.c.bf16 %v11534_v23, %v11532_v22  ;;  %v11577_v22 = vld [vmem:[%s25160_s1 + $0x6b8] sm:$0xff] }
  0x89   :  { %16044 = vmatpush1.bf16.msra.mxu0 %v16043_v30  ;;  %16332 = vmatpush1.bf16.msra.mxu1 %v16043_v30  ;;  %v16083_v30 = vpack.c.bf16 %v11533_v27, %v11531_v26  ;;  %v11576_v26 = vld [vmem:[%s25160_s1 + $0x6b0] sm:$0xff]  ;;  %v11582_v27 = vld [vmem:[%s25160_s1 + $0x6c8] sm:$0xff] }
  0x8a   :  { %16046 = vmatprep.subr.bf16.mxu0 %v16045_v31  ;;  %16334 = vmatprep.subr.bf16.mxu1 %v16045_v31  ;;  %v16085_v31 = vpack.c.bf16 %v11538_v29, %v11536_v28  ;;  %v11584_v28 = vld [vmem:[%s25160_s1 + $0x6d8] sm:$0xff] }
  0x8d   :  { %16048 = vmatpush1.bf16.msra.mxu0 %v16047_v36  ;;  %16336 = vmatpush1.bf16.msra.mxu1 %v16047_v36  ;;  %v16087_v36 = vpack.c.bf16 %v11537_v33, %v11535_v32  ;;  %v11583_v32 = vld [vmem:[%s25160_s1 + $0x6d0] sm:$0xff]  ;;  %v11586_v33 = vld [vmem:[%s25160_s1 + $0x6e8] sm:$0xff] }
  0x8e   :  { %16050 = vmatprep.subr.bf16.mxu0 %v16049_v37  ;;  %16338 = vmatprep.subr.bf16.mxu1 %v16049_v37  ;;  %v16089_v37 = vpack.c.bf16 %v11545_v35, %v11543_v34  ;;  %v11588_v34 = vld [vmem:[%s25160_s1 + $0x6f8] sm:$0xff]  ;;  %v11540_v35 = vld [vmem:[%s25161_s0 + $0x50] sm:$0xff] }
  0x91   :  { %16052 = vmatpush1.bf16.msra.mxu0 %v16051_v42  ;;  %16340 = vmatpush1.bf16.msra.mxu1 %v16051_v42  ;;  %v16091_v42 = vpack.c.bf16 %v11544_v39, %v11542_v38  ;;  %v16129_v38 = vpack.c.bf16 %v11588_v34, %v11586_v33  ;;  %v11585_v39 = vld [vmem:[%s25160_s1 + $0x6e0] sm:$0xff] }
  0x92   :  { %16054 = vmatprep.subr.bf16.mxu0 %v16053_v43  ;;  %16342 = vmatprep.subr.bf16.mxu1 %v16053_v43  ;;  %v11777_v43 = vld [vmem:[%s25161_s0 + $0x80] sm:$0xff] }
  0x93   :  { %v11624_v34 = vld [vmem:[%s25160_s1 + $0x800] sm:$0xff] }
  0x94   :  { %489 = vmatmul.mubr.f32.vlgmr.msra.gmra.mrb[0].mxu0 %v11462_v48  ;;  %1423 = vmatmul.mubr.f32.vlgmr.msra.gmra.mrb[0].mxu1 %v11738_v50  ;;  %v11553_v48 = vld [vmem:[%s25160_s1 + $0x5f8] sm:$0xff] }
  0x95   :  { %16056 = vmatpush1.bf16.msra.mxu0 %v16055_v49  ;;  %16344 = vmatpush1.bf16.msra.mxu1 %v16055_v49  ;;  %v11541_v49 = vld [vmem:[%s25161_s0 + $0x58] sm:$0xff]  ;;  %v16097_v52 = vpack.c.bf16 %v11553_v48, %v11551_v47  ;;  %v11589_v47 = vld [vmem:[%s25160_s1 + $0x700] sm:$0xff]  ;;  %v11591_v48 = vld [vmem:[%s25160_s1 + $0x710] sm:$0xff] }
  0x96   :  { %16058 = vmatprep.subr.bf16.mxu0 %v16057_v51  ;;  %16346 = vmatprep.subr.bf16.mxu1 %v16057_v51  ;;  %v20150_v50 = vld [vmem:[%s25161_s0 + $0x98] sm:$0xff]  ;;  %v16095_v51 = vpack.c.bf16 %v11548_v46, %v11546_v45  ;;  %v16131_v45 = vpack.c.bf16 %v11587_v40, %v11585_v39 }
  0x97   :  { %11539 = vmatprep.mubr.msk.f32.mxu0 %vm116_vm0, %v19660_v8  ;;  %11815 = vmatprep.mubr.msk.f32.mxu1 %vm116_vm0, %v11778_v56  ;;  %v11520_v8 = vld [vmem:[%s25160_s1 + $0x508] sm:$0xff]  ;;  %v11619_v39 = vld [vmem:[%s25161_s0 + $0x78] sm:$0xff] }
  0x98   :  { %v16069_v6 = vpack.c.bf16 %v11522_v4, %v11520_v8  ;;  %v11565_v8 = vld [vmem:[%s25160_s1 + $0x658] sm:$0xff] }
  0x99   :  { %16060 = vmatpush1.bf16.msra.mxu0 %v16059_v57  ;;  %16348 = vmatpush1.bf16.msra.mxu1 %v16059_v57  ;;  %v16101_v57 = vpack.c.bf16 %v11557_v55, %v11555_v54  ;;  %v11595_v54 = vld [vmem:[%s25160_s1 + $0x730] sm:$0xff]  ;;  %v11598_v55 = vld [vmem:[%s25160_s1 + $0x748] sm:$0xff]  ;;  %v11895_v40 = vld [vmem:[%s25161_s0 + $0xb8] sm:$0xff] }
  0x9a   :  { %16062 = vmatprep.subr.bf16.mxu0 %v16061_v58  ;;  %16350 = vmatprep.subr.bf16.mxu1 %v16061_v58  ;;  %v11554_v58 = vld [vmem:[%s25160_s1 + $0x600] sm:$0xff] }
  0x9b   :  { %v16103_v63 = vpack.c.bf16 %v11556_v60, %v11554_v58  ;;  %v11597_v60 = vld [vmem:[%s25160_s1 + $0x740] sm:$0xff] }
  0x9d   :  { %16064 = vmatpush1.bf16.msra.mxu0 %v16063_v0  ;;  %16352 = vmatpush1.bf16.msra.mxu1 %v16063_v0  ;;  %v16105_v0 = vpack.c.bf16 %v11561_v62, %v11559_v61  ;;  %v11599_v61 = vld [vmem:[%s25160_s1 + $0x750] sm:$0xff]  ;;  %v11602_v62 = vld [vmem:[%s25160_s1 + $0x768] sm:$0xff] }
  0x9e   :  { %16066 = vmatprep.subr.bf16.mxu0 %v16065_v1  ;;  %16354 = vmatprep.subr.bf16.mxu1 %v16065_v1  ;;  %v11558_v1 = vld [vmem:[%s25160_s1 + $0x620] sm:$0xff] }
  0x9f   :  { %v16107_v4 = vpack.c.bf16 %v11560_v2, %v11558_v1  ;;  %v11601_v2 = vld [vmem:[%s25160_s1 + $0x760] sm:$0xff] }
  0xa1   :  { %16068 = vmatpush1.bf16.msra.mxu0 %v16067_v5  ;;  %16356 = vmatpush1.bf16.msra.mxu1 %v16067_v5  ;;  %v16109_v5 = vpack.c.bf16 %v11565_v8, %v11563_v3  ;;  %v11603_v3 = vld [vmem:[%s25160_s1 + $0x770] sm:$0xff]  ;;  %v11606_v8 = vld [vmem:[%s25160_s1 + $0x788] sm:$0xff] }
  0xa2   :  { %16070 = vmatprep.subr.bf16.mxu0 %v16069_v6  ;;  %16358 = vmatprep.subr.bf16.mxu1 %v16069_v6  ;;  %v11562_v6 = vld [vmem:[%s25160_s1 + $0x640] sm:$0xff] }
  0xa3   :  { %v16111_v11 = vpack.c.bf16 %v11564_v7, %v11562_v6  ;;  %v11605_v7 = vld [vmem:[%s25160_s1 + $0x780] sm:$0xff] }
  0xa5   :  { %16072 = vmatpush1.bf16.msra.mxu0 %v16071_v12  ;;  %16360 = vmatpush1.bf16.msra.mxu1 %v16071_v12  ;;  %v16113_v12 = vpack.c.bf16 %v11569_v10, %v11567_v9  ;;  %v11607_v9 = vld [vmem:[%s25160_s1 + $0x790] sm:$0xff]  ;;  %v11610_v10 = vld [vmem:[%s25160_s1 + $0x7a8] sm:$0xff] }
  0xa6   :  { %16074 = vmatprep.subr.bf16.mxu0 %v16073_v13  ;;  %16362 = vmatprep.subr.bf16.mxu1 %v16073_v13  ;;  %v11566_v13 = vld [vmem:[%s25160_s1 + $0x660] sm:$0xff] }
  0xa7   :  { %v16115_v17 = vpack.c.bf16 %v11568_v14, %v11566_v13  ;;  %v11609_v14 = vld [vmem:[%s25160_s1 + $0x7a0] sm:$0xff] }
  0xa9   :  { %16076 = vmatpush1.bf16.msra.mxu0 %v16075_v18  ;;  %16364 = vmatpush1.bf16.msra.mxu1 %v16075_v18  ;;  %v16117_v18 = vpack.c.bf16 %v11573_v16, %v11571_v15  ;;  %v11611_v15 = vld [vmem:[%s25160_s1 + $0x7b0] sm:$0xff]  ;;  %v11614_v16 = vld [vmem:[%s25160_s1 + $0x7c8] sm:$0xff] }
  0xaa   :  { %16078 = vmatprep.subr.bf16.mxu0 %v16077_v19  ;;  %16366 = vmatprep.subr.bf16.mxu1 %v16077_v19  ;;  %v11570_v19 = vld [vmem:[%s25160_s1 + $0x680] sm:$0xff] }
  0xab   :  { %v16119_v23 = vpack.c.bf16 %v11572_v20, %v11570_v19  ;;  %v11613_v20 = vld [vmem:[%s25160_s1 + $0x7c0] sm:$0xff] }
  0xad   :  { %16080 = vmatpush1.bf16.msra.mxu0 %v16079_v24  ;;  %16368 = vmatpush1.bf16.msra.mxu1 %v16079_v24  ;;  %v16121_v24 = vpack.c.bf16 %v11577_v22, %v11575_v21  ;;  %v11615_v21 = vld [vmem:[%s25160_s1 + $0x7d0] sm:$0xff]  ;;  %v11621_v22 = vld [vmem:[%s25160_s1 + $0x7e8] sm:$0xff] }
  0xae   :  { %16082 = vmatprep.subr.bf16.mxu0 %v16081_v25  ;;  %16370 = vmatprep.subr.bf16.mxu1 %v16081_v25  ;;  %v11574_v25 = vld [vmem:[%s25160_s1 + $0x6a0] sm:$0xff] }
  0xaf   :  { %v16123_v29 = vpack.c.bf16 %v11576_v26, %v11574_v25  ;;  %v11620_v26 = vld [vmem:[%s25160_s1 + $0x7e0] sm:$0xff] }
  0xb1   :  { %16084 = vmatpush1.bf16.msra.mxu0 %v16083_v30  ;;  %16372 = vmatpush1.bf16.msra.mxu1 %v16083_v30  ;;  %v16125_v30 = vpack.c.bf16 %v11584_v28, %v11582_v27  ;;  %v11622_v27 = vld [vmem:[%s25160_s1 + $0x7f0] sm:$0xff]  ;;  %v11625_v28 = vld [vmem:[%s25160_s1 + $0x808] sm:$0xff] }
  0xb2   :  { %16086 = vmatprep.subr.bf16.mxu0 %v16085_v31  ;;  %16374 = vmatprep.subr.bf16.mxu1 %v16085_v31  ;;  %v11581_v31 = vld [vmem:[%s25160_s1 + $0x6c0] sm:$0xff] }
  0xb5   :  { %16088 = vmatpush1.bf16.msra.mxu0 %v16087_v36  ;;  %16376 = vmatpush1.bf16.msra.mxu1 %v16087_v36  ;;  %v16127_v36 = vpack.c.bf16 %v11583_v32, %v11581_v31  ;;  %v16163_v31 = vpack.c.bf16 %v11622_v27, %v11620_v26  ;;  %v11855_v32 = vld [vmem:[%s25161_s0 + $0xa0] sm:$0xff]  ;;  %v11618_v26 = vld [vmem:[%s25161_s0 + $0x70] sm:$0xff] }
  0xb6   :  { %16090 = vmatprep.subr.bf16.mxu0 %v16089_v37  ;;  %16378 = vmatprep.subr.bf16.mxu1 %v16089_v37  ;;  %v20257_v37 = vld [vmem:[%s25161_s0 + $0x90] sm:$0xff] }
  0xb7   :  { %v11894_v27 = vld [vmem:[%s25161_s0 + $0xb0] sm:$0xff] }
  0xb8   :  { %605 = vmatmul.mubr.f32.vlgmr.msra.gmra.mrb[0].mxu0 %v19767_v59  ;;  %1538 = vmatmul.mubr.f32.vlgmr.msra.gmra.mrb[0].mxu1 %v11777_v43  ;;  %v11550_v59 = vld [vmem:[%s25160_s1 + $0x5e0] sm:$0xff]  ;;  %v11580_v43 = vld [vmem:[%s25161_s0 + $0x68] sm:$0xff] }
  0xb9   :  { %16092 = vmatpush1.bf16.msra.mxu0 %v16091_v42  ;;  %16380 = vmatpush1.bf16.msra.mxu1 %v16091_v42  ;;  %v16099_v56 = vpack.c.bf16 %v11552_v53, %v11550_v59  ;;  %v11592_v42 = vld [vmem:[%s25160_s1 + $0x718] sm:$0xff]  ;;  %v11593_v53 = vld [vmem:[%s25160_s1 + $0x720] sm:$0xff] }
  0xba   :  { %16094 = vmatprep.subr.bf16.mxu0 %v16093_v44  ;;  %16382 = vmatprep.subr.bf16.mxu1 %v16093_v44  ;;  %v11856_v44 = vld [vmem:[%s25161_s0 + $0xa8] sm:$0xff]  ;;  %v16133_v46 = vpack.c.bf16 %v11592_v42, %v11590_v41 }
  0xbb   :  { %11578 = vmatprep.mubr.msk.f32.mxu0 %vm116_vm0, %v11541_v49  ;;  %11854 = vmatprep.mubr.msk.f32.mxu1 %vm116_vm0, %v20150_v50  ;;  %v11594_v49 = vld [vmem:[%s25160_s1 + $0x728] sm:$0xff] }
  0xbd   :  { %16096 = vmatpush1.bf16.msra.mxu0 %v16095_v51  ;;  %16384 = vmatpush1.bf16.msra.mxu1 %v16095_v51  ;;  %v11596_v51 = vld [vmem:[%s25160_s1 + $0x738] sm:$0xff] }
  0xbe   :  { %16098 = vmatprep.subr.bf16.mxu0 %v16097_v52  ;;  %16386 = vmatprep.subr.bf16.mxu1 %v16097_v52  ;;  %v16135_v52 = vpack.c.bf16 %v11591_v48, %v11589_v47  ;;  %v16137_v59 = vpack.c.bf16 %v11596_v51, %v11594_v49  ;;  %v11632_v49 = vld [vmem:[%s25160_s1 + $0x840] sm:$0xff]  ;;  %v11634_v51 = vld [vmem:[%s25160_s1 + $0x850] sm:$0xff] }
  0xc1   :  { %16100 = vmatpush1.bf16.msra.mxu0 %v16099_v56  ;;  %16388 = vmatpush1.bf16.msra.mxu1 %v16099_v56  ;;  %v11600_v56 = vld [vmem:[%s25160_s1 + $0x758] sm:$0xff] }
  0xc2   :  { %16102 = vmatprep.subr.bf16.mxu0 %v16101_v57  ;;  %16390 = vmatprep.subr.bf16.mxu1 %v16101_v57  ;;  %v16139_v57 = vpack.c.bf16 %v11595_v54, %v11593_v53  ;;  %v16141_v58 = vpack.c.bf16 %v11600_v56, %v11598_v55  ;;  %v16175_v53 = vpack.c.bf16 %v11634_v51, %v11632_v49  ;;  %v11636_v55 = vld [vmem:[%s25160_s1 + $0x860] sm:$0xff]  ;;  %v11638_v56 = vld [vmem:[%s25160_s1 + $0x870] sm:$0xff] }
  0xc3   :  { %v11953_v49 = vld [vmem:[%s25160_s1 + $0x1a0] sm:$0xff]  ;;  %v11955_v51 = vld [vmem:[%s25160_s1 + $0x1b0] sm:$0xff] }
  0xc5   :  { %16104 = vmatpush1.bf16.msra.mxu0 %v16103_v63  ;;  %16392 = vmatpush1.bf16.msra.mxu1 %v16103_v63  ;;  %v11604_v63 = vld [vmem:[%s25160_s1 + $0x778] sm:$0xff] }
  0xc6   :  { %16106 = vmatprep.subr.bf16.mxu0 %v16105_v0  ;;  %16394 = vmatprep.subr.bf16.mxu1 %v16105_v0  ;;  %v16143_v0 = vpack.c.bf16 %v11599_v61, %v11597_v60  ;;  %v16145_v1 = vpack.c.bf16 %v11604_v63, %v11602_v62  ;;  %v16179_v60 = vpack.c.bf16 %v11638_v56, %v11636_v55  ;;  %v11640_v62 = vld [vmem:[%s25160_s1 + $0x880] sm:$0xff]  ;;  %v11642_v63 = vld [vmem:[%s25160_s1 + $0x890] sm:$0xff] }
  0xc7   :  { %v11957_v55 = vld [vmem:[%s25160_s1 + $0x1c0] sm:$0xff]  ;;  %v11959_v56 = vld [vmem:[%s25160_s1 + $0x1d0] sm:$0xff] }
  0xc9   :  { %16108 = vmatpush1.bf16.msra.mxu0 %v16107_v4  ;;  %16396 = vmatpush1.bf16.msra.mxu1 %v16107_v4  ;;  %v11608_v4 = vld [vmem:[%s25160_s1 + $0x798] sm:$0xff] }
  0xca   :  { %16110 = vmatprep.subr.bf16.mxu0 %v16109_v5  ;;  %16398 = vmatprep.subr.bf16.mxu1 %v16109_v5  ;;  %v16147_v5 = vpack.c.bf16 %v11603_v3, %v11601_v2  ;;  %v16149_v6 = vpack.c.bf16 %v11608_v4, %v11606_v8  ;;  %v16183_v2 = vpack.c.bf16 %v11642_v63, %v11640_v62  ;;  %v11644_v8 = vld [vmem:[%s25160_s1 + $0x8a0] sm:$0xff]  ;;  %v11646_v4 = vld [vmem:[%s25160_s1 + $0x8b0] sm:$0xff] }
  0xcb   :  { %v11961_v62 = vld [vmem:[%s25160_s1 + $0x1e0] sm:$0xff]  ;;  %v11963_v63 = vld [vmem:[%s25160_s1 + $0x1f0] sm:$0xff] }
  0xcd   :  { %16112 = vmatpush1.bf16.msra.mxu0 %v16111_v11  ;;  %16400 = vmatpush1.bf16.msra.mxu1 %v16111_v11  ;;  %v11612_v11 = vld [vmem:[%s25160_s1 + $0x7b8] sm:$0xff] }
  0xce   :  { %16114 = vmatprep.subr.bf16.mxu0 %v16113_v12  ;;  %16402 = vmatprep.subr.bf16.mxu1 %v16113_v12  ;;  %v16151_v12 = vpack.c.bf16 %v11607_v9, %v11605_v7  ;;  %v16153_v13 = vpack.c.bf16 %v11612_v11, %v11610_v10  ;;  %v16187_v7 = vpack.c.bf16 %v11646_v4, %v11644_v8  ;;  %v11648_v10 = vld [vmem:[%s25160_s1 + $0x8c0] sm:$0xff]  ;;  %v11650_v11 = vld [vmem:[%s25160_s1 + $0x8d0] sm:$0xff] }
  0xcf   :  { %v11965_v8 = vld [vmem:[%s25160_s1 + $0x200] sm:$0xff]  ;;  %v11967_v4 = vld [vmem:[%s25160_s1 + $0x210] sm:$0xff] }
  0xd1   :  { %16116 = vmatpush1.bf16.msra.mxu0 %v16115_v17  ;;  %16404 = vmatpush1.bf16.msra.mxu1 %v16115_v17  ;;  %v11616_v17 = vld [vmem:[%s25160_s1 + $0x7d8] sm:$0xff] }
  0xd2   :  { %16118 = vmatprep.subr.bf16.mxu0 %v16117_v18  ;;  %16406 = vmatprep.subr.bf16.mxu1 %v16117_v18  ;;  %v16155_v18 = vpack.c.bf16 %v11611_v15, %v11609_v14  ;;  %v16157_v19 = vpack.c.bf16 %v11616_v17, %v11614_v16  ;;  %v16191_v14 = vpack.c.bf16 %v11650_v11, %v11648_v10  ;;  %v11652_v16 = vld [vmem:[%s25160_s1 + $0x8e0] sm:$0xff]  ;;  %v11654_v17 = vld [vmem:[%s25160_s1 + $0x8f0] sm:$0xff] }
  0xd3   :  { %v11969_v10 = vld [vmem:[%s25160_s1 + $0x220] sm:$0xff]  ;;  %v11971_v11 = vld [vmem:[%s25160_s1 + $0x230] sm:$0xff] }
  0xd5   :  { %16120 = vmatpush1.bf16.msra.mxu0 %v16119_v23  ;;  %16408 = vmatpush1.bf16.msra.mxu1 %v16119_v23  ;;  %v11623_v23 = vld [vmem:[%s25160_s1 + $0x7f8] sm:$0xff] }
  0xd6   :  { %16122 = vmatprep.subr.bf16.mxu0 %v16121_v24  ;;  %16410 = vmatprep.subr.bf16.mxu1 %v16121_v24  ;;  %v16159_v24 = vpack.c.bf16 %v11615_v21, %v11613_v20  ;;  %v16161_v25 = vpack.c.bf16 %v11623_v23, %v11621_v22  ;;  %v16195_v20 = vpack.c.bf16 %v11654_v17, %v11652_v16  ;;  %v11937_v22 = vld [vmem:[%s25160_s1 + $0x120] sm:$0xff]  ;;  %v11939_v23 = vld [vmem:[%s25160_s1 + $0x130] sm:$0xff] }
  0xd7   :  { %v1912_v16 = vld [vmem:[%s25160_s1] sm:$0xff]  ;;  %v1914_v17 = vld [vmem:[%s25160_s1 + $0x10] sm:$0xff] }
  0xd9   :  { %16124 = vmatpush1.bf16.msra.mxu0 %v16123_v29  ;;  %16412 = vmatpush1.bf16.msra.mxu1 %v16123_v29  ;;  %v11627_v29 = vld [vmem:[%s25160_s1 + $0x818] sm:$0xff] }
  0xda   :  { %16126 = vmatprep.subr.bf16.mxu0 %v16125_v30  ;;  %16414 = vmatprep.subr.bf16.mxu1 %v16125_v30  ;;  %v11579_v30 = vld [vmem:[%s25161_s0 + $0x60] sm:$0xff]  ;;  %v16165_v33 = vpack.c.bf16 %v11627_v29, %v11625_v28  ;;  %v16487_v28 = vpack.c.bf16 %v11939_v23, %v11937_v22 }
  0xdb   :  { %v1916_v23 = vld [vmem:[%s25160_s1 + $0x20] sm:$0xff] }
  0xdc   :  { %721 = vmatmul.mubr.f32.vlgmr.msra.gmra.mrb[0].mxu0 %v11540_v35  ;;  %1653 = vmatmul.mubr.f32.vlgmr.msra.gmra.mrb[0].mxu1 %v20257_v37  ;;  %v11626_v35 = vld [vmem:[%s25160_s1 + $0x810] sm:$0xff] }
  0xdd   :  { %16128 = vmatpush1.bf16.msra.mxu0 %v16127_v36  ;;  %16416 = vmatpush1.bf16.msra.mxu1 %v16127_v36  ;;  %v11629_v36 = vld [vmem:[%s25160_s1 + $0x828] sm:$0xff]  ;;  %v16167_v41 = vpack.c.bf16 %v11626_v35, %v11624_v34  ;;  %v12212_v34 = vld [vmem:[%s25161_s0 + $0xd8] sm:$0xff] }
  0xde   :  { %16130 = vmatprep.subr.bf16.mxu0 %v16129_v38  ;;  %16418 = vmatprep.subr.bf16.mxu1 %v16129_v38  ;;  %v11631_v38 = vld [vmem:[%s25160_s1 + $0x838] sm:$0xff] }
  0xdf   :  { %11617 = vmatprep.mubr.msk.f32.mxu0 %vm116_vm0, %v11580_v43  ;;  %11893 = vmatprep.mubr.msk.f32.mxu1 %vm116_vm0, %v11856_v44  ;;  %v16169_v42 = vpack.c.bf16 %v11631_v38, %v11629_v36  ;;  %v11628_v43 = vld [vmem:[%s25160_s1 + $0x820] sm:$0xff]  ;;  %v11630_v44 = vld [vmem:[%s25160_s1 + $0x830] sm:$0xff] }
  0xe0   :  { %v16171_v47 = vpack.c.bf16 %v11630_v44, %v11628_v43  ;;  %v11945_v38 = vld [vmem:[%s25160_s1 + $0x160] sm:$0xff] }
  0xe1   :  { %16132 = vmatpush1.bf16.msra.mxu0 %v16131_v45  ;;  %16420 = vmatpush1.bf16.msra.mxu1 %v16131_v45  ;;  %v11633_v45 = vld [vmem:[%s25160_s1 + $0x848] sm:$0xff]  ;;  %v11949_v44 = vld [vmem:[%s25160_s1 + $0x180] sm:$0xff] }
  0xe2   :  { %16134 = vmatprep.subr.bf16.mxu0 %v16133_v46  ;;  %16422 = vmatprep.subr.bf16.mxu1 %v16133_v46  ;;  %v11635_v46 = vld [vmem:[%s25160_s1 + $0x858] sm:$0xff] }
  0xe3   :  { %v16173_v48 = vpack.c.bf16 %v11635_v46, %v11633_v45  ;;  %v11951_v45 = vld [vmem:[%s25160_s1 + $0x190] sm:$0xff]  ;;  %v11956_v46 = vld [vmem:[%s25160_s1 + $0x1b8] sm:$0xff] }
  0xe5   :  { %16136 = vmatpush1.bf16.msra.mxu0 %v16135_v52  ;;  %16424 = vmatpush1.bf16.msra.mxu1 %v16135_v52  ;;  %v11637_v52 = vld [vmem:[%s25160_s1 + $0x868] sm:$0xff] }
  0xe6   :  { %16138 = vmatprep.subr.bf16.mxu0 %v16137_v59  ;;  %16426 = vmatprep.subr.bf16.mxu1 %v16137_v59  ;;  %v11639_v59 = vld [vmem:[%s25160_s1 + $0x878] sm:$0xff] }
  0xe7   :  { %v16177_v54 = vpack.c.bf16 %v11639_v59, %v11637_v52  ;;  %v11958_v52 = vld [vmem:[%s25160_s1 + $0x1c8] sm:$0xff]  ;;  %v11960_v59 = vld [vmem:[%s25160_s1 + $0x1d8] sm:$0xff] }
  0xe9   :  { %16140 = vmatpush1.bf16.msra.mxu0 %v16139_v57  ;;  %16428 = vmatpush1.bf16.msra.mxu1 %v16139_v57  ;;  %v11641_v57 = vld [vmem:[%s25160_s1 + $0x888] sm:$0xff] }
  0xea   :  { %16142 = vmatprep.subr.bf16.mxu0 %v16141_v58  ;;  %16430 = vmatprep.subr.bf16.mxu1 %v16141_v58  ;;  %v11643_v58 = vld [vmem:[%s25160_s1 + $0x898] sm:$0xff] }
  0xeb   :  { %v16181_v61 = vpack.c.bf16 %v11643_v58, %v11641_v57  ;;  %v11962_v57 = vld [vmem:[%s25160_s1 + $0x1e8] sm:$0xff]  ;;  %v11964_v58 = vld [vmem:[%s25160_s1 + $0x1f8] sm:$0xff] }
  0xed   :  { %16144 = vmatpush1.bf16.msra.mxu0 %v16143_v0  ;;  %16432 = vmatpush1.bf16.msra.mxu1 %v16143_v0  ;;  %v11645_v0 = vld [vmem:[%s25160_s1 + $0x8a8] sm:$0xff] }
  0xee   :  { %16146 = vmatprep.subr.bf16.mxu0 %v16145_v1  ;;  %16434 = vmatprep.subr.bf16.mxu1 %v16145_v1  ;;  %v11647_v1 = vld [vmem:[%s25160_s1 + $0x8b8] sm:$0xff] }
  0xef   :  { %v16185_v3 = vpack.c.bf16 %v11647_v1, %v11645_v0  ;;  %v11966_v0 = vld [vmem:[%s25160_s1 + $0x208] sm:$0xff]  ;;  %v11968_v1 = vld [vmem:[%s25160_s1 + $0x218] sm:$0xff] }
  0xf1   :  { %16148 = vmatpush1.bf16.msra.mxu0 %v16147_v5  ;;  %16436 = vmatpush1.bf16.msra.mxu1 %v16147_v5  ;;  %v11649_v5 = vld [vmem:[%s25160_s1 + $0x8c8] sm:$0xff] }
  0xf2   :  { %16150 = vmatprep.subr.bf16.mxu0 %v16149_v6  ;;  %16438 = vmatprep.subr.bf16.mxu1 %v16149_v6  ;;  %v11651_v6 = vld [vmem:[%s25160_s1 + $0x8d8] sm:$0xff] }
  0xf3   :  { %v16189_v9 = vpack.c.bf16 %v11651_v6, %v11649_v5  ;;  %v11970_v5 = vld [vmem:[%s25160_s1 + $0x228] sm:$0xff]  ;;  %v11972_v6 = vld [vmem:[%s25160_s1 + $0x238] sm:$0xff] }
  0xf5   :  { %16152 = vmatpush1.bf16.msra.mxu0 %v16151_v12  ;;  %16440 = vmatpush1.bf16.msra.mxu1 %v16151_v12  ;;  %v11653_v12 = vld [vmem:[%s25160_s1 + $0x8e8] sm:$0xff] }
  0xf6   :  { %16154 = vmatprep.subr.bf16.mxu0 %v16153_v13  ;;  %16442 = vmatprep.subr.bf16.mxu1 %v16153_v13  ;;  %v11655_v13 = vld [vmem:[%s25160_s1 + $0x8f8] sm:$0xff] }
  0xf7   :  { %v16193_v15 = vpack.c.bf16 %v11655_v13, %v11653_v12  ;;  %v1913_v12 = vld [vmem:[%s25160_s1 + $0x8] sm:$0xff]  ;;  %v1915_v13 = vld [vmem:[%s25160_s1 + $0x18] sm:$0xff] }
  0xf9   :  { %16156 = vmatpush1.bf16.msra.mxu0 %v16155_v18  ;;  %16444 = vmatpush1.bf16.msra.mxu1 %v16155_v18  ;;  %v11938_v18 = vld [vmem:[%s25160_s1 + $0x128] sm:$0xff] }
  0xfa   :  { %16158 = vmatprep.subr.bf16.mxu0 %v16157_v19  ;;  %16446 = vmatprep.subr.bf16.mxu1 %v16157_v19  ;;  %v11940_v19 = vld [vmem:[%s25160_s1 + $0x138] sm:$0xff] }
  0xfb   :  { %v16485_v21 = vpack.c.bf16 %v11940_v19, %v11938_v18  ;;  %v1917_v18 = vld [vmem:[%s25160_s1 + $0x28] sm:$0xff]  ;;  %v1919_v19 = vld [vmem:[%s25160_s1 + $0x38] sm:$0xff] }
  0xfc   :  { %v16525_v22 = vpack.c.bf16 %v1919_v19, %v1917_v18  ;;  %v11983_v18 = vld [vmem:[%s25160_s1 + $0x270] sm:$0xff]  ;;  %v11986_v19 = vld [vmem:[%s25160_s1 + $0x288] sm:$0xff] }
  0xfd   :  { %16160 = vmatpush1.bf16.msra.mxu0 %v16159_v24  ;;  %16448 = vmatpush1.bf16.msra.mxu1 %v16159_v24  ;;  %v11942_v24 = vld [vmem:[%s25160_s1 + $0x148] sm:$0xff] }
  0xfe   :  { %16162 = vmatprep.subr.bf16.mxu0 %v16161_v25  ;;  %16450 = vmatprep.subr.bf16.mxu1 %v16161_v25  ;;  %v11944_v25 = vld [vmem:[%s25160_s1 + $0x158] sm:$0xff] }
  0xff   :  { %v16489_v29 = vpack.c.bf16 %v11944_v25, %v11942_v24  ;;  %v1918_v24 = vld [vmem:[%s25160_s1 + $0x30] sm:$0xff]  ;;  %v1921_v25 = vld [vmem:[%s25160_s1 + $0x48] sm:$0xff] }
 0x100   :  { %837 = vmatmul.mubr.f32.vlgmr.msra.gmra.mrb[0].mxu0 %v11579_v30  ;;  %1768 = vmatmul.mubr.f32.vlgmr.msra.gmra.mrb[0].mxu1 %v11855_v32  ;;  %v11941_v30 = vld [vmem:[%s25160_s1 + $0x140] sm:$0xff]  ;;  %v11946_v32 = vld [vmem:[%s25160_s1 + $0x168] sm:$0xff] }
 0x101   :  { %16164 = vmatpush1.bf16.msra.mxu0 %v16163_v31  ;;  %16452 = vmatpush1.bf16.msra.mxu1 %v16163_v31  ;;  %v11943_v31 = vld [vmem:[%s25160_s1 + $0x150] sm:$0xff] }
 0x102   :  { %16166 = vmatprep.subr.bf16.mxu0 %v16165_v33  ;;  %16454 = vmatprep.subr.bf16.mxu1 %v16165_v33  ;;  %v11948_v33 = vld [vmem:[%s25160_s1 + $0x178] sm:$0xff]  ;;  %v16491_v35 = vpack.c.bf16 %v11943_v31, %v11941_v30  ;;  %v1922_v31 = vld [vmem:[%s25160_s1 + $0x50] sm:$0xff] }
 0x103   :  { %11656 = vmatprep.mubr.msk.f32.mxu0 %vm116_vm0, %v11619_v39  ;;  %11932 = vmatprep.mubr.msk.f32.mxu1 %vm116_vm0, %v11895_v40  ;;  %v16493_v36 = vpack.c.bf16 %v11948_v33, %v11946_v32  ;;  %v11947_v39 = vld [vmem:[%s25160_s1 + $0x170] sm:$0xff]  ;;  %v11950_v40 = vld [vmem:[%s25160_s1 + $0x188] sm:$0xff]  ;;  %v1927_v33 = vld [vmem:[%s25160_s1 + $0x78] sm:$0xff] }
 0x104   :  { %v1925_v32 = vld [vmem:[%s25160_s1 + $0x68] sm:$0xff] }
 0x105   :  { %16168 = vmatpush1.bf16.msra.mxu0 %v16167_v41  ;;  %16456 = vmatpush1.bf16.msra.mxu1 %v16167_v41  ;;  %v11952_v41 = vld [vmem:[%s25160_s1 + $0x198] sm:$0xff] }
 0x106   :  { %16170 = vmatprep.subr.bf16.mxu0 %v16169_v42  ;;  %16458 = vmatprep.subr.bf16.mxu1 %v16169_v42  ;;  %v16495_v42 = vpack.c.bf16 %v11947_v39, %v11945_v38  ;;  %v16497_v43 = vpack.c.bf16 %v11952_v41, %v11950_v40  ;;  %v1926_v38 = vld [vmem:[%s25160_s1 + $0x70] sm:$0xff]  ;;  %v1929_v39 = vld [vmem:[%s25160_s1 + $0x88] sm:$0xff]  ;;  %v1931_v40 = vld [vmem:[%s25160_s1 + $0x98] sm:$0xff] }
 0x109   :  { %16172 = vmatpush1.bf16.msra.mxu0 %v16171_v47  ;;  %16460 = vmatpush1.bf16.msra.mxu1 %v16171_v47  ;;  %v16499_v47 = vpack.c.bf16 %v11951_v45, %v11949_v44  ;;  %v1930_v44 = vld [vmem:[%s25160_s1 + $0x90] sm:$0xff]  ;;  %v1933_v45 = vld [vmem:[%s25160_s1 + $0xa8] sm:$0xff] }
 0x10a   :  { %16174 = vmatprep.subr.bf16.mxu0 %v16173_v48  ;;  %16462 = vmatprep.subr.bf16.mxu1 %v16173_v48 }
 0x10d   :  { %16176 = vmatpush1.bf16.msra.mxu0 %v16175_v53  ;;  %16464 = vmatpush1.bf16.msra.mxu1 %v16175_v53  ;;  %v16503_v53 = vpack.c.bf16 %v11955_v51, %v11953_v49  ;;  %v1934_v49 = vld [vmem:[%s25160_s1 + $0xb0] sm:$0xff]  ;;  %v1937_v51 = vld [vmem:[%s25160_s1 + $0xc8] sm:$0xff] }
 0x10e   :  { %16178 = vmatprep.subr.bf16.mxu0 %v16177_v54  ;;  %16466 = vmatprep.subr.bf16.mxu1 %v16177_v54  ;;  %v16505_v54 = vpack.c.bf16 %v11960_v59, %v11958_v52  ;;  %v1939_v52 = vld [vmem:[%s25160_s1 + $0xd8] sm:$0xff] }
 0x111   :  { %16180 = vmatpush1.bf16.msra.mxu0 %v16179_v60  ;;  %16468 = vmatpush1.bf16.msra.mxu1 %v16179_v60  ;;  %v16507_v60 = vpack.c.bf16 %v11959_v56, %v11957_v55  ;;  %v1938_v55 = vld [vmem:[%s25160_s1 + $0xd0] sm:$0xff]  ;;  %v1941_v56 = vld [vmem:[%s25160_s1 + $0xe8] sm:$0xff] }
 0x112   :  { %16182 = vmatprep.subr.bf16.mxu0 %v16181_v61  ;;  %16470 = vmatprep.subr.bf16.mxu1 %v16181_v61  ;;  %v16509_v61 = vpack.c.bf16 %v11964_v58, %v11962_v57  ;;  %v1943_v57 = vld [vmem:[%s25160_s1 + $0xf8] sm:$0xff] }
 0x115   :  { %16184 = vmatpush1.bf16.msra.mxu0 %v16183_v2  ;;  %16472 = vmatpush1.bf16.msra.mxu1 %v16183_v2  ;;  %v16511_v2 = vpack.c.bf16 %v11963_v63, %v11961_v62  ;;  %v1942_v62 = vld [vmem:[%s25160_s1 + $0xf0] sm:$0xff]  ;;  %v1945_v63 = vld [vmem:[%s25160_s1 + $0x108] sm:$0xff] }
 0x116   :  { %16186 = vmatprep.subr.bf16.mxu0 %v16185_v3  ;;  %16474 = vmatprep.subr.bf16.mxu1 %v16185_v3  ;;  %v16513_v3 = vpack.c.bf16 %v11968_v1, %v11966_v0  ;;  %v1947_v0 = vld [vmem:[%s25160_s1 + $0x118] sm:$0xff] }
 0x119   :  { %16188 = vmatpush1.bf16.msra.mxu0 %v16187_v7  ;;  %16476 = vmatpush1.bf16.msra.mxu1 %v16187_v7  ;;  %v16515_v7 = vpack.c.bf16 %v11967_v4, %v11965_v8  ;;  %v1946_v8 = vld [vmem:[%s25160_s1 + $0x110] sm:$0xff]  ;;  %v11978_v4 = vld [vmem:[%s25160_s1 + $0x248] sm:$0xff] }
 0x11a   :  { %16190 = vmatprep.subr.bf16.mxu0 %v16189_v9  ;;  %16478 = vmatprep.subr.bf16.mxu1 %v16189_v9  ;;  %v16517_v9 = vpack.c.bf16 %v11972_v6, %v11970_v5  ;;  %v11980_v5 = vld [vmem:[%s25160_s1 + $0x258] sm:$0xff] }
 0x11d   :  { %16192 = vmatpush1.bf16.msra.mxu0 %v16191_v14  ;;  %16480 = vmatpush1.bf16.msra.mxu1 %v16191_v14  ;;  %v16519_v14 = vpack.c.bf16 %v11971_v11, %v11969_v10  ;;  %v11979_v10 = vld [vmem:[%s25160_s1 + $0x250] sm:$0xff]  ;;  %v11982_v11 = vld [vmem:[%s25160_s1 + $0x268] sm:$0xff] }
 0x11e   :  { %16194 = vmatprep.subr.bf16.mxu0 %v16193_v15  ;;  %16482 = vmatprep.subr.bf16.mxu1 %v16193_v15  ;;  %v16521_v15 = vpack.c.bf16 %v1915_v13, %v1913_v12  ;;  %v11984_v12 = vld [vmem:[%s25160_s1 + $0x278] sm:$0xff]  ;;  %v11933_v13 = vld [vmem:[%s25161_s0 + $0x80] sm:$0xff] }
 0x121   :  { %16196 = vmatpush1.bf16.msra.mxu0 %v16195_v20  ;;  %16484 = vmatpush1.bf16.msra.mxu1 %v16195_v20  ;;  %v16523_v20 = vpack.c.bf16 %v1914_v17, %v1912_v16  ;;  %v16561_v16 = vpack.c.bf16 %v11984_v12, %v11982_v11  ;;  %v11981_v17 = vld [vmem:[%s25160_s1 + $0x260] sm:$0xff] }
 0x122   :  { %16486 = vmatprep.subr.bf16.mxu0 %v16485_v21  ;;  %16774 = vmatprep.subr.bf16.mxu1 %v16485_v21  ;;  %v12211_v21 = vld [vmem:[%s25161_s0 + $0xd0] sm:$0xff]  ;;  %v12020_v12 = vld [vmem:[%s25160_s1 + $0x380] sm:$0xff] }
 0x124   :  { %953 = vmatmul.mubr.f32.vlgmr.msra.gmra.mrb[0].mxu0 %v11618_v26  ;;  %1883 = vmatmul.mubr.f32.vlgmr.msra.gmra.mrb[0].mxu1 %v11894_v27  ;;  %v1923_v26 = vld [vmem:[%s25160_s1 + $0x58] sm:$0xff]  ;;  %v11934_v27 = vld [vmem:[%s25161_s0 + $0x88] sm:$0xff] }
 0x125   :  { %16488 = vmatpush1.bf16.msra.mxu0 %v16487_v28  ;;  %16776 = vmatpush1.bf16.msra.mxu1 %v16487_v28  ;;  %v20640_v28 = vld [vmem:[%s25161_s0 + $0xc8] sm:$0xff]  ;;  %v16529_v30 = vpack.c.bf16 %v1923_v26, %v1921_v25  ;;  %v11985_v25 = vld [vmem:[%s25160_s1 + $0x280] sm:$0xff]  ;;  %v11987_v26 = vld [vmem:[%s25160_s1 + $0x290] sm:$0xff] }
 0x126   :  { %16490 = vmatprep.subr.bf16.mxu0 %v16489_v29  ;;  %16778 = vmatprep.subr.bf16.mxu1 %v16489_v29  ;;  %v16527_v29 = vpack.c.bf16 %v1918_v24, %v1916_v23  ;;  %v16563_v23 = vpack.c.bf16 %v11983_v18, %v11981_v17  ;;  %v12015_v17 = vld [vmem:[%s25161_s0 + $0xb8] sm:$0xff] }
 0x127   :  { %11973 = vmatprep.mubr.msk.f32.mxu0 %vm116_vm0, %v20150_v50  ;;  %12249 = vmatprep.mubr.msk.f32.mxu1 %vm116_vm0, %v12212_v34  ;;  %v11954_v50 = vld [vmem:[%s25160_s1 + $0x1a8] sm:$0xff]  ;;  %v12291_v18 = vld [vmem:[%s25161_s0 + $0xf8] sm:$0xff] }
 0x128   :  { %v16501_v48 = vpack.c.bf16 %v11956_v46, %v11954_v50  ;;  %v1935_v50 = vld [vmem:[%s25160_s1 + $0xb8] sm:$0xff] }
 0x129   :  { %16492 = vmatpush1.bf16.msra.mxu0 %v16491_v35  ;;  %16780 = vmatpush1.bf16.msra.mxu1 %v16491_v35  ;;  %v16533_v35 = vpack.c.bf16 %v1927_v33, %v1925_v32  ;;  %v11991_v32 = vld [vmem:[%s25160_s1 + $0x2b0] sm:$0xff]  ;;  %v11994_v33 = vld [vmem:[%s25160_s1 + $0x2c8] sm:$0xff] }
 0x12a   :  { %16494 = vmatprep.subr.bf16.mxu0 %v16493_v36  ;;  %16782 = vmatprep.subr.bf16.mxu1 %v16493_v36  ;;  %v1924_v36 = vld [vmem:[%s25160_s1 + $0x60] sm:$0xff] }
 0x12b   :  { %v16535_v41 = vpack.c.bf16 %v1926_v38, %v1924_v36  ;;  %v11993_v38 = vld [vmem:[%s25160_s1 + $0x2c0] sm:$0xff] }
 0x12d   :  { %16496 = vmatpush1.bf16.msra.mxu0 %v16495_v42  ;;  %16784 = vmatpush1.bf16.msra.mxu1 %v16495_v42  ;;  %v16537_v42 = vpack.c.bf16 %v1931_v40, %v1929_v39  ;;  %v11995_v39 = vld [vmem:[%s25160_s1 + $0x2d0] sm:$0xff]  ;;  %v11998_v40 = vld [vmem:[%s25160_s1 + $0x2e8] sm:$0xff] }
 0x12e   :  { %16498 = vmatprep.subr.bf16.mxu0 %v16497_v43  ;;  %16786 = vmatprep.subr.bf16.mxu1 %v16497_v43  ;;  %v1928_v43 = vld [vmem:[%s25160_s1 + $0x80] sm:$0xff] }
 0x12f   :  { %v16539_v46 = vpack.c.bf16 %v1930_v44, %v1928_v43  ;;  %v11997_v44 = vld [vmem:[%s25160_s1 + $0x2e0] sm:$0xff] }
 0x131   :  { %16500 = vmatpush1.bf16.msra.mxu0 %v16499_v47  ;;  %16788 = vmatpush1.bf16.msra.mxu1 %v16499_v47  ;;  %v16541_v47 = vpack.c.bf16 %v1935_v50, %v1933_v45  ;;  %v11999_v45 = vld [vmem:[%s25160_s1 + $0x2f0] sm:$0xff]  ;;  %v12002_v50 = vld [vmem:[%s25160_s1 + $0x308] sm:$0xff] }
 0x132   :  { %16502 = vmatprep.subr.bf16.mxu0 %v16501_v48  ;;  %16790 = vmatprep.subr.bf16.mxu1 %v16501_v48  ;;  %v1932_v48 = vld [vmem:[%s25160_s1 + $0xa0] sm:$0xff] }
 0x133   :  { %v16543_v59 = vpack.c.bf16 %v1934_v49, %v1932_v48  ;;  %v12001_v49 = vld [vmem:[%s25160_s1 + $0x300] sm:$0xff] }
 0x135   :  { %16504 = vmatpush1.bf16.msra.mxu0 %v16503_v53  ;;  %16792 = vmatpush1.bf16.msra.mxu1 %v16503_v53  ;;  %v16545_v53 = vpack.c.bf16 %v1939_v52, %v1937_v51  ;;  %v12003_v51 = vld [vmem:[%s25160_s1 + $0x310] sm:$0xff]  ;;  %v12006_v52 = vld [vmem:[%s25160_s1 + $0x328] sm:$0xff] }
 0x136   :  { %16506 = vmatprep.subr.bf16.mxu0 %v16505_v54  ;;  %16794 = vmatprep.subr.bf16.mxu1 %v16505_v54  ;;  %v1936_v54 = vld [vmem:[%s25160_s1 + $0xc0] sm:$0xff] }
 0x137   :  { %v16547_v58 = vpack.c.bf16 %v1938_v55, %v1936_v54  ;;  %v12005_v55 = vld [vmem:[%s25160_s1 + $0x320] sm:$0xff] }
 0x139   :  { %16508 = vmatpush1.bf16.msra.mxu0 %v16507_v60  ;;  %16796 = vmatpush1.bf16.msra.mxu1 %v16507_v60  ;;  %v16549_v60 = vpack.c.bf16 %v1943_v57, %v1941_v56  ;;  %v12007_v56 = vld [vmem:[%s25160_s1 + $0x330] sm:$0xff]  ;;  %v12010_v57 = vld [vmem:[%s25160_s1 + $0x348] sm:$0xff] }
 0x13a   :  { %16510 = vmatprep.subr.bf16.mxu0 %v16509_v61  ;;  %16798 = vmatprep.subr.bf16.mxu1 %v16509_v61  ;;  %v1940_v61 = vld [vmem:[%s25160_s1 + $0xe0] sm:$0xff] }
 0x13b   :  { %v16551_v1 = vpack.c.bf16 %v1942_v62, %v1940_v61  ;;  %v12009_v62 = vld [vmem:[%s25160_s1 + $0x340] sm:$0xff] }
 0x13d   :  { %16512 = vmatpush1.bf16.msra.mxu0 %v16511_v2  ;;  %16800 = vmatpush1.bf16.msra.mxu1 %v16511_v2  ;;  %v16553_v2 = vpack.c.bf16 %v1947_v0, %v1945_v63  ;;  %v12011_v63 = vld [vmem:[%s25160_s1 + $0x350] sm:$0xff]  ;;  %v12017_v0 = vld [vmem:[%s25160_s1 + $0x368] sm:$0xff] }
 0x13e   :  { %16514 = vmatprep.subr.bf16.mxu0 %v16513_v3  ;;  %16802 = vmatprep.subr.bf16.mxu1 %v16513_v3  ;;  %v1944_v3 = vld [vmem:[%s25160_s1 + $0x100] sm:$0xff] }
 0x13f   :  { %v16555_v6 = vpack.c.bf16 %v1946_v8, %v1944_v3  ;;  %v12016_v8 = vld [vmem:[%s25160_s1 + $0x360] sm:$0xff] }
 0x141   :  { %16516 = vmatpush1.bf16.msra.mxu0 %v16515_v7  ;;  %16804 = vmatpush1.bf16.msra.mxu1 %v16515_v7  ;;  %v16557_v7 = vpack.c.bf16 %v11980_v5, %v11978_v4  ;;  %v12018_v4 = vld [vmem:[%s25160_s1 + $0x370] sm:$0xff]  ;;  %v12021_v5 = vld [vmem:[%s25160_s1 + $0x388] sm:$0xff] }
 0x142   :  { %16518 = vmatprep.subr.bf16.mxu0 %v16517_v9  ;;  %16806 = vmatprep.subr.bf16.mxu1 %v16517_v9  ;;  %v11977_v9 = vld [vmem:[%s25160_s1 + $0x240] sm:$0xff] }
 0x145   :  { %16520 = vmatpush1.bf16.msra.mxu0 %v16519_v14  ;;  %16808 = vmatpush1.bf16.msra.mxu1 %v16519_v14  ;;  %v16559_v14 = vpack.c.bf16 %v11979_v10, %v11977_v9  ;;  %v16595_v9 = vpack.c.bf16 %v12018_v4, %v12016_v8  ;;  %v12251_v10 = vld [vmem:[%s25161_s0 + $0xe0] sm:$0xff]  ;;  %v12014_v8 = vld [vmem:[%s25161_s0 + $0xb0] sm:$0xff] }
 0x146   :  { %16522 = vmatprep.subr.bf16.mxu0 %v16521_v15  ;;  %16810 = vmatprep.subr.bf16.mxu1 %v16521_v15  ;;  %v20747_v15 = vld [vmem:[%s25161_s0 + $0xc0] sm:$0xff] }
 0x148   :  { %2054 = vmatmul.mubr.f32.vlgmr.msra.gmra.mrb[2].mxu0 %v20257_v37  ;;  %2985 = vmatmul.mubr.f32.vlgmr.msra.gmra.mrb[2].mxu1 %v12211_v21  ;;  %v1920_v37 = vld [vmem:[%s25160_s1 + $0x40] sm:$0xff]  ;;  %v11976_v21 = vld [vmem:[%s25161_s0 + $0xa8] sm:$0xff] }
 0x149   :  { %16524 = vmatpush1.bf16.msra.mxu0 %v16523_v20  ;;  %16812 = vmatpush1.bf16.msra.mxu1 %v16523_v20  ;;  %v16531_v34 = vpack.c.bf16 %v1922_v31, %v1920_v37  ;;  %v11988_v20 = vld [vmem:[%s25160_s1 + $0x298] sm:$0xff]  ;;  %v11989_v31 = vld [vmem:[%s25160_s1 + $0x2a0] sm:$0xff] }
 0x14a   :  { %16526 = vmatprep.subr.bf16.mxu0 %v16525_v22  ;;  %16814 = vmatprep.subr.bf16.mxu1 %v16525_v22  ;;  %v12252_v22 = vld [vmem:[%s25161_s0 + $0xe8] sm:$0xff]  ;;  %v16565_v24 = vpack.c.bf16 %v11988_v20, %v11986_v19 }
 0x14b   :  { %11974 = vmatprep.mubr.msk.f32.mxu0 %vm116_vm0, %v11934_v27  ;;  %12250 = vmatprep.mubr.msk.f32.mxu1 %vm116_vm0, %v20640_v28  ;;  %v11990_v27 = vld [vmem:[%s25160_s1 + $0x2a8] sm:$0xff] }
 0x14d   :  { %16528 = vmatpush1.bf16.msra.mxu0 %v16527_v29  ;;  %16816 = vmatpush1.bf16.msra.mxu1 %v16527_v29  ;;  %v11992_v29 = vld [vmem:[%s25160_s1 + $0x2b8] sm:$0xff] }
 0x14e   :  { %16530 = vmatprep.subr.bf16.mxu0 %v16529_v30  ;;  %16818 = vmatprep.subr.bf16.mxu1 %v16529_v30  ;;  %v16567_v30 = vpack.c.bf16 %v11987_v26, %v11985_v25  ;;  %v16569_v37 = vpack.c.bf16 %v11992_v29, %v11990_v27  ;;  %v12028_v27 = vld [vmem:[%s25160_s1 + $0x3c0] sm:$0xff]  ;;  %v12030_v29 = vld [vmem:[%s25160_s1 + $0x3d0] sm:$0xff] }
 0x151   :  { %16532 = vmatpush1.bf16.msra.mxu0 %v16531_v34  ;;  %16820 = vmatpush1.bf16.msra.mxu1 %v16531_v34  ;;  %v11996_v34 = vld [vmem:[%s25160_s1 + $0x2d8] sm:$0xff] }
 0x152   :  { %16534 = vmatprep.subr.bf16.mxu0 %v16533_v35  ;;  %16822 = vmatprep.subr.bf16.mxu1 %v16533_v35  ;;  %v16571_v35 = vpack.c.bf16 %v11991_v32, %v11989_v31  ;;  %v16573_v36 = vpack.c.bf16 %v11996_v34, %v11994_v33  ;;  %v16607_v31 = vpack.c.bf16 %v12030_v29, %v12028_v27  ;;  %v12032_v33 = vld [vmem:[%s25160_s1 + $0x3e0] sm:$0xff]  ;;  %v12034_v34 = vld [vmem:[%s25160_s1 + $0x3f0] sm:$0xff] }
 0x153   :  { %v12071_v27 = vld [vmem:[%s25160_s1 + $0x500] sm:$0xff]  ;;  %v12073_v29 = vld [vmem:[%s25160_s1 + $0x510] sm:$0xff] }
 0x155   :  { %16536 = vmatpush1.bf16.msra.mxu0 %v16535_v41  ;;  %16824 = vmatpush1.bf16.msra.mxu1 %v16535_v41  ;;  %v12000_v41 = vld [vmem:[%s25160_s1 + $0x2f8] sm:$0xff] }
 0x156   :  { %16538 = vmatprep.subr.bf16.mxu0 %v16537_v42  ;;  %16826 = vmatprep.subr.bf16.mxu1 %v16537_v42  ;;  %v16575_v42 = vpack.c.bf16 %v11995_v39, %v11993_v38  ;;  %v16577_v43 = vpack.c.bf16 %v12000_v41, %v11998_v40  ;;  %v16611_v38 = vpack.c.bf16 %v12034_v34, %v12032_v33  ;;  %v12036_v40 = vld [vmem:[%s25160_s1 + $0x400] sm:$0xff]  ;;  %v12038_v41 = vld [vmem:[%s25160_s1 + $0x410] sm:$0xff] }
 0x157   :  { %v12075_v33 = vld [vmem:[%s25160_s1 + $0x520] sm:$0xff]  ;;  %v12077_v34 = vld [vmem:[%s25160_s1 + $0x530] sm:$0xff] }
 0x159   :  { %16540 = vmatpush1.bf16.msra.mxu0 %v16539_v46  ;;  %16828 = vmatpush1.bf16.msra.mxu1 %v16539_v46  ;;  %v12004_v46 = vld [vmem:[%s25160_s1 + $0x318] sm:$0xff] }
 0x15a   :  { %16542 = vmatprep.subr.bf16.mxu0 %v16541_v47  ;;  %16830 = vmatprep.subr.bf16.mxu1 %v16541_v47  ;;  %v16579_v47 = vpack.c.bf16 %v11999_v45, %v11997_v44  ;;  %v16581_v48 = vpack.c.bf16 %v12004_v46, %v12002_v50  ;;  %v16615_v44 = vpack.c.bf16 %v12038_v41, %v12036_v40  ;;  %v12040_v50 = vld [vmem:[%s25160_s1 + $0x420] sm:$0xff]  ;;  %v12042_v46 = vld [vmem:[%s25160_s1 + $0x430] sm:$0xff] }
 0x15b   :  { %v12079_v40 = vld [vmem:[%s25160_s1 + $0x540] sm:$0xff]  ;;  %v12081_v41 = vld [vmem:[%s25160_s1 + $0x550] sm:$0xff] }
 0x15d   :  { %16544 = vmatpush1.bf16.msra.mxu0 %v16543_v59  ;;  %16832 = vmatpush1.bf16.msra.mxu1 %v16543_v59  ;;  %v12008_v59 = vld [vmem:[%s25160_s1 + $0x338] sm:$0xff] }
 0x15e   :  { %16546 = vmatprep.subr.bf16.mxu0 %v16545_v53  ;;  %16834 = vmatprep.subr.bf16.mxu1 %v16545_v53  ;;  %v16583_v53 = vpack.c.bf16 %v12003_v51, %v12001_v49  ;;  %v16585_v54 = vpack.c.bf16 %v12008_v59, %v12006_v52  ;;  %v16619_v49 = vpack.c.bf16 %v12042_v46, %v12040_v50  ;;  %v12044_v52 = vld [vmem:[%s25160_s1 + $0x440] sm:$0xff]  ;;  %v12046_v59 = vld [vmem:[%s25160_s1 + $0x450] sm:$0xff] }
 0x15f   :  { %v12083_v50 = vld [vmem:[%s25160_s1 + $0x560] sm:$0xff]  ;;  %v12085_v46 = vld [vmem:[%s25160_s1 + $0x570] sm:$0xff] }
 0x161   :  { %16548 = vmatpush1.bf16.msra.mxu0 %v16547_v58  ;;  %16836 = vmatpush1.bf16.msra.mxu1 %v16547_v58  ;;  %v12012_v58 = vld [vmem:[%s25160_s1 + $0x358] sm:$0xff] }
 0x162   :  { %16550 = vmatprep.subr.bf16.mxu0 %v16549_v60  ;;  %16838 = vmatprep.subr.bf16.mxu1 %v16549_v60  ;;  %v16587_v60 = vpack.c.bf16 %v12007_v56, %v12005_v55  ;;  %v16589_v61 = vpack.c.bf16 %v12012_v58, %v12010_v57  ;;  %v16623_v55 = vpack.c.bf16 %v12046_v59, %v12044_v52  ;;  %v12048_v57 = vld [vmem:[%s25160_s1 + $0x460] sm:$0xff]  ;;  %v12050_v58 = vld [vmem:[%s25160_s1 + $0x470] sm:$0xff] }
 0x163   :  { %v12087_v52 = vld [vmem:[%s25160_s1 + $0x580] sm:$0xff]  ;;  %v12089_v59 = vld [vmem:[%s25160_s1 + $0x590] sm:$0xff] }
 0x165   :  { %16552 = vmatpush1.bf16.msra.mxu0 %v16551_v1  ;;  %16840 = vmatpush1.bf16.msra.mxu1 %v16551_v1  ;;  %v12019_v1 = vld [vmem:[%s25160_s1 + $0x378] sm:$0xff] }
 0x166   :  { %16554 = vmatprep.subr.bf16.mxu0 %v16553_v2  ;;  %16842 = vmatprep.subr.bf16.mxu1 %v16553_v2  ;;  %v16591_v2 = vpack.c.bf16 %v12011_v63, %v12009_v62  ;;  %v16593_v3 = vpack.c.bf16 %v12019_v1, %v12017_v0  ;;  %v16627_v62 = vpack.c.bf16 %v12050_v58, %v12048_v57  ;;  %v12055_v0 = vld [vmem:[%s25160_s1 + $0x480] sm:$0xff]  ;;  %v12057_v1 = vld [vmem:[%s25160_s1 + $0x490] sm:$0xff] }
 0x167   :  { %v16631_v4 = vpack.c.bf16 %v12057_v1, %v12055_v0  ;;  %v12094_v57 = vld [vmem:[%s25160_s1 + $0x5a0] sm:$0xff]  ;;  %v12096_v58 = vld [vmem:[%s25160_s1 + $0x5b0] sm:$0xff] }
 0x168   :  { %v12098_v1 = vld [vmem:[%s25160_s1 + $0x5c0] sm:$0xff] }
 0x169   :  { %16556 = vmatpush1.bf16.msra.mxu0 %v16555_v6  ;;  %16844 = vmatpush1.bf16.msra.mxu1 %v16555_v6  ;;  %v12023_v6 = vld [vmem:[%s25160_s1 + $0x398] sm:$0xff] }
 0x16a   :  { %16558 = vmatprep.subr.bf16.mxu0 %v16557_v7  ;;  %16846 = vmatprep.subr.bf16.mxu1 %v16557_v7  ;;  %v11975_v7 = vld [vmem:[%s25161_s0 + $0xa0] sm:$0xff]  ;;  %v16597_v11 = vpack.c.bf16 %v12023_v6, %v12021_v5  ;;  %v12290_v5 = vld [vmem:[%s25161_s0 + $0xf0] sm:$0xff] }
 0x16c   :  { %2128 = vmatmul.mubr.f32.vlgmr.msra.gmra.mrb[2].mxu0 %v11933_v13  ;;  %3059 = vmatmul.mubr.f32.vlgmr.msra.gmra.mrb[2].mxu1 %v20747_v15  ;;  %v12022_v13 = vld [vmem:[%s25160_s1 + $0x390] sm:$0xff] }
 0x16d   :  { %16560 = vmatpush1.bf16.msra.mxu0 %v16559_v14  ;;  %16848 = vmatpush1.bf16.msra.mxu1 %v16559_v14  ;;  %v12025_v14 = vld [vmem:[%s25160_s1 + $0x3a8] sm:$0xff]  ;;  %v16599_v19 = vpack.c.bf16 %v12022_v13, %v12020_v12 }
 0x16e   :  { %16562 = vmatprep.subr.bf16.mxu0 %v16561_v16  ;;  %16850 = vmatprep.subr.bf16.mxu1 %v16561_v16  ;;  %v12027_v16 = vld [vmem:[%s25160_s1 + $0x3b8] sm:$0xff]  ;;  %v12330_v12 = vld [vmem:[%s25161_s0 + $0x108] sm:$0xff] }
 0x16f   :  { %12013 = vmatprep.mubr.msk.f32.mxu0 %vm116_vm0, %v11976_v21  ;;  %12289 = vmatprep.mubr.msk.f32.mxu1 %vm116_vm0, %v12252_v22  ;;  %v16601_v20 = vpack.c.bf16 %v12027_v16, %v12025_v14  ;;  %v12024_v21 = vld [vmem:[%s25160_s1 + $0x3a0] sm:$0xff]  ;;  %v12026_v22 = vld [vmem:[%s25160_s1 + $0x3b0] sm:$0xff] }
 0x170   :  { %v16603_v25 = vpack.c.bf16 %v12026_v22, %v12024_v21  ;;  %v12063_v16 = vld [vmem:[%s25160_s1 + $0x4c0] sm:$0xff] }
 0x171   :  { %16564 = vmatpush1.bf16.msra.mxu0 %v16563_v23  ;;  %16852 = vmatpush1.bf16.msra.mxu1 %v16563_v23  ;;  %v12029_v23 = vld [vmem:[%s25160_s1 + $0x3c8] sm:$0xff]  ;;  %v12067_v22 = vld [vmem:[%s25160_s1 + $0x4e0] sm:$0xff] }
 0x172   :  { %16566 = vmatprep.subr.bf16.mxu0 %v16565_v24  ;;  %16854 = vmatprep.subr.bf16.mxu1 %v16565_v24  ;;  %v12031_v24 = vld [vmem:[%s25160_s1 + $0x3d8] sm:$0xff] }
 0x173   :  { %v16605_v26 = vpack.c.bf16 %v12031_v24, %v12029_v23  ;;  %v12069_v23 = vld [vmem:[%s25160_s1 + $0x4f0] sm:$0xff]  ;;  %v12074_v24 = vld [vmem:[%s25160_s1 + $0x518] sm:$0xff] }
 0x175   :  { %16568 = vmatpush1.bf16.msra.mxu0 %v16567_v30  ;;  %16856 = vmatpush1.bf16.msra.mxu1 %v16567_v30  ;;  %v12033_v30 = vld [vmem:[%s25160_s1 + $0x3e8] sm:$0xff] }
 0x176   :  { %16570 = vmatprep.subr.bf16.mxu0 %v16569_v37  ;;  %16858 = vmatprep.subr.bf16.mxu1 %v16569_v37  ;;  %v12035_v37 = vld [vmem:[%s25160_s1 + $0x3f8] sm:$0xff] }
 0x177   :  { %v16609_v32 = vpack.c.bf16 %v12035_v37, %v12033_v30  ;;  %v12076_v30 = vld [vmem:[%s25160_s1 + $0x528] sm:$0xff]  ;;  %v12078_v37 = vld [vmem:[%s25160_s1 + $0x538] sm:$0xff] }
 0x179   :  { %16572 = vmatpush1.bf16.msra.mxu0 %v16571_v35  ;;  %16860 = vmatpush1.bf16.msra.mxu1 %v16571_v35  ;;  %v12037_v35 = vld [vmem:[%s25160_s1 + $0x408] sm:$0xff] }
 0x17a   :  { %16574 = vmatprep.subr.bf16.mxu0 %v16573_v36  ;;  %16862 = vmatprep.subr.bf16.mxu1 %v16573_v36  ;;  %v12039_v36 = vld [vmem:[%s25160_s1 + $0x418] sm:$0xff] }
 0x17b   :  { %v16613_v39 = vpack.c.bf16 %v12039_v36, %v12037_v35  ;;  %v12080_v35 = vld [vmem:[%s25160_s1 + $0x548] sm:$0xff]  ;;  %v12082_v36 = vld [vmem:[%s25160_s1 + $0x558] sm:$0xff] }
 0x17d   :  { %16576 = vmatpush1.bf16.msra.mxu0 %v16575_v42  ;;  %16864 = vmatpush1.bf16.msra.mxu1 %v16575_v42  ;;  %v12041_v42 = vld [vmem:[%s25160_s1 + $0x428] sm:$0xff] }
 0x17e   :  { %16578 = vmatprep.subr.bf16.mxu0 %v16577_v43  ;;  %16866 = vmatprep.subr.bf16.mxu1 %v16577_v43  ;;  %v12043_v43 = vld [vmem:[%s25160_s1 + $0x438] sm:$0xff] }
 0x17f   :  { %v16617_v45 = vpack.c.bf16 %v12043_v43, %v12041_v42  ;;  %v12084_v42 = vld [vmem:[%s25160_s1 + $0x568] sm:$0xff]  ;;  %v12086_v43 = vld [vmem:[%s25160_s1 + $0x578] sm:$0xff] }
 0x181   :  { %16580 = vmatpush1.bf16.msra.mxu0 %v16579_v47  ;;  %16868 = vmatpush1.bf16.msra.mxu1 %v16579_v47  ;;  %v12045_v47 = vld [vmem:[%s25160_s1 + $0x448] sm:$0xff] }
 0x182   :  { %16582 = vmatprep.subr.bf16.mxu0 %v16581_v48  ;;  %16870 = vmatprep.subr.bf16.mxu1 %v16581_v48  ;;  %v12047_v48 = vld [vmem:[%s25160_s1 + $0x458] sm:$0xff] }
 0x183   :  { %v16621_v51 = vpack.c.bf16 %v12047_v48, %v12045_v47  ;;  %v12088_v47 = vld [vmem:[%s25160_s1 + $0x588] sm:$0xff]  ;;  %v12090_v48 = vld [vmem:[%s25160_s1 + $0x598] sm:$0xff] }
 0x185   :  { %16584 = vmatpush1.bf16.msra.mxu0 %v16583_v53  ;;  %16872 = vmatpush1.bf16.msra.mxu1 %v16583_v53  ;;  %v12049_v53 = vld [vmem:[%s25160_s1 + $0x468] sm:$0xff] }
 0x186   :  { %16586 = vmatprep.subr.bf16.mxu0 %v16585_v54  ;;  %16874 = vmatprep.subr.bf16.mxu1 %v16585_v54  ;;  %v12051_v54 = vld [vmem:[%s25160_s1 + $0x478] sm:$0xff] }
 0x187   :  { %v16625_v56 = vpack.c.bf16 %v12051_v54, %v12049_v53  ;;  %v12095_v53 = vld [vmem:[%s25160_s1 + $0x5a8] sm:$0xff]  ;;  %v12097_v54 = vld [vmem:[%s25160_s1 + $0x5b8] sm:$0xff] }
 0x189   :  { %16588 = vmatpush1.bf16.msra.mxu0 %v16587_v60  ;;  %16876 = vmatpush1.bf16.msra.mxu1 %v16587_v60  ;;  %v12056_v60 = vld [vmem:[%s25160_s1 + $0x488] sm:$0xff] }
 0x18a   :  { %16590 = vmatprep.subr.bf16.mxu0 %v16589_v61  ;;  %16878 = vmatprep.subr.bf16.mxu1 %v16589_v61  ;;  %v12058_v61 = vld [vmem:[%s25160_s1 + $0x498] sm:$0xff] }
 0x18b   :  { %v16629_v63 = vpack.c.bf16 %v12058_v61, %v12056_v60  ;;  %v12099_v60 = vld [vmem:[%s25160_s1 + $0x5c8] sm:$0xff]  ;;  %v12101_v61 = vld [vmem:[%s25160_s1 + $0x5d8] sm:$0xff] }
 0x18c   :  { %v16669_v0 = vpack.c.bf16 %v12101_v61, %v12099_v60  ;;  %v12133_v60 = vld [vmem:[%s25160_s1 + $0x6c0] sm:$0xff]  ;;  %v12135_v61 = vld [vmem:[%s25160_s1 + $0x6d0] sm:$0xff] }
 0x18d   :  { %16592 = vmatpush1.bf16.msra.mxu0 %v16591_v2  ;;  %16880 = vmatpush1.bf16.msra.mxu1 %v16591_v2  ;;  %v12060_v2 = vld [vmem:[%s25160_s1 + $0x4a8] sm:$0xff] }
 0x18e   :  { %16594 = vmatprep.subr.bf16.mxu0 %v16593_v3  ;;  %16882 = vmatprep.subr.bf16.mxu1 %v16593_v3  ;;  %v12062_v3 = vld [vmem:[%s25160_s1 + $0x4b8] sm:$0xff] }
 0x18f   :  { %v16633_v6 = vpack.c.bf16 %v12062_v3, %v12060_v2  ;;  %v12100_v2 = vld [vmem:[%s25160_s1 + $0x5d0] sm:$0xff]  ;;  %v12103_v3 = vld [vmem:[%s25160_s1 + $0x5e8] sm:$0xff] }
 0x190   :  { %2240 = vmatmul.mubr.f32.vlgmr.msra.gmra.mrb[2].mxu0 %v11975_v7  ;;  %3171 = vmatmul.mubr.f32.vlgmr.msra.gmra.mrb[2].mxu1 %v12251_v10  ;;  %v12059_v7 = vld [vmem:[%s25160_s1 + $0x4a0] sm:$0xff]  ;;  %v12064_v10 = vld [vmem:[%s25160_s1 + $0x4c8] sm:$0xff] }
 0x191   :  { %16596 = vmatpush1.bf16.msra.mxu0 %v16595_v9  ;;  %16884 = vmatpush1.bf16.msra.mxu1 %v16595_v9  ;;  %v12061_v9 = vld [vmem:[%s25160_s1 + $0x4b0] sm:$0xff] }
 0x192   :  { %16598 = vmatprep.subr.bf16.mxu0 %v16597_v11  ;;  %16886 = vmatprep.subr.bf16.mxu1 %v16597_v11  ;;  %v12066_v11 = vld [vmem:[%s25160_s1 + $0x4d8] sm:$0xff]  ;;  %v16635_v13 = vpack.c.bf16 %v12061_v9, %v12059_v7  ;;  %v12104_v9 = vld [vmem:[%s25160_s1 + $0x5f0] sm:$0xff] }
 0x193   :  { %12052 = vmatprep.mubr.msk.f32.mxu0 %vm116_vm0, %v12015_v17  ;;  %12328 = vmatprep.mubr.msk.f32.mxu1 %vm116_vm0, %v12291_v18  ;;  %v16637_v14 = vpack.c.bf16 %v12066_v11, %v12064_v10  ;;  %v12065_v17 = vld [vmem:[%s25160_s1 + $0x4d0] sm:$0xff]  ;;  %v12068_v18 = vld [vmem:[%s25160_s1 + $0x4e8] sm:$0xff]  ;;  %v12109_v11 = vld [vmem:[%s25160_s1 + $0x618] sm:$0xff] }
 0x194   :  { %v12107_v10 = vld [vmem:[%s25160_s1 + $0x608] sm:$0xff] }
 0x195   :  { %16600 = vmatpush1.bf16.msra.mxu0 %v16599_v19  ;;  %16888 = vmatpush1.bf16.msra.mxu1 %v16599_v19  ;;  %v12070_v19 = vld [vmem:[%s25160_s1 + $0x4f8] sm:$0xff] }
 0x196   :  { %16602 = vmatprep.subr.bf16.mxu0 %v16601_v20  ;;  %16890 = vmatprep.subr.bf16.mxu1 %v16601_v20  ;;  %v16639_v20 = vpack.c.bf16 %v12065_v17, %v12063_v16  ;;  %v16641_v21 = vpack.c.bf16 %v12070_v19, %v12068_v18  ;;  %v12108_v16 = vld [vmem:[%s25160_s1 + $0x610] sm:$0xff]  ;;  %v12111_v17 = vld [vmem:[%s25160_s1 + $0x628] sm:$0xff]  ;;  %v12113_v18 = vld [vmem:[%s25160_s1 + $0x638] sm:$0xff] }
 0x199   :  { %16604 = vmatpush1.bf16.msra.mxu0 %v16603_v25  ;;  %16892 = vmatpush1.bf16.msra.mxu1 %v16603_v25  ;;  %v16643_v25 = vpack.c.bf16 %v12069_v23, %v12067_v22  ;;  %v12112_v22 = vld [vmem:[%s25160_s1 + $0x630] sm:$0xff]  ;;  %v12115_v23 = vld [vmem:[%s25160_s1 + $0x648] sm:$0xff] }
 0x19a   :  { %16606 = vmatprep.subr.bf16.mxu0 %v16605_v26  ;;  %16894 = vmatprep.subr.bf16.mxu1 %v16605_v26 }
 0x19d   :  { %16608 = vmatpush1.bf16.msra.mxu0 %v16607_v31  ;;  %16896 = vmatpush1.bf16.msra.mxu1 %v16607_v31  ;;  %v16647_v31 = vpack.c.bf16 %v12073_v29, %v12071_v27  ;;  %v12116_v27 = vld [vmem:[%s25160_s1 + $0x650] sm:$0xff]  ;;  %v12119_v29 = vld [vmem:[%s25160_s1 + $0x668] sm:$0xff] }
 0x19e   :  { %16610 = vmatprep.subr.bf16.mxu0 %v16609_v32  ;;  %16898 = vmatprep.subr.bf16.mxu1 %v16609_v32  ;;  %v16649_v32 = vpack.c.bf16 %v12078_v37, %v12076_v30  ;;  %v12121_v30 = vld [vmem:[%s25160_s1 + $0x678] sm:$0xff]  ;;  %v963_v37 = vlaneseq }
 0x1a1   :  { %16612 = vmatpush1.bf16.msra.mxu0 %v16611_v38  ;;  %16900 = vmatpush1.bf16.msra.mxu1 %v16611_v38  ;;  %v16651_v38 = vpack.c.bf16 %v12077_v34, %v12075_v33  ;;  %v12118_v33 = vld [vmem:[%s25160_s1 + $0x660] sm:$0xff]  ;;  %v12120_v34 = vld [vmem:[%s25160_s1 + $0x670] sm:$0xff] }
 0x1a2   :  { %16614 = vmatprep.subr.bf16.mxu0 %v16613_v39  ;;  %16902 = vmatprep.subr.bf16.mxu1 %v16613_v39  ;;  %v16653_v39 = vpack.c.bf16 %v12082_v36, %v12080_v35  ;;  %v12123_v35 = vld [vmem:[%s25160_s1 + $0x688] sm:$0xff]  ;;  %v12125_v36 = vld [vmem:[%s25160_s1 + $0x698] sm:$0xff] }
 0x1a5   :  { %16616 = vmatpush1.bf16.msra.mxu0 %v16615_v44  ;;  %16904 = vmatpush1.bf16.msra.mxu1 %v16615_v44  ;;  %v16655_v44 = vpack.c.bf16 %v12081_v41, %v12079_v40  ;;  %v16693_v40 = vpack.c.bf16 %v12125_v36, %v12123_v35  ;;  %v12122_v41 = vld [vmem:[%s25160_s1 + $0x680] sm:$0xff]  ;;  %v12150_v35 = vld [vmem:[%s25160_s1 + $0x748] sm:$0xff]  ;;  %v12152_v36 = vld [vmem:[%s25160_s1 + $0x758] sm:$0xff] }
 0x1a6   :  { %16618 = vmatprep.subr.bf16.mxu0 %v16617_v45  ;;  %16906 = vmatprep.subr.bf16.mxu1 %v16617_v45  ;;  %v16657_v45 = vpack.c.bf16 %v12086_v43, %v12084_v42  ;;  %v12124_v42 = vld [vmem:[%s25160_s1 + $0x690] sm:$0xff]  ;;  %v12127_v43 = vld [vmem:[%s25160_s1 + $0x6a8] sm:$0xff] }
 0x1a9   :  { %16620 = vmatpush1.bf16.msra.mxu0 %v16619_v49  ;;  %16908 = vmatpush1.bf16.msra.mxu1 %v16619_v49  ;;  %v16659_v49 = vpack.c.bf16 %v12085_v46, %v12083_v50  ;;  %v16695_v50 = vpack.c.bf16 %v12124_v42, %v12122_v41  ;;  %v961_v46 = vld [vmem:[%s25162_s2] sm:$0x3]  ;;  %v12151_v42 = vld [vmem:[%s25160_s1 + $0x750] sm:$0xff] }
 0x1aa   :  { %16622 = vmatprep.subr.bf16.mxu0 %v16621_v51  ;;  %16910 = vmatprep.subr.bf16.mxu1 %v16621_v51  ;;  %v16661_v51 = vpack.c.bf16 %v12090_v48, %v12088_v47  ;;  %v1891_v47 = vld [vmem:[%s25162_s2] sm:$0x3] }
 0x1ab   :  { %v12149_v41 = vld [vmem:[%s25160_s1 + $0x740] sm:$0xff] }
 0x1ad   :  { %16624 = vmatpush1.bf16.msra.mxu0 %v16623_v55  ;;  %16912 = vmatpush1.bf16.msra.mxu1 %v16623_v55  ;;  %v16663_v55 = vpack.c.bf16 %v12089_v59, %v12087_v52  ;;  %v12128_v52 = vld [vmem:[%s25160_s1 + $0x6b0] sm:$0xff]  ;;  %v12134_v59 = vld [vmem:[%s25160_s1 + $0x6c8] sm:$0xff] }
 0x1ae   :  { %16626 = vmatprep.subr.bf16.mxu0 %v16625_v56  ;;  %16914 = vmatprep.subr.bf16.mxu1 %v16625_v56  ;;  %v16665_v56 = vpack.c.bf16 %v12097_v54, %v12095_v53  ;;  %v12136_v53 = vld [vmem:[%s25160_s1 + $0x6d8] sm:$0xff] }
 0x1b1   :  { %16628 = vmatpush1.bf16.msra.mxu0 %v16627_v62  ;;  %16916 = vmatpush1.bf16.msra.mxu1 %v16627_v62  ;;  %v16667_v62 = vpack.c.bf16 %v12096_v58, %v12094_v57 }
 0x1b2   :  { %16630 = vmatprep.subr.bf16.mxu0 %v16629_v63  ;;  %16918 = vmatprep.subr.bf16.mxu1 %v16629_v63  ;;  %v12329_v63 = vld [vmem:[%s25161_s0 + $0x100] sm:$0xff] }
 0x1b4   :  { %2354 = vmatmul.mubr.f32.vlgmr.msra.gmra.mrb[2].mxu0 %v12014_v8  ;;  %3285 = vmatmul.mubr.f32.vlgmr.msra.gmra.mrb[2].mxu1 %v12290_v5  ;;  %v12105_v8 = vld [vmem:[%s25160_s1 + $0x5f8] sm:$0xff] }
 0x1b5   :  { %16632 = vmatpush1.bf16.msra.mxu0 %v16631_v4  ;;  %16920 = vmatpush1.bf16.msra.mxu1 %v16631_v4  ;;  %v12093_v4 = vld [vmem:[%s25161_s0 + $0xd8] sm:$0xff]  ;;  %v16673_v7 = vpack.c.bf16 %v12105_v8, %v12103_v3 }
 0x1b6   :  { %16634 = vmatprep.subr.bf16.mxu0 %v16633_v6  ;;  %16922 = vmatprep.subr.bf16.mxu1 %v16633_v6  ;;  %v21130_v5 = vld [vmem:[%s25161_s0 + $0x118] sm:$0xff]  ;;  %v16671_v6 = vpack.c.bf16 %v12100_v2, %v12098_v1  ;;  %v12138_v1 = vld [vmem:[%s25160_s1 + $0x6e8] sm:$0xff] }
 0x1b7   :  { %12091 = vmatprep.mubr.msk.f32.mxu0 %vm116_vm0, %v20640_v28  ;;  %12367 = vmatprep.mubr.msk.f32.mxu1 %vm116_vm0, %v12330_v12  ;;  %v12072_v28 = vld [vmem:[%s25160_s1 + $0x508] sm:$0xff]  ;;  %v12140_v2 = vld [vmem:[%s25160_s1 + $0x6f8] sm:$0xff] }
 0x1b8   :  { %v16645_v26 = vpack.c.bf16 %v12074_v24, %v12072_v28  ;;  %v12117_v28 = vld [vmem:[%s25160_s1 + $0x658] sm:$0xff] }
 0x1b9   :  { %16636 = vmatpush1.bf16.msra.mxu0 %v16635_v13  ;;  %16924 = vmatpush1.bf16.msra.mxu1 %v16635_v13  ;;  %v16677_v13 = vpack.c.bf16 %v12109_v11, %v12107_v10  ;;  %v12092_v10 = vld [vmem:[%s25161_s0 + $0xd0] sm:$0xff] }
 0x1ba   :  { %16638 = vmatprep.subr.bf16.mxu0 %v16637_v14  ;;  %16926 = vmatprep.subr.bf16.mxu1 %v16637_v14  ;;  %v12106_v14 = vld [vmem:[%s25160_s1 + $0x600] sm:$0xff]  ;;  %v21263_v11 = vld [vmem:[%s25161_s0 + $0x110] sm:$0xff] }
 0x1bb   :  { %v16679_v19 = vpack.c.bf16 %v12108_v16, %v12106_v14  ;;  %v12137_v14 = vld [vmem:[%s25160_s1 + $0x6e0] sm:$0xff]  ;;  %v12139_v16 = vld [vmem:[%s25160_s1 + $0x6f0] sm:$0xff] }
 0x1bd   :  { %16640 = vmatpush1.bf16.msra.mxu0 %v16639_v20  ;;  %16928 = vmatpush1.bf16.msra.mxu1 %v16639_v20  ;;  %v16681_v20 = vpack.c.bf16 %v12113_v18, %v12111_v17  ;;  %v12142_v18 = vld [vmem:[%s25160_s1 + $0x708] sm:$0xff] }
 0x1be   :  { %16642 = vmatprep.subr.bf16.mxu0 %v16641_v21  ;;  %16930 = vmatprep.subr.bf16.mxu1 %v16641_v21  ;;  %v12110_v21 = vld [vmem:[%s25160_s1 + $0x620] sm:$0xff] }
 0x1bf   :  { %v16683_v24 = vpack.c.bf16 %v12112_v22, %v12110_v21 }
 0x1c1   :  { %16644 = vmatpush1.bf16.msra.mxu0 %v16643_v25  ;;  %16932 = vmatpush1.bf16.msra.mxu1 %v16643_v25  ;;  %v16685_v25 = vpack.c.bf16 %v12117_v28, %v12115_v23  ;;  %v16707_v28 = vpack.c.bf16 %v12139_v16, %v12137_v14  ;;  %v12172_v16 = vld [vmem:[%s25160_s1 + $0x7e0] sm:$0xff] }
 0x1c2   :  { %16646 = vmatprep.subr.bf16.mxu0 %v16645_v26  ;;  %16934 = vmatprep.subr.bf16.mxu1 %v16645_v26  ;;  %v12114_v26 = vld [vmem:[%s25160_s1 + $0x640] sm:$0xff] }
 0x1c5   :  { %16648 = vmatpush1.bf16.msra.mxu0 %v16647_v31  ;;  %16936 = vmatpush1.bf16.msra.mxu1 %v16647_v31  ;;  %v16687_v31 = vpack.c.bf16 %v12116_v27, %v12114_v26  ;;  %v12141_v26 = vld [vmem:[%s25160_s1 + $0x700] sm:$0xff]  ;;  %v12143_v27 = vld [vmem:[%s25160_s1 + $0x710] sm:$0xff] }
 0x1c6   :  { %16650 = vmatprep.subr.bf16.mxu0 %v16649_v32  ;;  %16938 = vmatprep.subr.bf16.mxu1 %v16649_v32  ;;  %v16689_v32 = vpack.c.bf16 %v12121_v30, %v12119_v29  ;;  %v12146_v29 = vld [vmem:[%s25160_s1 + $0x728] sm:$0xff]  ;;  %v12148_v30 = vld [vmem:[%s25160_s1 + $0x738] sm:$0xff] }
 0x1c9   :  { %16652 = vmatpush1.bf16.msra.mxu0 %v16651_v38  ;;  %16940 = vmatpush1.bf16.msra.mxu1 %v16651_v38  ;;  %v21195_v38 = vshrl.u32 %v963_v37, 7 }
 0x1ca   :  { %16654 = vmatprep.subr.bf16.mxu0 %v16653_v39  ;;  %16942 = vmatprep.subr.bf16.mxu1 %v16653_v39  ;;  %v16691_v39 = vpack.c.bf16 %v12120_v34, %v12118_v33  ;;  %v12145_v33 = vld [vmem:[%s25160_s1 + $0x720] sm:$0xff]  ;;  %v12147_v34 = vld [vmem:[%s25160_s1 + $0x730] sm:$0xff] }
 0x1cb   :  { %25190 = vst [vmem:[#allocation3_spill] sm:$0xff] %v21195_v38  ;;  %v21219_v48 = vsub.s32 1, %v21195_v38 }
 0x1cd   :  { %16656 = vmatpush1.bf16.msra.mxu0 %v16655_v44  ;;  %16944 = vmatpush1.bf16.msra.mxu1 %v16655_v44  ;;  %v12129_v44 = vld [vmem:[%s25160_s1 + $0x6b8] sm:$0xff]  ;;  %25192 = vst [vmem:[#allocation5_spill] sm:$0xff] %v21219_v48  ;;  %v1900_v57 = vrot.slane %v1891_v47, %v21219_v48 }
 0x1ce   :  { %16658 = vmatprep.subr.bf16.mxu0 %v16657_v45  ;;  %16946 = vmatprep.subr.bf16.mxu1 %v16657_v45  ;;  %v21210_v45 = vsub.s32 0, %v21195_v38 }
 0x1d0   :  { %25191 = vst [vmem:[#allocation4_spill] sm:$0xff] %v21210_v45  ;;  %v966_v54 = vrot.slane %v961_v46, %v21210_v45 }
 0x1d1   :  { %16660 = vmatpush1.bf16.msra.mxu0 %v16659_v49  ;;  %16948 = vmatpush1.bf16.msra.mxu1 %v16659_v49  ;;  %v16697_v49 = vpack.c.bf16 %v12129_v44, %v12127_v43  ;;  %v12154_v43 = vld [vmem:[%s25160_s1 + $0x768] sm:$0xff]  ;;  %v12156_v44 = vld [vmem:[%s25160_s1 + $0x778] sm:$0xff] }
 0x1d2   :  { %16662 = vmatprep.subr.bf16.mxu0 %v16661_v51  ;;  %16950 = vmatprep.subr.bf16.mxu1 %v16661_v51  ;;  %v12126_v51 = vld [vmem:[%s25160_s1 + $0x6a0] sm:$0xff] }
 0x1d3   :  { %v16699_v58 = vpack.c.bf16 %v12128_v52, %v12126_v51  ;;  %v12158_v51 = vld [vmem:[%s25160_s1 + $0x788] sm:$0xff]  ;;  %v12160_v52 = vld [vmem:[%s25160_s1 + $0x798] sm:$0xff] }
 0x1d5   :  { %16664 = vmatpush1.bf16.msra.mxu0 %v16663_v55  ;;  %16952 = vmatpush1.bf16.msra.mxu1 %v16663_v55  ;;  %v1896_v55 = vrot.slane %v1891_v47, %v21210_v45  ;;  %v12153_v47 = vld [vmem:[%s25160_s1 + $0x760] sm:$0xff] }
 0x1d6   :  { %16666 = vmatprep.subr.bf16.mxu0 %v16665_v56  ;;  %16954 = vmatprep.subr.bf16.mxu1 %v16665_v56  ;;  %v970_v56 = vrot.slane %v961_v46, %v21219_v48  ;;  %v16721_v46 = vpack.c.bf16 %v12156_v44, %v12154_v43  ;;  %v12186_v43 = vld [vmem:[%s25160_s1 + $0x850] sm:$0xff]  ;;  %v12189_v44 = vld [vmem:[%s25160_s1 + $0x868] sm:$0xff] }
 0x1d8   :  { %2469 = vmatmul.mubr.f32.vlgmr.msra.gmra.mrb[2].mxu0 %v20747_v15  ;;  %3400 = vmatmul.mubr.f32.vlgmr.msra.gmra.mrb[2].mxu1 %v12329_v63  ;;  %v12102_v15 = vld [vmem:[%s25160_s1 + $0x5e0] sm:$0xff] }
 0x1d9   :  { %16668 = vmatpush1.bf16.msra.mxu0 %v16667_v62  ;;  %16956 = vmatpush1.bf16.msra.mxu1 %v16667_v62  ;;  %v16675_v12 = vpack.c.bf16 %v12104_v9, %v12102_v15  ;;  %v16701_v62 = vpack.c.bf16 %v12136_v53, %v12134_v59  ;;  %v16725_v53 = vpack.c.bf16 %v12160_v52, %v12158_v51  ;;  %v12190_v51 = vld [vmem:[%s25160_s1 + $0x870] sm:$0xff]  ;;  %v12193_v52 = vld [vmem:[%s25160_s1 + $0x888] sm:$0xff] }
 0x1da   :  { %16670 = vmatprep.subr.bf16.mxu0 %v16669_v0  ;;  %16958 = vmatprep.subr.bf16.mxu1 %v16669_v0 }
 0x1db   :  { %12130 = vmatprep.mubr.msk.f32.mxu0 %vm116_vm0, %v12093_v4  ;;  %12406 = vmatprep.mubr.msk.f32.mxu1 %vm116_vm0, %v21130_v5 }
 0x1dd   :  { %16672 = vmatpush1.bf16.msra.mxu0 %v16671_v6  ;;  %16960 = vmatpush1.bf16.msra.mxu1 %v16671_v6  ;;  %v16703_v6 = vpack.c.bf16 %v12135_v61, %v12133_v60  ;;  %v12161_v61 = vld [vmem:[%s25160_s1 + $0x7a0] sm:$0xff] }
 0x1de   :  { %16674 = vmatprep.subr.bf16.mxu0 %v16673_v7  ;;  %16962 = vmatprep.subr.bf16.mxu1 %v16673_v7 }
 0x1e1   :  { %16676 = vmatpush1.bf16.msra.mxu0 %v16675_v12  ;;  %16964 = vmatpush1.bf16.msra.mxu1 %v16675_v12 }
 0x1e2   :  { %16678 = vmatprep.subr.bf16.mxu0 %v16677_v13  ;;  %16966 = vmatprep.subr.bf16.mxu1 %v16677_v13  ;;  %v16705_v13 = vpack.c.bf16 %v12140_v2, %v12138_v1 }
 0x1e5   :  { %16680 = vmatpush1.bf16.msra.mxu0 %v16679_v19  ;;  %16968 = vmatpush1.bf16.msra.mxu1 %v16679_v19  ;;  %v12144_v19 = vld [vmem:[%s25160_s1 + $0x718] sm:$0xff] }
 0x1e6   :  { %16682 = vmatprep.subr.bf16.mxu0 %v16681_v20  ;;  %16970 = vmatprep.subr.bf16.mxu1 %v16681_v20  ;;  %v12132_v20 = vld [vmem:[%s25161_s0 + $0xe8] sm:$0xff] }
 0x1e9   :  { %16684 = vmatpush1.bf16.msra.mxu0 %v16683_v24  ;;  %16972 = vmatpush1.bf16.msra.mxu1 %v16683_v24  ;;  %v12408_v24 = vld [vmem:[%s25161_s0 + $0x128] sm:$0xff] }
 0x1ea   :  { %16686 = vmatprep.subr.bf16.mxu0 %v16685_v25  ;;  %16974 = vmatprep.subr.bf16.mxu1 %v16685_v25  ;;  %v16709_v25 = vpack.c.bf16 %v12144_v19, %v12142_v18  ;;  %v12174_v18 = vld [vmem:[%s25160_s1 + $0x7f0] sm:$0xff]  ;;  %v12177_v19 = vld [vmem:[%s25160_s1 + $0x808] sm:$0xff] }
 0x1ed   :  { %16688 = vmatpush1.bf16.msra.mxu0 %v16687_v31  ;;  %16976 = vmatpush1.bf16.msra.mxu1 %v16687_v31  ;;  %v16711_v31 = vpack.c.bf16 %v12143_v27, %v12141_v26  ;;  %v12176_v26 = vld [vmem:[%s25160_s1 + $0x800] sm:$0xff]  ;;  %v12178_v27 = vld [vmem:[%s25160_s1 + $0x810] sm:$0xff] }
 0x1ee   :  { %16690 = vmatprep.subr.bf16.mxu0 %v16689_v32  ;;  %16978 = vmatprep.subr.bf16.mxu1 %v16689_v32  ;;  %v16713_v32 = vpack.c.bf16 %v12148_v30, %v12146_v29  ;;  %v12181_v29 = vld [vmem:[%s25160_s1 + $0x828] sm:$0xff]  ;;  %v12183_v30 = vld [vmem:[%s25160_s1 + $0x838] sm:$0xff] }
 0x1f1   :  { %16692 = vmatpush1.bf16.msra.mxu0 %v16691_v39  ;;  %16980 = vmatpush1.bf16.msra.mxu1 %v16691_v39  ;;  %v16715_v39 = vpack.c.bf16 %v12147_v34, %v12145_v33  ;;  %v16745_v33 = vpack.c.bf16 %v12183_v30, %v12181_v29  ;;  %v12180_v34 = vld [vmem:[%s25160_s1 + $0x820] sm:$0xff]  ;;  %v12496_v29 = vld [vmem:[%s25160_s1 + $0x158] sm:$0xff]  ;;  %v12170_v30 = vld [vmem:[%s25161_s0 + $0xf0] sm:$0xff] }
 0x1f2   :  { %16694 = vmatprep.subr.bf16.mxu0 %v16693_v40  ;;  %16982 = vmatprep.subr.bf16.mxu1 %v16693_v40  ;;  %v16717_v40 = vpack.c.bf16 %v12152_v36, %v12150_v35  ;;  %v12182_v35 = vld [vmem:[%s25160_s1 + $0x830] sm:$0xff]  ;;  %v12185_v36 = vld [vmem:[%s25160_s1 + $0x848] sm:$0xff] }
 0x1f5   :  { %16696 = vmatpush1.bf16.msra.mxu0 %v16695_v50  ;;  %16984 = vmatpush1.bf16.msra.mxu1 %v16695_v50  ;;  %v16719_v50 = vpack.c.bf16 %v12151_v42, %v12149_v41  ;;  %v12184_v42 = vld [vmem:[%s25160_s1 + $0x840] sm:$0xff] }
 0x1f6   :  { %16698 = vmatprep.subr.bf16.mxu0 %v16697_v49  ;;  %16986 = vmatprep.subr.bf16.mxu1 %v16697_v49  ;;  %v12155_v49 = vld [vmem:[%s25160_s1 + $0x770] sm:$0xff] }
 0x1f7   :  { %v954_v63 = vpop.f32.mrb[0].mxu0  ;;  %v1884_v0 = vpop.f32.mrb[0].mxu1  ;;  %v16723_v59 = vpack.c.bf16 %v12155_v49, %v12153_v47  ;;  %v12188_v49 = vld [vmem:[%s25160_s1 + $0x860] sm:$0xff] }
 0x1f8   :  { %v21249_v3 = vadd.f32 %v1896_v55, %v1884_v0  ;;  %v956_v8 = vpop.f32.mrb[1].mxu0  ;;  %v1886_v4 = vpop.f32.mrb[1].mxu1  ;;  %v21251_v7 = vadd.f32 %v966_v54, %v954_v63  ;;  %v12157_v54 = vld [vmem:[%s25160_s1 + $0x780] sm:$0xff]  ;;  %v12159_v55 = vld [vmem:[%s25160_s1 + $0x790] sm:$0xff]  ;;  %v12166_v63 = vld [vmem:[%s25160_s1 + $0x7c8] sm:$0xff] }
 0x1f9   :  { %v21253_v15 = vadd.f32 %v970_v56, %v956_v8  ;;  %v21255_v9 = vadd.f32 %v1900_v57, %v1886_v4  ;;  %16700 = vmatpush1.bf16.msra.mxu0 %v16699_v58  ;;  %16988 = vmatpush1.bf16.msra.mxu1 %v16699_v58  ;;  %v12162_v56 = vld [vmem:[%s25160_s1 + $0x7a8] sm:$0xff]  ;;  %v12164_v57 = vld [vmem:[%s25160_s1 + $0x7b8] sm:$0xff]  ;;  %v16727_v58 = vpack.c.bf16 %v12159_v55, %v12157_v54  ;;  %v12165_v8 = vld [vmem:[%s25160_s1 + $0x7c0] sm:$0xff] }
 0x1fa   :  { %v1905_v12 = vmax.f32 %v21249_v3, 0.0  ;;  %16702 = vmatprep.subr.bf16.mxu0 %v16701_v62  ;;  %16990 = vmatprep.subr.bf16.mxu1 %v16701_v62  ;;  %v975_v21 = vmax.f32 %v21251_v7, 0.0  ;;  %v16729_v60 = vpack.c.bf16 %v12164_v57, %v12162_v56  ;;  %v12163_v62 = vld [vmem:[%s25160_s1 + $0x7b0] sm:$0xff]  ;;  %v12168_v0 = vld [vmem:[%s25160_s1 + $0x7d8] sm:$0xff]  ;;  %v12192_v55 = vld [vmem:[%s25160_s1 + $0x880] sm:$0xff] }
 0x1fb   :  { %v25172_v17 = vmax.f32 %v21255_v9, 0.0  ;;  %v25173_v22 = vmax.f32 %v21253_v15, 0.0  ;;  %v16731_v1 = vpack.c.bf16 %v12163_v62, %v12161_v61  ;;  %v16733_v2 = vpack.c.bf16 %v12168_v0, %v12166_v63  ;;  %v12167_v4 = vld [vmem:[%s25160_s1 + $0x7d0] sm:$0xff]  ;;  %v12197_v57 = vld [vmem:[%s25160_s1 + $0x8a8] sm:$0xff]  ;;  %v12196_v62 = vld [vmem:[%s25160_s1 + $0x8a0] sm:$0xff] }
 0x1fc   :  { %2584 = vmatmul.mubr.f32.vlgmr.msra.gmra.mrb[2].mxu0 %v12092_v10  ;;  %3515 = vmatmul.mubr.f32.vlgmr.msra.gmra.mrb[2].mxu1 %v21263_v11  ;;  %v12175_v10 = vld [vmem:[%s25160_s1 + $0x7f8] sm:$0xff]  ;;  %v12194_v56 = vld [vmem:[%s25160_s1 + $0x890] sm:$0xff]  ;;  %v12201_v0 = vld [vmem:[%s25160_s1 + $0x8c8] sm:$0xff] }
 0x1fd   :  { %16704 = vmatpush1.bf16.msra.mxu0 %v16703_v6  ;;  %16992 = vmatpush1.bf16.msra.mxu1 %v16703_v6  ;;  %v19397_v23 = vpack.i.bf16 %v25172_v17, %v1905_v12  ;;  %v19402_v37 = vpack.i.bf16 %v25173_v22, %v975_v21  ;;  %v12173_v6 = vld [vmem:[%s25160_s1 + $0x7e8] sm:$0xff]  ;;  %v12198_v63 = vld [vmem:[%s25160_s1 + $0x8b0] sm:$0xff]  ;;  %v13625_v7 = vld [vmem:[%s25163_s3 + $0x1a0] sm:$0xff] }
 0x1fe   :  { %16706 = vmatprep.subr.bf16.mxu0 %v16705_v13  ;;  %16994 = vmatprep.subr.bf16.mxu1 %v16705_v13  ;;  %v16735_v13 = vpack.c.bf16 %v12167_v4, %v12165_v8  ;;  %v16737_v14 = vpack.c.bf16 %v12175_v10, %v12173_v6  ;;  %v12200_v4 = vld [vmem:[%s25160_s1 + $0x8c0] sm:$0xff]  ;;  %v12202_v6 = vld [vmem:[%s25160_s1 + $0x8d0] sm:$0xff]  ;;  %v12205_v10 = vld [vmem:[%s25160_s1 + $0x8e8] sm:$0xff] }
 0x1ff   :  { %19398 = vrot.lane.b32.xlu0 %v19397_v23, %s19438_s17  ;;  %12169 = vmatprep.mubr.msk.f32.mxu0 %vm116_vm0, %v12132_v20  ;;  %v12179_v20 = vld [vmem:[%s25160_s1 + $0x818] sm:$0xff]  ;;  %v12131_v23 = vld [vmem:[%s25161_s0 + $0xe0] sm:$0xff]  ;;  %v13610_v3 = vld [vmem:[%s25163_s3 + $0x128] sm:$0xff] }
 0x200   :  { %12445 = vmatprep.mubr.msk.f32.mxu1 %vm116_vm0, %v12408_v24  ;;  %v12407_v24 = vld [vmem:[%s25161_s0 + $0x120] sm:$0xff] }
 0x201   :  { %16708 = vmatpush1.bf16.msra.mxu0 %v16707_v28  ;;  %16996 = vmatpush1.bf16.msra.mxu1 %v16707_v28  ;;  %v16739_v28 = vpack.c.bf16 %v12174_v18, %v12172_v16  ;;  %v12204_v18 = vld [vmem:[%s25160_s1 + $0x8e0] sm:$0xff] }
 0x202   :  { %16710 = vmatprep.subr.bf16.mxu0 %v16709_v25  ;;  %16998 = vmatprep.subr.bf16.mxu1 %v16709_v25  ;;  %v16741_v25 = vpack.c.bf16 %v12179_v20, %v12177_v19  ;;  %v12206_v19 = vld [vmem:[%s25160_s1 + $0x8f0] sm:$0xff]  ;;  %v12490_v20 = vld [vmem:[%s25160_s1 + $0x128] sm:$0xff] }
 0x203   :  { %19403 = vrot.lane.b32.xlu0 %v19402_v37, %s19438_s17  ;;  %v12171_v37 = vld [vmem:[%s25161_s0 + $0xf8] sm:$0xff] }
 0x205   :  { %16712 = vmatpush1.bf16.msra.mxu0 %v16711_v31  ;;  %17000 = vmatpush1.bf16.msra.mxu1 %v16711_v31  ;;  %v12447_v31 = vld [vmem:[%s25161_s0 + $0x138] sm:$0xff] }
 0x206   :  { %16714 = vmatprep.subr.bf16.mxu0 %v16713_v32  ;;  %17002 = vmatprep.subr.bf16.mxu1 %v16713_v32  ;;  %v16743_v32 = vpack.c.bf16 %v12178_v27, %v12176_v26  ;;  %v12491_v26 = vld [vmem:[%s25160_s1 + $0x130] sm:$0xff]  ;;  %v12494_v27 = vld [vmem:[%s25160_s1 + $0x148] sm:$0xff] }
 0x209   :  { %16716 = vmatpush1.bf16.msra.mxu0 %v16715_v39  ;;  %17004 = vmatpush1.bf16.msra.mxu1 %v16715_v39  ;;  %v12187_v39 = vld [vmem:[%s25160_s1 + $0x858] sm:$0xff] }
 0x20a   :  { %16718 = vmatprep.subr.bf16.mxu0 %v16717_v40  ;;  %17006 = vmatprep.subr.bf16.mxu1 %v16717_v40  ;;  %v16747_v40 = vpack.c.bf16 %v12182_v35, %v12180_v34  ;;  %v16749_v41 = vpack.c.bf16 %v12187_v39, %v12185_v36  ;;  %v12495_v34 = vld [vmem:[%s25160_s1 + $0x150] sm:$0xff]  ;;  %v12498_v35 = vld [vmem:[%s25160_s1 + $0x168] sm:$0xff]  ;;  %v12500_v36 = vld [vmem:[%s25160_s1 + $0x178] sm:$0xff] }
 0x20b   :  { %v12764_v39 = vld [vmem:[%s25161_s0 + $0x158] sm:$0xff] }
 0x20d   :  { %16720 = vmatpush1.bf16.msra.mxu0 %v16719_v50  ;;  %17008 = vmatpush1.bf16.msra.mxu1 %v16719_v50  ;;  %v12191_v50 = vld [vmem:[%s25160_s1 + $0x878] sm:$0xff] }
 0x20e   :  { %16722 = vmatprep.subr.bf16.mxu0 %v16721_v46  ;;  %17010 = vmatprep.subr.bf16.mxu1 %v16721_v46  ;;  %v16751_v46 = vpack.c.bf16 %v12186_v43, %v12184_v42  ;;  %v16753_v47 = vpack.c.bf16 %v12191_v50, %v12189_v44  ;;  %v12497_v42 = vld [vmem:[%s25160_s1 + $0x160] sm:$0xff]  ;;  %v12499_v43 = vld [vmem:[%s25160_s1 + $0x170] sm:$0xff]  ;;  %v12502_v44 = vld [vmem:[%s25160_s1 + $0x188] sm:$0xff] }
 0x20f   :  { %v12504_v50 = vld [vmem:[%s25160_s1 + $0x198] sm:$0xff] }
 0x211   :  { %16724 = vmatpush1.bf16.msra.mxu0 %v16723_v59  ;;  %17012 = vmatpush1.bf16.msra.mxu1 %v16723_v59  ;;  %v12195_v59 = vld [vmem:[%s25160_s1 + $0x898] sm:$0xff] }
 0x212   :  { %16726 = vmatprep.subr.bf16.mxu0 %v16725_v53  ;;  %17014 = vmatprep.subr.bf16.mxu1 %v16725_v53  ;;  %v16755_v53 = vpack.c.bf16 %v12190_v51, %v12188_v49  ;;  %v16757_v54 = vpack.c.bf16 %v12195_v59, %v12193_v52  ;;  %v12501_v49 = vld [vmem:[%s25160_s1 + $0x180] sm:$0xff]  ;;  %v12503_v51 = vld [vmem:[%s25160_s1 + $0x190] sm:$0xff]  ;;  %v12508_v52 = vld [vmem:[%s25160_s1 + $0x1b8] sm:$0xff] }
 0x213   :  { %v17075_v59 = vpack.c.bf16 %v12503_v51, %v12501_v49  ;;  %v3787_v49 = vld [vmem:[%s25160_s1 + $0x68] sm:$0xff]  ;;  %v3789_v51 = vld [vmem:[%s25160_s1 + $0x78] sm:$0xff] }
 0x215   :  { %16728 = vmatpush1.bf16.msra.mxu0 %v16727_v58  ;;  %17016 = vmatpush1.bf16.msra.mxu1 %v16727_v58  ;;  %v12199_v58 = vld [vmem:[%s25160_s1 + $0x8b8] sm:$0xff] }
 0x216   :  { %16730 = vmatprep.subr.bf16.mxu0 %v16729_v60  ;;  %17018 = vmatprep.subr.bf16.mxu1 %v16729_v60  ;;  %v16759_v60 = vpack.c.bf16 %v12194_v56, %v12192_v55  ;;  %v16761_v61 = vpack.c.bf16 %v12199_v58, %v12197_v57  ;;  %v12507_v55 = vld [vmem:[%s25160_s1 + $0x1b0] sm:$0xff]  ;;  %v12510_v56 = vld [vmem:[%s25160_s1 + $0x1c8] sm:$0xff]  ;;  %v12512_v57 = vld [vmem:[%s25160_s1 + $0x1d8] sm:$0xff] }
 0x219   :  { %16732 = vmatpush1.bf16.msra.mxu0 %v16731_v1  ;;  %17020 = vmatpush1.bf16.msra.mxu1 %v16731_v1  ;;  %v12203_v1 = vld [vmem:[%s25160_s1 + $0x8d8] sm:$0xff] }
 0x21a   :  { %16734 = vmatprep.subr.bf16.mxu0 %v16733_v2  ;;  %17022 = vmatprep.subr.bf16.mxu1 %v16733_v2  ;;  %v16763_v2 = vpack.c.bf16 %v12198_v63, %v12196_v62  ;;  %v16765_v8 = vpack.c.bf16 %v12203_v1, %v12201_v0  ;;  %v12511_v62 = vld [vmem:[%s25160_s1 + $0x1d0] sm:$0xff]  ;;  %v12514_v63 = vld [vmem:[%s25160_s1 + $0x1e8] sm:$0xff]  ;;  %v12516_v0 = vld [vmem:[%s25160_s1 + $0x1f8] sm:$0xff] }
 0x21d   :  { %16736 = vmatpush1.bf16.msra.mxu0 %v16735_v13  ;;  %17024 = vmatpush1.bf16.msra.mxu1 %v16735_v13  ;;  %v12207_v13 = vld [vmem:[%s25160_s1 + $0x8f8] sm:$0xff] }
 0x21e   :  { %16738 = vmatprep.subr.bf16.mxu0 %v16737_v14  ;;  %17026 = vmatprep.subr.bf16.mxu1 %v16737_v14  ;;  %v16767_v14 = vpack.c.bf16 %v12202_v6, %v12200_v4  ;;  %v16769_v16 = vpack.c.bf16 %v12207_v13, %v12205_v10  ;;  %v12515_v4 = vld [vmem:[%s25160_s1 + $0x1f0] sm:$0xff]  ;;  %v12518_v6 = vld [vmem:[%s25160_s1 + $0x208] sm:$0xff]  ;;  %v12520_v10 = vld [vmem:[%s25160_s1 + $0x218] sm:$0xff] }
 0x220   :  { %2699 = vmatmul.mubr.f32.vlgmr.msra.gmra.mrb[2].mxu0 %v12131_v23  ;;  %3630 = vmatmul.mubr.f32.vlgmr.msra.gmra.mrb[2].mxu1 %v12407_v24  ;;  %v12492_v23 = vld [vmem:[%s25160_s1 + $0x138] sm:$0xff] }
 0x221   :  { %16740 = vmatpush1.bf16.msra.mxu0 %v16739_v28  ;;  %17028 = vmatpush1.bf16.msra.mxu1 %v16739_v28  ;;  %v16771_v28 = vpack.c.bf16 %v12206_v19, %v12204_v18  ;;  %v17061_v24 = vpack.c.bf16 %v12492_v23, %v12490_v20  ;;  %v12519_v18 = vld [vmem:[%s25160_s1 + $0x210] sm:$0xff]  ;;  %v12522_v19 = vld [vmem:[%s25160_s1 + $0x228] sm:$0xff]  ;;  %v12524_v20 = vld [vmem:[%s25160_s1 + $0x238] sm:$0xff] }
 0x222   :  { %16742 = vmatprep.subr.bf16.mxu0 %v16741_v25  ;;  %17030 = vmatprep.subr.bf16.mxu1 %v16741_v25  ;;  %v12489_v25 = vld [vmem:[%s25160_s1 + $0x120] sm:$0xff] }
 0x223   :  { %12208 = vmatprep.mubr.msk.f32.mxu0 %vm116_vm0, %v12171_v37  ;;  %12484 = vmatprep.mubr.msk.f32.mxu1 %vm116_vm0, %v12447_v31  ;;  %v12446_v37 = vld [vmem:[%s25161_s0 + $0x130] sm:$0xff]  ;;  %v17063_v31 = vpack.c.bf16 %v12491_v26, %v12489_v25  ;;  %v3775_v26 = vld [vmem:[%s25160_s1 + $0x8] sm:$0xff] }
 0x224   :  { %v12523_v25 = vld [vmem:[%s25160_s1 + $0x230] sm:$0xff] }
 0x225   :  { %16744 = vmatpush1.bf16.msra.mxu0 %v16743_v32  ;;  %17032 = vmatpush1.bf16.msra.mxu1 %v16743_v32  ;;  %v17065_v32 = vpack.c.bf16 %v12496_v29, %v12494_v27  ;;  %v3777_v27 = vld [vmem:[%s25160_s1 + $0x18] sm:$0xff] }
 0x226   :  { %16746 = vmatprep.subr.bf16.mxu0 %v16745_v33  ;;  %17034 = vmatprep.subr.bf16.mxu1 %v16745_v33  ;;  %v12493_v33 = vld [vmem:[%s25160_s1 + $0x140] sm:$0xff] }
 0x229   :  { %16748 = vmatpush1.bf16.msra.mxu0 %v16747_v40  ;;  %17036 = vmatpush1.bf16.msra.mxu1 %v16747_v40  ;;  %v17067_v40 = vpack.c.bf16 %v12495_v34, %v12493_v33  ;;  %v3781_v33 = vld [vmem:[%s25160_s1 + $0x38] sm:$0xff] }
 0x22a   :  { %16750 = vmatprep.subr.bf16.mxu0 %v16749_v41  ;;  %17038 = vmatprep.subr.bf16.mxu1 %v16749_v41  ;;  %v17069_v41 = vpack.c.bf16 %v12500_v36, %v12498_v35  ;;  %v12763_v35 = vld [vmem:[%s25161_s0 + $0x150] sm:$0xff] }
 0x22d   :  { %16752 = vmatpush1.bf16.msra.mxu0 %v16751_v46  ;;  %17040 = vmatpush1.bf16.msra.mxu1 %v16751_v46  ;;  %v17071_v46 = vpack.c.bf16 %v12499_v43, %v12497_v42  ;;  %v3785_v42 = vld [vmem:[%s25160_s1 + $0x58] sm:$0xff]  ;;  %v12486_v43 = vld [vmem:[%s25161_s0 + $0x108] sm:$0xff] }
 0x22e   :  { %16754 = vmatprep.subr.bf16.mxu0 %v16753_v47  ;;  %17042 = vmatprep.subr.bf16.mxu1 %v16753_v47  ;;  %v17073_v47 = vpack.c.bf16 %v12504_v50, %v12502_v44  ;;  %v21660_v44 = vld [vmem:[%s25161_s0 + $0x148] sm:$0xff] }
 0x231   :  { %16756 = vmatpush1.bf16.msra.mxu0 %v16755_v53  ;;  %17044 = vmatpush1.bf16.msra.mxu1 %v16755_v53 }
 0x232   :  { %16758 = vmatprep.subr.bf16.mxu0 %v16757_v54  ;;  %17046 = vmatprep.subr.bf16.mxu1 %v16757_v54  ;;  %v12505_v54 = vld [vmem:[%s25160_s1 + $0x1a0] sm:$0xff] }
 0x233   :  { %v17079_v58 = vpack.c.bf16 %v12507_v55, %v12505_v54  ;;  %v3791_v54 = vld [vmem:[%s25160_s1 + $0x88] sm:$0xff]  ;;  %v3793_v55 = vld [vmem:[%s25160_s1 + $0x98] sm:$0xff] }
 0x235   :  { %16760 = vmatpush1.bf16.msra.mxu0 %v16759_v60  ;;  %17048 = vmatpush1.bf16.msra.mxu1 %v16759_v60  ;;  %v17081_v60 = vpack.c.bf16 %v12512_v57, %v12510_v56  ;;  %v17113_v57 = vpack.c.bf16 %v3793_v55, %v3791_v54  ;;  %v12542_v54 = vld [vmem:[%s25160_s1 + $0x2a8] sm:$0xff]  ;;  %v12544_v55 = vld [vmem:[%s25160_s1 + $0x2b8] sm:$0xff] }
 0x236   :  { %16762 = vmatprep.subr.bf16.mxu0 %v16761_v61  ;;  %17050 = vmatprep.subr.bf16.mxu1 %v16761_v61  ;;  %v12509_v61 = vld [vmem:[%s25160_s1 + $0x1c0] sm:$0xff] }
 0x237   :  { %v17083_v1 = vpack.c.bf16 %v12511_v62, %v12509_v61  ;;  %v3795_v61 = vld [vmem:[%s25160_s1 + $0xa8] sm:$0xff]  ;;  %v3797_v62 = vld [vmem:[%s25160_s1 + $0xb8] sm:$0xff] }
 0x239   :  { %16764 = vmatpush1.bf16.msra.mxu0 %v16763_v2  ;;  %17052 = vmatpush1.bf16.msra.mxu1 %v16763_v2  ;;  %v17085_v2 = vpack.c.bf16 %v12516_v0, %v12514_v63  ;;  %v17117_v0 = vpack.c.bf16 %v3797_v62, %v3795_v61  ;;  %v12546_v61 = vld [vmem:[%s25160_s1 + $0x2c8] sm:$0xff]  ;;  %v12548_v62 = vld [vmem:[%s25160_s1 + $0x2d8] sm:$0xff] }
 0x23a   :  { %16766 = vmatprep.subr.bf16.mxu0 %v16765_v8  ;;  %17054 = vmatprep.subr.bf16.mxu1 %v16765_v8  ;;  %v12513_v8 = vld [vmem:[%s25160_s1 + $0x1e0] sm:$0xff] }
 0x23b   :  { %v17087_v13 = vpack.c.bf16 %v12515_v4, %v12513_v8  ;;  %v3799_v8 = vld [vmem:[%s25160_s1 + $0xc8] sm:$0xff]  ;;  %v3801_v4 = vld [vmem:[%s25160_s1 + $0xd8] sm:$0xff] }
 0x23d   :  { %16768 = vmatpush1.bf16.msra.mxu0 %v16767_v14  ;;  %17056 = vmatpush1.bf16.msra.mxu1 %v16767_v14  ;;  %v17089_v14 = vpack.c.bf16 %v12520_v10, %v12518_v6  ;;  %v17121_v10 = vpack.c.bf16 %v3801_v4, %v3799_v8  ;;  %v12550_v8 = vld [vmem:[%s25160_s1 + $0x2e8] sm:$0xff]  ;;  %v12552_v4 = vld [vmem:[%s25160_s1 + $0x2f8] sm:$0xff] }
 0x23e   :  { %16770 = vmatprep.subr.bf16.mxu0 %v16769_v16  ;;  %17058 = vmatprep.subr.bf16.mxu1 %v16769_v16  ;;  %v12517_v16 = vld [vmem:[%s25160_s1 + $0x200] sm:$0xff] }
 0x23f   :  { %v17091_v23 = vpack.c.bf16 %v12519_v18, %v12517_v16  ;;  %v3803_v16 = vld [vmem:[%s25160_s1 + $0xe8] sm:$0xff]  ;;  %v3805_v18 = vld [vmem:[%s25160_s1 + $0xf8] sm:$0xff] }
 0x241   :  { %16772 = vmatpush1.bf16.msra.mxu0 %v16771_v28  ;;  %17060 = vmatpush1.bf16.msra.mxu1 %v16771_v28  ;;  %v17093_v28 = vpack.c.bf16 %v12524_v20, %v12522_v19  ;;  %v17125_v20 = vpack.c.bf16 %v3805_v18, %v3803_v16  ;;  %v12554_v16 = vld [vmem:[%s25160_s1 + $0x308] sm:$0xff]  ;;  %v12556_v18 = vld [vmem:[%s25160_s1 + $0x318] sm:$0xff] }
 0x242   :  { %17062 = vmatprep.subr.bf16.mxu0 %v17061_v24  ;;  %17350 = vmatprep.subr.bf16.mxu1 %v17061_v24  ;;  %v12521_v24 = vld [vmem:[%s25160_s1 + $0x220] sm:$0xff] }
 0x243   :  { %v17095_v29 = vpack.c.bf16 %v12523_v25, %v12521_v24  ;;  %v3807_v24 = vld [vmem:[%s25160_s1 + $0x108] sm:$0xff]  ;;  %v3809_v25 = vld [vmem:[%s25160_s1 + $0x118] sm:$0xff] }
 0x244   :  { %2814 = vmatmul.mubr.f32.vlgmr.msra.gmra.mrb[2].mxu0 %v12170_v30  ;;  %3745 = vmatmul.mubr.f32.vlgmr.msra.gmra.mrb[2].mxu1 %v12446_v37  ;;  %v17097_v30 = vpack.c.bf16 %v3777_v27, %v3775_v26  ;;  %v3774_v37 = vld [vmem:[%s25160_s1] sm:$0xff]  ;;  %v17129_v27 = vpack.c.bf16 %v3809_v25, %v3807_v24  ;;  %v12558_v24 = vld [vmem:[%s25160_s1 + $0x328] sm:$0xff]  ;;  %v12560_v25 = vld [vmem:[%s25160_s1 + $0x338] sm:$0xff] }
 0x245   :  { %17064 = vmatpush1.bf16.msra.mxu0 %v17063_v31  ;;  %17352 = vmatpush1.bf16.msra.mxu1 %v17063_v31  ;;  %v3776_v31 = vld [vmem:[%s25160_s1 + $0x10] sm:$0xff] }
 0x246   :  { %17066 = vmatprep.subr.bf16.mxu0 %v17065_v32  ;;  %17354 = vmatprep.subr.bf16.mxu1 %v17065_v32  ;;  %v3779_v32 = vld [vmem:[%s25160_s1 + $0x28] sm:$0xff]  ;;  %v17099_v34 = vpack.c.bf16 %v3776_v31, %v3774_v37  ;;  %v12532_v31 = vld [vmem:[%s25160_s1 + $0x258] sm:$0xff] }
 0x247   :  { %12525 = vmatprep.mubr.msk.f32.mxu0 %vm116_vm0, %v21130_v5  ;;  %12801 = vmatprep.mubr.msk.f32.mxu1 %vm116_vm0, %v12764_v39  ;;  %v12506_v5 = vld [vmem:[%s25160_s1 + $0x1a8] sm:$0xff]  ;;  %v17101_v36 = vpack.c.bf16 %v3781_v33, %v3779_v32  ;;  %v3778_v39 = vld [vmem:[%s25160_s1 + $0x20] sm:$0xff] }
 0x248   :  { %v17077_v53 = vpack.c.bf16 %v12508_v52, %v12506_v5  ;;  %v17109_v52 = vpack.c.bf16 %v3789_v51, %v3787_v49  ;;  %v12530_v37 = vld [vmem:[%s25160_s1 + $0x248] sm:$0xff] }
 0x249   :  { %17068 = vmatpush1.bf16.msra.mxu0 %v17067_v40  ;;  %17356 = vmatpush1.bf16.msra.mxu1 %v17067_v40  ;;  %v3780_v40 = vld [vmem:[%s25160_s1 + $0x30] sm:$0xff]  ;;  %v17133_v33 = vpack.c.bf16 %v12532_v31, %v12530_v37  ;;  %v12528_v49 = vld [vmem:[%s25161_s0 + $0x128] sm:$0xff]  ;;  %v12564_v31 = vld [vmem:[%s25160_s1 + $0x358] sm:$0xff] }
 0x24a   :  { %17070 = vmatprep.subr.bf16.mxu0 %v17069_v41  ;;  %17358 = vmatprep.subr.bf16.mxu1 %v17069_v41  ;;  %v3783_v41 = vld [vmem:[%s25160_s1 + $0x48] sm:$0xff]  ;;  %v17103_v50 = vpack.c.bf16 %v3780_v40, %v3778_v39  ;;  %v12536_v39 = vld [vmem:[%s25160_s1 + $0x278] sm:$0xff]  ;;  %v12485_v40 = vld [vmem:[%s25161_s0 + $0x100] sm:$0xff] }
 0x24b   :  { %v12804_v51 = vld [vmem:[%s25161_s0 + $0x168] sm:$0xff] }
 0x24c   :  { %v12562_v37 = vld [vmem:[%s25160_s1 + $0x348] sm:$0xff] }
 0x24d   :  { %17072 = vmatpush1.bf16.msra.mxu0 %v17071_v46  ;;  %17360 = vmatpush1.bf16.msra.mxu1 %v17071_v46  ;;  %v17105_v46 = vpack.c.bf16 %v3785_v42, %v3783_v41  ;;  %v21767_v42 = vld [vmem:[%s25161_s0 + $0x140] sm:$0xff] }
 0x24e   :  { %17074 = vmatprep.subr.bf16.mxu0 %v17073_v47  ;;  %17362 = vmatprep.subr.bf16.mxu1 %v17073_v47  ;;  %v4715_v47 = vld [vmem:[%s25160_s1 + $0x50] sm:$0xff] }
 0x251   :  { %17076 = vmatpush1.bf16.msra.mxu0 %v17075_v59  ;;  %17364 = vmatpush1.bf16.msra.mxu1 %v17075_v59  ;;  %v3786_v59 = vld [vmem:[%s25160_s1 + $0x60] sm:$0xff] }
 0x252   :  { %17078 = vmatprep.subr.bf16.mxu0 %v17077_v53  ;;  %17366 = vmatprep.subr.bf16.mxu1 %v17077_v53  ;;  %v3788_v53 = vld [vmem:[%s25160_s1 + $0x70] sm:$0xff] }
 0x253   :  { %v17111_v56 = vpack.c.bf16 %v3788_v53, %v3786_v59  ;;  %v12537_v59 = vld [vmem:[%s25160_s1 + $0x280] sm:$0xff]  ;;  %v12539_v53 = vld [vmem:[%s25160_s1 + $0x290] sm:$0xff] }
 0x255   :  { %17080 = vmatpush1.bf16.msra.mxu0 %v17079_v58  ;;  %17368 = vmatpush1.bf16.msra.mxu1 %v17079_v58  ;;  %v3790_v58 = vld [vmem:[%s25160_s1 + $0x80] sm:$0xff] }
 0x256   :  { %17082 = vmatprep.subr.bf16.mxu0 %v17081_v60  ;;  %17370 = vmatprep.subr.bf16.mxu1 %v17081_v60  ;;  %v3792_v60 = vld [vmem:[%s25160_s1 + $0x90] sm:$0xff] }
 0x257   :  { %v17115_v63 = vpack.c.bf16 %v3792_v60, %v3790_v58  ;;  %v12541_v58 = vld [vmem:[%s25160_s1 + $0x2a0] sm:$0xff]  ;;  %v12543_v60 = vld [vmem:[%s25160_s1 + $0x2b0] sm:$0xff] }
 0x259   :  { %17084 = vmatpush1.bf16.msra.mxu0 %v17083_v1  ;;  %17372 = vmatpush1.bf16.msra.mxu1 %v17083_v1  ;;  %v3794_v1 = vld [vmem:[%s25160_s1 + $0xa0] sm:$0xff] }
 0x25a   :  { %17086 = vmatprep.subr.bf16.mxu0 %v17085_v2  ;;  %17374 = vmatprep.subr.bf16.mxu1 %v17085_v2  ;;  %v3796_v2 = vld [vmem:[%s25160_s1 + $0xb0] sm:$0xff] }
 0x25b   :  { %v17119_v6 = vpack.c.bf16 %v3796_v2, %v3794_v1  ;;  %v12545_v1 = vld [vmem:[%s25160_s1 + $0x2c0] sm:$0xff]  ;;  %v12547_v2 = vld [vmem:[%s25160_s1 + $0x2d0] sm:$0xff] }
 0x25d   :  { %17088 = vmatpush1.bf16.msra.mxu0 %v17087_v13  ;;  %17376 = vmatpush1.bf16.msra.mxu1 %v17087_v13  ;;  %v3798_v13 = vld [vmem:[%s25160_s1 + $0xc0] sm:$0xff] }
 0x25e   :  { %17090 = vmatprep.subr.bf16.mxu0 %v17089_v14  ;;  %17378 = vmatprep.subr.bf16.mxu1 %v17089_v14  ;;  %v3800_v14 = vld [vmem:[%s25160_s1 + $0xd0] sm:$0xff] }
 0x25f   :  { %v17123_v19 = vpack.c.bf16 %v3800_v14, %v3798_v13  ;;  %v12549_v13 = vld [vmem:[%s25160_s1 + $0x2e0] sm:$0xff]  ;;  %v12551_v14 = vld [vmem:[%s25160_s1 + $0x2f0] sm:$0xff] }
 0x261   :  { %17092 = vmatpush1.bf16.msra.mxu0 %v17091_v23  ;;  %17380 = vmatpush1.bf16.msra.mxu1 %v17091_v23  ;;  %v3802_v23 = vld [vmem:[%s25160_s1 + $0xe0] sm:$0xff] }
 0x262   :  { %17094 = vmatprep.subr.bf16.mxu0 %v17093_v28  ;;  %17382 = vmatprep.subr.bf16.mxu1 %v17093_v28  ;;  %v3804_v28 = vld [vmem:[%s25160_s1 + $0xf0] sm:$0xff] }
 0x263   :  { %v17127_v26 = vpack.c.bf16 %v3804_v28, %v3802_v23  ;;  %v12553_v23 = vld [vmem:[%s25160_s1 + $0x300] sm:$0xff]  ;;  %v12555_v28 = vld [vmem:[%s25160_s1 + $0x310] sm:$0xff] }
 0x265   :  { %17096 = vmatpush1.bf16.msra.mxu0 %v17095_v29  ;;  %17384 = vmatpush1.bf16.msra.mxu1 %v17095_v29  ;;  %v3806_v29 = vld [vmem:[%s25160_s1 + $0x100] sm:$0xff] }
 0x266   :  { %17098 = vmatprep.subr.bf16.mxu0 %v17097_v30  ;;  %17386 = vmatprep.subr.bf16.mxu1 %v17097_v30  ;;  %v3808_v30 = vld [vmem:[%s25160_s1 + $0x110] sm:$0xff] }
 0x267   :  { %v17131_v32 = vpack.c.bf16 %v3808_v30, %v3806_v29  ;;  %v12557_v29 = vld [vmem:[%s25160_s1 + $0x320] sm:$0xff]  ;;  %v12559_v30 = vld [vmem:[%s25160_s1 + $0x330] sm:$0xff] }
 0x268   :  { %3916 = vmatmul.mubr.f32.vlgmr.msra.gmra.mrb[4].mxu0 %v21263_v11  ;;  %4847 = vmatmul.mubr.f32.vlgmr.msra.gmra.mrb[4].mxu1 %v12763_v35  ;;  %v4713_v11 = vld [vmem:[%s25160_s1 + $0x40] sm:$0xff]  ;;  %v12531_v35 = vld [vmem:[%s25160_s1 + $0x250] sm:$0xff] }
 0x269   :  { %17100 = vmatpush1.bf16.msra.mxu0 %v17099_v34  ;;  %17388 = vmatpush1.bf16.msra.mxu1 %v17099_v34  ;;  %v17395_v5 = vpack.c.bf16 %v4715_v47, %v4713_v11  ;;  %v12529_v34 = vld [vmem:[%s25160_s1 + $0x240] sm:$0xff]  ;;  %v12538_v11 = vld [vmem:[%s25160_s1 + $0x288] sm:$0xff]  ;;  %v12540_v47 = vld [vmem:[%s25160_s1 + $0x298] sm:$0xff] }
 0x26a   :  { %17102 = vmatprep.subr.bf16.mxu0 %v17101_v36  ;;  %17390 = vmatprep.subr.bf16.mxu1 %v17101_v36  ;;  %v12534_v36 = vld [vmem:[%s25160_s1 + $0x268] sm:$0xff]  ;;  %v17135_v41 = vpack.c.bf16 %v12531_v35, %v12529_v34  ;;  %v12561_v34 = vld [vmem:[%s25160_s1 + $0x340] sm:$0xff]  ;;  %v12563_v35 = vld [vmem:[%s25160_s1 + $0x350] sm:$0xff] }
 0x26b   :  { %12526 = vmatprep.mubr.msk.f32.mxu0 %vm116_vm0, %v12486_v43  ;;  %12802 = vmatprep.mubr.msk.f32.mxu1 %vm116_vm0, %v21660_v44  ;;  %v17137_v43 = vpack.c.bf16 %v12536_v39, %v12534_v36  ;;  %v12569_v36 = vld [vmem:[%s25160_s1 + $0x368] sm:$0xff]  ;;  %v12571_v39 = vld [vmem:[%s25160_s1 + $0x378] sm:$0xff] }
 0x26d   :  { %17104 = vmatpush1.bf16.msra.mxu0 %v17103_v50  ;;  %17392 = vmatpush1.bf16.msra.mxu1 %v17103_v50  ;;  %v12533_v50 = vld [vmem:[%s25160_s1 + $0x260] sm:$0xff] }
 0x26e   :  { %17106 = vmatprep.subr.bf16.mxu0 %v17105_v46  ;;  %17394 = vmatprep.subr.bf16.mxu1 %v17105_v46  ;;  %v12535_v46 = vld [vmem:[%s25160_s1 + $0x270] sm:$0xff] }
 0x271   :  { %17396 = vmatpush1.bf16.msra.mxu1 %v17395_v5  ;;  %17108 = vmatpush1.bf16.msra.mxu0 %v17395_v5  ;;  %v17139_v5 = vpack.c.bf16 %v12535_v46, %v12533_v50  ;;  %v12570_v50 = vld [vmem:[%s25160_s1 + $0x370] sm:$0xff]  ;;  %v12573_v46 = vld [vmem:[%s25160_s1 + $0x388] sm:$0xff] }
 0x272   :  { %17110 = vmatprep.subr.bf16.mxu0 %v17109_v52  ;;  %17398 = vmatprep.subr.bf16.mxu1 %v17109_v52  ;;  %v17141_v52 = vpack.c.bf16 %v12540_v47, %v12538_v11  ;;  %v12575_v11 = vld [vmem:[%s25160_s1 + $0x398] sm:$0xff]  ;;  %v12527_v47 = vld [vmem:[%s25161_s0 + $0x120] sm:$0xff] }
 0x275   :  { %17112 = vmatpush1.bf16.msra.mxu0 %v17111_v56  ;;  %17400 = vmatpush1.bf16.msra.mxu1 %v17111_v56  ;;  %v17143_v56 = vpack.c.bf16 %v12539_v53, %v12537_v59  ;;  %v12574_v59 = vld [vmem:[%s25160_s1 + $0x390] sm:$0xff]  ;;  %v12577_v53 = vld [vmem:[%s25160_s1 + $0x3a8] sm:$0xff] }
 0x276   :  { %17114 = vmatprep.subr.bf16.mxu0 %v17113_v57  ;;  %17402 = vmatprep.subr.bf16.mxu1 %v17113_v57  ;;  %v17145_v57 = vpack.c.bf16 %v12544_v55, %v12542_v54  ;;  %v12579_v54 = vld [vmem:[%s25160_s1 + $0x3b8] sm:$0xff] }
 0x277   :  { %v12567_v55 = vld [vmem:[%s25161_s0 + $0x138] sm:$0xff] }
 0x279   :  { %17116 = vmatpush1.bf16.msra.mxu0 %v17115_v63  ;;  %17404 = vmatpush1.bf16.msra.mxu1 %v17115_v63  ;;  %v17147_v63 = vpack.c.bf16 %v12543_v60, %v12541_v58  ;;  %v17177_v58 = vpack.c.bf16 %v12579_v54, %v12577_v53  ;;  %v12576_v60 = vld [vmem:[%s25160_s1 + $0x3a0] sm:$0xff]  ;;  %v12614_v53 = vld [vmem:[%s25160_s1 + $0x4b8] sm:$0xff]  ;;  %v12566_v54 = vld [vmem:[%s25161_s0 + $0x130] sm:$0xff] }
 0x27a   :  { %17118 = vmatprep.subr.bf16.mxu0 %v17117_v0  ;;  %17406 = vmatprep.subr.bf16.mxu1 %v17117_v0  ;;  %v17149_v0 = vpack.c.bf16 %v12548_v62, %v12546_v61  ;;  %v12578_v61 = vld [vmem:[%s25160_s1 + $0x3b0] sm:$0xff]  ;;  %v12581_v62 = vld [vmem:[%s25160_s1 + $0x3c8] sm:$0xff] }
 0x27d   :  { %17120 = vmatpush1.bf16.msra.mxu0 %v17119_v6  ;;  %17408 = vmatpush1.bf16.msra.mxu1 %v17119_v6  ;;  %v17151_v6 = vpack.c.bf16 %v12547_v2, %v12545_v1  ;;  %v12580_v2 = vld [vmem:[%s25160_s1 + $0x3c0] sm:$0xff] }
 0x27e   :  { %17122 = vmatprep.subr.bf16.mxu0 %v17121_v10  ;;  %17410 = vmatprep.subr.bf16.mxu1 %v17121_v10  ;;  %v17153_v10 = vpack.c.bf16 %v12552_v4, %v12550_v8  ;;  %v12582_v8 = vld [vmem:[%s25160_s1 + $0x3d0] sm:$0xff]  ;;  %v12585_v4 = vld [vmem:[%s25160_s1 + $0x3e8] sm:$0xff] }
 0x281   :  { %17124 = vmatpush1.bf16.msra.mxu0 %v17123_v19  ;;  %17412 = vmatpush1.bf16.msra.mxu1 %v17123_v19  ;;  %v17155_v19 = vpack.c.bf16 %v12551_v14, %v12549_v13  ;;  %v12584_v14 = vld [vmem:[%s25160_s1 + $0x3e0] sm:$0xff] }
 0x282   :  { %17126 = vmatprep.subr.bf16.mxu0 %v17125_v20  ;;  %17414 = vmatprep.subr.bf16.mxu1 %v17125_v20  ;;  %v17157_v20 = vpack.c.bf16 %v12556_v18, %v12554_v16  ;;  %v12586_v16 = vld [vmem:[%s25160_s1 + $0x3f0] sm:$0xff]  ;;  %v12589_v18 = vld [vmem:[%s25160_s1 + $0x408] sm:$0xff] }
 0x285   :  { %17128 = vmatpush1.bf16.msra.mxu0 %v17127_v26  ;;  %17416 = vmatpush1.bf16.msra.mxu1 %v17127_v26  ;;  %v17159_v26 = vpack.c.bf16 %v12555_v28, %v12553_v23  ;;  %v12588_v28 = vld [vmem:[%s25160_s1 + $0x400] sm:$0xff] }
 0x286   :  { %17130 = vmatprep.subr.bf16.mxu0 %v17129_v27  ;;  %17418 = vmatprep.subr.bf16.mxu1 %v17129_v27  ;;  %v17161_v27 = vpack.c.bf16 %v12560_v25, %v12558_v24  ;;  %v12590_v24 = vld [vmem:[%s25160_s1 + $0x410] sm:$0xff]  ;;  %v12593_v25 = vld [vmem:[%s25160_s1 + $0x428] sm:$0xff] }
 0x289   :  { %17132 = vmatpush1.bf16.msra.mxu0 %v17131_v32  ;;  %17420 = vmatpush1.bf16.msra.mxu1 %v17131_v32  ;;  %v17163_v32 = vpack.c.bf16 %v12559_v30, %v12557_v29  ;;  %v12592_v30 = vld [vmem:[%s25160_s1 + $0x420] sm:$0xff] }
 0x28a   :  { %17134 = vmatprep.subr.bf16.mxu0 %v17133_v33  ;;  %17422 = vmatprep.subr.bf16.mxu1 %v17133_v33  ;;  %v17165_v33 = vpack.c.bf16 %v12564_v31, %v12562_v37  ;;  %v12594_v37 = vld [vmem:[%s25160_s1 + $0x430] sm:$0xff]  ;;  %v12597_v31 = vld [vmem:[%s25160_s1 + $0x448] sm:$0xff] }
 0x28c   :  { %3990 = vmatmul.mubr.f32.vlgmr.msra.gmra.mrb[4].mxu0 %v12485_v40  ;;  %4921 = vmatmul.mubr.f32.vlgmr.msra.gmra.mrb[4].mxu1 %v21767_v42  ;;  %v17167_v40 = vpack.c.bf16 %v12563_v35, %v12561_v34  ;;  %v12596_v35 = vld [vmem:[%s25160_s1 + $0x440] sm:$0xff] }
 0x28d   :  { %17136 = vmatpush1.bf16.msra.mxu0 %v17135_v41  ;;  %17424 = vmatpush1.bf16.msra.mxu1 %v17135_v41  ;;  %v17169_v41 = vpack.c.bf16 %v12571_v39, %v12569_v36  ;;  %v12598_v36 = vld [vmem:[%s25160_s1 + $0x450] sm:$0xff]  ;;  %v12601_v39 = vld [vmem:[%s25160_s1 + $0x468] sm:$0xff] }
 0x28e   :  { %17138 = vmatprep.subr.bf16.mxu0 %v17137_v43  ;;  %17426 = vmatprep.subr.bf16.mxu1 %v17137_v43  ;;  %v12568_v43 = vld [vmem:[%s25160_s1 + $0x360] sm:$0xff] }
 0x28f   :  { %12565 = vmatprep.mubr.msk.f32.mxu0 %vm116_vm0, %v12528_v49  ;;  %12841 = vmatprep.mubr.msk.f32.mxu1 %vm116_vm0, %v12804_v51  ;;  %v17171_v49 = vpack.c.bf16 %v12570_v50, %v12568_v43  ;;  %v12803_v51 = vld [vmem:[%s25161_s0 + $0x160] sm:$0xff] }
 0x290   :  { %v12600_v50 = vld [vmem:[%s25160_s1 + $0x460] sm:$0xff] }
 0x291   :  { %17140 = vmatpush1.bf16.msra.mxu0 %v17139_v5  ;;  %17428 = vmatpush1.bf16.msra.mxu1 %v17139_v5  ;;  %v17173_v5 = vpack.c.bf16 %v12575_v11, %v12573_v46  ;;  %v12602_v46 = vld [vmem:[%s25160_s1 + $0x470] sm:$0xff]  ;;  %v12608_v11 = vld [vmem:[%s25160_s1 + $0x488] sm:$0xff] }
 0x292   :  { %17142 = vmatprep.subr.bf16.mxu0 %v17141_v52  ;;  %17430 = vmatprep.subr.bf16.mxu1 %v17141_v52  ;;  %v12572_v52 = vld [vmem:[%s25160_s1 + $0x380] sm:$0xff] }
 0x295   :  { %17144 = vmatpush1.bf16.msra.mxu0 %v17143_v56  ;;  %17432 = vmatpush1.bf16.msra.mxu1 %v17143_v56  ;;  %v12843_v56 = vld [vmem:[%s25161_s0 + $0x178] sm:$0xff] }
 0x296   :  { %17146 = vmatprep.subr.bf16.mxu0 %v17145_v57  ;;  %17434 = vmatprep.subr.bf16.mxu1 %v17145_v57  ;;  %v17175_v57 = vpack.c.bf16 %v12574_v59, %v12572_v52  ;;  %v12609_v52 = vld [vmem:[%s25160_s1 + $0x490] sm:$0xff]  ;;  %v12612_v59 = vld [vmem:[%s25160_s1 + $0x4a8] sm:$0xff] }
 0x299   :  { %17148 = vmatpush1.bf16.msra.mxu0 %v17147_v63  ;;  %17436 = vmatpush1.bf16.msra.mxu1 %v17147_v63  ;;  %v12583_v63 = vld [vmem:[%s25160_s1 + $0x3d8] sm:$0xff] }
 0x29a   :  { %17150 = vmatprep.subr.bf16.mxu0 %v17149_v0  ;;  %17438 = vmatprep.subr.bf16.mxu1 %v17149_v0  ;;  %v17179_v0 = vpack.c.bf16 %v12578_v61, %v12576_v60  ;;  %v17181_v1 = vpack.c.bf16 %v12583_v63, %v12581_v62  ;;  %v12613_v60 = vld [vmem:[%s25160_s1 + $0x4b0] sm:$0xff]  ;;  %v12616_v61 = vld [vmem:[%s25160_s1 + $0x4c8] sm:$0xff]  ;;  %v12618_v62 = vld [vmem:[%s25160_s1 + $0x4d8] sm:$0xff] }
 0x29b   :  { %v12882_v63 = vld [vmem:[%s25161_s0 + $0x188] sm:$0xff] }
 0x29d   :  { %17152 = vmatpush1.bf16.msra.mxu0 %v17151_v6  ;;  %17440 = vmatpush1.bf16.msra.mxu1 %v17151_v6  ;;  %v12587_v6 = vld [vmem:[%s25160_s1 + $0x3f8] sm:$0xff] }
 0x29e   :  { %17154 = vmatprep.subr.bf16.mxu0 %v17153_v10  ;;  %17442 = vmatprep.subr.bf16.mxu1 %v17153_v10  ;;  %v17183_v10 = vpack.c.bf16 %v12582_v8, %v12580_v2  ;;  %v17185_v13 = vpack.c.bf16 %v12587_v6, %v12585_v4  ;;  %v12615_v2 = vld [vmem:[%s25160_s1 + $0x4c0] sm:$0xff]  ;;  %v12617_v8 = vld [vmem:[%s25160_s1 + $0x4d0] sm:$0xff]  ;;  %v12620_v4 = vld [vmem:[%s25160_s1 + $0x4e8] sm:$0xff] }
 0x29f   :  { %v12622_v6 = vld [vmem:[%s25160_s1 + $0x4f8] sm:$0xff] }
 0x2a1   :  { %17156 = vmatpush1.bf16.msra.mxu0 %v17155_v19  ;;  %17444 = vmatpush1.bf16.msra.mxu1 %v17155_v19  ;;  %v12591_v19 = vld [vmem:[%s25160_s1 + $0x418] sm:$0xff] }
 0x2a2   :  { %17158 = vmatprep.subr.bf16.mxu0 %v17157_v20  ;;  %17446 = vmatprep.subr.bf16.mxu1 %v17157_v20  ;;  %v17187_v20 = vpack.c.bf16 %v12586_v16, %v12584_v14  ;;  %v17189_v23 = vpack.c.bf16 %v12591_v19, %v12589_v18  ;;  %v12619_v14 = vld [vmem:[%s25160_s1 + $0x4e0] sm:$0xff]  ;;  %v12621_v16 = vld [vmem:[%s25160_s1 + $0x4f0] sm:$0xff]  ;;  %v12626_v18 = vld [vmem:[%s25160_s1 + $0x518] sm:$0xff] }
 0x2a3   :  { %v17219_v19 = vpack.c.bf16 %v12621_v16, %v12619_v14  ;;  %v12659_v14 = vld [vmem:[%s25160_s1 + $0x608] sm:$0xff]  ;;  %v12661_v16 = vld [vmem:[%s25160_s1 + $0x618] sm:$0xff] }
 0x2a5   :  { %17160 = vmatpush1.bf16.msra.mxu0 %v17159_v26  ;;  %17448 = vmatpush1.bf16.msra.mxu1 %v17159_v26  ;;  %v12595_v26 = vld [vmem:[%s25160_s1 + $0x438] sm:$0xff] }
 0x2a6   :  { %17162 = vmatprep.subr.bf16.mxu0 %v17161_v27  ;;  %17450 = vmatprep.subr.bf16.mxu1 %v17161_v27  ;;  %v17191_v27 = vpack.c.bf16 %v12590_v24, %v12588_v28  ;;  %v17193_v29 = vpack.c.bf16 %v12595_v26, %v12593_v25  ;;  %v12625_v28 = vld [vmem:[%s25160_s1 + $0x510] sm:$0xff]  ;;  %v12628_v24 = vld [vmem:[%s25160_s1 + $0x528] sm:$0xff]  ;;  %v12630_v25 = vld [vmem:[%s25160_s1 + $0x538] sm:$0xff] }
 0x2a9   :  { %17164 = vmatpush1.bf16.msra.mxu0 %v17163_v32  ;;  %17452 = vmatpush1.bf16.msra.mxu1 %v17163_v32  ;;  %v12599_v32 = vld [vmem:[%s25160_s1 + $0x458] sm:$0xff] }
 0x2aa   :  { %17166 = vmatprep.subr.bf16.mxu0 %v17165_v33  ;;  %17454 = vmatprep.subr.bf16.mxu1 %v17165_v33  ;;  %v17195_v33 = vpack.c.bf16 %v12594_v37, %v12592_v30  ;;  %v17197_v34 = vpack.c.bf16 %v12599_v32, %v12597_v31  ;;  %v12629_v30 = vld [vmem:[%s25160_s1 + $0x530] sm:$0xff]  ;;  %v12632_v37 = vld [vmem:[%s25160_s1 + $0x548] sm:$0xff]  ;;  %v12634_v31 = vld [vmem:[%s25160_s1 + $0x558] sm:$0xff] }
 0x2ad   :  { %17168 = vmatpush1.bf16.msra.mxu0 %v17167_v40  ;;  %17456 = vmatpush1.bf16.msra.mxu1 %v17167_v40  ;;  %v12603_v40 = vld [vmem:[%s25160_s1 + $0x478] sm:$0xff] }
 0x2ae   :  { %17170 = vmatprep.subr.bf16.mxu0 %v17169_v41  ;;  %17458 = vmatprep.subr.bf16.mxu1 %v17169_v41  ;;  %v17199_v41 = vpack.c.bf16 %v12598_v36, %v12596_v35  ;;  %v17201_v43 = vpack.c.bf16 %v12603_v40, %v12601_v39  ;;  %v12633_v35 = vld [vmem:[%s25160_s1 + $0x550] sm:$0xff]  ;;  %v12636_v36 = vld [vmem:[%s25160_s1 + $0x568] sm:$0xff]  ;;  %v12638_v39 = vld [vmem:[%s25160_s1 + $0x578] sm:$0xff] }
 0x2b0   :  { %4102 = vmatmul.mubr.f32.vlgmr.msra.gmra.mrb[4].mxu0 %v12527_v47  ;;  %5033 = vmatmul.mubr.f32.vlgmr.msra.gmra.mrb[4].mxu1 %v12803_v51  ;;  %v12610_v47 = vld [vmem:[%s25160_s1 + $0x498] sm:$0xff] }
 0x2b1   :  { %17172 = vmatpush1.bf16.msra.mxu0 %v17171_v49  ;;  %17460 = vmatpush1.bf16.msra.mxu1 %v17171_v49  ;;  %v17203_v49 = vpack.c.bf16 %v12602_v46, %v12600_v50  ;;  %v17205_v51 = vpack.c.bf16 %v12610_v47, %v12608_v11  ;;  %v12637_v50 = vld [vmem:[%s25160_s1 + $0x570] sm:$0xff]  ;;  %v12640_v46 = vld [vmem:[%s25160_s1 + $0x588] sm:$0xff]  ;;  %v12642_v11 = vld [vmem:[%s25160_s1 + $0x598] sm:$0xff] }
 0x2b2   :  { %17174 = vmatprep.subr.bf16.mxu0 %v17173_v5  ;;  %17462 = vmatprep.subr.bf16.mxu1 %v17173_v5  ;;  %v12607_v5 = vld [vmem:[%s25160_s1 + $0x480] sm:$0xff] }
 0x2b3   :  { %12604 = vmatprep.mubr.msk.f32.mxu0 %vm116_vm0, %v12567_v55  ;;  %12880 = vmatprep.mubr.msk.f32.mxu1 %vm116_vm0, %v12843_v56  ;;  %v17207_v55 = vpack.c.bf16 %v12609_v52, %v12607_v5  ;;  %v12842_v56 = vld [vmem:[%s25161_s0 + $0x170] sm:$0xff]  ;;  %v12647_v52 = vld [vmem:[%s25160_s1 + $0x5a8] sm:$0xff] }
 0x2b4   :  { %v12641_v5 = vld [vmem:[%s25160_s1 + $0x590] sm:$0xff] }
 0x2b5   :  { %17176 = vmatpush1.bf16.msra.mxu0 %v17175_v57  ;;  %17464 = vmatpush1.bf16.msra.mxu1 %v17175_v57  ;;  %v17209_v57 = vpack.c.bf16 %v12614_v53, %v12612_v59  ;;  %v12649_v59 = vld [vmem:[%s25160_s1 + $0x5b8] sm:$0xff] }
 0x2b6   :  { %17178 = vmatprep.subr.bf16.mxu0 %v17177_v58  ;;  %17466 = vmatprep.subr.bf16.mxu1 %v17177_v58  ;;  %v12611_v58 = vld [vmem:[%s25160_s1 + $0x4a0] sm:$0xff] }
 0x2b9   :  { %17180 = vmatpush1.bf16.msra.mxu0 %v17179_v0  ;;  %17468 = vmatpush1.bf16.msra.mxu1 %v17179_v0  ;;  %v17211_v0 = vpack.c.bf16 %v12613_v60, %v12611_v58  ;;  %v12653_v58 = vld [vmem:[%s25160_s1 + $0x5d8] sm:$0xff] }
 0x2ba   :  { %17182 = vmatprep.subr.bf16.mxu0 %v17181_v1  ;;  %17470 = vmatprep.subr.bf16.mxu1 %v17181_v1  ;;  %v17213_v1 = vpack.c.bf16 %v12618_v62, %v12616_v61  ;;  %v12881_v61 = vld [vmem:[%s25161_s0 + $0x180] sm:$0xff] }
 0x2bd   :  { %17184 = vmatpush1.bf16.msra.mxu0 %v17183_v10  ;;  %17472 = vmatpush1.bf16.msra.mxu1 %v17183_v10  ;;  %v17215_v10 = vpack.c.bf16 %v12617_v8, %v12615_v2  ;;  %v12657_v2 = vld [vmem:[%s25160_s1 + $0x5f8] sm:$0xff] }
 0x2be   :  { %17186 = vmatprep.subr.bf16.mxu0 %v17185_v13  ;;  %17474 = vmatprep.subr.bf16.mxu1 %v17185_v13  ;;  %v17217_v13 = vpack.c.bf16 %v12622_v6, %v12620_v4  ;;  %v12645_v8 = vld [vmem:[%s25161_s0 + $0x158] sm:$0xff] }
 0x2bf   :  { %v22150_v4 = vld [vmem:[%s25161_s0 + $0x198] sm:$0xff] }
 0x2c1   :  { %17188 = vmatpush1.bf16.msra.mxu0 %v17187_v20  ;;  %17476 = vmatpush1.bf16.msra.mxu1 %v17187_v20 }
 0x2c2   :  { %17190 = vmatprep.subr.bf16.mxu0 %v17189_v23  ;;  %17478 = vmatprep.subr.bf16.mxu1 %v17189_v23  ;;  %v12623_v23 = vld [vmem:[%s25160_s1 + $0x500] sm:$0xff] }
 0x2c3   :  { %v17223_v26 = vpack.c.bf16 %v12625_v28, %v12623_v23  ;;  %v12663_v23 = vld [vmem:[%s25160_s1 + $0x628] sm:$0xff]  ;;  %v12665_v28 = vld [vmem:[%s25160_s1 + $0x638] sm:$0xff] }
 0x2c5   :  { %17192 = vmatpush1.bf16.msra.mxu0 %v17191_v27  ;;  %17480 = vmatpush1.bf16.msra.mxu1 %v17191_v27  ;;  %v17225_v27 = vpack.c.bf16 %v12630_v25, %v12628_v24  ;;  %v17257_v25 = vpack.c.bf16 %v12665_v28, %v12663_v23  ;;  %v12644_v28 = vld [vmem:[%s25161_s0 + $0x150] sm:$0xff] }
 0x2c6   :  { %17194 = vmatprep.subr.bf16.mxu0 %v17193_v29  ;;  %17482 = vmatprep.subr.bf16.mxu1 %v17193_v29  ;;  %v12627_v29 = vld [vmem:[%s25160_s1 + $0x520] sm:$0xff] }
 0x2c7   :  { %v17227_v32 = vpack.c.bf16 %v12629_v30, %v12627_v29  ;;  %v12667_v29 = vld [vmem:[%s25160_s1 + $0x648] sm:$0xff]  ;;  %v12669_v30 = vld [vmem:[%s25160_s1 + $0x658] sm:$0xff] }
 0x2c9   :  { %17196 = vmatpush1.bf16.msra.mxu0 %v17195_v33  ;;  %17484 = vmatpush1.bf16.msra.mxu1 %v17195_v33  ;;  %v17229_v33 = vpack.c.bf16 %v12634_v31, %v12632_v37  ;;  %v17261_v31 = vpack.c.bf16 %v12669_v30, %v12667_v29  ;;  %v12691_v29 = vld [vmem:[%s25160_s1 + $0x6f0] sm:$0xff] }
 0x2ca   :  { %17198 = vmatprep.subr.bf16.mxu0 %v17197_v34  ;;  %17486 = vmatprep.subr.bf16.mxu1 %v17197_v34  ;;  %v12631_v34 = vld [vmem:[%s25160_s1 + $0x540] sm:$0xff] }
 0x2cb   :  { %v17231_v40 = vpack.c.bf16 %v12633_v35, %v12631_v34  ;;  %v12671_v34 = vld [vmem:[%s25160_s1 + $0x668] sm:$0xff]  ;;  %v12673_v35 = vld [vmem:[%s25160_s1 + $0x678] sm:$0xff] }
 0x2cd   :  { %17200 = vmatpush1.bf16.msra.mxu0 %v17199_v41  ;;  %17488 = vmatpush1.bf16.msra.mxu1 %v17199_v41  ;;  %v17233_v41 = vpack.c.bf16 %v12638_v39, %v12636_v36  ;;  %v17265_v39 = vpack.c.bf16 %v12673_v35, %v12671_v34 }
 0x2ce   :  { %17202 = vmatprep.subr.bf16.mxu0 %v17201_v43  ;;  %17490 = vmatprep.subr.bf16.mxu1 %v17201_v43  ;;  %v12635_v43 = vld [vmem:[%s25160_s1 + $0x560] sm:$0xff] }
 0x2cf   :  { %v17235_v47 = vpack.c.bf16 %v12637_v50, %v12635_v43  ;;  %v12675_v43 = vld [vmem:[%s25160_s1 + $0x688] sm:$0xff]  ;;  %v12677_v50 = vld [vmem:[%s25160_s1 + $0x698] sm:$0xff] }
 0x2d1   :  { %17204 = vmatpush1.bf16.msra.mxu0 %v17203_v49  ;;  %17492 = vmatpush1.bf16.msra.mxu1 %v17203_v49  ;;  %v17237_v49 = vpack.c.bf16 %v12642_v11, %v12640_v46  ;;  %v17269_v11 = vpack.c.bf16 %v12677_v50, %v12675_v43  ;;  %v12695_v43 = vld [vmem:[%s25160_s1 + $0x710] sm:$0xff]  ;;  %v12698_v50 = vld [vmem:[%s25160_s1 + $0x728] sm:$0xff] }
 0x2d2   :  { %17206 = vmatprep.subr.bf16.mxu0 %v17205_v51  ;;  %17494 = vmatprep.subr.bf16.mxu1 %v17205_v51  ;;  %v12639_v51 = vld [vmem:[%s25160_s1 + $0x580] sm:$0xff] }
 0x2d3   :  { %v17239_v53 = vpack.c.bf16 %v12641_v5, %v12639_v51  ;;  %v12679_v51 = vld [vmem:[%s25160_s1 + $0x6a8] sm:$0xff]  ;;  %v12681_v5 = vld [vmem:[%s25160_s1 + $0x6b8] sm:$0xff] }
 0x2d4   :  { %4216 = vmatmul.mubr.f32.vlgmr.msra.gmra.mrb[4].mxu0 %v12566_v54  ;;  %5147 = vmatmul.mubr.f32.vlgmr.msra.gmra.mrb[4].mxu1 %v12842_v56  ;;  %v17241_v54 = vpack.c.bf16 %v12649_v59, %v12647_v52  ;;  %v12648_v56 = vld [vmem:[%s25160_s1 + $0x5b0] sm:$0xff]  ;;  %v2822_v59 = vld [vmem:[%s25162_s2] sm:$0x3] }
 0x2d5   :  { %17208 = vmatpush1.bf16.msra.mxu0 %v17207_v55  ;;  %17496 = vmatpush1.bf16.msra.mxu1 %v17207_v55  ;;  %v12646_v55 = vld [vmem:[%s25160_s1 + $0x5a0] sm:$0xff] }
 0x2d6   :  { %17210 = vmatprep.subr.bf16.mxu0 %v17209_v57  ;;  %17498 = vmatprep.subr.bf16.mxu1 %v17209_v57  ;;  %v12651_v57 = vld [vmem:[%s25160_s1 + $0x5c8] sm:$0xff]  ;;  %v17243_v60 = vpack.c.bf16 %v12648_v56, %v12646_v55  ;;  %v12678_v55 = vld [vmem:[%s25160_s1 + $0x6a0] sm:$0xff]  ;;  %v12680_v56 = vld [vmem:[%s25160_s1 + $0x6b0] sm:$0xff] }
 0x2d7   :  { %12643 = vmatprep.mubr.msk.f32.mxu0 %vm116_vm0, %v21660_v44  ;;  %12919 = vmatprep.mubr.msk.f32.mxu1 %vm116_vm0, %v12882_v63  ;;  %v12624_v44 = vld [vmem:[%s25160_s1 + $0x508] sm:$0xff]  ;;  %v17245_v62 = vpack.c.bf16 %v12653_v58, %v12651_v57  ;;  %v12650_v63 = vld [vmem:[%s25160_s1 + $0x5c0] sm:$0xff]  ;;  %v12688_v58 = vld [vmem:[%s25160_s1 + $0x6d8] sm:$0xff] }
 0x2d8   :  { %v17221_v20 = vpack.c.bf16 %v12626_v18, %v12624_v44  ;;  %v17253_v18 = vpack.c.bf16 %v12661_v16, %v12659_v14  ;;  %v12686_v57 = vld [vmem:[%s25160_s1 + $0x6c8] sm:$0xff] }
 0x2d9   :  { %17212 = vmatpush1.bf16.msra.mxu0 %v17211_v0  ;;  %17500 = vmatpush1.bf16.msra.mxu1 %v17211_v0  ;;  %v12652_v0 = vld [vmem:[%s25160_s1 + $0x5d0] sm:$0xff] }
 0x2da   :  { %17214 = vmatprep.subr.bf16.mxu0 %v17213_v1  ;;  %17502 = vmatprep.subr.bf16.mxu1 %v17213_v1  ;;  %v12655_v1 = vld [vmem:[%s25160_s1 + $0x5e8] sm:$0xff]  ;;  %v17247_v6 = vpack.c.bf16 %v12652_v0, %v12650_v63  ;;  %v17275_v0 = vpack.c.bf16 %v12680_v56, %v12678_v55  ;;  %v12701_v55 = vld [vmem:[%s25160_s1 + $0x740] sm:$0xff]  ;;  %v12703_v56 = vld [vmem:[%s25160_s1 + $0x750] sm:$0xff] }
 0x2dd   :  { %17216 = vmatpush1.bf16.msra.mxu0 %v17215_v10  ;;  %17504 = vmatpush1.bf16.msra.mxu1 %v17215_v10  ;;  %v17249_v10 = vpack.c.bf16 %v12657_v2, %v12655_v1  ;;  %v12685_v1 = vld [vmem:[%s25160_s1 + $0x6c0] sm:$0xff]  ;;  %v12687_v2 = vld [vmem:[%s25160_s1 + $0x6d0] sm:$0xff] }
 0x2de   :  { %17218 = vmatprep.subr.bf16.mxu0 %v17217_v13  ;;  %17506 = vmatprep.subr.bf16.mxu1 %v17217_v13  ;;  %v12656_v13 = vld [vmem:[%s25160_s1 + $0x5f0] sm:$0xff] }
 0x2e1   :  { %17220 = vmatpush1.bf16.msra.mxu0 %v17219_v19  ;;  %17508 = vmatpush1.bf16.msra.mxu1 %v17219_v19  ;;  %v12658_v19 = vld [vmem:[%s25160_s1 + $0x600] sm:$0xff] }
 0x2e2   :  { %17222 = vmatprep.subr.bf16.mxu0 %v17221_v20  ;;  %17510 = vmatprep.subr.bf16.mxu1 %v17221_v20  ;;  %v12660_v20 = vld [vmem:[%s25160_s1 + $0x610] sm:$0xff] }
 0x2e3   :  { %v17255_v24 = vpack.c.bf16 %v12660_v20, %v12658_v19 }
 0x2e5   :  { %17224 = vmatpush1.bf16.msra.mxu0 %v17223_v26  ;;  %17512 = vmatpush1.bf16.msra.mxu1 %v17223_v26  ;;  %v12662_v26 = vld [vmem:[%s25160_s1 + $0x620] sm:$0xff] }
 0x2e6   :  { %17226 = vmatprep.subr.bf16.mxu0 %v17225_v27  ;;  %17514 = vmatprep.subr.bf16.mxu1 %v17225_v27  ;;  %v12664_v27 = vld [vmem:[%s25160_s1 + $0x630] sm:$0xff] }
 0x2e7   :  { %v17259_v37 = vpack.c.bf16 %v12664_v27, %v12662_v26  ;;  %v12689_v27 = vld [vmem:[%s25160_s1 + $0x6e0] sm:$0xff] }
 0x2e9   :  { %17228 = vmatpush1.bf16.msra.mxu0 %v17227_v32  ;;  %17516 = vmatpush1.bf16.msra.mxu1 %v17227_v32  ;;  %v12666_v32 = vld [vmem:[%s25160_s1 + $0x640] sm:$0xff] }
 0x2ea   :  { %17230 = vmatprep.subr.bf16.mxu0 %v17229_v33  ;;  %17518 = vmatprep.subr.bf16.mxu1 %v17229_v33  ;;  %v12668_v33 = vld [vmem:[%s25160_s1 + $0x650] sm:$0xff] }
 0x2eb   :  { %v17263_v36 = vpack.c.bf16 %v12668_v33, %v12666_v32  ;;  %v12684_v32 = vld [vmem:[%s25161_s0 + $0x168] sm:$0xff] }
 0x2ed   :  { %17232 = vmatpush1.bf16.msra.mxu0 %v17231_v40  ;;  %17520 = vmatpush1.bf16.msra.mxu1 %v17231_v40  ;;  %v12670_v40 = vld [vmem:[%s25160_s1 + $0x660] sm:$0xff] }
 0x2ee   :  { %17234 = vmatprep.subr.bf16.mxu0 %v17233_v41  ;;  %17522 = vmatprep.subr.bf16.mxu1 %v17233_v41  ;;  %v12672_v41 = vld [vmem:[%s25160_s1 + $0x670] sm:$0xff] }
 0x2ef   :  { %v17267_v46 = vpack.c.bf16 %v12672_v41, %v12670_v40  ;;  %v12693_v41 = vld [vmem:[%s25160_s1 + $0x700] sm:$0xff] }
 0x2f1   :  { %17236 = vmatpush1.bf16.msra.mxu0 %v17235_v47  ;;  %17524 = vmatpush1.bf16.msra.mxu1 %v17235_v47  ;;  %v12674_v47 = vld [vmem:[%s25160_s1 + $0x680] sm:$0xff] }
 0x2f2   :  { %17238 = vmatprep.subr.bf16.mxu0 %v17237_v49  ;;  %17526 = vmatprep.subr.bf16.mxu1 %v17237_v49  ;;  %v12676_v49 = vld [vmem:[%s25160_s1 + $0x690] sm:$0xff] }
 0x2f3   :  { %v17271_v52 = vpack.c.bf16 %v12676_v49, %v12674_v47  ;;  %v17287_v47 = vpack.c.bf16 %v12695_v43, %v12693_v41  ;;  %v12683_v41 = vld [vmem:[%s25161_s0 + $0x160] sm:$0xff] }
 0x2f5   :  { %17240 = vmatpush1.bf16.msra.mxu0 %v17239_v53  ;;  %17528 = vmatpush1.bf16.msra.mxu1 %v17239_v53  ;;  %v3753_v53 = vld [vmem:[%s25162_s2] sm:$0x3] }
 0x2f6   :  { %17242 = vmatprep.subr.bf16.mxu0 %v17241_v54  ;;  %17530 = vmatprep.subr.bf16.mxu1 %v17241_v54  ;;  %v17273_v54 = vpack.c.bf16 %v12681_v5, %v12679_v51  ;;  %v3762_v63 = vrot.slane %v3753_v53, %v21219_v48  ;;  %v12697_v51 = vld [vmem:[%s25160_s1 + $0x720] sm:$0xff]  ;;  %v12699_v5 = vld [vmem:[%s25160_s1 + $0x730] sm:$0xff] }
 0x2f8   :  { %4331 = vmatmul.mubr.f32.vlgmr.msra.gmra.mrb[4].mxu0 %v21767_v42  ;;  %5262 = vmatmul.mubr.f32.vlgmr.msra.gmra.mrb[4].mxu1 %v12881_v61  ;;  %v12654_v42 = vld [vmem:[%s25160_s1 + $0x5e0] sm:$0xff]  ;;  %v3758_v61 = vrot.slane %v3753_v53, %v21210_v45  ;;  %v17291_v53 = vpack.c.bf16 %v12699_v5, %v12697_v51  ;;  %v12735_v51 = vld [vmem:[%s25160_s1 + $0x838] sm:$0xff] }
 0x2f9   :  { %17244 = vmatpush1.bf16.msra.mxu0 %v17243_v60  ;;  %17532 = vmatpush1.bf16.msra.mxu1 %v17243_v60  ;;  %v17251_v44 = vpack.c.bf16 %v12656_v13, %v12654_v42  ;;  %v2827_v60 = vrot.slane %v2822_v59, %v21210_v45  ;;  %v12690_v42 = vld [vmem:[%s25160_s1 + $0x6e8] sm:$0xff]  ;;  %v12692_v13 = vld [vmem:[%s25160_s1 + $0x6f8] sm:$0xff] }
 0x2fa   :  { %17246 = vmatprep.subr.bf16.mxu0 %v17245_v62  ;;  %17534 = vmatprep.subr.bf16.mxu1 %v17245_v62  ;;  %v2831_v62 = vrot.slane %v2822_v59, %v21219_v48  ;;  %v17281_v26 = vpack.c.bf16 %v12692_v13, %v12690_v42  ;;  %v12704_v59 = vld [vmem:[%s25160_s1 + $0x758] sm:$0xff]  ;;  %v12714_v42 = vld [vmem:[%s25160_s1 + $0x7a8] sm:$0xff] }
 0x2fb   :  { %12682 = vmatprep.mubr.msk.f32.mxu0 %vm116_vm0, %v12645_v8  ;;  %12958 = vmatprep.mubr.msk.f32.mxu1 %vm116_vm0, %v22150_v4  ;;  %v17277_v8 = vpack.c.bf16 %v12688_v58, %v12686_v57  ;;  %v12706_v57 = vld [vmem:[%s25160_s1 + $0x768] sm:$0xff]  ;;  %v12708_v58 = vld [vmem:[%s25160_s1 + $0x778] sm:$0xff] }
 0x2fc   :  { %v12716_v13 = vld [vmem:[%s25160_s1 + $0x7b8] sm:$0xff] }
 0x2fd   :  { %17248 = vmatpush1.bf16.msra.mxu0 %v17247_v6  ;;  %17536 = vmatpush1.bf16.msra.mxu1 %v17247_v6  ;;  %v12723_v5 = vld [vmem:[%s25161_s0 + $0x178] sm:$0xff] }
 0x2fe   :  { %17250 = vmatprep.subr.bf16.mxu0 %v17249_v10  ;;  %17538 = vmatprep.subr.bf16.mxu1 %v17249_v10 }
 0x301   :  { %17252 = vmatpush1.bf16.msra.mxu0 %v17251_v44  ;;  %17540 = vmatpush1.bf16.msra.mxu1 %v17251_v44 }
 0x302   :  { %17254 = vmatprep.subr.bf16.mxu0 %v17253_v18  ;;  %17542 = vmatprep.subr.bf16.mxu1 %v17253_v18  ;;  %v17279_v18 = vpack.c.bf16 %v12687_v2, %v12685_v1  ;;  %v12712_v1 = vld [vmem:[%s25160_s1 + $0x798] sm:$0xff] }
 0x305   :  { %17256 = vmatpush1.bf16.msra.mxu0 %v17255_v24  ;;  %17544 = vmatpush1.bf16.msra.mxu1 %v17255_v24  ;;  %v22267_v24 = vld [vmem:[%s25161_s0 + $0x190] sm:$0xff] }
 0x306   :  { %17258 = vmatprep.subr.bf16.mxu0 %v17257_v25  ;;  %17546 = vmatprep.subr.bf16.mxu1 %v17257_v25 }
 0x309   :  { %17260 = vmatpush1.bf16.msra.mxu0 %v17259_v37  ;;  %17548 = vmatpush1.bf16.msra.mxu1 %v17259_v37  ;;  %v12694_v37 = vld [vmem:[%s25160_s1 + $0x708] sm:$0xff] }
 0x30a   :  { %17262 = vmatprep.subr.bf16.mxu0 %v17261_v31  ;;  %17550 = vmatprep.subr.bf16.mxu1 %v17261_v31  ;;  %v12696_v31 = vld [vmem:[%s25160_s1 + $0x718] sm:$0xff] }
 0x30b   :  { %v17285_v40 = vpack.c.bf16 %v12696_v31, %v12694_v37  ;;  %v12727_v37 = vld [vmem:[%s25160_s1 + $0x7f8] sm:$0xff] }
 0x30d   :  { %17264 = vmatpush1.bf16.msra.mxu0 %v17263_v36  ;;  %17552 = vmatpush1.bf16.msra.mxu1 %v17263_v36  ;;  %v17283_v36 = vpack.c.bf16 %v12691_v29, %v12689_v27  ;;  %v12719_v27 = vld [vmem:[%s25160_s1 + $0x7d0] sm:$0xff]  ;;  %v12725_v29 = vld [vmem:[%s25160_s1 + $0x7e8] sm:$0xff] }
 0x30e   :  { %17266 = vmatprep.subr.bf16.mxu0 %v17265_v39  ;;  %17554 = vmatprep.subr.bf16.mxu1 %v17265_v39  ;;  %v12960_v39 = vld [vmem:[%s25161_s0 + $0x1a8] sm:$0xff] }
 0x311   :  { %17268 = vmatpush1.bf16.msra.mxu0 %v17267_v46  ;;  %17556 = vmatpush1.bf16.msra.mxu1 %v17267_v46  ;;  %v12700_v46 = vld [vmem:[%s25160_s1 + $0x738] sm:$0xff] }
 0x312   :  { %17270 = vmatprep.subr.bf16.mxu0 %v17269_v11  ;;  %17558 = vmatprep.subr.bf16.mxu1 %v17269_v11  ;;  %v17289_v49 = vpack.c.bf16 %v12700_v46, %v12698_v50  ;;  %v12959_v50 = vld [vmem:[%s25161_s0 + $0x1a0] sm:$0xff] }
 0x315   :  { %17272 = vmatpush1.bf16.msra.mxu0 %v17271_v52  ;;  %17560 = vmatpush1.bf16.msra.mxu1 %v17271_v52  ;;  %v12702_v52 = vld [vmem:[%s25160_s1 + $0x748] sm:$0xff] }
 0x316   :  { %17274 = vmatprep.subr.bf16.mxu0 %v17273_v54  ;;  %17562 = vmatprep.subr.bf16.mxu1 %v17273_v54  ;;  %v17293_v54 = vpack.c.bf16 %v12704_v59, %v12702_v52  ;;  %v12999_v52 = vld [vmem:[%s25161_s0 + $0x1b8] sm:$0xff] }
 0x317   :  { %v2815_v6 = vpop.f32.mrb[2].mxu0  ;;  %v3746_v10 = vpop.f32.mrb[2].mxu1 }
 0x318   :  { %v2834_v14 = vadd.f32 %v2827_v60, %v2815_v6  ;;  %v2817_v16 = vpop.f32.mrb[3].mxu0  ;;  %v3748_v44 = vpop.f32.mrb[3].mxu1  ;;  %v3765_v19 = vadd.f32 %v3758_v61, %v3746_v10  ;;  %v17295_v60 = vpack.c.bf16 %v12703_v56, %v12701_v55  ;;  %v17297_v61 = vpack.c.bf16 %v12708_v58, %v12706_v57  ;;  %v12709_v6 = vld [vmem:[%s25160_s1 + $0x780] sm:$0xff]  ;;  %v12711_v10 = vld [vmem:[%s25160_s1 + $0x790] sm:$0xff]  ;;  %v12737_v56 = vld [vmem:[%s25160_s1 + $0x848] sm:$0xff] }
 0x319   :  { %v2835_v20 = vadd.f32 %v2831_v62, %v2817_v16  ;;  %v3766_v23 = vadd.f32 %v3762_v63, %v3748_v44  ;;  %17276 = vmatpush1.bf16.msra.mxu0 %v17275_v0  ;;  %17564 = vmatpush1.bf16.msra.mxu1 %v17275_v0  ;;  %v12705_v62 = vld [vmem:[%s25160_s1 + $0x760] sm:$0xff]  ;;  %v12707_v63 = vld [vmem:[%s25160_s1 + $0x770] sm:$0xff]  ;;  %v12710_v0 = vld [vmem:[%s25160_s1 + $0x788] sm:$0xff]  ;;  %v17305_v16 = vpack.c.bf16 %v12716_v13, %v12714_v42 }
 0x31a   :  { %v22269_v25 = vmax.f32 %v2834_v14, 0.0  ;;  %17278 = vmatprep.subr.bf16.mxu0 %v17277_v8  ;;  %17566 = vmatprep.subr.bf16.mxu1 %v17277_v8  ;;  %v22289_v33 = vmax.f32 %v3765_v19, 0.0  ;;  %v17299_v2 = vpack.c.bf16 %v12707_v63, %v12705_v62  ;;  %v17301_v8 = vpack.c.bf16 %v12712_v1, %v12710_v0  ;;  %v12713_v44 = vld [vmem:[%s25160_s1 + $0x7a0] sm:$0xff]  ;;  %v12718_v19 = vld [vmem:[%s25160_s1 + $0x7c8] sm:$0xff]  ;;  %v12734_v55 = vld [vmem:[%s25160_s1 + $0x830] sm:$0xff] }
 0x31b   :  { %v22277_v30 = vmax.f32 %v2835_v20, 0.0  ;;  %v22291_v34 = vmax.f32 %v3766_v23, 0.0  ;;  %v17303_v14 = vpack.c.bf16 %v12711_v10, %v12709_v6  ;;  %v12720_v20 = vld [vmem:[%s25160_s1 + $0x7d8] sm:$0xff]  ;;  %v12738_v62 = vld [vmem:[%s25160_s1 + $0x850] sm:$0xff]  ;;  %v12741_v63 = vld [vmem:[%s25160_s1 + $0x868] sm:$0xff] }
 0x31c   :  { %4446 = vmatmul.mubr.f32.vlgmr.msra.gmra.mrb[4].mxu0 %v12644_v28  ;;  %5377 = vmatmul.mubr.f32.vlgmr.msra.gmra.mrb[4].mxu1 %v22267_v24  ;;  %v17309_v28 = vpack.c.bf16 %v12720_v20, %v12718_v19  ;;  %v12739_v57 = vld [vmem:[%s25160_s1 + $0x858] sm:$0xff]  ;;  %v12742_v6 = vld [vmem:[%s25160_s1 + $0x870] sm:$0xff]  ;;  %v12745_v10 = vld [vmem:[%s25160_s1 + $0x888] sm:$0xff] }
 0x31d   :  { %17280 = vmatpush1.bf16.msra.mxu0 %v17279_v18  ;;  %17568 = vmatpush1.bf16.msra.mxu1 %v17279_v18  ;;  %v19407_v35 = vpack.i.bf16 %v22277_v30, %v22269_v25  ;;  %v19412_v11 = vpack.i.bf16 %v22291_v34, %v22289_v33  ;;  %v12715_v18 = vld [vmem:[%s25160_s1 + $0x7b0] sm:$0xff]  ;;  %v12743_v0 = vld [vmem:[%s25160_s1 + $0x878] sm:$0xff] }
 0x31e   :  { %17282 = vmatprep.subr.bf16.mxu0 %v17281_v26  ;;  %17570 = vmatprep.subr.bf16.mxu1 %v17281_v26  ;;  %v17307_v23 = vpack.c.bf16 %v12715_v18, %v12713_v44  ;;  %v12717_v26 = vld [vmem:[%s25160_s1 + $0x7c0] sm:$0xff]  ;;  %v12747_v42 = vld [vmem:[%s25160_s1 + $0x898] sm:$0xff]  ;;  %v12746_v44 = vld [vmem:[%s25160_s1 + $0x890] sm:$0xff] }
 0x31f   :  { %19408 = vrot.lane.b32.xlu1 %v19407_v35, %s19438_s17  ;;  %12721 = vmatprep.mubr.msk.f32.mxu0 %vm116_vm0, %v12684_v32  ;;  %v17311_v31 = vpack.c.bf16 %v12719_v27, %v12717_v26  ;;  %v17313_v32 = vpack.c.bf16 %v12727_v37, %v12725_v29  ;;  %v12724_v35 = vld [vmem:[%s25160_s1 + $0x7e0] sm:$0xff]  ;;  %v12749_v18 = vld [vmem:[%s25160_s1 + $0x8a8] sm:$0xff]  ;;  %v12751_v19 = vld [vmem:[%s25160_s1 + $0x8b8] sm:$0xff] }
 0x320   :  { %12997 = vmatprep.mubr.msk.f32.mxu1 %vm116_vm0, %v12960_v39  ;;  %v12729_v39 = vld [vmem:[%s25160_s1 + $0x808] sm:$0xff]  ;;  %v12750_v26 = vld [vmem:[%s25160_s1 + $0x8b0] sm:$0xff]  ;;  %v12755_v29 = vld [vmem:[%s25160_s1 + $0x8d8] sm:$0xff] }
 0x321   :  { %17284 = vmatpush1.bf16.msra.mxu0 %v17283_v36  ;;  %17572 = vmatpush1.bf16.msra.mxu1 %v17283_v36  ;;  %v12726_v36 = vld [vmem:[%s25160_s1 + $0x7f0] sm:$0xff]  ;;  %v12753_v27 = vld [vmem:[%s25160_s1 + $0x8c8] sm:$0xff] }
 0x322   :  { %17286 = vmatprep.subr.bf16.mxu0 %v17285_v40  ;;  %17574 = vmatprep.subr.bf16.mxu1 %v17285_v40  ;;  %v12731_v40 = vld [vmem:[%s25160_s1 + $0x818] sm:$0xff]  ;;  %v17315_v43 = vpack.c.bf16 %v12726_v36, %v12724_v35  ;;  %v12754_v35 = vld [vmem:[%s25160_s1 + $0x8d0] sm:$0xff]  ;;  %v12757_v36 = vld [vmem:[%s25160_s1 + $0x8e8] sm:$0xff] }
 0x323   :  { %19413 = vrot.lane.b32.xlu1 %v19412_v11, %s19438_s17  ;;  %v17317_v46 = vpack.c.bf16 %v12731_v40, %v12729_v39  ;;  %v12728_v11 = vld [vmem:[%s25160_s1 + $0x800] sm:$0xff]  ;;  %v12759_v39 = vld [vmem:[%s25160_s1 + $0x8f8] sm:$0xff] }
 0x325   :  { %17288 = vmatpush1.bf16.msra.mxu0 %v17287_v47  ;;  %17576 = vmatpush1.bf16.msra.mxu1 %v17287_v47  ;;  %v12730_v47 = vld [vmem:[%s25160_s1 + $0x810] sm:$0xff] }
 0x326   :  { %17290 = vmatprep.subr.bf16.mxu0 %v17289_v49  ;;  %17578 = vmatprep.subr.bf16.mxu1 %v17289_v49  ;;  %v12733_v49 = vld [vmem:[%s25160_s1 + $0x828] sm:$0xff]  ;;  %v17319_v59 = vpack.c.bf16 %v12730_v47, %v12728_v11  ;;  %v13044_v11 = vld [vmem:[%s25160_s1 + $0x138] sm:$0xff] }
 0x329   :  { %17292 = vmatpush1.bf16.msra.mxu0 %v17291_v53  ;;  %17580 = vmatpush1.bf16.msra.mxu1 %v17291_v53  ;;  %v17321_v53 = vpack.c.bf16 %v12735_v51, %v12733_v49  ;;  %v13041_v51 = vld [vmem:[%s25160_s1 + $0x120] sm:$0xff] }
 0x32a   :  { %17294 = vmatprep.subr.bf16.mxu0 %v17293_v54  ;;  %17582 = vmatprep.subr.bf16.mxu1 %v17293_v54  ;;  %v12732_v54 = vld [vmem:[%s25160_s1 + $0x820] sm:$0xff] }
 0x32b   :  { %v17323_v58 = vpack.c.bf16 %v12734_v55, %v12732_v54  ;;  %v12998_v54 = vld [vmem:[%s25161_s0 + $0x1b0] sm:$0xff] }
 0x32d   :  { %17296 = vmatpush1.bf16.msra.mxu0 %v17295_v60  ;;  %17584 = vmatpush1.bf16.msra.mxu1 %v17295_v60  ;;  %v17325_v60 = vpack.c.bf16 %v12739_v57, %v12737_v56  ;;  %v13045_v57 = vld [vmem:[%s25160_s1 + $0x140] sm:$0xff] }
 0x32e   :  { %17298 = vmatprep.subr.bf16.mxu0 %v17297_v61  ;;  %17586 = vmatprep.subr.bf16.mxu1 %v17297_v61  ;;  %v12736_v61 = vld [vmem:[%s25160_s1 + $0x840] sm:$0xff] }
 0x32f   :  { %v17327_v1 = vpack.c.bf16 %v12738_v62, %v12736_v61  ;;  %v13052_v61 = vld [vmem:[%s25160_s1 + $0x178] sm:$0xff] }
 0x330   :  { %v13316_v62 = vld [vmem:[%s25161_s0 + $0x1d8] sm:$0xff] }
 0x331   :  { %17300 = vmatpush1.bf16.msra.mxu0 %v17299_v2  ;;  %17588 = vmatpush1.bf16.msra.mxu1 %v17299_v2  ;;  %v17329_v2 = vpack.c.bf16 %v12743_v0, %v12741_v63 }
 0x332   :  { %17302 = vmatprep.subr.bf16.mxu0 %v17301_v8  ;;  %17590 = vmatprep.subr.bf16.mxu1 %v17301_v8  ;;  %v12740_v8 = vld [vmem:[%s25160_s1 + $0x860] sm:$0xff] }
 0x333   :  { %v17331_v13 = vpack.c.bf16 %v12742_v6, %v12740_v8  ;;  %v13054_v8 = vld [vmem:[%s25160_s1 + $0x188] sm:$0xff]  ;;  %v13056_v6 = vld [vmem:[%s25160_s1 + $0x198] sm:$0xff] }
 0x335   :  { %17304 = vmatpush1.bf16.msra.mxu0 %v17303_v14  ;;  %17592 = vmatpush1.bf16.msra.mxu1 %v17303_v14  ;;  %v17333_v14 = vpack.c.bf16 %v12747_v42, %v12745_v10  ;;  %v17649_v42 = vpack.c.bf16 %v13056_v6, %v13054_v8  ;;  %v5642_v8 = vld [vmem:[%s25160_s1 + $0x30] sm:$0xff]  ;;  %v5645_v6 = vld [vmem:[%s25160_s1 + $0x48] sm:$0xff] }
 0x336   :  { %17306 = vmatprep.subr.bf16.mxu0 %v17305_v16  ;;  %17594 = vmatprep.subr.bf16.mxu1 %v17305_v16  ;;  %v12744_v16 = vld [vmem:[%s25160_s1 + $0x880] sm:$0xff] }
 0x337   :  { %v17335_v20 = vpack.c.bf16 %v12746_v44, %v12744_v16  ;;  %v13060_v16 = vld [vmem:[%s25160_s1 + $0x1b8] sm:$0xff] }
 0x339   :  { %17308 = vmatpush1.bf16.msra.mxu0 %v17307_v23  ;;  %17596 = vmatpush1.bf16.msra.mxu1 %v17307_v23  ;;  %v17337_v23 = vpack.c.bf16 %v12751_v19, %v12749_v18  ;;  %v13057_v19 = vld [vmem:[%s25160_s1 + $0x1a0] sm:$0xff] }
 0x33a   :  { %17310 = vmatprep.subr.bf16.mxu0 %v17309_v28  ;;  %17598 = vmatprep.subr.bf16.mxu1 %v17309_v28  ;;  %v12748_v28 = vld [vmem:[%s25160_s1 + $0x8a0] sm:$0xff] }
 0x33b   :  { %v17339_v37 = vpack.c.bf16 %v12750_v26, %v12748_v28  ;;  %v13064_v28 = vld [vmem:[%s25160_s1 + $0x1d8] sm:$0xff] }
 0x33d   :  { %17312 = vmatpush1.bf16.msra.mxu0 %v17311_v31  ;;  %17600 = vmatpush1.bf16.msra.mxu1 %v17311_v31  ;;  %v17341_v31 = vpack.c.bf16 %v12755_v29, %v12753_v27  ;;  %v13061_v29 = vld [vmem:[%s25160_s1 + $0x1c0] sm:$0xff] }
 0x33e   :  { %17314 = vmatprep.subr.bf16.mxu0 %v17313_v32  ;;  %17602 = vmatprep.subr.bf16.mxu1 %v17313_v32  ;;  %v12752_v32 = vld [vmem:[%s25160_s1 + $0x8c0] sm:$0xff] }
 0x33f   :  { %v17343_v40 = vpack.c.bf16 %v12754_v35, %v12752_v32  ;;  %v13068_v32 = vld [vmem:[%s25160_s1 + $0x1f8] sm:$0xff] }
 0x340   :  { %4561 = vmatmul.mubr.f32.vlgmr.msra.gmra.mrb[4].mxu0 %v12683_v41  ;;  %5492 = vmatmul.mubr.f32.vlgmr.msra.gmra.mrb[4].mxu1 %v12959_v50  ;;  %v17345_v41 = vpack.c.bf16 %v12759_v39, %v12757_v36  ;;  %v12758_v50 = vld [vmem:[%s25160_s1 + $0x8f0] sm:$0xff]  ;;  %v13065_v39 = vld [vmem:[%s25160_s1 + $0x1e0] sm:$0xff] }
 0x341   :  { %17316 = vmatpush1.bf16.msra.mxu0 %v17315_v43  ;;  %17604 = vmatpush1.bf16.msra.mxu1 %v17315_v43  ;;  %v12756_v43 = vld [vmem:[%s25160_s1 + $0x8e0] sm:$0xff] }
 0x342   :  { %17318 = vmatprep.subr.bf16.mxu0 %v17317_v46  ;;  %17606 = vmatprep.subr.bf16.mxu1 %v17317_v46  ;;  %v13042_v46 = vld [vmem:[%s25160_s1 + $0x128] sm:$0xff]  ;;  %v17347_v47 = vpack.c.bf16 %v12758_v50, %v12756_v43  ;;  %v13072_v43 = vld [vmem:[%s25160_s1 + $0x218] sm:$0xff] }
 0x343   :  { %12760 = vmatprep.mubr.msk.f32.mxu0 %vm116_vm0, %v12723_v5  ;;  %13036 = vmatprep.mubr.msk.f32.mxu1 %vm116_vm0, %v12999_v52  ;;  %v17637_v49 = vpack.c.bf16 %v13044_v11, %v13042_v46  ;;  %v13043_v5 = vld [vmem:[%s25160_s1 + $0x130] sm:$0xff]  ;;  %v13046_v52 = vld [vmem:[%s25160_s1 + $0x148] sm:$0xff]  ;;  %v13069_v11 = vld [vmem:[%s25160_s1 + $0x200] sm:$0xff] }
 0x344   :  { %v17639_v55 = vpack.c.bf16 %v13043_v5, %v13041_v51  ;;  %v13076_v51 = vld [vmem:[%s25160_s1 + $0x238] sm:$0xff] }
 0x345   :  { %17320 = vmatpush1.bf16.msra.mxu0 %v17319_v59  ;;  %17608 = vmatpush1.bf16.msra.mxu1 %v17319_v59  ;;  %v13048_v59 = vld [vmem:[%s25160_s1 + $0x158] sm:$0xff] }
 0x346   :  { %17322 = vmatprep.subr.bf16.mxu0 %v17321_v53  ;;  %17610 = vmatprep.subr.bf16.mxu1 %v17321_v53  ;;  %v12722_v53 = vld [vmem:[%s25161_s0 + $0x170] sm:$0xff]  ;;  %v17641_v56 = vpack.c.bf16 %v13048_v59, %v13046_v52  ;;  %v13073_v59 = vld [vmem:[%s25160_s1 + $0x220] sm:$0xff] }
 0x349   :  { %17324 = vmatpush1.bf16.msra.mxu0 %v17323_v58  ;;  %17612 = vmatpush1.bf16.msra.mxu1 %v17323_v58  ;;  %v13047_v58 = vld [vmem:[%s25160_s1 + $0x150] sm:$0xff] }
 0x34a   :  { %17326 = vmatprep.subr.bf16.mxu0 %v17325_v60  ;;  %17614 = vmatprep.subr.bf16.mxu1 %v17325_v60  ;;  %v13050_v60 = vld [vmem:[%s25160_s1 + $0x168] sm:$0xff]  ;;  %v17643_v63 = vpack.c.bf16 %v13047_v58, %v13045_v57  ;;  %v5636_v58 = vld [vmem:[%s25160_s1] sm:$0xff] }
 0x34b   :  { %v17645_v0 = vpack.c.bf16 %v13052_v61, %v13050_v60  ;;  %v5638_v60 = vld [vmem:[%s25160_s1 + $0x10] sm:$0xff]  ;;  %v5641_v61 = vld [vmem:[%s25160_s1 + $0x28] sm:$0xff] }
 0x34d   :  { %17328 = vmatpush1.bf16.msra.mxu0 %v17327_v1  ;;  %17616 = vmatpush1.bf16.msra.mxu1 %v17327_v1  ;;  %v13049_v1 = vld [vmem:[%s25160_s1 + $0x160] sm:$0xff] }
 0x34e   :  { %17330 = vmatprep.subr.bf16.mxu0 %v17329_v2  ;;  %17618 = vmatprep.subr.bf16.mxu1 %v17329_v2  ;;  %v13051_v2 = vld [vmem:[%s25160_s1 + $0x170] sm:$0xff] }
 0x34f   :  { %v17647_v10 = vpack.c.bf16 %v13051_v2, %v13049_v1  ;;  %v5640_v2 = vld [vmem:[%s25160_s1 + $0x20] sm:$0xff] }
 0x351   :  { %17332 = vmatpush1.bf16.msra.mxu0 %v17331_v13  ;;  %17620 = vmatpush1.bf16.msra.mxu1 %v17331_v13  ;;  %v13053_v13 = vld [vmem:[%s25160_s1 + $0x180] sm:$0xff] }
 0x352   :  { %17334 = vmatprep.subr.bf16.mxu0 %v17333_v14  ;;  %17622 = vmatprep.subr.bf16.mxu1 %v17333_v14  ;;  %v13055_v14 = vld [vmem:[%s25160_s1 + $0x190] sm:$0xff] }
 0x353   :  { %v17651_v44 = vpack.c.bf16 %v13055_v14, %v13053_v13  ;;  %v22664_v13 = vld [vmem:[%s25161_s0 + $0x1c8] sm:$0xff]  ;;  %v17679_v14 = vpack.c.bf16 %v5642_v8, %v5640_v2  ;;  %v13081_v8 = vld [vmem:[%s25160_s1 + $0x240] sm:$0xff] }
 0x355   :  { %17336 = vmatpush1.bf16.msra.mxu0 %v17335_v20  ;;  %17624 = vmatpush1.bf16.msra.mxu1 %v17335_v20  ;;  %v13059_v20 = vld [vmem:[%s25160_s1 + $0x1b0] sm:$0xff] }
 0x356   :  { %17338 = vmatprep.subr.bf16.mxu0 %v17337_v23  ;;  %17626 = vmatprep.subr.bf16.mxu1 %v17337_v23  ;;  %v13062_v23 = vld [vmem:[%s25160_s1 + $0x1c8] sm:$0xff]  ;;  %v17655_v26 = vpack.c.bf16 %v13059_v20, %v13057_v19 }
 0x357   :  { %v17657_v27 = vpack.c.bf16 %v13064_v28, %v13062_v23  ;;  %v5648_v23 = vld [vmem:[%s25160_s1 + $0x60] sm:$0xff]  ;;  %v5650_v28 = vld [vmem:[%s25160_s1 + $0x70] sm:$0xff] }
 0x359   :  { %17340 = vmatpush1.bf16.msra.mxu0 %v17339_v37  ;;  %17628 = vmatpush1.bf16.msra.mxu1 %v17339_v37  ;;  %v13063_v37 = vld [vmem:[%s25160_s1 + $0x1d0] sm:$0xff] }
 0x35a   :  { %17342 = vmatprep.subr.bf16.mxu0 %v17341_v31  ;;  %17630 = vmatprep.subr.bf16.mxu1 %v17341_v31  ;;  %v13066_v31 = vld [vmem:[%s25160_s1 + $0x1e8] sm:$0xff]  ;;  %v17659_v35 = vpack.c.bf16 %v13063_v37, %v13061_v29  ;;  %v17687_v29 = vpack.c.bf16 %v5650_v28, %v5648_v23 }
 0x35b   :  { %v17661_v36 = vpack.c.bf16 %v13068_v32, %v13066_v31  ;;  %v5652_v31 = vld [vmem:[%s25160_s1 + $0x80] sm:$0xff]  ;;  %v5654_v32 = vld [vmem:[%s25160_s1 + $0x90] sm:$0xff]  ;;  %v13080_v23 = vld [vmem:[%s25161_s0 + $0x1a8] sm:$0xff] }
 0x35c   :  { %v13356_v28 = vld [vmem:[%s25161_s0 + $0x1e8] sm:$0xff] }
 0x35d   :  { %17344 = vmatpush1.bf16.msra.mxu0 %v17343_v40  ;;  %17632 = vmatpush1.bf16.msra.mxu1 %v17343_v40  ;;  %v13067_v40 = vld [vmem:[%s25160_s1 + $0x1f0] sm:$0xff] }
 0x35e   :  { %17346 = vmatprep.subr.bf16.mxu0 %v17345_v41  ;;  %17634 = vmatprep.subr.bf16.mxu1 %v17345_v41  ;;  %v13070_v41 = vld [vmem:[%s25160_s1 + $0x208] sm:$0xff]  ;;  %v17663_v50 = vpack.c.bf16 %v13067_v40, %v13065_v39  ;;  %v17691_v39 = vpack.c.bf16 %v5654_v32, %v5652_v31  ;;  %v13096_v32 = vld [vmem:[%s25160_s1 + $0x2b8] sm:$0xff] }
 0x35f   :  { %v17665_v46 = vpack.c.bf16 %v13072_v43, %v13070_v41  ;;  %v5656_v41 = vld [vmem:[%s25160_s1 + $0xa0] sm:$0xff]  ;;  %v5658_v43 = vld [vmem:[%s25160_s1 + $0xb0] sm:$0xff]  ;;  %v13094_v31 = vld [vmem:[%s25160_s1 + $0x2a8] sm:$0xff] }
 0x361   :  { %17348 = vmatpush1.bf16.msra.mxu0 %v17347_v47  ;;  %17636 = vmatpush1.bf16.msra.mxu1 %v17347_v47  ;;  %v13071_v47 = vld [vmem:[%s25160_s1 + $0x210] sm:$0xff] }
 0x362   :  { %17638 = vmatprep.subr.bf16.mxu0 %v17637_v49  ;;  %17926 = vmatprep.subr.bf16.mxu1 %v17637_v49  ;;  %v13074_v49 = vld [vmem:[%s25160_s1 + $0x228] sm:$0xff]  ;;  %v17667_v5 = vpack.c.bf16 %v13071_v47, %v13069_v11  ;;  %v17695_v11 = vpack.c.bf16 %v5658_v43, %v5656_v41  ;;  %v13100_v43 = vld [vmem:[%s25160_s1 + $0x2d8] sm:$0xff] }
 0x363   :  { %v17669_v52 = vpack.c.bf16 %v13076_v51, %v13074_v49  ;;  %v5660_v49 = vld [vmem:[%s25160_s1 + $0xc0] sm:$0xff]  ;;  %v5662_v51 = vld [vmem:[%s25160_s1 + $0xd0] sm:$0xff]  ;;  %v13098_v41 = vld [vmem:[%s25160_s1 + $0x2c8] sm:$0xff] }
 0x364   :  { %4676 = vmatmul.mubr.f32.vlgmr.msra.gmra.mrb[4].mxu0 %v12722_v53  ;;  %5607 = vmatmul.mubr.f32.vlgmr.msra.gmra.mrb[4].mxu1 %v12998_v54  ;;  %v13075_v53 = vld [vmem:[%s25160_s1 + $0x230] sm:$0xff]  ;;  %v5637_v54 = vld [vmem:[%s25160_s1 + $0x8] sm:$0xff] }
 0x365   :  { %17640 = vmatpush1.bf16.msra.mxu0 %v17639_v55  ;;  %17928 = vmatpush1.bf16.msra.mxu1 %v17639_v55  ;;  %v5639_v55 = vld [vmem:[%s25160_s1 + $0x18] sm:$0xff] }
 0x366   :  { %17642 = vmatprep.subr.bf16.mxu0 %v17641_v56  ;;  %17930 = vmatprep.subr.bf16.mxu1 %v17641_v56  ;;  %v17671_v56 = vpack.c.bf16 %v13075_v53, %v13073_v59  ;;  %v17673_v57 = vpack.c.bf16 %v5639_v55, %v5637_v54  ;;  %v17699_v59 = vpack.c.bf16 %v5662_v51, %v5660_v49  ;;  %v5664_v54 = vld [vmem:[%s25160_s1 + $0xe0] sm:$0xff]  ;;  %v5666_v55 = vld [vmem:[%s25160_s1 + $0xf0] sm:$0xff]  ;;  %v13102_v49 = vld [vmem:[%s25160_s1 + $0x2e8] sm:$0xff] }
 0x367   :  { %13077 = vmatprep.mubr.msk.f32.mxu0 %vm116_vm0, %v22150_v4  ;;  %13353 = vmatprep.mubr.msk.f32.mxu1 %vm116_vm0, %v13316_v62  ;;  %v13058_v4 = vld [vmem:[%s25160_s1 + $0x1a8] sm:$0xff]  ;;  %v5643_v62 = vld [vmem:[%s25160_s1 + $0x38] sm:$0xff] }
 0x368   :  { %v17653_v18 = vpack.c.bf16 %v13060_v16, %v13058_v4  ;;  %v17677_v1 = vpack.c.bf16 %v5643_v62, %v5641_v61  ;;  %v5646_v16 = vld [vmem:[%s25160_s1 + $0x50] sm:$0xff]  ;;  %v5668_v61 = vld [vmem:[%s25160_s1 + $0x100] sm:$0xff]  ;;  %v13104_v51 = vld [vmem:[%s25160_s1 + $0x2f8] sm:$0xff] }
 0x369   :  { %17644 = vmatpush1.bf16.msra.mxu0 %v17643_v63  ;;  %17932 = vmatpush1.bf16.msra.mxu1 %v17643_v63  ;;  %v17675_v63 = vpack.c.bf16 %v5638_v60, %v5636_v58  ;;  %v17703_v58 = vpack.c.bf16 %v5666_v55, %v5664_v54  ;;  %v5670_v62 = vld [vmem:[%s25160_s1 + $0x110] sm:$0xff]  ;;  %v13106_v54 = vld [vmem:[%s25160_s1 + $0x308] sm:$0xff]  ;;  %v13108_v55 = vld [vmem:[%s25160_s1 + $0x318] sm:$0xff] }
 0x36a   :  { %17646 = vmatprep.subr.bf16.mxu0 %v17645_v0  ;;  %17934 = vmatprep.subr.bf16.mxu1 %v17645_v0  ;;  %v13315_v0 = vld [vmem:[%s25161_s0 + $0x1d0] sm:$0xff] }
 0x36d   :  { %17648 = vmatpush1.bf16.msra.mxu0 %v17647_v10  ;;  %17936 = vmatpush1.bf16.msra.mxu1 %v17647_v10  ;;  %v5647_v10 = vld [vmem:[%s25160_s1 + $0x58] sm:$0xff] }
 0x36e   :  { %17650 = vmatprep.subr.bf16.mxu0 %v17649_v42  ;;  %17938 = vmatprep.subr.bf16.mxu1 %v17649_v42  ;;  %v13038_v42 = vld [vmem:[%s25161_s0 + $0x188] sm:$0xff]  ;;  %v17681_v4 = vpack.c.bf16 %v5647_v10, %v5645_v6  ;;  %v13083_v6 = vld [vmem:[%s25160_s1 + $0x250] sm:$0xff] }
 0x36f   :  { %v13086_v10 = vld [vmem:[%s25160_s1 + $0x268] sm:$0xff] }
 0x371   :  { %17652 = vmatpush1.bf16.msra.mxu0 %v17651_v44  ;;  %17940 = vmatpush1.bf16.msra.mxu1 %v17651_v44  ;;  %v5649_v44 = vld [vmem:[%s25160_s1 + $0x68] sm:$0xff] }
 0x372   :  { %17654 = vmatprep.subr.bf16.mxu0 %v17653_v18  ;;  %17942 = vmatprep.subr.bf16.mxu1 %v17653_v18  ;;  %v5651_v18 = vld [vmem:[%s25160_s1 + $0x78] sm:$0xff] }
 0x373   :  { %v17685_v20 = vpack.c.bf16 %v5651_v18, %v5649_v44  ;;  %v13085_v44 = vld [vmem:[%s25160_s1 + $0x260] sm:$0xff]  ;;  %v13087_v18 = vld [vmem:[%s25160_s1 + $0x270] sm:$0xff] }
 0x375   :  { %17656 = vmatpush1.bf16.msra.mxu0 %v17655_v26  ;;  %17944 = vmatpush1.bf16.msra.mxu1 %v17655_v26  ;;  %v5653_v26 = vld [vmem:[%s25160_s1 + $0x88] sm:$0xff] }
 0x376   :  { %17658 = vmatprep.subr.bf16.mxu0 %v17657_v27  ;;  %17946 = vmatprep.subr.bf16.mxu1 %v17657_v27  ;;  %v5655_v27 = vld [vmem:[%s25160_s1 + $0x98] sm:$0xff] }
 0x377   :  { %v17689_v37 = vpack.c.bf16 %v5655_v27, %v5653_v26  ;;  %v17715_v26 = vpack.c.bf16 %v13087_v18, %v13085_v44  ;;  %v13123_v44 = vld [vmem:[%s25160_s1 + $0x378] sm:$0xff] }
 0x379   :  { %17660 = vmatpush1.bf16.msra.mxu0 %v17659_v35  ;;  %17948 = vmatpush1.bf16.msra.mxu1 %v17659_v35  ;;  %v5657_v35 = vld [vmem:[%s25160_s1 + $0xa8] sm:$0xff] }
 0x37a   :  { %17662 = vmatprep.subr.bf16.mxu0 %v17661_v36  ;;  %17950 = vmatprep.subr.bf16.mxu1 %v17661_v36  ;;  %v5659_v36 = vld [vmem:[%s25160_s1 + $0xb8] sm:$0xff] }
 0x37b   :  { %v17693_v40 = vpack.c.bf16 %v5659_v36, %v5657_v35  ;;  %v17721_v36 = vpack.c.bf16 %v13096_v32, %v13094_v31  ;;  %v13124_v32 = vld [vmem:[%s25160_s1 + $0x380] sm:$0xff] }
 0x37d   :  { %17664 = vmatpush1.bf16.msra.mxu0 %v17663_v50  ;;  %17952 = vmatpush1.bf16.msra.mxu1 %v17663_v50  ;;  %v5661_v50 = vld [vmem:[%s25160_s1 + $0xc8] sm:$0xff] }
 0x37e   :  { %17666 = vmatprep.subr.bf16.mxu0 %v17665_v46  ;;  %17954 = vmatprep.subr.bf16.mxu1 %v17665_v46  ;;  %v5663_v46 = vld [vmem:[%s25160_s1 + $0xd8] sm:$0xff] }
 0x37f   :  { %v17697_v47 = vpack.c.bf16 %v5663_v46, %v5661_v50  ;;  %v17725_v46 = vpack.c.bf16 %v13100_v43, %v13098_v41  ;;  %v13395_v41 = vld [vmem:[%s25161_s0 + $0x1f8] sm:$0xff] }
 0x381   :  { %17668 = vmatpush1.bf16.msra.mxu0 %v17667_v5  ;;  %17956 = vmatpush1.bf16.msra.mxu1 %v17667_v5  ;;  %v5665_v5 = vld [vmem:[%s25160_s1 + $0xe8] sm:$0xff] }
 0x382   :  { %17670 = vmatprep.subr.bf16.mxu0 %v17669_v52  ;;  %17958 = vmatprep.subr.bf16.mxu1 %v17669_v52  ;;  %v5667_v52 = vld [vmem:[%s25160_s1 + $0xf8] sm:$0xff] }
 0x383   :  { %v17701_v53 = vpack.c.bf16 %v5667_v52, %v5665_v5  ;;  %v17729_v52 = vpack.c.bf16 %v13104_v51, %v13102_v49  ;;  %v13135_v49 = vld [vmem:[%s25160_s1 + $0x3d8] sm:$0xff] }
 0x385   :  { %17672 = vmatpush1.bf16.msra.mxu0 %v17671_v56  ;;  %17960 = vmatpush1.bf16.msra.mxu1 %v17671_v56  ;;  %v5669_v56 = vld [vmem:[%s25160_s1 + $0x108] sm:$0xff] }
 0x386   :  { %17674 = vmatprep.subr.bf16.mxu0 %v17673_v57  ;;  %17962 = vmatprep.subr.bf16.mxu1 %v17673_v57  ;;  %v5671_v57 = vld [vmem:[%s25160_s1 + $0x118] sm:$0xff] }
 0x387   :  { %v17705_v60 = vpack.c.bf16 %v5671_v57, %v5669_v56  ;;  %v17733_v57 = vpack.c.bf16 %v13108_v55, %v13106_v54  ;;  %v13139_v54 = vld [vmem:[%s25160_s1 + $0x3f8] sm:$0xff] }
 0x388   :  { %5778 = vmatmul.mubr.f32.vlgmr.msra.gmra.mrb[6].mxu0 %v22267_v24  ;;  %6709 = vmatmul.mubr.f32.vlgmr.msra.gmra.mrb[6].mxu1 %v13315_v0  ;;  %v5644_v24 = vld [vmem:[%s25160_s1 + $0x40] sm:$0xff]  ;;  %v13084_v0 = vld [vmem:[%s25160_s1 + $0x258] sm:$0xff] }
 0x389   :  { %17676 = vmatpush1.bf16.msra.mxu0 %v17675_v63  ;;  %17964 = vmatpush1.bf16.msra.mxu1 %v17675_v63  ;;  %v17683_v19 = vpack.c.bf16 %v5646_v16, %v5644_v24  ;;  %v13082_v63 = vld [vmem:[%s25160_s1 + $0x248] sm:$0xff]  ;;  %v22771_v24 = vld [vmem:[%s25161_s0 + $0x1c0] sm:$0xff] }
 0x38a   :  { %17678 = vmatprep.subr.bf16.mxu0 %v17677_v1  ;;  %17966 = vmatprep.subr.bf16.mxu1 %v17677_v1  ;;  %v17707_v1 = vpack.c.bf16 %v5670_v62, %v5668_v61  ;;  %v17709_v2 = vpack.c.bf16 %v13084_v0, %v13082_v63  ;;  %v13110_v61 = vld [vmem:[%s25160_s1 + $0x328] sm:$0xff]  ;;  %v13112_v62 = vld [vmem:[%s25160_s1 + $0x338] sm:$0xff] }
 0x38b   :  { %13078 = vmatprep.mubr.msk.f32.mxu0 %vm116_vm0, %v13038_v42  ;;  %13354 = vmatprep.mubr.msk.f32.mxu1 %vm116_vm0, %v22664_v13  ;;  %v13088_v42 = vld [vmem:[%s25160_s1 + $0x278] sm:$0xff]  ;;  %v17737_v0 = vpack.c.bf16 %v13112_v62, %v13110_v61 }
 0x38c   :  { %v17713_v16 = vpack.c.bf16 %v13088_v42, %v13086_v10  ;;  %v13143_v61 = vld [vmem:[%s25160_s1 + $0x418] sm:$0xff] }
 0x38d   :  { %17680 = vmatpush1.bf16.msra.mxu0 %v17679_v14  ;;  %17968 = vmatpush1.bf16.msra.mxu1 %v17679_v14  ;;  %v13037_v14 = vld [vmem:[%s25161_s0 + $0x180] sm:$0xff] }
 0x38e   :  { %17682 = vmatprep.subr.bf16.mxu0 %v17681_v4  ;;  %17970 = vmatprep.subr.bf16.mxu1 %v17681_v4  ;;  %v17711_v4 = vpack.c.bf16 %v13083_v6, %v13081_v8  ;;  %v13114_v8 = vld [vmem:[%s25160_s1 + $0x348] sm:$0xff]  ;;  %v13116_v6 = vld [vmem:[%s25160_s1 + $0x358] sm:$0xff] }
 0x38f   :  { %v17741_v42 = vpack.c.bf16 %v13116_v6, %v13114_v8  ;;  %v13147_v8 = vld [vmem:[%s25160_s1 + $0x438] sm:$0xff] }
 0x391   :  { %17684 = vmatpush1.bf16.msra.mxu0 %v17683_v19  ;;  %17972 = vmatpush1.bf16.msra.mxu1 %v17683_v19  ;;  %v13090_v19 = vld [vmem:[%s25160_s1 + $0x288] sm:$0xff] }
 0x392   :  { %17686 = vmatprep.subr.bf16.mxu0 %v17685_v20  ;;  %17974 = vmatprep.subr.bf16.mxu1 %v17685_v20  ;;  %v13092_v20 = vld [vmem:[%s25160_s1 + $0x298] sm:$0xff] }
 0x393   :  { %v17717_v27 = vpack.c.bf16 %v13092_v20, %v13090_v19  ;;  %v13120_v20 = vld [vmem:[%s25160_s1 + $0x360] sm:$0xff] }
 0x395   :  { %17688 = vmatpush1.bf16.msra.mxu0 %v17687_v29  ;;  %17976 = vmatpush1.bf16.msra.mxu1 %v17687_v29  ;;  %v13089_v29 = vld [vmem:[%s25160_s1 + $0x280] sm:$0xff] }
 0x396   :  { %17690 = vmatprep.subr.bf16.mxu0 %v17689_v37  ;;  %17978 = vmatprep.subr.bf16.mxu1 %v17689_v37  ;;  %v13091_v37 = vld [vmem:[%s25160_s1 + $0x290] sm:$0xff] }
 0x397   :  { %v17719_v35 = vpack.c.bf16 %v13091_v37, %v13089_v29  ;;  %v13355_v37 = vld [vmem:[%s25161_s0 + $0x1e0] sm:$0xff] }
 0x399   :  { %17692 = vmatpush1.bf16.msra.mxu0 %v17691_v39  ;;  %17980 = vmatpush1.bf16.msra.mxu1 %v17691_v39  ;;  %v13093_v39 = vld [vmem:[%s25160_s1 + $0x2a0] sm:$0xff] }
 0x39a   :  { %17694 = vmatprep.subr.bf16.mxu0 %v17693_v40  ;;  %17982 = vmatprep.subr.bf16.mxu1 %v17693_v40  ;;  %v13095_v40 = vld [vmem:[%s25160_s1 + $0x2b0] sm:$0xff] }
 0x39b   :  { %v17723_v50 = vpack.c.bf16 %v13095_v40, %v13093_v39  ;;  %v13131_v39 = vld [vmem:[%s25160_s1 + $0x3b8] sm:$0xff] }
 0x39c   :  { %v13119_v40 = vld [vmem:[%s25161_s0 + $0x1b8] sm:$0xff] }
 0x39d   :  { %17696 = vmatpush1.bf16.msra.mxu0 %v17695_v11  ;;  %17984 = vmatpush1.bf16.msra.mxu1 %v17695_v11  ;;  %v13097_v11 = vld [vmem:[%s25160_s1 + $0x2c0] sm:$0xff] }
 0x39e   :  { %17698 = vmatprep.subr.bf16.mxu0 %v17697_v47  ;;  %17986 = vmatprep.subr.bf16.mxu1 %v17697_v47  ;;  %v13099_v47 = vld [vmem:[%s25160_s1 + $0x2d0] sm:$0xff] }
 0x39f   :  { %v17727_v5 = vpack.c.bf16 %v13099_v47, %v13097_v11  ;;  %v13130_v11 = vld [vmem:[%s25160_s1 + $0x3b0] sm:$0xff]  ;;  %v13133_v47 = vld [vmem:[%s25160_s1 + $0x3c8] sm:$0xff] }
 0x3a1   :  { %17700 = vmatpush1.bf16.msra.mxu0 %v17699_v59  ;;  %17988 = vmatpush1.bf16.msra.mxu1 %v17699_v59  ;;  %v13101_v59 = vld [vmem:[%s25160_s1 + $0x2e0] sm:$0xff] }
 0x3a2   :  { %17702 = vmatprep.subr.bf16.mxu0 %v17701_v53  ;;  %17990 = vmatprep.subr.bf16.mxu1 %v17701_v53  ;;  %v13103_v53 = vld [vmem:[%s25160_s1 + $0x2f0] sm:$0xff] }
 0x3a3   :  { %v17731_v56 = vpack.c.bf16 %v13103_v53, %v13101_v59  ;;  %v13134_v59 = vld [vmem:[%s25160_s1 + $0x3d0] sm:$0xff]  ;;  %v13137_v53 = vld [vmem:[%s25160_s1 + $0x3e8] sm:$0xff] }
 0x3a5   :  { %17704 = vmatpush1.bf16.msra.mxu0 %v17703_v58  ;;  %17992 = vmatpush1.bf16.msra.mxu1 %v17703_v58  ;;  %v13105_v58 = vld [vmem:[%s25160_s1 + $0x300] sm:$0xff] }
 0x3a6   :  { %17706 = vmatprep.subr.bf16.mxu0 %v17705_v60  ;;  %17994 = vmatprep.subr.bf16.mxu1 %v17705_v60  ;;  %v13107_v60 = vld [vmem:[%s25160_s1 + $0x310] sm:$0xff] }
 0x3a7   :  { %v17735_v63 = vpack.c.bf16 %v13107_v60, %v13105_v58  ;;  %v13138_v58 = vld [vmem:[%s25160_s1 + $0x3f0] sm:$0xff]  ;;  %v13141_v60 = vld [vmem:[%s25160_s1 + $0x408] sm:$0xff] }
 0x3a9   :  { %17708 = vmatpush1.bf16.msra.mxu0 %v17707_v1  ;;  %17996 = vmatpush1.bf16.msra.mxu1 %v17707_v1  ;;  %v13109_v1 = vld [vmem:[%s25160_s1 + $0x320] sm:$0xff] }
 0x3aa   :  { %17710 = vmatprep.subr.bf16.mxu0 %v17709_v2  ;;  %17998 = vmatprep.subr.bf16.mxu1 %v17709_v2  ;;  %v13111_v2 = vld [vmem:[%s25160_s1 + $0x330] sm:$0xff] }
 0x3ab   :  { %v17739_v10 = vpack.c.bf16 %v13111_v2, %v13109_v1  ;;  %v13142_v1 = vld [vmem:[%s25160_s1 + $0x410] sm:$0xff]  ;;  %v13145_v2 = vld [vmem:[%s25160_s1 + $0x428] sm:$0xff] }
 0x3ac   :  { %5852 = vmatmul.mubr.f32.vlgmr.msra.gmra.mrb[6].mxu0 %v13037_v14  ;;  %6783 = vmatmul.mubr.f32.vlgmr.msra.gmra.mrb[6].mxu1 %v22771_v24  ;;  %v13113_v14 = vld [vmem:[%s25160_s1 + $0x340] sm:$0xff] }
 0x3ad   :  { %17712 = vmatpush1.bf16.msra.mxu0 %v17711_v4  ;;  %18000 = vmatpush1.bf16.msra.mxu1 %v17711_v4  ;;  %v13115_v4 = vld [vmem:[%s25160_s1 + $0x350] sm:$0xff] }
 0x3ae   :  { %17714 = vmatprep.subr.bf16.mxu0 %v17713_v16  ;;  %18002 = vmatprep.subr.bf16.mxu1 %v17713_v16  ;;  %v13121_v16 = vld [vmem:[%s25160_s1 + $0x368] sm:$0xff]  ;;  %v17743_v18 = vpack.c.bf16 %v13115_v4, %v13113_v14  ;;  %v13146_v14 = vld [vmem:[%s25160_s1 + $0x430] sm:$0xff] }
 0x3af   :  { %13117 = vmatprep.mubr.msk.f32.mxu0 %vm116_vm0, %v13080_v23  ;;  %13393 = vmatprep.mubr.msk.f32.mxu1 %vm116_vm0, %v13356_v28  ;;  %v17745_v19 = vpack.c.bf16 %v13123_v44, %v13121_v16  ;;  %v13122_v23 = vld [vmem:[%s25160_s1 + $0x370] sm:$0xff]  ;;  %v13125_v28 = vld [vmem:[%s25160_s1 + $0x388] sm:$0xff]  ;;  %v13151_v16 = vld [vmem:[%s25160_s1 + $0x458] sm:$0xff] }
 0x3b0   :  { %v17747_v29 = vpack.c.bf16 %v13122_v23, %v13120_v20  ;;  %v13149_v4 = vld [vmem:[%s25160_s1 + $0x448] sm:$0xff]  ;;  %v13150_v20 = vld [vmem:[%s25160_s1 + $0x450] sm:$0xff] }
 0x3b1   :  { %17716 = vmatpush1.bf16.msra.mxu0 %v17715_v26  ;;  %18004 = vmatpush1.bf16.msra.mxu1 %v17715_v26  ;;  %v13127_v26 = vld [vmem:[%s25160_s1 + $0x398] sm:$0xff]  ;;  %v13153_v23 = vld [vmem:[%s25160_s1 + $0x468] sm:$0xff] }
 0x3b2   :  { %17718 = vmatprep.subr.bf16.mxu0 %v17717_v27  ;;  %18006 = vmatprep.subr.bf16.mxu1 %v17717_v27  ;;  %v13079_v27 = vld [vmem:[%s25161_s0 + $0x1a0] sm:$0xff]  ;;  %v17749_v31 = vpack.c.bf16 %v13127_v26, %v13125_v28  ;;  %v13155_v28 = vld [vmem:[%s25160_s1 + $0x478] sm:$0xff] }
 0x3b5   :  { %17720 = vmatpush1.bf16.msra.mxu0 %v17719_v35  ;;  %18008 = vmatpush1.bf16.msra.mxu1 %v17719_v35  ;;  %v13126_v35 = vld [vmem:[%s25160_s1 + $0x390] sm:$0xff] }
 0x3b6   :  { %17722 = vmatprep.subr.bf16.mxu0 %v17721_v36  ;;  %18010 = vmatprep.subr.bf16.mxu1 %v17721_v36  ;;  %v13129_v36 = vld [vmem:[%s25160_s1 + $0x3a8] sm:$0xff]  ;;  %v17751_v43 = vpack.c.bf16 %v13126_v35, %v13124_v32  ;;  %v13162_v32 = vld [vmem:[%s25160_s1 + $0x498] sm:$0xff] }
 0x3b9   :  { %17724 = vmatpush1.bf16.msra.mxu0 %v17723_v50  ;;  %18012 = vmatpush1.bf16.msra.mxu1 %v17723_v50  ;;  %v17753_v50 = vpack.c.bf16 %v13131_v39, %v13129_v36  ;;  %v13159_v39 = vld [vmem:[%s25160_s1 + $0x480] sm:$0xff] }
 0x3ba   :  { %17726 = vmatprep.subr.bf16.mxu0 %v17725_v46  ;;  %18014 = vmatprep.subr.bf16.mxu1 %v17725_v46  ;;  %v13128_v46 = vld [vmem:[%s25160_s1 + $0x3a0] sm:$0xff] }
 0x3bb   :  { %v17755_v51 = vpack.c.bf16 %v13130_v11, %v13128_v46  ;;  %v13394_v11 = vld [vmem:[%s25161_s0 + $0x1f0] sm:$0xff] }
 0x3bd   :  { %17728 = vmatpush1.bf16.msra.mxu0 %v17727_v5  ;;  %18016 = vmatpush1.bf16.msra.mxu1 %v17727_v5  ;;  %v17757_v5 = vpack.c.bf16 %v13135_v49, %v13133_v47  ;;  %v13163_v49 = vld [vmem:[%s25160_s1 + $0x4a0] sm:$0xff] }
 0x3be   :  { %17730 = vmatprep.subr.bf16.mxu0 %v17729_v52  ;;  %18018 = vmatprep.subr.bf16.mxu1 %v17729_v52  ;;  %v13132_v52 = vld [vmem:[%s25160_s1 + $0x3c0] sm:$0xff] }
 0x3bf   :  { %v17759_v55 = vpack.c.bf16 %v13134_v59, %v13132_v52  ;;  %v13170_v52 = vld [vmem:[%s25160_s1 + $0x4d8] sm:$0xff]  ;;  %v13434_v59 = vld [vmem:[%s25161_s0 + $0x208] sm:$0xff] }
 0x3c1   :  { %17732 = vmatpush1.bf16.msra.mxu0 %v17731_v56  ;;  %18020 = vmatpush1.bf16.msra.mxu1 %v17731_v56  ;;  %v17761_v56 = vpack.c.bf16 %v13139_v54, %v13137_v53 }
 0x3c2   :  { %17734 = vmatprep.subr.bf16.mxu0 %v17733_v57  ;;  %18022 = vmatprep.subr.bf16.mxu1 %v17733_v57  ;;  %v13136_v57 = vld [vmem:[%s25160_s1 + $0x3e0] sm:$0xff] }
 0x3c3   :  { %v17763_v62 = vpack.c.bf16 %v13138_v58, %v13136_v57  ;;  %v13172_v57 = vld [vmem:[%s25160_s1 + $0x4e8] sm:$0xff]  ;;  %v13174_v58 = vld [vmem:[%s25160_s1 + $0x4f8] sm:$0xff] }
 0x3c5   :  { %17736 = vmatpush1.bf16.msra.mxu0 %v17735_v63  ;;  %18024 = vmatpush1.bf16.msra.mxu1 %v17735_v63  ;;  %v17765_v63 = vpack.c.bf16 %v13143_v61, %v13141_v60  ;;  %v17793_v61 = vpack.c.bf16 %v13174_v58, %v13172_v57  ;;  %v13204_v57 = vld [vmem:[%s25160_s1 + $0x5d0] sm:$0xff]  ;;  %v13207_v58 = vld [vmem:[%s25160_s1 + $0x5e8] sm:$0xff] }
 0x3c6   :  { %17738 = vmatprep.subr.bf16.mxu0 %v17737_v0  ;;  %18026 = vmatprep.subr.bf16.mxu1 %v17737_v0  ;;  %v13140_v0 = vld [vmem:[%s25160_s1 + $0x400] sm:$0xff] }
 0x3c7   :  { %v17767_v6 = vpack.c.bf16 %v13142_v1, %v13140_v0  ;;  %v13178_v0 = vld [vmem:[%s25160_s1 + $0x518] sm:$0xff] }
 0x3c9   :  { %17740 = vmatpush1.bf16.msra.mxu0 %v17739_v10  ;;  %18028 = vmatpush1.bf16.msra.mxu1 %v17739_v10  ;;  %v17769_v10 = vpack.c.bf16 %v13147_v8, %v13145_v2  ;;  %v13175_v8 = vld [vmem:[%s25160_s1 + $0x500] sm:$0xff] }
 0x3ca   :  { %17742 = vmatprep.subr.bf16.mxu0 %v17741_v42  ;;  %18030 = vmatprep.subr.bf16.mxu1 %v17741_v42  ;;  %v13144_v42 = vld [vmem:[%s25160_s1 + $0x420] sm:$0xff] }
 0x3cb   :  { %v17771_v44 = vpack.c.bf16 %v13146_v14, %v13144_v42  ;;  %v13182_v42 = vld [vmem:[%s25160_s1 + $0x538] sm:$0xff] }
 0x3cd   :  { %17744 = vmatpush1.bf16.msra.mxu0 %v17743_v18  ;;  %18032 = vmatpush1.bf16.msra.mxu1 %v17743_v18  ;;  %v17773_v18 = vpack.c.bf16 %v13151_v16, %v13149_v4  ;;  %v13179_v16 = vld [vmem:[%s25160_s1 + $0x520] sm:$0xff] }
 0x3ce   :  { %17746 = vmatprep.subr.bf16.mxu0 %v17745_v19  ;;  %18034 = vmatprep.subr.bf16.mxu1 %v17745_v19  ;;  %v13148_v19 = vld [vmem:[%s25160_s1 + $0x440] sm:$0xff] }
 0x3cf   :  { %v17775_v26 = vpack.c.bf16 %v13150_v20, %v13148_v19  ;;  %v13186_v19 = vld [vmem:[%s25160_s1 + $0x558] sm:$0xff] }
 0x3d0   :  { %5964 = vmatmul.mubr.f32.vlgmr.msra.gmra.mrb[6].mxu0 %v13079_v27  ;;  %6895 = vmatmul.mubr.f32.vlgmr.msra.gmra.mrb[6].mxu1 %v13355_v37  ;;  %v17777_v27 = vpack.c.bf16 %v13155_v28, %v13153_v23  ;;  %v13154_v37 = vld [vmem:[%s25160_s1 + $0x470] sm:$0xff]  ;;  %v13183_v28 = vld [vmem:[%s25160_s1 + $0x540] sm:$0xff] }
 0x3d1   :  { %17748 = vmatpush1.bf16.msra.mxu0 %v17747_v29  ;;  %18036 = vmatpush1.bf16.msra.mxu1 %v17747_v29  ;;  %v13152_v29 = vld [vmem:[%s25160_s1 + $0x460] sm:$0xff] }
 0x3d2   :  { %17750 = vmatprep.subr.bf16.mxu0 %v17749_v31  ;;  %18038 = vmatprep.subr.bf16.mxu1 %v17749_v31  ;;  %v13160_v31 = vld [vmem:[%s25160_s1 + $0x488] sm:$0xff]  ;;  %v17779_v35 = vpack.c.bf16 %v13154_v37, %v13152_v29  ;;  %v13190_v29 = vld [vmem:[%s25160_s1 + $0x578] sm:$0xff] }
 0x3d3   :  { %13156 = vmatprep.mubr.msk.f32.mxu0 %vm116_vm0, %v13119_v40  ;;  %13432 = vmatprep.mubr.msk.f32.mxu1 %vm116_vm0, %v13395_v41  ;;  %v17781_v36 = vpack.c.bf16 %v13162_v32, %v13160_v31  ;;  %v13161_v40 = vld [vmem:[%s25160_s1 + $0x490] sm:$0xff]  ;;  %v13164_v41 = vld [vmem:[%s25160_s1 + $0x4a8] sm:$0xff]  ;;  %v13187_v32 = vld [vmem:[%s25160_s1 + $0x560] sm:$0xff] }
 0x3d4   :  { %v17783_v46 = vpack.c.bf16 %v13161_v40, %v13159_v39  ;;  %v13194_v39 = vld [vmem:[%s25160_s1 + $0x598] sm:$0xff] }
 0x3d5   :  { %17752 = vmatpush1.bf16.msra.mxu0 %v17751_v43  ;;  %18040 = vmatpush1.bf16.msra.mxu1 %v17751_v43  ;;  %v13166_v43 = vld [vmem:[%s25160_s1 + $0x4b8] sm:$0xff] }
 0x3d6   :  { %17754 = vmatprep.subr.bf16.mxu0 %v17753_v50  ;;  %18042 = vmatprep.subr.bf16.mxu1 %v17753_v50  ;;  %v13118_v50 = vld [vmem:[%s25161_s0 + $0x1b0] sm:$0xff]  ;;  %v17785_v47 = vpack.c.bf16 %v13166_v43, %v13164_v41  ;;  %v13191_v43 = vld [vmem:[%s25160_s1 + $0x580] sm:$0xff] }
 0x3d9   :  { %17756 = vmatpush1.bf16.msra.mxu0 %v17755_v51  ;;  %18044 = vmatpush1.bf16.msra.mxu1 %v17755_v51  ;;  %v13165_v51 = vld [vmem:[%s25160_s1 + $0x4b0] sm:$0xff] }
 0x3da   :  { %17758 = vmatprep.subr.bf16.mxu0 %v17757_v5  ;;  %18046 = vmatprep.subr.bf16.mxu1 %v17757_v5  ;;  %v13168_v5 = vld [vmem:[%s25160_s1 + $0x4c8] sm:$0xff]  ;;  %v17787_v53 = vpack.c.bf16 %v13165_v51, %v13163_v49  ;;  %v13198_v51 = vld [vmem:[%s25160_s1 + $0x5a0] sm:$0xff] }
 0x3db   :  { %v17789_v54 = vpack.c.bf16 %v13170_v52, %v13168_v5  ;;  %v13200_v5 = vld [vmem:[%s25160_s1 + $0x5b0] sm:$0xff]  ;;  %v13203_v52 = vld [vmem:[%s25160_s1 + $0x5c8] sm:$0xff] }
 0x3dd   :  { %17760 = vmatpush1.bf16.msra.mxu0 %v17759_v55  ;;  %18048 = vmatpush1.bf16.msra.mxu1 %v17759_v55  ;;  %v13167_v55 = vld [vmem:[%s25160_s1 + $0x4c0] sm:$0xff] }
 0x3de   :  { %17762 = vmatprep.subr.bf16.mxu0 %v17761_v56  ;;  %18050 = vmatprep.subr.bf16.mxu1 %v17761_v56  ;;  %v13169_v56 = vld [vmem:[%s25160_s1 + $0x4d0] sm:$0xff] }
 0x3df   :  { %v17791_v60 = vpack.c.bf16 %v13169_v56, %v13167_v55  ;;  %v13202_v56 = vld [vmem:[%s25160_s1 + $0x5c0] sm:$0xff] }
 0x3e1   :  { %17764 = vmatpush1.bf16.msra.mxu0 %v17763_v62  ;;  %18052 = vmatpush1.bf16.msra.mxu1 %v17763_v62  ;;  %v13171_v62 = vld [vmem:[%s25160_s1 + $0x4e0] sm:$0xff] }
 0x3e2   :  { %17766 = vmatprep.subr.bf16.mxu0 %v17765_v63  ;;  %18054 = vmatprep.subr.bf16.mxu1 %v17765_v63  ;;  %v13173_v63 = vld [vmem:[%s25160_s1 + $0x4f0] sm:$0xff] }
 0x3e3   :  { %v17795_v1 = vpack.c.bf16 %v13173_v63, %v13171_v62  ;;  %v13473_v62 = vld [vmem:[%s25161_s0 + $0x218] sm:$0xff]  ;;  %v17823_v63 = vpack.c.bf16 %v13204_v57, %v13202_v56 }
 0x3e4   :  { %v13240_v56 = vld [vmem:[%s25160_s1 + $0x6d8] sm:$0xff] }
 0x3e5   :  { %17768 = vmatpush1.bf16.msra.mxu0 %v17767_v6  ;;  %18056 = vmatpush1.bf16.msra.mxu1 %v17767_v6  ;;  %v13177_v6 = vld [vmem:[%s25160_s1 + $0x510] sm:$0xff] }
 0x3e6   :  { %17770 = vmatprep.subr.bf16.mxu0 %v17769_v10  ;;  %18058 = vmatprep.subr.bf16.mxu1 %v17769_v10  ;;  %v13180_v10 = vld [vmem:[%s25160_s1 + $0x528] sm:$0xff]  ;;  %v17799_v14 = vpack.c.bf16 %v13177_v6, %v13175_v8 }
 0x3e7   :  { %v17801_v4 = vpack.c.bf16 %v13182_v42, %v13180_v10  ;;  %v13210_v10 = vld [vmem:[%s25160_s1 + $0x600] sm:$0xff]  ;;  %v13212_v42 = vld [vmem:[%s25160_s1 + $0x610] sm:$0xff] }
 0x3e9   :  { %17772 = vmatpush1.bf16.msra.mxu0 %v17771_v44  ;;  %18060 = vmatpush1.bf16.msra.mxu1 %v17771_v44  ;;  %v13181_v44 = vld [vmem:[%s25160_s1 + $0x530] sm:$0xff] }
 0x3ea   :  { %17774 = vmatprep.subr.bf16.mxu0 %v17773_v18  ;;  %18062 = vmatprep.subr.bf16.mxu1 %v17773_v18  ;;  %v13184_v18 = vld [vmem:[%s25160_s1 + $0x548] sm:$0xff]  ;;  %v17803_v20 = vpack.c.bf16 %v13181_v44, %v13179_v16  ;;  %v17831_v16 = vpack.c.bf16 %v13212_v42, %v13210_v10 }
 0x3eb   :  { %v17805_v23 = vpack.c.bf16 %v13186_v19, %v13184_v18  ;;  %v13214_v18 = vld [vmem:[%s25160_s1 + $0x620] sm:$0xff]  ;;  %v13216_v19 = vld [vmem:[%s25160_s1 + $0x630] sm:$0xff] }
 0x3ed   :  { %17776 = vmatpush1.bf16.msra.mxu0 %v17775_v26  ;;  %18064 = vmatpush1.bf16.msra.mxu1 %v17775_v26  ;;  %v13185_v26 = vld [vmem:[%s25160_s1 + $0x550] sm:$0xff] }
 0x3ee   :  { %17778 = vmatprep.subr.bf16.mxu0 %v17777_v27  ;;  %18066 = vmatprep.subr.bf16.mxu1 %v17777_v27  ;;  %v13188_v27 = vld [vmem:[%s25160_s1 + $0x568] sm:$0xff]  ;;  %v17807_v37 = vpack.c.bf16 %v13185_v26, %v13183_v28  ;;  %v17835_v28 = vpack.c.bf16 %v13216_v19, %v13214_v18  ;;  %v13472_v19 = vld [vmem:[%s25161_s0 + $0x210] sm:$0xff] }
 0x3ef   :  { %v17809_v31 = vpack.c.bf16 %v13190_v29, %v13188_v27  ;;  %v13218_v27 = vld [vmem:[%s25160_s1 + $0x640] sm:$0xff]  ;;  %v13220_v29 = vld [vmem:[%s25160_s1 + $0x650] sm:$0xff] }
 0x3f1   :  { %17780 = vmatpush1.bf16.msra.mxu0 %v17779_v35  ;;  %18068 = vmatpush1.bf16.msra.mxu1 %v17779_v35  ;;  %v13189_v35 = vld [vmem:[%s25160_s1 + $0x570] sm:$0xff] }
 0x3f2   :  { %17782 = vmatprep.subr.bf16.mxu0 %v17781_v36  ;;  %18070 = vmatprep.subr.bf16.mxu1 %v17781_v36  ;;  %v13192_v36 = vld [vmem:[%s25160_s1 + $0x588] sm:$0xff]  ;;  %v17811_v40 = vpack.c.bf16 %v13189_v35, %v13187_v32  ;;  %v17839_v32 = vpack.c.bf16 %v13220_v29, %v13218_v27  ;;  %v13243_v27 = vld [vmem:[%s25160_s1 + $0x6f0] sm:$0xff] }
 0x3f3   :  { %v17813_v41 = vpack.c.bf16 %v13194_v39, %v13192_v36  ;;  %v13222_v36 = vld [vmem:[%s25160_s1 + $0x660] sm:$0xff]  ;;  %v13224_v39 = vld [vmem:[%s25160_s1 + $0x670] sm:$0xff] }
 0x3f4   :  { %6078 = vmatmul.mubr.f32.vlgmr.msra.gmra.mrb[6].mxu0 %v13118_v50  ;;  %7009 = vmatmul.mubr.f32.vlgmr.msra.gmra.mrb[6].mxu1 %v13394_v11  ;;  %v13193_v50 = vld [vmem:[%s25160_s1 + $0x590] sm:$0xff]  ;;  %v13201_v11 = vld [vmem:[%s25160_s1 + $0x5b8] sm:$0xff] }
 0x3f5   :  { %17784 = vmatpush1.bf16.msra.mxu0 %v17783_v46  ;;  %18072 = vmatpush1.bf16.msra.mxu1 %v17783_v46  ;;  %v13199_v46 = vld [vmem:[%s25160_s1 + $0x5a8] sm:$0xff] }
 0x3f6   :  { %17786 = vmatprep.subr.bf16.mxu0 %v17785_v47  ;;  %18074 = vmatprep.subr.bf16.mxu1 %v17785_v47  ;;  %v17815_v47 = vpack.c.bf16 %v13193_v50, %v13191_v43  ;;  %v17817_v49 = vpack.c.bf16 %v13201_v11, %v13199_v46  ;;  %v17843_v43 = vpack.c.bf16 %v13224_v39, %v13222_v36  ;;  %v13226_v46 = vld [vmem:[%s25160_s1 + $0x680] sm:$0xff]  ;;  %v13228_v11 = vld [vmem:[%s25160_s1 + $0x690] sm:$0xff] }
 0x3f7   :  { %13195 = vmatprep.mubr.msk.f32.mxu0 %vm116_vm0, %v22664_v13  ;;  %13471 = vmatprep.mubr.msk.f32.mxu1 %vm116_vm0, %v13434_v59  ;;  %v13176_v13 = vld [vmem:[%s25160_s1 + $0x508] sm:$0xff]  ;;  %v13205_v59 = vld [vmem:[%s25160_s1 + $0x5d8] sm:$0xff] }
 0x3f8   :  { %v17797_v2 = vpack.c.bf16 %v13178_v0, %v13176_v13  ;;  %v17821_v55 = vpack.c.bf16 %v13205_v59, %v13203_v52  ;;  %v13206_v0 = vld [vmem:[%s25160_s1 + $0x5e0] sm:$0xff] }
 0x3f9   :  { %17788 = vmatpush1.bf16.msra.mxu0 %v17787_v53  ;;  %18076 = vmatpush1.bf16.msra.mxu1 %v17787_v53  ;;  %v17819_v53 = vpack.c.bf16 %v13200_v5, %v13198_v51  ;;  %v17847_v51 = vpack.c.bf16 %v13228_v11, %v13226_v46  ;;  %v4684_v5 = vld [vmem:[%s25162_s2] sm:$0x3]  ;;  %v13247_v46 = vld [vmem:[%s25160_s1 + $0x710] sm:$0xff]  ;;  %v13250_v11 = vld [vmem:[%s25160_s1 + $0x728] sm:$0xff] }
 0x3fa   :  { %17790 = vmatprep.subr.bf16.mxu0 %v17789_v54  ;;  %18078 = vmatprep.subr.bf16.mxu1 %v17789_v54  ;;  %v13433_v54 = vld [vmem:[%s25161_s0 + $0x200] sm:$0xff]  ;;  %v4689_v57 = vrot.slane %v4684_v5, %v21210_v45 }
 0x3fb   :  { %v5615_v52 = vld [vmem:[%s25162_s2] sm:$0x3] }
 0x3fd   :  { %17792 = vmatpush1.bf16.msra.mxu0 %v17791_v60  ;;  %18080 = vmatpush1.bf16.msra.mxu1 %v17791_v60  ;;  %v13209_v60 = vld [vmem:[%s25160_s1 + $0x5f8] sm:$0xff] }
 0x3fe   :  { %17794 = vmatprep.subr.bf16.mxu0 %v17793_v61  ;;  %18082 = vmatprep.subr.bf16.mxu1 %v17793_v61  ;;  %v13197_v61 = vld [vmem:[%s25161_s0 + $0x1d8] sm:$0xff]  ;;  %v17825_v13 = vpack.c.bf16 %v13209_v60, %v13207_v58  ;;  %v5620_v58 = vrot.slane %v5615_v52, %v21210_v45  ;;  %v4693_v60 = vrot.slane %v4684_v5, %v21219_v48  ;;  %v13249_v5 = vld [vmem:[%s25160_s1 + $0x720] sm:$0xff] }
 0x401   :  { %17796 = vmatpush1.bf16.msra.mxu0 %v17795_v1  ;;  %18084 = vmatpush1.bf16.msra.mxu1 %v17795_v1  ;;  %v13211_v1 = vld [vmem:[%s25160_s1 + $0x608] sm:$0xff] }
 0x402   :  { %17798 = vmatprep.subr.bf16.mxu0 %v17797_v2  ;;  %18086 = vmatprep.subr.bf16.mxu1 %v17797_v2  ;;  %v13213_v2 = vld [vmem:[%s25160_s1 + $0x618] sm:$0xff] }
 0x403   :  { %v17829_v6 = vpack.c.bf16 %v13213_v2, %v13211_v1  ;;  %v13242_v2 = vld [vmem:[%s25160_s1 + $0x6e8] sm:$0xff] }
 0x405   :  { %17800 = vmatpush1.bf16.msra.mxu0 %v17799_v14  ;;  %18088 = vmatpush1.bf16.msra.mxu1 %v17799_v14  ;;  %v13215_v14 = vld [vmem:[%s25160_s1 + $0x628] sm:$0xff] }
 0x406   :  { %17802 = vmatprep.subr.bf16.mxu0 %v17801_v4  ;;  %18090 = vmatprep.subr.bf16.mxu1 %v17801_v4  ;;  %v13217_v4 = vld [vmem:[%s25160_s1 + $0x638] sm:$0xff] }
 0x407   :  { %v17833_v44 = vpack.c.bf16 %v13217_v4, %v13215_v14 }
 0x409   :  { %17804 = vmatpush1.bf16.msra.mxu0 %v17803_v20  ;;  %18092 = vmatpush1.bf16.msra.mxu1 %v17803_v20  ;;  %v13219_v20 = vld [vmem:[%s25160_s1 + $0x648] sm:$0xff] }
 0x40a   :  { %17806 = vmatprep.subr.bf16.mxu0 %v17805_v23  ;;  %18094 = vmatprep.subr.bf16.mxu1 %v17805_v23  ;;  %v13221_v23 = vld [vmem:[%s25160_s1 + $0x658] sm:$0xff] }
 0x40b   :  { %v17837_v26 = vpack.c.bf16 %v13221_v23, %v13219_v20 }
 0x40d   :  { %17808 = vmatpush1.bf16.msra.mxu0 %v17807_v37  ;;  %18096 = vmatpush1.bf16.msra.mxu1 %v17807_v37  ;;  %v13223_v37 = vld [vmem:[%s25160_s1 + $0x668] sm:$0xff] }
 0x40e   :  { %17810 = vmatprep.subr.bf16.mxu0 %v17809_v31  ;;  %18098 = vmatprep.subr.bf16.mxu1 %v17809_v31  ;;  %v13225_v31 = vld [vmem:[%s25160_s1 + $0x678] sm:$0xff] }
 0x40f   :  { %v17841_v35 = vpack.c.bf16 %v13225_v31, %v13223_v37  ;;  %v13246_v31 = vld [vmem:[%s25160_s1 + $0x708] sm:$0xff] }
 0x411   :  { %17812 = vmatpush1.bf16.msra.mxu0 %v17811_v40  ;;  %18100 = vmatpush1.bf16.msra.mxu1 %v17811_v40  ;;  %v13227_v40 = vld [vmem:[%s25160_s1 + $0x688] sm:$0xff] }
 0x412   :  { %17814 = vmatprep.subr.bf16.mxu0 %v17813_v41  ;;  %18102 = vmatprep.subr.bf16.mxu1 %v17813_v41  ;;  %v13229_v41 = vld [vmem:[%s25160_s1 + $0x698] sm:$0xff] }
 0x413   :  { %v17845_v50 = vpack.c.bf16 %v13229_v41, %v13227_v40  ;;  %v13236_v40 = vld [vmem:[%s25161_s0 + $0x1e8] sm:$0xff] }
 0x414   :  { %v13512_v41 = vld [vmem:[%s25161_s0 + $0x228] sm:$0xff] }
 0x415   :  { %17816 = vmatpush1.bf16.msra.mxu0 %v17815_v47  ;;  %18104 = vmatpush1.bf16.msra.mxu1 %v17815_v47  ;;  %v13231_v47 = vld [vmem:[%s25160_s1 + $0x6a8] sm:$0xff] }
 0x416   :  { %17818 = vmatprep.subr.bf16.mxu0 %v17817_v49  ;;  %18106 = vmatprep.subr.bf16.mxu1 %v17817_v49  ;;  %v13233_v49 = vld [vmem:[%s25160_s1 + $0x6b8] sm:$0xff] }
 0x417   :  { %v17849_v59 = vpack.c.bf16 %v13233_v49, %v13231_v47  ;;  %v13252_v47 = vld [vmem:[%s25160_s1 + $0x738] sm:$0xff] }
 0x418   :  { %6193 = vmatmul.mubr.f32.vlgmr.msra.gmra.mrb[6].mxu0 %v22771_v24  ;;  %7124 = vmatmul.mubr.f32.vlgmr.msra.gmra.mrb[6].mxu1 %v13433_v54  ;;  %v13208_v24 = vld [vmem:[%s25160_s1 + $0x5f0] sm:$0xff] }
 0x419   :  { %17820 = vmatpush1.bf16.msra.mxu0 %v17819_v53  ;;  %18108 = vmatpush1.bf16.msra.mxu1 %v17819_v53  ;;  %v17827_v8 = vpack.c.bf16 %v13208_v24, %v13206_v0  ;;  %v13230_v53 = vld [vmem:[%s25160_s1 + $0x6a0] sm:$0xff]  ;;  %v13232_v54 = vld [vmem:[%s25160_s1 + $0x6b0] sm:$0xff] }
 0x41a   :  { %17822 = vmatprep.subr.bf16.mxu0 %v17821_v55  ;;  %18110 = vmatprep.subr.bf16.mxu1 %v17821_v55  ;;  %v13238_v55 = vld [vmem:[%s25160_s1 + $0x6c8] sm:$0xff]  ;;  %v13239_v0 = vld [vmem:[%s25160_s1 + $0x6d0] sm:$0xff] }
 0x41b   :  { %13234 = vmatprep.mubr.msk.f32.mxu0 %vm116_vm0, %v13197_v61  ;;  %13510 = vmatprep.mubr.msk.f32.mxu1 %vm116_vm0, %v13473_v62  ;;  %v5624_v61 = vrot.slane %v5615_v52, %v21219_v48  ;;  %v17851_v62 = vpack.c.bf16 %v13232_v54, %v13230_v53  ;;  %v13251_v52 = vld [vmem:[%s25160_s1 + $0x730] sm:$0xff]  ;;  %v13256_v53 = vld [vmem:[%s25160_s1 + $0x758] sm:$0xff] }
 0x41c   :  { %v17867_v54 = vpack.c.bf16 %v13251_v52, %v13249_v5  ;;  %v13282_v5 = vld [vmem:[%s25160_s1 + $0x810] sm:$0xff]  ;;  %v13285_v52 = vld [vmem:[%s25160_s1 + $0x828] sm:$0xff] }
 0x41d   :  { %17824 = vmatpush1.bf16.msra.mxu0 %v17823_v63  ;;  %18112 = vmatpush1.bf16.msra.mxu1 %v17823_v63  ;;  %v17853_v63 = vpack.c.bf16 %v13240_v56, %v13238_v55  ;;  %v13253_v56 = vld [vmem:[%s25160_s1 + $0x740] sm:$0xff] }
 0x41e   :  { %17826 = vmatprep.subr.bf16.mxu0 %v17825_v13  ;;  %18114 = vmatprep.subr.bf16.mxu1 %v17825_v13  ;;  %v13237_v13 = vld [vmem:[%s25160_s1 + $0x6c0] sm:$0xff] }
 0x41f   :  { %v17855_v18 = vpack.c.bf16 %v13239_v0, %v13237_v13  ;;  %v13259_v13 = vld [vmem:[%s25160_s1 + $0x770] sm:$0xff]  ;;  %v13262_v0 = vld [vmem:[%s25160_s1 + $0x788] sm:$0xff] }
 0x421   :  { %17828 = vmatpush1.bf16.msra.mxu0 %v17827_v8  ;;  %18116 = vmatpush1.bf16.msra.mxu1 %v17827_v8  ;;  %v13244_v8 = vld [vmem:[%s25160_s1 + $0x6f8] sm:$0xff] }
 0x422   :  { %17830 = vmatprep.subr.bf16.mxu0 %v17829_v6  ;;  %18118 = vmatprep.subr.bf16.mxu1 %v17829_v6 }
 0x425   :  { %17832 = vmatpush1.bf16.msra.mxu0 %v17831_v16  ;;  %18120 = vmatpush1.bf16.msra.mxu1 %v17831_v16 }
 0x426   :  { %17834 = vmatprep.subr.bf16.mxu0 %v17833_v44  ;;  %18122 = vmatprep.subr.bf16.mxu1 %v17833_v44  ;;  %v13196_v44 = vld [vmem:[%s25161_s0 + $0x1d0] sm:$0xff] }
 0x429   :  { %17836 = vmatpush1.bf16.msra.mxu0 %v17835_v28  ;;  %18124 = vmatpush1.bf16.msra.mxu1 %v17835_v28  ;;  %v17857_v28 = vpack.c.bf16 %v13244_v8, %v13242_v2  ;;  %v13261_v8 = vld [vmem:[%s25160_s1 + $0x780] sm:$0xff] }
 0x42a   :  { %17838 = vmatprep.subr.bf16.mxu0 %v17837_v26  ;;  %18126 = vmatprep.subr.bf16.mxu1 %v17837_v26  ;;  %v13241_v26 = vld [vmem:[%s25160_s1 + $0x6e0] sm:$0xff] }
 0x42b   :  { %v17859_v39 = vpack.c.bf16 %v13243_v27, %v13241_v26  ;;  %v13269_v27 = vld [vmem:[%s25160_s1 + $0x7c0] sm:$0xff] }
 0x42d   :  { %17840 = vmatpush1.bf16.msra.mxu0 %v17839_v32  ;;  %18128 = vmatpush1.bf16.msra.mxu1 %v17839_v32  ;;  %v13248_v32 = vld [vmem:[%s25160_s1 + $0x718] sm:$0xff] }
 0x42e   :  { %17842 = vmatprep.subr.bf16.mxu0 %v17841_v35  ;;  %18130 = vmatprep.subr.bf16.mxu1 %v17841_v35 }
 0x431   :  { %17844 = vmatpush1.bf16.msra.mxu0 %v17843_v43  ;;  %18132 = vmatpush1.bf16.msra.mxu1 %v17843_v43  ;;  %v17861_v43 = vpack.c.bf16 %v13248_v32, %v13246_v31  ;;  %v13271_v31 = vld [vmem:[%s25160_s1 + $0x7d0] sm:$0xff]  ;;  %v13277_v32 = vld [vmem:[%s25160_s1 + $0x7e8] sm:$0xff] }
 0x432   :  { %17846 = vmatprep.subr.bf16.mxu0 %v17845_v50  ;;  %18134 = vmatprep.subr.bf16.mxu1 %v17845_v50  ;;  %v13245_v50 = vld [vmem:[%s25160_s1 + $0x700] sm:$0xff] }
 0x433   :  { %v17863_v49 = vpack.c.bf16 %v13247_v46, %v13245_v50  ;;  %v13283_v50 = vld [vmem:[%s25160_s1 + $0x818] sm:$0xff]  ;;  %v13235_v46 = vld [vmem:[%s25161_s0 + $0x1e0] sm:$0xff] }
 0x435   :  { %17848 = vmatpush1.bf16.msra.mxu0 %v17847_v51  ;;  %18136 = vmatpush1.bf16.msra.mxu1 %v17847_v51  ;;  %v17865_v51 = vpack.c.bf16 %v13252_v47, %v13250_v11  ;;  %v13511_v47 = vld [vmem:[%s25161_s0 + $0x220] sm:$0xff] }
 0x436   :  { %17850 = vmatprep.subr.bf16.mxu0 %v17849_v59  ;;  %18138 = vmatprep.subr.bf16.mxu1 %v17849_v59  ;;  %v13254_v59 = vld [vmem:[%s25160_s1 + $0x748] sm:$0xff] }
 0x437   :  { %v4677_v24 = vpop.f32.mrb[4].mxu0  ;;  %v5608_v1 = vpop.f32.mrb[4].mxu1  ;;  %v17869_v55 = vpack.c.bf16 %v13256_v53, %v13254_v59  ;;  %v13287_v59 = vld [vmem:[%s25160_s1 + $0x838] sm:$0xff] }
 0x438   :  { %v4696_v6 = vadd.f32 %v4689_v57, %v4677_v24  ;;  %v5627_v10 = vadd.f32 %v5620_v58, %v5608_v1  ;;  %v4679_v42 = vpop.f32.mrb[5].mxu0  ;;  %v5610_v14 = vpop.f32.mrb[5].mxu1  ;;  %v13255_v57 = vld [vmem:[%s25160_s1 + $0x750] sm:$0xff]  ;;  %v13258_v58 = vld [vmem:[%s25160_s1 + $0x768] sm:$0xff]  ;;  %v13264_v24 = vld [vmem:[%s25160_s1 + $0x798] sm:$0xff] }
 0x439   :  { %v4697_v4 = vadd.f32 %v4693_v60, %v4679_v42  ;;  %v5628_v16 = vadd.f32 %v5624_v61, %v5610_v14  ;;  %17852 = vmatpush1.bf16.msra.mxu0 %v17851_v62  ;;  %18140 = vmatpush1.bf16.msra.mxu1 %v17851_v62  ;;  %v13260_v60 = vld [vmem:[%s25160_s1 + $0x778] sm:$0xff]  ;;  %v17871_v61 = vpack.c.bf16 %v13255_v57, %v13253_v56  ;;  %v13284_v57 = vld [vmem:[%s25160_s1 + $0x820] sm:$0xff] }
 0x43a   :  { %v23268_v20 = vmax.f32 %v4696_v6, 0.0  ;;  %v23270_v23 = vmax.f32 %v5627_v10, 0.0  ;;  %17854 = vmatprep.subr.bf16.mxu0 %v17853_v63  ;;  %18142 = vmatprep.subr.bf16.mxu1 %v17853_v63  ;;  %v17873_v62 = vpack.c.bf16 %v13260_v60, %v13258_v58  ;;  %v13257_v63 = vld [vmem:[%s25160_s1 + $0x760] sm:$0xff]  ;;  %v17877_v2 = vpack.c.bf16 %v13264_v24, %v13262_v0  ;;  %v13263_v6 = vld [vmem:[%s25160_s1 + $0x790] sm:$0xff]  ;;  %v13266_v10 = vld [vmem:[%s25160_s1 + $0x7a8] sm:$0xff] }
 0x43b   :  { %v23278_v29 = vmax.f32 %v4697_v4, 0.0  ;;  %v23280_v37 = vmax.f32 %v5628_v16, 0.0  ;;  %v17875_v1 = vpack.c.bf16 %v13259_v13, %v13257_v63  ;;  %v13268_v42 = vld [vmem:[%s25160_s1 + $0x7b8] sm:$0xff]  ;;  %v17879_v14 = vpack.c.bf16 %v13263_v6, %v13261_v8  ;;  %v13265_v16 = vld [vmem:[%s25160_s1 + $0x7a0] sm:$0xff]  ;;  %v13286_v58 = vld [vmem:[%s25160_s1 + $0x830] sm:$0xff] }
 0x43c   :  { %25193 = vst [vmem:[#allocation6_spill] sm:$0xff] %v23268_v20  ;;  %6308 = vmatmul.mubr.f32.vlgmr.msra.gmra.mrb[6].mxu0 %v13196_v44  ;;  %7239 = vmatmul.mubr.f32.vlgmr.msra.gmra.mrb[6].mxu1 %v13472_v19  ;;  %v17881_v4 = vpack.c.bf16 %v13268_v42, %v13266_v10  ;;  %v13267_v44 = vld [vmem:[%s25160_s1 + $0x7b0] sm:$0xff]  ;;  %v13272_v19 = vld [vmem:[%s25160_s1 + $0x7d8] sm:$0xff]  ;;  %v17897_v56 = vpack.c.bf16 %v13287_v59, %v13285_v52  ;;  %v13289_v60 = vld [vmem:[%s25160_s1 + $0x848] sm:$0xff] }
 0x43d   :  { %17856 = vmatpush1.bf16.msra.mxu0 %v17855_v18  ;;  %18144 = vmatpush1.bf16.msra.mxu1 %v17855_v18  ;;  %v19422_v35 = vpack.i.bf16 %v23280_v37, %v23270_v23  ;;  %v19417_v36 = vpack.i.bf16 %v23278_v29, %v23268_v20  ;;  %v13270_v18 = vld [vmem:[%s25160_s1 + $0x7c8] sm:$0xff]  ;;  %v13275_v53 = vld [vmem:[%s25161_s0 + $0x1f8] sm:$0xff]  ;;  %v13288_v13 = vld [vmem:[%s25160_s1 + $0x840] sm:$0xff] }
 0x43e   :  { %17858 = vmatprep.subr.bf16.mxu0 %v17857_v28  ;;  %18146 = vmatprep.subr.bf16.mxu1 %v17857_v28  ;;  %v17883_v28 = vpack.c.bf16 %v13267_v44, %v13265_v16  ;;  %v17885_v26 = vpack.c.bf16 %v13272_v19, %v13270_v18  ;;  %v13290_v0 = vld [vmem:[%s25160_s1 + $0x850] sm:$0xff]  ;;  %v13293_v24 = vld [vmem:[%s25160_s1 + $0x868] sm:$0xff]  ;;  %v13292_v6 = vld [vmem:[%s25160_s1 + $0x860] sm:$0xff] }
 0x43f   :  { %19423 = vrot.lane.b32.xlu1 %v19422_v35, %s19438_s17  ;;  %19418 = vrot.lane.b32.xlu0 %v19417_v36, %s19438_s17  ;;  %v13279_v35 = vld [vmem:[%s25160_s1 + $0x7f8] sm:$0xff]  ;;  %v17887_v36 = vpack.c.bf16 %v13271_v31, %v13269_v27  ;;  %v13294_v10 = vld [vmem:[%s25160_s1 + $0x870] sm:$0xff] }
 0x440   :  { %13273 = vmatprep.mubr.msk.f32.mxu0 %vm116_vm0, %v13236_v40  ;;  %13549 = vmatprep.mubr.msk.f32.mxu1 %vm116_vm0, %v13512_v41  ;;  %v13276_v40 = vld [vmem:[%s25160_s1 + $0x7e0] sm:$0xff]  ;;  %v13278_v41 = vld [vmem:[%s25160_s1 + $0x7f0] sm:$0xff]  ;;  %v13297_v42 = vld [vmem:[%s25160_s1 + $0x888] sm:$0xff] }
 0x441   :  { %17860 = vmatpush1.bf16.msra.mxu0 %v17859_v39  ;;  %18148 = vmatpush1.bf16.msra.mxu1 %v17859_v39  ;;  %v17889_v39 = vpack.c.bf16 %v13279_v35, %v13277_v32  ;;  %v17891_v11 = vpack.c.bf16 %v13278_v41, %v13276_v40  ;;  %v13296_v44 = vld [vmem:[%s25160_s1 + $0x880] sm:$0xff]  ;;  %v13298_v18 = vld [vmem:[%s25160_s1 + $0x890] sm:$0xff]  ;;  %v13301_v19 = vld [vmem:[%s25160_s1 + $0x8a8] sm:$0xff] }
 0x442   :  { %17862 = vmatprep.subr.bf16.mxu0 %v17861_v43  ;;  %18150 = vmatprep.subr.bf16.mxu1 %v17861_v43  ;;  %v13281_v43 = vld [vmem:[%s25160_s1 + $0x808] sm:$0xff]  ;;  %v13300_v31 = vld [vmem:[%s25160_s1 + $0x8a0] sm:$0xff]  ;;  %v13302_v32 = vld [vmem:[%s25160_s1 + $0x8b0] sm:$0xff] }
 0x443   :  { %v13305_v35 = vld [vmem:[%s25160_s1 + $0x8c8] sm:$0xff]  ;;  %v13304_v41 = vld [vmem:[%s25160_s1 + $0x8c0] sm:$0xff] }
 0x444   :  { %v13589_v52 = vld [vmem:[%s25163_s3 + $0x80] sm:$0xff]  ;;  %v13590_v59 = vld [vmem:[%s25163_s3 + $0x88] sm:$0xff] }
 0x445   :  { %17864 = vmatpush1.bf16.msra.mxu0 %v17863_v49  ;;  %18152 = vmatpush1.bf16.msra.mxu1 %v17863_v49  ;;  %v17893_v49 = vpack.c.bf16 %v13283_v50, %v13281_v43  ;;  %v13306_v43 = vld [vmem:[%s25160_s1 + $0x8d0] sm:$0xff]  ;;  %v13309_v50 = vld [vmem:[%s25160_s1 + $0x8e8] sm:$0xff] }
 0x446   :  { %17866 = vmatprep.subr.bf16.mxu0 %v17865_v51  ;;  %18154 = vmatprep.subr.bf16.mxu1 %v17865_v51  ;;  %v13280_v51 = vld [vmem:[%s25160_s1 + $0x800] sm:$0xff] }
 0x449   :  { %17868 = vmatpush1.bf16.msra.mxu0 %v17867_v54  ;;  %18156 = vmatpush1.bf16.msra.mxu1 %v17867_v54  ;;  %v13551_v54 = vld [vmem:[%s25161_s0 + $0x238] sm:$0xff] }
 0x44a   :  { %17870 = vmatprep.subr.bf16.mxu0 %v17869_v55  ;;  %18158 = vmatprep.subr.bf16.mxu1 %v17869_v55  ;;  %v17895_v55 = vpack.c.bf16 %v13282_v5, %v13280_v51  ;;  %v13310_v51 = vld [vmem:[%s25160_s1 + $0x8f0] sm:$0xff] }
 0x44d   :  { %17872 = vmatpush1.bf16.msra.mxu0 %v17871_v61  ;;  %18160 = vmatpush1.bf16.msra.mxu1 %v17871_v61  ;;  %v13291_v61 = vld [vmem:[%s25160_s1 + $0x858] sm:$0xff] }
 0x44e   :  { %17874 = vmatprep.subr.bf16.mxu0 %v17873_v62  ;;  %18162 = vmatprep.subr.bf16.mxu1 %v17873_v62  ;;  %v17899_v62 = vpack.c.bf16 %v13286_v58, %v13284_v57  ;;  %v17901_v63 = vpack.c.bf16 %v13291_v61, %v13289_v60  ;;  %v23520_v57 = vpack.c.bf16 %v13590_v59, %v13589_v52  ;;  %v13591_v60 = vld [vmem:[%s25163_s3 + $0x90] sm:$0xff]  ;;  %v25176_v61 = vmov 0.0|0.0  }
 0x44f   :  { %v13603_v59 = vld [vmem:[%s25163_s3 + $0xf0] sm:$0xff] }
 0x451   :  { %17876 = vmatpush1.bf16.msra.mxu0 %v17875_v1  ;;  %18164 = vmatpush1.bf16.msra.mxu1 %v17875_v1  ;;  %v13295_v1 = vld [vmem:[%s25160_s1 + $0x878] sm:$0xff] }
 0x452   :  { %17878 = vmatprep.subr.bf16.mxu0 %v17877_v2  ;;  %18166 = vmatprep.subr.bf16.mxu1 %v17877_v2  ;;  %v17903_v2 = vpack.c.bf16 %v13290_v0, %v13288_v13  ;;  %v17905_v8 = vpack.c.bf16 %v13295_v1, %v13293_v24  ;;  %v7500_v13 = vld [vmem:[%s25163_s3 + $0x18] sm:$0xff]  ;;  %v13593_v1 = vld [vmem:[%s25163_s3 + $0xa0] sm:$0xff] }
 0x455   :  { %17880 = vmatpush1.bf16.msra.mxu0 %v17879_v14  ;;  %18168 = vmatpush1.bf16.msra.mxu1 %v17879_v14  ;;  %v13299_v14 = vld [vmem:[%s25160_s1 + $0x898] sm:$0xff] }
 0x456   :  { %17882 = vmatprep.subr.bf16.mxu0 %v17881_v4  ;;  %18170 = vmatprep.subr.bf16.mxu1 %v17881_v4  ;;  %v17907_v4 = vpack.c.bf16 %v13294_v10, %v13292_v6  ;;  %v17909_v16 = vpack.c.bf16 %v13299_v14, %v13297_v42  ;;  %v7502_v6 = vld [vmem:[%s25163_s3 + $0x28] sm:$0xff]  ;;  %v25174_v10 = vmov 0.0  }
 0x459   :  { %17884 = vmatpush1.bf16.msra.mxu0 %v17883_v28  ;;  %18172 = vmatpush1.bf16.msra.mxu1 %v17883_v28  ;;  %v13303_v28 = vld [vmem:[%s25160_s1 + $0x8b8] sm:$0xff] }
 0x45a   :  { %17886 = vmatprep.subr.bf16.mxu0 %v17885_v26  ;;  %18174 = vmatprep.subr.bf16.mxu1 %v17885_v26  ;;  %v17911_v26 = vpack.c.bf16 %v13298_v18, %v13296_v44  ;;  %v17913_v27 = vpack.c.bf16 %v13303_v28, %v13301_v19  ;;  %v7503_v44 = vld [vmem:[%s25163_s3 + $0x30] sm:$0xff]  ;;  %v7504_v18 = vld [vmem:[%s25163_s3 + $0x38] sm:$0xff] }
 0x45b   :  { %v23586_v28 = vpack.c.bf16 %v7504_v18, %v7503_v44  ;;  %v13624_v44 = vld [vmem:[%s25163_s3 + $0x198] sm:$0xff] }
 0x45d   :  { %17888 = vmatpush1.bf16.msra.mxu0 %v17887_v36  ;;  %18176 = vmatpush1.bf16.msra.mxu1 %v17887_v36  ;;  %v13307_v36 = vld [vmem:[%s25160_s1 + $0x8d8] sm:$0xff] }
 0x45e   :  { %17890 = vmatprep.subr.bf16.mxu0 %v17889_v39  ;;  %18178 = vmatprep.subr.bf16.mxu1 %v17889_v39  ;;  %v17915_v39 = vpack.c.bf16 %v13302_v32, %v13300_v31  ;;  %v17917_v40 = vpack.c.bf16 %v13307_v36, %v13305_v35  ;;  %v7505_v31 = vld [vmem:[%s25163_s3 + $0x40] sm:$0xff]  ;;  %v7506_v32 = vld [vmem:[%s25163_s3 + $0x48] sm:$0xff] }
 0x45f   :  { %v23606_v36 = vpack.c.bf16 %v7506_v32, %v7505_v31  ;;  %v13611_v32 = vld [vmem:[%s25163_s3 + $0x130] sm:$0xff] }
 0x460   :  { %6423 = vmatmul.mubr.f32.vlgmr.msra.gmra.mrb[6].mxu0 %v13235_v46  ;;  %7354 = vmatmul.mubr.f32.vlgmr.msra.gmra.mrb[6].mxu1 %v13511_v47  ;;  %v13311_v46 = vld [vmem:[%s25160_s1 + $0x8f8] sm:$0xff] }
 0x461   :  { %17892 = vmatpush1.bf16.msra.mxu0 %v17891_v11  ;;  %18180 = vmatpush1.bf16.msra.mxu1 %v17891_v11  ;;  %v17919_v11 = vpack.c.bf16 %v13306_v43, %v13304_v41  ;;  %v17921_v47 = vpack.c.bf16 %v13311_v46, %v13309_v50  ;;  %v7507_v41 = vld [vmem:[%s25163_s3 + $0x50] sm:$0xff]  ;;  %v7508_v43 = vld [vmem:[%s25163_s3 + $0x58] sm:$0xff] }
 0x462   :  { %17894 = vmatprep.subr.bf16.mxu0 %v17893_v49  ;;  %18182 = vmatprep.subr.bf16.mxu1 %v17893_v49  ;;  %v13308_v49 = vld [vmem:[%s25160_s1 + $0x8e0] sm:$0xff]  ;;  %v23626_v46 = vpack.c.bf16 %v7508_v43, %v7507_v41  ;;  %v13628_v41 = vld [vmem:[%s25163_s3 + $0x1b8] sm:$0xff] }
 0x463   :  { %13312 = vmatprep.mubr.msk.f32.mxu0 %vm116_vm0, %v13275_v53  ;;  %13588 = vmatprep.mubr.msk.f32.mxu1 %vm116_vm0, %v13551_v54  ;;  %v17923_v5 = vpack.c.bf16 %v13310_v51, %v13308_v49  ;;  %v7497_v53 = vld [vmem:[%s25163_s3] sm:$0xff]  ;;  %v7498_v54 = vld [vmem:[%s25163_s3 + $0x8] sm:$0xff] }
 0x464   :  { %v23522_v58 = vpack.c.bf16 %v7498_v54, %v7497_v53  ;;  %v7509_v49 = vld [vmem:[%s25163_s3 + $0x60] sm:$0xff]  ;;  %v7510_v51 = vld [vmem:[%s25163_s3 + $0x68] sm:$0xff]  ;;  %v13604_v53 = vld [vmem:[%s25163_s3 + $0xf8] sm:$0xff] }
 0x465   :  { %17896 = vmatpush1.bf16.msra.mxu0 %v17895_v55  ;;  %18184 = vmatpush1.bf16.msra.mxu1 %v17895_v55  ;;  %v13274_v55 = vld [vmem:[%s25161_s0 + $0x1f0] sm:$0xff]  ;;  %v23646_v52 = vpack.c.bf16 %v7510_v51, %v7509_v49  ;;  %v13614_v49 = vld [vmem:[%s25163_s3 + $0x148] sm:$0xff]  ;;  %v13629_v51 = vld [vmem:[%s25163_s3 + $0x1c0] sm:$0xff] }
 0x466   :  { %17898 = vmatprep.subr.bf16.mxu0 %v17897_v56  ;;  %18186 = vmatprep.subr.bf16.mxu1 %v17897_v56  ;;  %v13550_v56 = vld [vmem:[%s25161_s0 + $0x230] sm:$0xff] }
 0x467   :  { %v7511_v54 = vld [vmem:[%s25163_s3 + $0x70] sm:$0xff] }
 0x469   :  { %17900 = vmatpush1.bf16.msra.mxu0 %v17899_v62  ;;  %18188 = vmatpush1.bf16.msra.mxu1 %v17899_v62  ;;  %v13592_v62 = vld [vmem:[%s25163_s3 + $0x98] sm:$0xff] }
 0x46a   :  { %17902 = vmatprep.subr.bf16.mxu0 %v17901_v63  ;;  %18190 = vmatprep.subr.bf16.mxu1 %v17901_v63  ;;  %v7499_v63 = vld [vmem:[%s25163_s3 + $0x10] sm:$0xff]  ;;  %v23540_v0 = vpack.c.bf16 %v13592_v62, %v13591_v60  ;;  %v13605_v62 = vld [vmem:[%s25163_s3 + $0x100] sm:$0xff] }
 0x46b   :  { %v23542_v24 = vpack.c.bf16 %v7500_v13, %v7499_v63  ;;  %v13606_v63 = vld [vmem:[%s25163_s3 + $0x108] sm:$0xff]  ;;  %v13621_v13 = vld [vmem:[%s25163_s3 + $0x180] sm:$0xff] }
 0x46d   :  { %17904 = vmatpush1.bf16.msra.mxu0 %v17903_v2  ;;  %18192 = vmatpush1.bf16.msra.mxu1 %v17903_v2  ;;  %v13594_v2 = vld [vmem:[%s25163_s3 + $0xa8] sm:$0xff] }
 0x46e   :  { %17906 = vmatprep.subr.bf16.mxu0 %v17905_v8  ;;  %18194 = vmatprep.subr.bf16.mxu1 %v17905_v8  ;;  %v7501_v8 = vld [vmem:[%s25163_s3 + $0x20] sm:$0xff]  ;;  %v23564_v42 = vpack.c.bf16 %v13594_v2, %v13593_v1  ;;  %v13622_v1 = vld [vmem:[%s25163_s3 + $0x188] sm:$0xff]  ;;  %v23684_v2 = vpack.c.bf16 %v13606_v63, %v13605_v62  ;;  %v13616_v62 = vld [vmem:[%s25163_s3 + $0x158] sm:$0xff] }
 0x46f   :  { %v23566_v14 = vpack.c.bf16 %v7502_v6, %v7501_v8  ;;  %v23686_v8 = vpack.c.bf16 %v13622_v1, %v13621_v13  ;;  %v13607_v6 = vld [vmem:[%s25163_s3 + $0x110] sm:$0xff]  ;;  %v13632_v13 = vld [vmem:[%s25163_s3 + $0x1d8] sm:$0xff] }
 0x470   :  { %v13631_v63 = vld [vmem:[%s25163_s3 + $0x1d0] sm:$0xff] }
 0x471   :  { %17908 = vmatpush1.bf16.msra.mxu0 %v17907_v4  ;;  %18196 = vmatpush1.bf16.msra.mxu1 %v17907_v4  ;;  %v13595_v4 = vld [vmem:[%s25163_s3 + $0xb0] sm:$0xff] }
 0x472   :  { %17910 = vmatprep.subr.bf16.mxu0 %v17909_v16  ;;  %18198 = vmatprep.subr.bf16.mxu1 %v17909_v16  ;;  %v13596_v16 = vld [vmem:[%s25163_s3 + $0xb8] sm:$0xff] }
 0x473   :  { %v23584_v19 = vpack.c.bf16 %v13596_v16, %v13595_v4  ;;  %v13608_v4 = vld [vmem:[%s25163_s3 + $0x118] sm:$0xff]  ;;  %v13623_v16 = vld [vmem:[%s25163_s3 + $0x190] sm:$0xff] }
 0x474   :  { %v23708_v18 = vpack.c.bf16 %v13608_v4, %v13607_v6  ;;  %v23794_v6 = vpack.c.bf16 %v13632_v13, %v13631_v63  ;;  %v13617_v4 = vld [vmem:[%s25163_s3 + $0x160] sm:$0xff] }
 0x475   :  { %17912 = vmatpush1.bf16.msra.mxu0 %v17911_v26  ;;  %18200 = vmatpush1.bf16.msra.mxu1 %v17911_v26  ;;  %v13597_v26 = vld [vmem:[%s25163_s3 + $0xc0] sm:$0xff] }
 0x476   :  { %17914 = vmatprep.subr.bf16.mxu0 %v17913_v27  ;;  %18202 = vmatprep.subr.bf16.mxu1 %v17913_v27  ;;  %v13598_v27 = vld [vmem:[%s25163_s3 + $0xc8] sm:$0xff] }
 0x477   :  { %v23604_v35 = vpack.c.bf16 %v13598_v27, %v13597_v26  ;;  %v23710_v26 = vpack.c.bf16 %v13624_v44, %v13623_v16  ;;  %v13609_v27 = vld [vmem:[%s25163_s3 + $0x120] sm:$0xff]  ;;  %v13618_v16 = vld [vmem:[%s25163_s3 + $0x168] sm:$0xff] }
 0x478   :  { %v13633_v44 = vld [vmem:[%s25163_s3 + $0x1e0] sm:$0xff] }
 0x479   :  { %17916 = vmatpush1.bf16.msra.mxu0 %v17915_v39  ;;  %18204 = vmatpush1.bf16.msra.mxu1 %v17915_v39  ;;  %v13599_v39 = vld [vmem:[%s25163_s3 + $0xd0] sm:$0xff] }
 0x47a   :  { %17918 = vmatprep.subr.bf16.mxu0 %v17917_v40  ;;  %18206 = vmatprep.subr.bf16.mxu1 %v17917_v40  ;;  %v13600_v40 = vld [vmem:[%s25163_s3 + $0xd8] sm:$0xff] }
 0x47b   :  { %v23624_v50 = vpack.c.bf16 %v13600_v40, %v13599_v39  ;;  %v13612_v39 = vld [vmem:[%s25163_s3 + $0x138] sm:$0xff]  ;;  %v13627_v40 = vld [vmem:[%s25163_s3 + $0x1b0] sm:$0xff] }
 0x47c   :  { %v23752_v43 = vpack.c.bf16 %v13612_v39, %v13611_v32  ;;  %v13620_v32 = vld [vmem:[%s25163_s3 + $0x178] sm:$0xff]  ;;  %v13635_v39 = vld [vmem:[%s25163_s3 + $0x1f0] sm:$0xff] }
 0x47d   :  { %17920 = vmatpush1.bf16.msra.mxu0 %v17919_v11  ;;  %18208 = vmatpush1.bf16.msra.mxu1 %v17919_v11  ;;  %v13601_v11 = vld [vmem:[%s25163_s3 + $0xe0] sm:$0xff] }
 0x47e   :  { %17922 = vmatprep.subr.bf16.mxu0 %v17921_v47  ;;  %18210 = vmatprep.subr.bf16.mxu1 %v17921_v47  ;;  %v13602_v47 = vld [vmem:[%s25163_s3 + $0xe8] sm:$0xff] }
 0x481   :  { %17924 = vmatpush1.bf16.msra.mxu0 %v17923_v5  ;;  %18212 = vmatpush1.bf16.msra.mxu1 %v17923_v5  ;;  %v23644_v5 = vpack.c.bf16 %v13602_v47, %v13601_v11  ;;  %v23754_v11 = vpack.c.bf16 %v13628_v41, %v13627_v40  ;;  %v13613_v47 = vld [vmem:[%s25163_s3 + $0x140] sm:$0xff]  ;;  %v13636_v40 = vld [vmem:[%s25163_s3 + $0x1f8] sm:$0xff] }
 0x482   :  { %18213 = vmatprep.subr.bf16.mxu0 %v25176_v61  ;;  %18237 = vmatprep.subr.bf16.mxu1 %v25176_v61 }
 0x484   :  { %6538 = vmatmul.mubr.f32.vlgmr.msra.gmra.mrb[6].mxu0 %v13274_v55  ;;  %7469 = vmatmul.mubr.f32.vlgmr.msra.gmra.mrb[6].mxu1 %v13550_v56  ;;  %v7512_v55 = vld [vmem:[%s25163_s3 + $0x78] sm:$0xff]  ;;  %v23664_v56 = vpack.c.bf16 %v13604_v53, %v13603_v59  ;;  %v13630_v59 = vld [vmem:[%s25163_s3 + $0x1c8] sm:$0xff]  ;;  %v23772_v53 = vpack.c.bf16 %v13614_v49, %v13613_v47  ;;  %v23834_v47 = vpack.c.bf16 %v13636_v40, %v13635_v39  ;;  %v19399_v49 = vpop.permute.xlu0 %19398 }
 0x485   :  { %18215 = vmatpush3.bf16.msra.mxu0 %v23520_v57  ;;  %18239 = vmatpush3.bf16.msra.mxu1 %v23522_v58  ;;  %v23666_v60 = vpack.c.bf16 %v7512_v55, %v7511_v54  ;;  %v23774_v54 = vpack.c.bf16 %v13630_v59, %v13629_v51  ;;  %v13615_v55 = vld [vmem:[%s25163_s3 + $0x150] sm:$0xff]  ;;  %v19401_v59 = vunpack.i.h.bf16 %v19399_v49 }
 0x486   :  { %18216 = vmatprep.subr.bf16.mxu0 %v25176_v61  ;;  %18240 = vmatprep.subr.bf16.mxu1 %v25176_v61  ;;  %v23792_v1 = vpack.c.bf16 %v13616_v62, %v13615_v55  ;;  %v19400_v55 = vunpack.i.l.bf16 %v19399_v49 }
 0x487   :  { %14510 = vmatprep.mubr.msk.f32.mxu0 %vm19440_vm1, %v25174_v10  ;;  %14545 = vmatprep.mubr.msk.f32.mxu1 %vm19440_vm1, %v25174_v10 }
 0x488   :  { %v19404_v51 = vpop.permute.xlu0 %19403  ;;  %v7877_v13 = vsel %vm7876_vm2, %v19400_v55, %v19401_v59  ;;  %v7860_v59 = vld [vmem:[%s25164_s5 + $0x10] sm:$0xff]  ;;  %v7861_v55 = vld [vmem:[%s25164_s5 + $0x18] sm:$0xff] }
 0x489   :  { %18218 = vmatpush3.bf16.msra.mxu0 %v23540_v0  ;;  %18242 = vmatpush3.bf16.msra.mxu1 %v23542_v24  ;;  %v19406_v62 = vunpack.i.h.bf16 %v19404_v51  ;;  %v19405_v63 = vunpack.i.l.bf16 %v19404_v51 }
 0x48a   :  { %18219 = vmatprep.subr.bf16.mxu0 %v25176_v61  ;;  %18243 = vmatprep.subr.bf16.mxu1 %v25176_v61 }
 0x48d   :  { %18221 = vmatpush3.bf16.msra.mxu0 %v23564_v42  ;;  %18245 = vmatpush3.bf16.msra.mxu1 %v23566_v14 }
 0x48e   :  { %18222 = vmatprep.subr.bf16.mxu0 %v25176_v61  ;;  %18246 = vmatprep.subr.bf16.mxu1 %v25176_v61 }
 0x491   :  { %18224 = vmatpush3.bf16.msra.mxu0 %v23584_v19  ;;  %18248 = vmatpush3.bf16.msra.mxu1 %v23586_v28 }
 0x492   :  { %18225 = vmatprep.subr.bf16.mxu0 %v25176_v61  ;;  %18249 = vmatprep.subr.bf16.mxu1 %v25176_v61 }
 0x495   :  { %18227 = vmatpush3.bf16.msra.mxu0 %v23604_v35  ;;  %18251 = vmatpush3.bf16.msra.mxu1 %v23606_v36 }
 0x496   :  { %18228 = vmatprep.subr.bf16.mxu0 %v25176_v61  ;;  %18252 = vmatprep.subr.bf16.mxu1 %v25176_v61 }
 0x499   :  { %18230 = vmatpush3.bf16.msra.mxu0 %v23624_v50  ;;  %18254 = vmatpush3.bf16.msra.mxu1 %v23626_v46 }
 0x49a   :  { %18231 = vmatprep.subr.bf16.mxu0 %v25176_v61  ;;  %18255 = vmatprep.subr.bf16.mxu1 %v25176_v61 }
 0x49d   :  { %18233 = vmatpush3.bf16.msra.mxu0 %v23644_v5  ;;  %18257 = vmatpush3.bf16.msra.mxu1 %v23646_v52 }
 0x49e   :  { %18234 = vmatprep.subr.bf16.mxu0 %v25176_v61  ;;  %18258 = vmatprep.subr.bf16.mxu1 %v25176_v61 }
 0x4a1   :  { %18236 = vmatpush3.bf16.msra.mxu0 %v23664_v56  ;;  %18260 = vmatpush3.bf16.msra.mxu1 %v23666_v60 }
 0x4a2   :  { %18261 = vmatprep.subr.bf16.mxu0 %v25176_v61  ;;  %18285 = vmatprep.subr.bf16.mxu1 %v25176_v61 }
 0x4a4   :  { %14511 = vmatmul.mubr.f32.vlgmr.msra.gmra.mrb[8].mxu0 %v1905_v12  ;;  %14546 = vmatmul.mubr.f32.vlgmr.msra.gmra.mrb[8].mxu1 %v975_v21  ;;  %v13626_v12 = vld [vmem:[%s25163_s3 + $0x1a8] sm:$0xff]  ;;  %v23732_v21 = vpack.c.bf16 %v13610_v3, %v13609_v27  ;;  %v23812_v3 = vpack.c.bf16 %v13618_v16, %v13617_v4  ;;  %v7955_v4 = vsel %vm7876_vm2, %v19405_v63, %v19406_v62  ;;  %v19409_v16 = vpop.permute.xlu1 %19408 }
 0x4a5   :  { %18263 = vmatpush3.bf16.msra.mxu0 %v23684_v2  ;;  %18287 = vmatpush3.bf16.msra.mxu1 %v23686_v8  ;;  %v23734_v31 = vpack.c.bf16 %v13626_v12, %v13625_v7  ;;  %v13634_v27 = vld [vmem:[%s25163_s3 + $0x1e8] sm:$0xff]  ;;  %v13619_v12 = vld [vmem:[%s25163_s3 + $0x170] sm:$0xff]  ;;  %v19410_v39 = vunpack.i.l.bf16 %v19409_v16 }
 0x4a6   :  { %18264 = vmatprep.subr.bf16.mxu0 %v25176_v61  ;;  %18288 = vmatprep.subr.bf16.mxu1 %v25176_v61  ;;  %v23814_v7 = vpack.c.bf16 %v13634_v27, %v13633_v44  ;;  %v23832_v41 = vpack.c.bf16 %v13620_v32, %v13619_v12  ;;  %v7858_v27 = vld [vmem:[%s25164_s5] sm:$0xff]  ;;  %v7859_v12 = vld [vmem:[%s25164_s5 + $0x8] sm:$0xff]  ;;  %v19411_v32 = vunpack.i.h.bf16 %v19409_v16 }
 0x4a7   :  { %14580 = vmatprep.mubr.msk.f32.mxu0 %vm19440_vm1, %v25174_v10  ;;  %14615 = vmatprep.mubr.msk.f32.mxu1 %vm19440_vm1, %v25174_v10  ;;  %v18418_v51 = vpack.c.bf16 %v7859_v12, %v7858_v27  ;;  %v7863_v16 = vld [vmem:[%s25164_s5 + $0x28] sm:$0xff]  ;;  %v7864_v27 = vld [vmem:[%s25164_s5 + $0x30] sm:$0xff]  ;;  %v7865_v12 = vld [vmem:[%s25164_s5 + $0x38] sm:$0xff] }
 0x4a8   :  { %v19414_v44 = vpop.permute.xlu1 %19413  ;;  %v23931_v62 = vsel %vm7876_vm2, %v19410_v39, %v19411_v32  ;;  %v18427_v32 = vpack.c.bf16 %v7865_v12, %v7864_v27  ;;  %v13638_v39 = vld [vmem:[%s25164_s5 + $0x40] sm:$0xff] }
 0x4a9   :  { %18266 = vmatpush3.bf16.msra.mxu0 %v23708_v18  ;;  %18290 = vmatpush3.bf16.msra.mxu1 %v23710_v26  ;;  %v19416_v40 = vunpack.i.h.bf16 %v19414_v44  ;;  %v19415_v49 = vunpack.i.l.bf16 %v19414_v44 }
 0x4aa   :  { %18267 = vmatprep.subr.bf16.mxu0 %v25176_v61  ;;  %18291 = vmatprep.subr.bf16.mxu1 %v25176_v61 }
 0x4ab   :  { %v23934_v63 = vsel %vm7876_vm2, %v19415_v49, %v19416_v40  ;;  %v13639_v40 = vld [vmem:[%s25164_s5 + $0x48] sm:$0xff] }
 0x4ac   :  { %v18406_v49 = vpack.c.bf16 %v13639_v40, %v13638_v39  ;;  %v13643_v39 = vld [vmem:[%s25164_s5 + $0x68] sm:$0xff] }
 0x4ad   :  { %18269 = vmatpush3.bf16.msra.mxu0 %v23732_v21  ;;  %18293 = vmatpush3.bf16.msra.mxu1 %v23734_v31 }
 0x4ae   :  { %18270 = vmatprep.subr.bf16.mxu0 %v25176_v61  ;;  %18294 = vmatprep.subr.bf16.mxu1 %v25176_v61 }
 0x4b1   :  { %18272 = vmatpush3.bf16.msra.mxu0 %v23752_v43  ;;  %18296 = vmatpush3.bf16.msra.mxu1 %v23754_v11 }
 0x4b2   :  { %18273 = vmatprep.subr.bf16.mxu0 %v25176_v61  ;;  %18297 = vmatprep.subr.bf16.mxu1 %v25176_v61 }
 0x4b5   :  { %18275 = vmatpush3.bf16.msra.mxu0 %v23772_v53  ;;  %18299 = vmatpush3.bf16.msra.mxu1 %v23774_v54 }
 0x4b6   :  { %18276 = vmatprep.subr.bf16.mxu0 %v25176_v61  ;;  %18300 = vmatprep.subr.bf16.mxu1 %v25176_v61 }
 0x4b9   :  { %18278 = vmatpush3.bf16.msra.mxu0 %v23792_v1  ;;  %18302 = vmatpush3.bf16.msra.mxu1 %v23794_v6 }
 0x4ba   :  { %18279 = vmatprep.subr.bf16.mxu0 %v25176_v61  ;;  %18303 = vmatprep.subr.bf16.mxu1 %v25176_v61 }
 0x4bd   :  { %18281 = vmatpush3.bf16.msra.mxu0 %v23812_v3  ;;  %18305 = vmatpush3.bf16.msra.mxu1 %v23814_v7 }
 0x4be   :  { %18282 = vmatprep.subr.bf16.mxu0 %v25176_v61  ;;  %18306 = vmatprep.subr.bf16.mxu1 %v25176_v61 }
 0x4c1   :  { %18284 = vmatpush3.bf16.msra.mxu0 %v23832_v41  ;;  %18308 = vmatpush3.bf16.msra.mxu1 %v23834_v47 }
 0x4c2   :  { %18309 = vmatprep.subr.bf16.mxu0 %v25176_v61  ;;  %18333 = vmatprep.subr.bf16.mxu1 %v25176_v61 }
 0x4c4   :  { %14581 = vmatmul.mubr.f32.vlgmr.msra.gmra.mrb[10].mxu0 %v22269_v25  ;;  %14616 = vmatmul.mubr.f32.vlgmr.msra.gmra.mrb[10].mxu1 %v22289_v33 }
 0x4c5   :  { %18311 = vmatpush3.bf16.msra.mxu0 %v23520_v57  ;;  %18335 = vmatpush3.bf16.msra.mxu1 %v23522_v58 }
 0x4c6   :  { %18312 = vmatprep.subr.bf16.mxu0 %v25176_v61  ;;  %18336 = vmatprep.subr.bf16.mxu1 %v25176_v61 }
 0x4c7   :  { %14650 = vmatprep.mubr.msk.f32.mxu0 %vm19440_vm1, %v25174_v10  ;;  %14685 = vmatprep.mubr.msk.f32.mxu1 %vm19440_vm1, %v25174_v10 }
 0x4c9   :  { %18314 = vmatpush3.bf16.msra.mxu0 %v23540_v0  ;;  %18338 = vmatpush3.bf16.msra.mxu1 %v23542_v24 }
 0x4ca   :  { %18315 = vmatprep.subr.bf16.mxu0 %v25176_v61  ;;  %18339 = vmatprep.subr.bf16.mxu1 %v25176_v61 }
 0x4cd   :  { %18317 = vmatpush3.bf16.msra.mxu0 %v23564_v42  ;;  %18341 = vmatpush3.bf16.msra.mxu1 %v23566_v14 }
 0x4ce   :  { %18318 = vmatprep.subr.bf16.mxu0 %v25176_v61  ;;  %18342 = vmatprep.subr.bf16.mxu1 %v25176_v61 }
 0x4d1   :  { %18320 = vmatpush3.bf16.msra.mxu0 %v23584_v19  ;;  %18344 = vmatpush3.bf16.msra.mxu1 %v23586_v28 }
 0x4d2   :  { %18321 = vmatprep.subr.bf16.mxu0 %v25176_v61  ;;  %18345 = vmatprep.subr.bf16.mxu1 %v25176_v61 }
 0x4d5   :  { %18323 = vmatpush3.bf16.msra.mxu0 %v23604_v35  ;;  %18347 = vmatpush3.bf16.msra.mxu1 %v23606_v36 }
 0x4d6   :  { %18324 = vmatprep.subr.bf16.mxu0 %v25176_v61  ;;  %18348 = vmatprep.subr.bf16.mxu1 %v25176_v61 }
 0x4d9   :  { %18326 = vmatpush3.bf16.msra.mxu0 %v23624_v50  ;;  %18350 = vmatpush3.bf16.msra.mxu1 %v23626_v46 }
 0x4da   :  { %18327 = vmatprep.subr.bf16.mxu0 %v25176_v61  ;;  %18351 = vmatprep.subr.bf16.mxu1 %v25176_v61 }
 0x4dd   :  { %18329 = vmatpush3.bf16.msra.mxu0 %v23644_v5  ;;  %18353 = vmatpush3.bf16.msra.mxu1 %v23646_v52 }
 0x4de   :  { %18330 = vmatprep.subr.bf16.mxu0 %v25176_v61  ;;  %18354 = vmatprep.subr.bf16.mxu1 %v25176_v61 }
 0x4e1   :  { %18332 = vmatpush3.bf16.msra.mxu0 %v23664_v56  ;;  %18356 = vmatpush3.bf16.msra.mxu1 %v23666_v60 }
 0x4e2   :  { %18357 = vmatprep.subr.bf16.mxu0 %v25176_v61  ;;  %18381 = vmatprep.subr.bf16.mxu1 %v25176_v61 }
 0x4e4   :  { %14651 = vmatmul.mubr.f32.vlgmr.msra.gmra.mrb[12].mxu0 %v7877_v13  ;;  %14686 = vmatmul.mubr.f32.vlgmr.msra.gmra.mrb[12].mxu1 %v7955_v4  ;;  %v18421_v13 = vpack.c.bf16 %v7861_v55, %v7860_v59  ;;  %v7862_v4 = vld [vmem:[%s25164_s5 + $0x20] sm:$0xff]  ;;  %v13640_v55 = vld [vmem:[%s25164_s5 + $0x50] sm:$0xff] }
 0x4e5   :  { %18359 = vmatpush3.bf16.msra.mxu0 %v23684_v2  ;;  %18383 = vmatpush3.bf16.msra.mxu1 %v23686_v8  ;;  %v18424_v44 = vpack.c.bf16 %v7863_v16, %v7862_v4  ;;  %v7477_v59 = vld [vmem:[%s25162_s2] sm:$0x3] }
 0x4e6   :  { %18360 = vmatprep.subr.bf16.mxu0 %v25176_v61  ;;  %18384 = vmatprep.subr.bf16.mxu1 %v25176_v61  ;;  %v7486_v12 = vrot.slane %v7477_v59, %v21219_v48 }
 0x4e7   :  { %14720 = vmatprep.mubr.msk.f32.mxu0 %vm19440_vm1, %v25174_v10  ;;  %14755 = vmatprep.mubr.msk.f32.mxu1 %vm19440_vm1, %v25174_v10 }
 0x4e9   :  { %18362 = vmatpush3.bf16.msra.mxu0 %v23708_v18  ;;  %18386 = vmatpush3.bf16.msra.mxu1 %v23710_v26 }
 0x4ea   :  { %18363 = vmatprep.subr.bf16.mxu0 %v25176_v61  ;;  %18387 = vmatprep.subr.bf16.mxu1 %v25176_v61 }
 0x4ed   :  { %18365 = vmatpush3.bf16.msra.mxu0 %v23732_v21  ;;  %18389 = vmatpush3.bf16.msra.mxu1 %v23734_v31 }
 0x4ee   :  { %18366 = vmatprep.subr.bf16.mxu0 %v25176_v61  ;;  %18390 = vmatprep.subr.bf16.mxu1 %v25176_v61 }
 0x4f1   :  { %18368 = vmatpush3.bf16.msra.mxu0 %v23752_v43  ;;  %18392 = vmatpush3.bf16.msra.mxu1 %v23754_v11 }
 0x4f2   :  { %18369 = vmatprep.subr.bf16.mxu0 %v25176_v61  ;;  %18393 = vmatprep.subr.bf16.mxu1 %v25176_v61 }
 0x4f5   :  { %18371 = vmatpush3.bf16.msra.mxu0 %v23772_v53  ;;  %18395 = vmatpush3.bf16.msra.mxu1 %v23774_v54 }
 0x4f6   :  { %18372 = vmatprep.subr.bf16.mxu0 %v25176_v61  ;;  %18396 = vmatprep.subr.bf16.mxu1 %v25176_v61 }
 0x4f9   :  { %18374 = vmatpush3.bf16.msra.mxu0 %v23792_v1  ;;  %18398 = vmatpush3.bf16.msra.mxu1 %v23794_v6 }
 0x4fa   :  { %18375 = vmatprep.subr.bf16.mxu0 %v25176_v61  ;;  %18399 = vmatprep.subr.bf16.mxu1 %v25176_v61 }
 0x4fd   :  { %18377 = vmatpush3.bf16.msra.mxu0 %v23812_v3  ;;  %18401 = vmatpush3.bf16.msra.mxu1 %v23814_v7 }
 0x4fe   :  { %18378 = vmatprep.subr.bf16.mxu0 %v25176_v61  ;;  %18402 = vmatprep.subr.bf16.mxu1 %v25176_v61 }
 0x501   :  { %18380 = vmatpush3.bf16.msra.mxu0 %v23832_v41  ;;  %18404 = vmatpush3.bf16.msra.mxu1 %v23834_v47 }
 0x502   :  { %18417 = vmatprep.subr.bf16.mxu1 %v25176_v61  ;;  %18405 = vmatprep.subr.bf16.mxu0 %v25176_v61 }
 0x504   :  { %14721 = vmatmul.mubr.f32.vlgmr.msra.gmra.mrb[14].mxu0 %v23931_v62  ;;  %14756 = vmatmul.mubr.f32.vlgmr.msra.gmra.mrb[14].mxu1 %v23934_v63 }
 0x505   :  { %18419 = vmatpush3.bf16.msra.mxu1 %v18418_v51  ;;  %14793 = vmatprep.mubr.msk.f32.mxu1 %vm19440_vm1, %v25174_v10  ;;  %v6546_v51 = vld [vmem:[%s25162_s2] sm:$0x3] }
 0x506   :  { %18420 = vmatprep.subr.bf16.mxu1 %v25176_v61  ;;  %14774 = vmatprep.mubr.msk.f32.mxu0 %vm19440_vm1, %v25174_v10  ;;  %v6551_v16 = vrot.slane %v6546_v51, %v21210_v45  ;;  %v6555_v27 = vrot.slane %v6546_v51, %v21219_v48 }
 0x507   :  { %18407 = vmatpush3.bf16.msra.mxu0 %v18406_v49 }
 0x508   :  { %18408 = vmatprep.subr.bf16.mxu0 %v25176_v61 }
 0x509   :  { %18422 = vmatpush3.bf16.msra.mxu1 %v18421_v13  ;;  %v13641_v13 = vld [vmem:[%s25164_s5 + $0x58] sm:$0xff] }
 0x50a   :  { %18423 = vmatprep.subr.bf16.mxu1 %v25176_v61  ;;  %v18409_v4 = vpack.c.bf16 %v13641_v13, %v13640_v55 }
 0x50c   :  { %18410 = vmatpush3.bf16.msra.mxu0 %v18409_v4 }
 0x50d   :  { %18425 = vmatpush3.bf16.msra.mxu1 %v18424_v44  ;;  %v7482_v44 = vrot.slane %v7477_v59, %v21210_v45  ;;  %18411 = vmatprep.subr.bf16.mxu0 %v25176_v61  ;;  %v25197_v45 = vmov 0.0|0.0  }
 0x50e   :  { %18426 = vmatprep.subr.bf16.mxu1 %v25176_v61 }
 0x511   :  { %18428 = vmatpush3.bf16.msra.mxu1 %v18427_v32  ;;  %v13642_v32 = vld [vmem:[%s25164_s5 + $0x60] sm:$0xff] }
 0x512   :  { %18453 = vmatprep.subr.bf16.mxu1 %v25176_v61  ;;  %v18412_v55 = vpack.c.bf16 %v13643_v39, %v13642_v32 }
 0x514   :  { %18413 = vmatpush3.bf16.msra.mxu0 %v18412_v55 }
 0x515   :  { %18414 = vmatprep.subr.bf16.mxu0 %v25197_v45 }
 0x557   :  { %v6539_v40 = vpop.f32.mrb[6].mxu0  ;;  %v7470_v49 = vpop.f32.mrb[6].mxu1 }
 0x558   :  { %v23988_v13 = vadd.f32 %v6551_v16, %v6539_v40  ;;  %v23990_v17 = vadd.f32 %v7482_v44, %v7470_v49  ;;  %v6541_v51 = vpop.f32.mrb[7].mxu0  ;;  %v7472_v59 = vpop.f32.mrb[7].mxu1  ;;  %v13644_v16 = vld [vmem:[%s25164_s5 + $0x70] sm:$0xff]  ;;  %v13645_v44 = vld [vmem:[%s25164_s5 + $0x78] sm:$0xff] }
 0x559   :  { %v23992_v4 = vadd.f32 %v6555_v27, %v6541_v51  ;;  %v23994_v22 = vadd.f32 %v7486_v12, %v7472_v59  ;;  %v18415_v32 = vpack.c.bf16 %v13645_v44, %v13644_v16 }
 0x55a   :  { %25194 = vst [vmem:[#allocation7_spill] sm:$0xff] %v23990_v17  ;;  %v25181_v10 = vmax.f32 %v23988_v13, 0.0  ;;  %v25185_v61 = vmax.f32 %v23990_v17, 0.0 }
 0x55b   :  { %25195 = vst [vmem:[#allocation8_spill] sm:$0xff] %v23992_v4  ;;  %25196 = vst [vmem:[#allocation9_spill] sm:$0xff] %v23994_v22  ;;  %v25180_v27 = vmax.f32 %v23992_v4, 0.0  ;;  %v25184_v12 = vmax.f32 %v23994_v22, 0.0  ;;  %18416 = vmatpush3.bf16.msra.mxu0 %v18415_v32  ;;  %v24021_v32 = vld [vmem:[%s25165_s4] ss:$0 sm:$0xff] }
 0x55c   :  { %18429 = vmatprep.subr.bf16.mxu0 %v25197_v45 }
 0x55d   :  { %v19427_v39 = vpack.i.bf16 %v25180_v27, %v25181_v10  ;;  %v19432_v40 = vpack.i.bf16 %v25184_v12, %v25185_v61 }
 0x55f   :  { %19433 = vrot.lane.b32.xlu1 %v19432_v40, %s19438_s17  ;;  %19428 = vrot.lane.b32.xlu0 %v19427_v39, %s19438_s17  ;;  %v25198_v39 = vmov 0.0  }
 0x577   :  { %v7597_v49 = vpop.f32.mrb[8].mxu0  ;;  %v7667_v55 = vpop.f32.mrb[8].mxu1 }
 0x578   :  { %v7668_v51 = vadd.f32 %v7667_v55, %v7597_v49  ;;  %v14512_v59 = vpop.f32.mrb[9].mxu0  ;;  %v14547_v16 = vpop.f32.mrb[9].mxu1 }
 0x597   :  { %v7755_v44 = vpop.f32.mrb[10].mxu0  ;;  %v7844_v48 = vpop.f32.mrb[10].mxu1 }
 0x598   :  { %v7759_v27 = vadd.f32 %v7755_v44, %v7668_v51  ;;  %v14582_v10 = vpop.f32.mrb[11].mxu0  ;;  %v14617_v38 = vpop.f32.mrb[11].mxu1 }
 0x59a   :  { %v7848_v12 = vadd.f32 %v7844_v48, %v7759_v27 }
 0x59c   :  { %v7856_v40 = vadd.f32 %v24021_v32, %v7848_v12  ;;  %v25199_v12 = vmax.f32 %v21253_v15, 0.0 }
 0x59e   :  { %v7857_v61 = vmax.f32 %v7856_v40, 0.0 }
 0x5a0   :  { %14794 = vmatmul.mubr.msk.f32.vlgmr.msra.gmra.mrb[16].mxu1 %vm7876_vm2, %v7857_v61 }
 0x5a1   :  { %18455 = vmatpush3.bf16.msra.mxu1 %v23522_v58  ;;  %14863 = vmatprep.mubr.msk.f32.mxu1 %vm19440_vm1, %v25198_v39 }
 0x5a2   :  { %18456 = vmatprep.subr.bf16.mxu1 %v25197_v45 }
 0x5a5   :  { %18458 = vmatpush3.bf16.msra.mxu1 %v23542_v24 }
 0x5a6   :  { %18459 = vmatprep.subr.bf16.mxu1 %v25197_v45 }
 0x5a9   :  { %18461 = vmatpush3.bf16.msra.mxu1 %v23566_v14 }
 0x5aa   :  { %18462 = vmatprep.subr.bf16.mxu1 %v25197_v45 }
 0x5ad   :  { %18464 = vmatpush3.bf16.msra.mxu1 %v23586_v28 }
 0x5ae   :  { %18465 = vmatprep.subr.bf16.mxu1 %v25197_v45 }
 0x5b1   :  { %18467 = vmatpush3.bf16.msra.mxu1 %v23606_v36 }
 0x5b2   :  { %18468 = vmatprep.subr.bf16.mxu1 %v25197_v45 }
 0x5b5   :  { %18470 = vmatpush3.bf16.msra.mxu1 %v23626_v46 }
 0x5b6   :  { %18471 = vmatprep.subr.bf16.mxu1 %v25197_v45 }
 0x5b7   :  { %v7945_v38 = vpop.f32.mrb[12].mxu0  ;;  %v8023_v48 = vpop.f32.mrb[12].mxu1 }
 0x5b8   :  { %v8024_v61 = vadd.f32 %v8023_v48, %v7945_v38  ;;  %v14652_v10 = vpop.f32.mrb[13].mxu0  ;;  %v14687_v27 = vpop.f32.mrb[13].mxu1  ;;  %v25200_v38 = vmax.f32 %v21255_v9, 0.0  ;;  %v13648_v9 = vld [vmem:[%s25164_s5 + $0x80] sm:$0xff]  ;;  %v13650_v48 = vld [vmem:[%s25164_s5 + $0x90] sm:$0xff] }
 0x5b9   :  { %18473 = vmatpush3.bf16.msra.mxu1 %v23646_v52  ;;  %v13651_v10 = vld [vmem:[%s25164_s5 + $0x98] sm:$0xff] }
 0x5ba   :  { %18474 = vmatprep.subr.bf16.mxu1 %v25197_v45  ;;  %v18529_v27 = vpack.c.bf16 %v13651_v10, %v13650_v48 }
 0x5bd   :  { %18476 = vmatpush3.bf16.msra.mxu1 %v23666_v60 }
 0x5be   :  { %18501 = vmatprep.subr.bf16.mxu1 %v25197_v45 }
 0x5c0   :  { %14864 = vmatmul.mubr.f32.vlgmr.msra.gmra.mrb[18].mxu1 %v25199_v12  ;;  %v13652_v12 = vld [vmem:[%s25164_s5 + $0xa0] sm:$0xff] }
 0x5c1   :  { %18503 = vmatpush3.bf16.msra.mxu1 %v23686_v8  ;;  %14933 = vmatprep.mubr.msk.f32.mxu1 %vm19440_vm1, %v25198_v39 }
 0x5c2   :  { %18504 = vmatprep.subr.bf16.mxu1 %v25197_v45 }
 0x5c5   :  { %18506 = vmatpush3.bf16.msra.mxu1 %v23710_v26 }
 0x5c6   :  { %18507 = vmatprep.subr.bf16.mxu1 %v25197_v45 }
 0x5c9   :  { %18509 = vmatpush3.bf16.msra.mxu1 %v23734_v31 }
 0x5ca   :  { %18510 = vmatprep.subr.bf16.mxu1 %v25197_v45 }
 0x5cd   :  { %18512 = vmatpush3.bf16.msra.mxu1 %v23754_v11 }
 0x5ce   :  { %18513 = vmatprep.subr.bf16.mxu1 %v25197_v45 }
 0x5d1   :  { %18515 = vmatpush3.bf16.msra.mxu1 %v23774_v54 }
 0x5d2   :  { %18516 = vmatprep.subr.bf16.mxu1 %v25197_v45 }
 0x5d5   :  { %18518 = vmatpush3.bf16.msra.mxu1 %v23794_v6 }
 0x5d6   :  { %18519 = vmatprep.subr.bf16.mxu1 %v25197_v45 }
 0x5d7   :  { %v8103_v15 = vpop.f32.mrb[14].mxu0  ;;  %v8184_v49 = vpop.f32.mrb[14].mxu1 }
 0x5d8   :  { %v8107_v55 = vadd.f32 %v8103_v15, %v8024_v61  ;;  %v14722_v51 = vpop.f32.mrb[15].mxu0  ;;  %v14757_v59 = vpop.f32.mrb[15].mxu1  ;;  %v13653_v15 = vld [vmem:[%s25164_s5 + $0xa8] sm:$0xff] }
 0x5d9   :  { %18521 = vmatpush3.bf16.msra.mxu1 %v23814_v7  ;;  %v13654_v59 = vld [vmem:[%s25164_s5 + $0xb0] sm:$0xff] }
 0x5da   :  { %v8188_v16 = vadd.f32 %v8184_v49, %v8107_v55  ;;  %18522 = vmatprep.subr.bf16.mxu1 %v25197_v45  ;;  %v18532_v49 = vpack.c.bf16 %v13653_v15, %v13652_v12 }
 0x5dc   :  { %v8189_v44 = vadd.f32 %v24021_v32, %v8188_v16  ;;  %v13655_v16 = vld [vmem:[%s25164_s5 + $0xb8] sm:$0xff] }
 0x5dd   :  { %18524 = vmatpush3.bf16.msra.mxu1 %v23834_v47 }
 0x5de   :  { %v8190_v40 = vmax.f32 %v8189_v44, 0.0  ;;  %18537 = vmatprep.subr.bf16.mxu1 %v25197_v45  ;;  %v18535_v44 = vpack.c.bf16 %v13655_v16, %v13654_v59 }
 0x5e0   :  { %14934 = vmatmul.mubr.f32.vlgmr.msra.gmra.mrb[20].mxu1 %v22291_v34  ;;  %14775 = vmatmul.mubr.msk.f32.vlgmr.msra.gmra.mrb[16].mxu0 %vm7876_vm2, %v8190_v40 }
 0x5e1   :  { %18431 = vmatpush3.bf16.msra.mxu0 %v23520_v57  ;;  %18539 = vmatpush3.bf16.msra.mxu1 %v23520_v57 }
 0x5e2   :  { %18432 = vmatprep.subr.bf16.mxu0 %v25197_v45  ;;  %18540 = vmatprep.subr.bf16.mxu1 %v25197_v45 }
 0x5e3   :  { %14828 = vmatprep.mubr.msk.f32.mxu0 %vm19440_vm1, %v25198_v39  ;;  %14987 = vmatprep.mubr.msk.f32.mxu1 %vm19440_vm1, %v25198_v39 }
 0x5e5   :  { %18434 = vmatpush3.bf16.msra.mxu0 %v23540_v0  ;;  %18542 = vmatpush3.bf16.msra.mxu1 %v23540_v0 }
 0x5e6   :  { %18435 = vmatprep.subr.bf16.mxu0 %v25197_v45  ;;  %18543 = vmatprep.subr.bf16.mxu1 %v25197_v45 }
 0x5e9   :  { %18437 = vmatpush3.bf16.msra.mxu0 %v23564_v42  ;;  %18545 = vmatpush3.bf16.msra.mxu1 %v23564_v42 }
 0x5ea   :  { %18438 = vmatprep.subr.bf16.mxu0 %v25197_v45  ;;  %18546 = vmatprep.subr.bf16.mxu1 %v25197_v45 }
 0x5ed   :  { %18440 = vmatpush3.bf16.msra.mxu0 %v23584_v19  ;;  %18548 = vmatpush3.bf16.msra.mxu1 %v23584_v19 }
 0x5ee   :  { %18441 = vmatprep.subr.bf16.mxu0 %v25197_v45  ;;  %18549 = vmatprep.subr.bf16.mxu1 %v25197_v45 }
 0x5f1   :  { %18443 = vmatpush3.bf16.msra.mxu0 %v23604_v35  ;;  %18551 = vmatpush3.bf16.msra.mxu1 %v23604_v35 }
 0x5f2   :  { %18444 = vmatprep.subr.bf16.mxu0 %v25197_v45  ;;  %18552 = vmatprep.subr.bf16.mxu1 %v25197_v45 }
 0x5f5   :  { %18446 = vmatpush3.bf16.msra.mxu0 %v23624_v50  ;;  %18554 = vmatpush3.bf16.msra.mxu1 %v23624_v50 }
 0x5f6   :  { %18447 = vmatprep.subr.bf16.mxu0 %v25197_v45  ;;  %18555 = vmatprep.subr.bf16.mxu1 %v25197_v45 }
 0x5f9   :  { %18449 = vmatpush3.bf16.msra.mxu0 %v23644_v5  ;;  %18557 = vmatpush3.bf16.msra.mxu1 %v23644_v5 }
 0x5fa   :  { %18450 = vmatprep.subr.bf16.mxu0 %v25197_v45  ;;  %18558 = vmatprep.subr.bf16.mxu1 %v25197_v45 }
 0x5fd   :  { %18452 = vmatpush3.bf16.msra.mxu0 %v23664_v56  ;;  %18560 = vmatpush3.bf16.msra.mxu1 %v23664_v56 }
 0x5fe   :  { %18477 = vmatprep.subr.bf16.mxu0 %v25197_v45  ;;  %18585 = vmatprep.subr.bf16.mxu1 %v25197_v45 }
 0x600   :  { %14829 = vmatmul.mubr.f32.vlgmr.msra.gmra.mrb[18].mxu0 %v25200_v38  ;;  %14988 = vmatmul.mubr.f32.vlgmr.msra.gmra.mrb[22].mxu1 %v22289_v33  ;;  %v13649_v33 = vld [vmem:[%s25164_s5 + $0x88] sm:$0xff] }
 0x601   :  { %18479 = vmatpush3.bf16.msra.mxu0 %v23684_v2  ;;  %18587 = vmatpush3.bf16.msra.mxu1 %v23684_v2  ;;  %v18526_v61 = vpack.c.bf16 %v13649_v33, %v13648_v9 }
 0x602   :  { %18480 = vmatprep.subr.bf16.mxu0 %v25197_v45  ;;  %18588 = vmatprep.subr.bf16.mxu1 %v25197_v45 }
 0x603   :  { %14898 = vmatprep.mubr.msk.f32.mxu0 %vm19440_vm1, %v25198_v39  ;;  %15057 = vmatprep.mubr.msk.f32.mxu1 %vm19440_vm1, %v25198_v39 }
 0x605   :  { %18482 = vmatpush3.bf16.msra.mxu0 %v23708_v18  ;;  %18590 = vmatpush3.bf16.msra.mxu1 %v23708_v18 }
 0x606   :  { %18483 = vmatprep.subr.bf16.mxu0 %v25197_v45  ;;  %18591 = vmatprep.subr.bf16.mxu1 %v25197_v45 }
 0x609   :  { %18485 = vmatpush3.bf16.msra.mxu0 %v23732_v21  ;;  %18593 = vmatpush3.bf16.msra.mxu1 %v23732_v21 }
 0x60a   :  { %18486 = vmatprep.subr.bf16.mxu0 %v25197_v45  ;;  %18594 = vmatprep.subr.bf16.mxu1 %v25197_v45 }
 0x60d   :  { %18488 = vmatpush3.bf16.msra.mxu0 %v23752_v43  ;;  %18596 = vmatpush3.bf16.msra.mxu1 %v23752_v43 }
 0x60e   :  { %18489 = vmatprep.subr.bf16.mxu0 %v25197_v45  ;;  %18597 = vmatprep.subr.bf16.mxu1 %v25197_v45 }
 0x611   :  { %18491 = vmatpush3.bf16.msra.mxu0 %v23772_v53  ;;  %18599 = vmatpush3.bf16.msra.mxu1 %v23772_v53 }
 0x612   :  { %18492 = vmatprep.subr.bf16.mxu0 %v25197_v45  ;;  %18600 = vmatprep.subr.bf16.mxu1 %v25197_v45 }
 0x615   :  { %18494 = vmatpush3.bf16.msra.mxu0 %v23792_v1  ;;  %18602 = vmatpush3.bf16.msra.mxu1 %v23792_v1 }
 0x616   :  { %18495 = vmatprep.subr.bf16.mxu0 %v25197_v45  ;;  %18603 = vmatprep.subr.bf16.mxu1 %v25197_v45 }
 0x619   :  { %18497 = vmatpush3.bf16.msra.mxu0 %v23812_v3  ;;  %18605 = vmatpush3.bf16.msra.mxu1 %v23812_v3 }
 0x61a   :  { %18498 = vmatprep.subr.bf16.mxu0 %v25197_v45  ;;  %18606 = vmatprep.subr.bf16.mxu1 %v25197_v45 }
 0x61d   :  { %18500 = vmatpush3.bf16.msra.mxu0 %v23832_v41  ;;  %18608 = vmatpush3.bf16.msra.mxu1 %v23832_v41 }
 0x61e   :  { %18525 = vmatprep.subr.bf16.mxu0 %v25197_v45  ;;  %18633 = vmatprep.subr.bf16.mxu1 %v25197_v45 }
 0x620   :  { %14899 = vmatmul.mubr.f32.vlgmr.msra.gmra.mrb[20].mxu0 %v22277_v30  ;;  %15058 = vmatmul.mubr.f32.vlgmr.msra.gmra.mrb[24].mxu1 %v23268_v20 }
 0x621   :  { %14952 = vmatprep.mubr.msk.f32.mxu0 %vm19440_vm1, %v25198_v39  ;;  %15111 = vmatprep.mubr.msk.f32.mxu1 %vm19440_vm1, %v25198_v39 }
 0x622   :  { %18527 = vmatpush3.bf16.msra.mxu0 %v18526_v61 }
 0x623   :  { %18528 = vmatprep.subr.bf16.mxu0 %v25197_v45 }
 0x626   :  { %18530 = vmatpush3.bf16.msra.mxu0 %v18529_v27 }
 0x627   :  { %18531 = vmatprep.subr.bf16.mxu0 %v25197_v45 }
 0x62a   :  { %18533 = vmatpush3.bf16.msra.mxu0 %v18532_v49 }
 0x62b   :  { %18534 = vmatprep.subr.bf16.mxu0 %v25197_v45 }
 0x62e   :  { %18536 = vmatpush3.bf16.msra.mxu0 %v18535_v44 }
 0x62f   :  { %18561 = vmatprep.subr.bf16.mxu0 %v25197_v45 }
 0x673   :  { %v8342_v55 = vpop.f32.mrb[16].mxu1 }
 0x674   :  { %v14795_v51 = vpop.f32.mrb[17].mxu1 }
 0x693   :  { %v8482_v40 = vpop.f32.mrb[18].mxu1 }
 0x694   :  { %v14865_v38 = vpop.f32.mrb[19].mxu1 }
 0x6b3   :  { %v8623_v9 = vpop.f32.mrb[20].mxu1  ;;  %v8269_v33 = vpop.f32.mrb[16].mxu0 }
 0x6b4   :  { %v24175_v48 = vadd.f32 %v8342_v55, %v8269_v33  ;;  %v14935_v61 = vpop.f32.mrb[21].mxu1  ;;  %v14776_v10 = vpop.f32.mrb[17].mxu0  ;;  %v13662_v33 = vld [vmem:[%s25164_s5 + $0xe8] sm:$0xff] }
 0x6d3   :  { %v8412_v27 = vpop.f32.mrb[18].mxu0  ;;  %v24177_v12 = vpop.f32.mrb[22].mxu1 }
 0x6d4   :  { %v8483_v15 = vadd.f32 %v8482_v40, %v8412_v27  ;;  %v14830_v49 = vpop.f32.mrb[19].mxu0  ;;  %v14989_v51 = vpop.f32.mrb[23].mxu1 }
 0x6d5   :  { %v19419_v40 = vpop.permute.xlu0 %19418  ;;  %v13663_v49 = vld [vmem:[%s25164_s5 + $0xf0] sm:$0xff]  ;;  %v13664_v51 = vld [vmem:[%s25164_s5 + $0xf8] sm:$0xff] }
 0x6d6   :  { %v19421_v61 = vunpack.i.h.bf16 %v19419_v40  ;;  %v19420_v10 = vunpack.i.l.bf16 %v19419_v40 }
 0x6f3   :  { %v8552_v22 = vpop.f32.mrb[20].mxu0  ;;  %v24179_v4 = vpop.f32.mrb[24].mxu1 }
 0x6f4   :  { %v8556_v59 = vadd.f32 %v8552_v22, %v8483_v15  ;;  %v14900_v16 = vpop.f32.mrb[21].mxu0  ;;  %v15059_v44 = vpop.f32.mrb[25].mxu1  ;;  %v13658_v22 = vld [vmem:[%s25164_s5 + $0xc8] sm:$0xff]  ;;  %v24279_v15 = vsel %vm7876_vm2, %v19420_v10, %v19421_v61 }
 0x6f6   :  { %v8627_v17 = vadd.f32 %v8623_v9, %v8556_v59  ;;  %v13661_v9 = vld [vmem:[%s25164_s5 + $0xe0] sm:$0xff]  ;;  %v18643_v59 = vpack.c.bf16 %v13664_v51, %v13663_v49  ;;  %v13667_v51 = vld [vmem:[%s25164_s5 + $0x108] sm:$0xff] }
 0x6f7   :  { %v18640_v27 = vpack.c.bf16 %v13662_v33, %v13661_v9 }
 0x6f8   :  { %v8628_v38 = vadd.f32 %v24021_v32, %v8627_v17  ;;  %v13657_v17 = vld [vmem:[%s25164_s5 + $0xc0] sm:$0xff] }
 0x6fa   :  { %v8629_v20 = vmax.f32 %v8628_v38, 0.0 }
 0x6fc   :  { %14953 = vmatmul.mubr.msk.f32.vlgmr.msra.gmra.mrb[22].mxu0 %vm7876_vm2, %v8629_v20  ;;  %v18634_v20 = vpack.c.bf16 %v13658_v22, %v13657_v17 }
 0x6fd   :  { %18563 = vmatpush3.bf16.msra.mxu0 %v23522_v58  ;;  %15022 = vmatprep.mubr.msk.f32.mxu0 %vm19440_vm1, %v25198_v39 }
 0x6fe   :  { %18564 = vmatprep.subr.bf16.mxu0 %v25197_v45  ;;  %18635 = vmatpush3.bf16.msra.mxu1 %v18634_v20 }
 0x6ff   :  { %18636 = vmatprep.subr.bf16.mxu1 %v25197_v45 }
 0x701   :  { %18566 = vmatpush3.bf16.msra.mxu0 %v23542_v24 }
 0x702   :  { %18567 = vmatprep.subr.bf16.mxu0 %v25197_v45 }
 0x705   :  { %18569 = vmatpush3.bf16.msra.mxu0 %v23566_v14 }
 0x706   :  { %18570 = vmatprep.subr.bf16.mxu0 %v25197_v45 }
 0x709   :  { %18572 = vmatpush3.bf16.msra.mxu0 %v23586_v28 }
 0x70a   :  { %18573 = vmatprep.subr.bf16.mxu0 %v25197_v45 }
 0x70d   :  { %18575 = vmatpush3.bf16.msra.mxu0 %v23606_v36 }
 0x70e   :  { %18576 = vmatprep.subr.bf16.mxu0 %v25197_v45 }
 0x711   :  { %18578 = vmatpush3.bf16.msra.mxu0 %v23626_v46 }
 0x712   :  { %18579 = vmatprep.subr.bf16.mxu0 %v25197_v45 }
 0x715   :  { %18581 = vmatpush3.bf16.msra.mxu0 %v23646_v52 }
 0x716   :  { %18582 = vmatprep.subr.bf16.mxu0 %v25197_v45 }
 0x719   :  { %18584 = vmatpush3.bf16.msra.mxu0 %v23666_v60 }
 0x71a   :  { %18609 = vmatprep.subr.bf16.mxu0 %v25197_v45 }
 0x71c   :  { %15023 = vmatmul.mubr.f32.vlgmr.msra.gmra.mrb[24].mxu0 %v22269_v25  ;;  %v13659_v25 = vld [vmem:[%s25164_s5 + $0xd0] sm:$0xff] }
 0x71d   :  { %18611 = vmatpush3.bf16.msra.mxu0 %v23686_v8  ;;  %15092 = vmatprep.mubr.msk.f32.mxu0 %vm19440_vm1, %v25198_v39 }
 0x71e   :  { %18612 = vmatprep.subr.bf16.mxu0 %v25197_v45 }
 0x721   :  { %18614 = vmatpush3.bf16.msra.mxu0 %v23710_v26 }
 0x722   :  { %18615 = vmatprep.subr.bf16.mxu0 %v25197_v45 }
 0x725   :  { %18617 = vmatpush3.bf16.msra.mxu0 %v23734_v31 }
 0x726   :  { %18618 = vmatprep.subr.bf16.mxu0 %v25197_v45 }
 0x729   :  { %18620 = vmatpush3.bf16.msra.mxu0 %v23754_v11 }
 0x72a   :  { %18621 = vmatprep.subr.bf16.mxu0 %v25197_v45 }
 0x72d   :  { %18623 = vmatpush3.bf16.msra.mxu0 %v23774_v54 }
 0x72e   :  { %18624 = vmatprep.subr.bf16.mxu0 %v25197_v45 }
 0x731   :  { %18626 = vmatpush3.bf16.msra.mxu0 %v23794_v6 }
 0x732   :  { %18627 = vmatprep.subr.bf16.mxu0 %v25197_v45 }
 0x735   :  { %18629 = vmatpush3.bf16.msra.mxu0 %v23814_v7 }
 0x736   :  { %18630 = vmatprep.subr.bf16.mxu0 %v25197_v45 }
 0x739   :  { %18632 = vmatpush3.bf16.msra.mxu0 %v23834_v47 }
 0x73a   :  { %18645 = vmatprep.subr.bf16.mxu0 %v25197_v45 }
 0x73c   :  { %15093 = vmatmul.mubr.f32.vlgmr.msra.gmra.mrb[26].mxu0 %v23270_v23 }
 0x73d   :  { %18647 = vmatpush3.bf16.msra.mxu0 %v23520_v57  ;;  %15146 = vmatprep.mubr.msk.f32.mxu0 %vm19440_vm1, %v25198_v39 }
 0x73e   :  { %18648 = vmatprep.subr.bf16.mxu0 %v25197_v45 }
 0x741   :  { %18650 = vmatpush3.bf16.msra.mxu0 %v23540_v0 }
 0x742   :  { %18651 = vmatprep.subr.bf16.mxu0 %v25197_v45 }
 0x745   :  { %18653 = vmatpush3.bf16.msra.mxu0 %v23564_v42 }
 0x746   :  { %18654 = vmatprep.subr.bf16.mxu0 %v25197_v45 }
 0x749   :  { %18656 = vmatpush3.bf16.msra.mxu0 %v23584_v19 }
 0x74a   :  { %18657 = vmatprep.subr.bf16.mxu0 %v25197_v45 }
 0x74d   :  { %18659 = vmatpush3.bf16.msra.mxu0 %v23604_v35 }
 0x74e   :  { %18660 = vmatprep.subr.bf16.mxu0 %v25197_v45 }
 0x751   :  { %18662 = vmatpush3.bf16.msra.mxu0 %v23624_v50 }
 0x752   :  { %18663 = vmatprep.subr.bf16.mxu0 %v25197_v45 }
 0x755   :  { %18665 = vmatpush3.bf16.msra.mxu0 %v23644_v5 }
 0x756   :  { %18666 = vmatprep.subr.bf16.mxu0 %v25197_v45 }
 0x759   :  { %18668 = vmatpush3.bf16.msra.mxu0 %v23664_v56 }
 0x75a   :  { %18693 = vmatprep.subr.bf16.mxu0 %v25197_v45 }
 0x75c   :  { %15147 = vmatmul.mubr.f32.vlgmr.msra.gmra.mrb[28].mxu0 %v23934_v63  ;;  %v13660_v63 = vld [vmem:[%s25164_s5 + $0xd8] sm:$0xff] }
 0x75d   :  { %18695 = vmatpush3.bf16.msra.mxu0 %v23684_v2  ;;  %15216 = vmatprep.mubr.msk.f32.mxu0 %vm19440_vm1, %v25198_v39  ;;  %v18637_v55 = vpack.c.bf16 %v13660_v63, %v13659_v25 }
 0x75e   :  { %18696 = vmatprep.subr.bf16.mxu0 %v25197_v45 }
 0x75f   :  { %18638 = vmatpush3.bf16.msra.mxu1 %v18637_v55 }
 0x760   :  { %18639 = vmatprep.subr.bf16.mxu1 %v25197_v45 }
 0x761   :  { %18698 = vmatpush3.bf16.msra.mxu0 %v23708_v18 }
 0x762   :  { %18699 = vmatprep.subr.bf16.mxu0 %v25197_v45 }
 0x763   :  { %18641 = vmatpush3.bf16.msra.mxu1 %v18640_v27 }
 0x764   :  { %18642 = vmatprep.subr.bf16.mxu1 %v25197_v45 }
 0x765   :  { %18701 = vmatpush3.bf16.msra.mxu0 %v23732_v21 }
 0x766   :  { %18702 = vmatprep.subr.bf16.mxu0 %v25197_v45 }
 0x767   :  { %18644 = vmatpush3.bf16.msra.mxu1 %v18643_v59  ;;  %v13668_v59 = vld [vmem:[%s25164_s5 + $0x110] sm:$0xff] }
 0x768   :  { %18669 = vmatprep.subr.bf16.mxu1 %v25197_v45 }
 0x769   :  { %18704 = vmatpush3.bf16.msra.mxu0 %v23752_v43 }
 0x76a   :  { %18705 = vmatprep.subr.bf16.mxu0 %v25197_v45 }
 0x76d   :  { %18707 = vmatpush3.bf16.msra.mxu0 %v23772_v53 }
 0x76e   :  { %18708 = vmatprep.subr.bf16.mxu0 %v25197_v45 }
 0x771   :  { %18710 = vmatpush3.bf16.msra.mxu0 %v23792_v1 }
 0x772   :  { %18711 = vmatprep.subr.bf16.mxu0 %v25197_v45 }
 0x775   :  { %18713 = vmatpush3.bf16.msra.mxu0 %v23812_v3 }
 0x776   :  { %18714 = vmatprep.subr.bf16.mxu0 %v25197_v45 }
 0x779   :  { %18716 = vmatpush3.bf16.msra.mxu0 %v23832_v41 }
 0x77a   :  { %18741 = vmatprep.subr.bf16.mxu0 %v25197_v45 }
 0x77c   :  { %15217 = vmatmul.mubr.f32.vlgmr.msra.gmra.mrb[30].mxu0 %v24279_v15 }
 0x77d   :  { %15270 = vmatprep.mubr.msk.f32.mxu0 %vm19440_vm1, %v25198_v39 }
 0x7cf   :  { %v8708_v16 = vpop.f32.mrb[22].mxu0 }
 0x7d0   :  { %v24293_v44 = vadd.f32 %v8708_v16, %v24175_v48  ;;  %v14954_v38 = vpop.f32.mrb[23].mxu0 }
 0x7d1   :  { %v13669_v38 = vld [vmem:[%s25164_s5 + $0x118] sm:$0xff] }
 0x7ef   :  { %v8849_v17 = vpop.f32.mrb[24].mxu0 }
 0x7f0   :  { %v8850_v22 = vadd.f32 %v8849_v17, %v24177_v12  ;;  %v15024_v25 = vpop.f32.mrb[25].mxu0  ;;  %v18745_v17 = vpack.c.bf16 %v13669_v38, %v13668_v59 }
 0x7f1   :  { %v13671_v25 = vld [vmem:[%s25164_s5 + $0x128] sm:$0xff] }
 0x7f2   :  { %v8924_v20 = vadd.f32 %v24179_v4, %v8850_v22  ;;  %v13670_v22 = vld [vmem:[%s25164_s5 + $0x120] sm:$0xff] }
 0x80f   :  { %v8992_v63 = vpop.f32.mrb[26].mxu0 }
 0x810   :  { %v8996_v55 = vadd.f32 %v8992_v63, %v8924_v20  ;;  %v15094_v40 = vpop.f32.mrb[27].mxu0  ;;  %v18748_v20 = vpack.c.bf16 %v13671_v25, %v13670_v22  ;;  %v13672_v63 = vld [vmem:[%s25164_s5 + $0x130] sm:$0xff] }
 0x811   :  { %v13677_v22 = vld [vmem:[%s25164_s5 + $0x150] sm:$0xff] }
 0x812   :  { %v8997_v9 = vadd.f32 %v24021_v32, %v8996_v55  ;;  %v13673_v55 = vld [vmem:[%s25164_s5 + $0x138] sm:$0xff] }
 0x813   :  { %v18751_v40 = vpack.c.bf16 %v13673_v55, %v13672_v63  ;;  %v13679_v55 = vld [vmem:[%s25164_s5 + $0x160] sm:$0xff] }
 0x814   :  { %v8998_v33 = vmax.f32 %v8997_v9, 0.0 }
 0x816   :  { %15112 = vmatmul.mubr.msk.f32.vlgmr.msra.gmra.mrb[26].mxu1 %vm7876_vm2, %v8998_v33 }
 0x817   :  { %18671 = vmatpush3.bf16.msra.mxu1 %v23522_v58  ;;  %15181 = vmatprep.mubr.msk.f32.mxu1 %vm19440_vm1, %v25198_v39 }
 0x818   :  { %18672 = vmatprep.subr.bf16.mxu1 %v25197_v45 }
 0x81b   :  { %18674 = vmatpush3.bf16.msra.mxu1 %v23542_v24 }
 0x81c   :  { %18675 = vmatprep.subr.bf16.mxu1 %v25197_v45 }
 0x81f   :  { %18677 = vmatpush3.bf16.msra.mxu1 %v23566_v14 }
 0x820   :  { %18678 = vmatprep.subr.bf16.mxu1 %v25197_v45 }
 0x823   :  { %18680 = vmatpush3.bf16.msra.mxu1 %v23586_v28 }
 0x824   :  { %18681 = vmatprep.subr.bf16.mxu1 %v25197_v45 }
 0x827   :  { %18683 = vmatpush3.bf16.msra.mxu1 %v23606_v36 }
 0x828   :  { %18684 = vmatprep.subr.bf16.mxu1 %v25197_v45 }
 0x82b   :  { %18686 = vmatpush3.bf16.msra.mxu1 %v23626_v46 }
 0x82c   :  { %18687 = vmatprep.subr.bf16.mxu1 %v25197_v45 }
 0x82f   :  { %18689 = vmatpush3.bf16.msra.mxu1 %v23646_v52  ;;  %v24314_v4 = vpop.f32.mrb[28].mxu0 }
 0x830   :  { %v15148_v48 = vpop.f32.mrb[29].mxu0  ;;  %18690 = vmatprep.subr.bf16.mxu1 %v25197_v45 }
 0x833   :  { %18692 = vmatpush3.bf16.msra.mxu1 %v23666_v60 }
 0x834   :  { %18717 = vmatprep.subr.bf16.mxu1 %v25197_v45 }
 0x836   :  { %15182 = vmatmul.mubr.f32.vlgmr.msra.gmra.mrb[28].mxu1 %v23931_v62  ;;  %v19424_v62 = vpop.permute.xlu1 %19423 }
 0x837   :  { %18719 = vmatpush3.bf16.msra.mxu1 %v23686_v8  ;;  %15251 = vmatprep.mubr.msk.f32.mxu1 %vm19440_vm1, %v25198_v39  ;;  %v19426_v10 = vunpack.i.h.bf16 %v19424_v62  ;;  %v19425_v27 = vunpack.i.l.bf16 %v19424_v62 }
 0x838   :  { %18720 = vmatprep.subr.bf16.mxu1 %v25197_v45 }
 0x839   :  { %v24341_v49 = vsel %vm7876_vm2, %v19425_v27, %v19426_v10 }
 0x83b   :  { %18722 = vmatpush3.bf16.msra.mxu1 %v23710_v26 }
 0x83c   :  { %18723 = vmatprep.subr.bf16.mxu1 %v25197_v45 }
 0x83f   :  { %18725 = vmatpush3.bf16.msra.mxu1 %v23734_v31 }
 0x840   :  { %18726 = vmatprep.subr.bf16.mxu1 %v25197_v45 }
 0x843   :  { %18728 = vmatpush3.bf16.msra.mxu1 %v23754_v11 }
 0x844   :  { %18729 = vmatprep.subr.bf16.mxu1 %v25197_v45 }
 0x847   :  { %18731 = vmatpush3.bf16.msra.mxu1 %v23774_v54 }
 0x848   :  { %18732 = vmatprep.subr.bf16.mxu1 %v25197_v45 }
 0x84b   :  { %18734 = vmatpush3.bf16.msra.mxu1 %v23794_v6 }
 0x84c   :  { %18735 = vmatprep.subr.bf16.mxu1 %v25197_v45 }
 0x84f   :  { %18737 = vmatpush3.bf16.msra.mxu1 %v23814_v7  ;;  %v24335_v12 = vpop.f32.mrb[30].mxu0 }
 0x850   :  { %v15218_v61 = vpop.f32.mrb[31].mxu0  ;;  %18738 = vmatprep.subr.bf16.mxu1 %v25197_v45 }
 0x853   :  { %18740 = vmatpush3.bf16.msra.mxu1 %v23834_v47 }
 0x854   :  { %18753 = vmatprep.subr.bf16.mxu1 %v25197_v45 }
 0x856   :  { %15252 = vmatmul.mubr.f32.vlgmr.msra.gmra.mrb[30].mxu1 %v24341_v49 }
 0x857   :  { %18755 = vmatpush3.bf16.msra.mxu1 %v23520_v57  ;;  %15305 = vmatprep.mubr.msk.f32.mxu1 %vm19440_vm1, %v25198_v39 }
 0x858   :  { %18756 = vmatprep.subr.bf16.mxu1 %v25197_v45 }
 0x85b   :  { %18758 = vmatpush3.bf16.msra.mxu1 %v23540_v0 }
 0x85c   :  { %18759 = vmatprep.subr.bf16.mxu1 %v25197_v45 }
 0x85f   :  { %18761 = vmatpush3.bf16.msra.mxu1 %v23564_v42 }
 0x860   :  { %18762 = vmatprep.subr.bf16.mxu1 %v25197_v45 }
 0x863   :  { %18764 = vmatpush3.bf16.msra.mxu1 %v23584_v19 }
 0x864   :  { %18765 = vmatprep.subr.bf16.mxu1 %v25197_v45 }
 0x867   :  { %18767 = vmatpush3.bf16.msra.mxu1 %v23604_v35 }
 0x868   :  { %18768 = vmatprep.subr.bf16.mxu1 %v25197_v45 }
 0x86b   :  { %18770 = vmatpush3.bf16.msra.mxu1 %v23624_v50 }
 0x86c   :  { %18771 = vmatprep.subr.bf16.mxu1 %v25197_v45 }
 0x86f   :  { %18773 = vmatpush3.bf16.msra.mxu1 %v23644_v5 }
 0x870   :  { %18774 = vmatprep.subr.bf16.mxu1 %v25197_v45 }
 0x873   :  { %18776 = vmatpush3.bf16.msra.mxu1 %v23664_v56 }
 0x874   :  { %18801 = vmatprep.subr.bf16.mxu1 %v25197_v45 }
 0x876   :  { %15306 = vmatmul.mubr.f32.vlgmr.msra.gmra.mrb[32].mxu1 %v22291_v34  ;;  %v13666_v34 = vld [vmem:[%s25164_s5 + $0x100] sm:$0xff] }
 0x877   :  { %18803 = vmatpush3.bf16.msra.mxu1 %v23684_v2  ;;  %15375 = vmatprep.mubr.msk.f32.mxu1 %vm19440_vm1, %v25198_v39  ;;  %v18742_v16 = vpack.c.bf16 %v13667_v51, %v13666_v34 }
 0x878   :  { %18804 = vmatprep.subr.bf16.mxu1 %v25197_v45 }
 0x879   :  { %18743 = vmatpush3.bf16.msra.mxu0 %v18742_v16 }
 0x87a   :  { %18744 = vmatprep.subr.bf16.mxu0 %v25197_v45 }
 0x87b   :  { %18806 = vmatpush3.bf16.msra.mxu1 %v23708_v18 }
 0x87c   :  { %18807 = vmatprep.subr.bf16.mxu1 %v25197_v45 }
 0x87d   :  { %18746 = vmatpush3.bf16.msra.mxu0 %v18745_v17  ;;  %v13676_v17 = vld [vmem:[%s25164_s5 + $0x148] sm:$0xff] }
 0x87e   :  { %18747 = vmatprep.subr.bf16.mxu0 %v25197_v45 }
 0x87f   :  { %18809 = vmatpush3.bf16.msra.mxu1 %v23732_v21 }
 0x880   :  { %18810 = vmatprep.subr.bf16.mxu1 %v25197_v45 }
 0x881   :  { %18749 = vmatpush3.bf16.msra.mxu0 %v18748_v20  ;;  %v13678_v20 = vld [vmem:[%s25164_s5 + $0x158] sm:$0xff] }
 0x882   :  { %18750 = vmatprep.subr.bf16.mxu0 %v25197_v45  ;;  %v18853_v63 = vpack.c.bf16 %v13678_v20, %v13677_v22  ;;  %v25203_v20 = vld [vmem:[#allocation7_spill] sm:$0xff] }
 0x883   :  { %18812 = vmatpush3.bf16.msra.mxu1 %v23752_v43 }
 0x884   :  { %18813 = vmatprep.subr.bf16.mxu1 %v25197_v45 }
 0x885   :  { %18752 = vmatpush3.bf16.msra.mxu0 %v18751_v40  ;;  %v13680_v40 = vld [vmem:[%s25164_s5 + $0x168] sm:$0xff] }
 0x886   :  { %18777 = vmatprep.subr.bf16.mxu0 %v25197_v45 }
 0x887   :  { %18815 = vmatpush3.bf16.msra.mxu1 %v23772_v53 }
 0x888   :  { %18816 = vmatprep.subr.bf16.mxu1 %v25197_v45 }
 0x88b   :  { %18818 = vmatpush3.bf16.msra.mxu1 %v23792_v1 }
 0x88c   :  { %18819 = vmatprep.subr.bf16.mxu1 %v25197_v45 }
 0x88f   :  { %18821 = vmatpush3.bf16.msra.mxu1 %v23812_v3 }
 0x890   :  { %18822 = vmatprep.subr.bf16.mxu1 %v25197_v45 }
 0x893   :  { %18824 = vmatpush3.bf16.msra.mxu1 %v23832_v41 }
 0x894   :  { %18849 = vmatprep.subr.bf16.mxu1 %v25197_v45 }
 0x896   :  { %15376 = vmatmul.mubr.f32.vlgmr.msra.gmra.mrb[34].mxu1 %v23278_v29 }
 0x897   :  { %15429 = vmatprep.mubr.msk.f32.mxu1 %vm19440_vm1, %v25198_v39 }
 0x8e9   :  { %v9077_v9 = vpop.f32.mrb[26].mxu1 }
 0x8ea   :  { %v24413_v33 = vadd.f32 %v9077_v9, %v24293_v44  ;;  %v15113_v48 = vpop.f32.mrb[27].mxu1  ;;  %v18856_v9 = vpack.c.bf16 %v13680_v40, %v13679_v55  ;;  %v13685_v55 = vld [vmem:[%s25164_s5 + $0x188] sm:$0xff]  ;;  %v13686_v40 = vld [vmem:[%s25164_s5 + $0x190] sm:$0xff] }
 0x8eb   :  { %v25201_v48 = vmax.f32 %v23988_v13, 0.0 }
 0x909   :  { %v9218_v62 = vpop.f32.mrb[28].mxu1 }
 0x90a   :  { %v9219_v61 = vadd.f32 %v9218_v62, %v24314_v4  ;;  %v15183_v10 = vpop.f32.mrb[29].mxu1  ;;  %v13681_v62 = vld [vmem:[%s25164_s5 + $0x170] sm:$0xff] }
 0x90c   :  { %v9302_v27 = vadd.f32 %v24335_v12, %v9219_v61  ;;  %v13682_v61 = vld [vmem:[%s25164_s5 + $0x178] sm:$0xff] }
 0x90d   :  { %v18859_v10 = vpack.c.bf16 %v13682_v61, %v13681_v62  ;;  %v19429_v61 = vpop.permute.xlu0 %19428 }
 0x929   :  { %v9379_v34 = vpop.f32.mrb[30].mxu1 }
 0x92a   :  { %v9383_v51 = vadd.f32 %v9379_v34, %v9302_v27  ;;  %v15253_v59 = vpop.f32.mrb[31].mxu1 }
 0x92c   :  { %v9384_v16 = vadd.f32 %v24021_v32, %v9383_v51 }
 0x92e   :  { %v9385_v38 = vmax.f32 %v9384_v16, 0.0 }
 0x930   :  { %15271 = vmatmul.mubr.msk.f32.vlgmr.msra.gmra.mrb[32].mxu0 %vm7876_vm2, %v9385_v38 }
 0x931   :  { %18779 = vmatpush3.bf16.msra.mxu0 %v23522_v58  ;;  %15340 = vmatprep.mubr.msk.f32.mxu0 %vm19440_vm1, %v25198_v39 }
 0x932   :  { %18780 = vmatprep.subr.bf16.mxu0 %v25197_v45 }
 0x935   :  { %18782 = vmatpush3.bf16.msra.mxu0 %v23542_v24 }
 0x936   :  { %18783 = vmatprep.subr.bf16.mxu0 %v25197_v45 }
 0x939   :  { %18785 = vmatpush3.bf16.msra.mxu0 %v23566_v14 }
 0x93a   :  { %18786 = vmatprep.subr.bf16.mxu0 %v25197_v45 }
 0x93d   :  { %18788 = vmatpush3.bf16.msra.mxu0 %v23586_v28 }
 0x93e   :  { %18789 = vmatprep.subr.bf16.mxu0 %v25197_v45 }
 0x941   :  { %18791 = vmatpush3.bf16.msra.mxu0 %v23606_v36 }
 0x942   :  { %18792 = vmatprep.subr.bf16.mxu0 %v25197_v45 }
 0x945   :  { %18794 = vmatpush3.bf16.msra.mxu0 %v23626_v46 }
 0x946   :  { %18795 = vmatprep.subr.bf16.mxu0 %v25197_v45 }
 0x949   :  { %18797 = vmatpush3.bf16.msra.mxu0 %v23646_v52  ;;  %v24434_v44 = vpop.f32.mrb[32].mxu1 }
 0x94a   :  { %v15307_v4 = vpop.f32.mrb[33].mxu1  ;;  %18798 = vmatprep.subr.bf16.mxu0 %v25197_v45 }
 0x94d   :  { %18800 = vmatpush3.bf16.msra.mxu0 %v23666_v60 }
 0x94e   :  { %18825 = vmatprep.subr.bf16.mxu0 %v25197_v45 }
 0x950   :  { %15341 = vmatmul.mubr.f32.vlgmr.msra.gmra.mrb[34].mxu0 %v22277_v30 }
 0x951   :  { %18827 = vmatpush3.bf16.msra.mxu0 %v23686_v8  ;;  %15410 = vmatprep.mubr.msk.f32.mxu0 %vm19440_vm1, %v25198_v39 }
 0x952   :  { %18828 = vmatprep.subr.bf16.mxu0 %v25197_v45 }
 0x955   :  { %18830 = vmatpush3.bf16.msra.mxu0 %v23710_v26 }
 0x956   :  { %18831 = vmatprep.subr.bf16.mxu0 %v25197_v45 }
 0x959   :  { %18833 = vmatpush3.bf16.msra.mxu0 %v23734_v31 }
 0x95a   :  { %18834 = vmatprep.subr.bf16.mxu0 %v25197_v45 }
 0x95d   :  { %18836 = vmatpush3.bf16.msra.mxu0 %v23754_v11 }
 0x95e   :  { %18837 = vmatprep.subr.bf16.mxu0 %v25197_v45 }
 0x961   :  { %18839 = vmatpush3.bf16.msra.mxu0 %v23774_v54 }
 0x962   :  { %18840 = vmatprep.subr.bf16.mxu0 %v25197_v45 }
 0x965   :  { %18842 = vmatpush3.bf16.msra.mxu0 %v23794_v6 }
 0x966   :  { %18843 = vmatprep.subr.bf16.mxu0 %v25197_v45 }
 0x969   :  { %18845 = vmatpush3.bf16.msra.mxu0 %v23814_v7  ;;  %v24455_v30 = vpop.f32.mrb[34].mxu1 }
 0x96a   :  { %v15377_v12 = vpop.f32.mrb[35].mxu1  ;;  %18846 = vmatprep.subr.bf16.mxu0 %v25197_v45 }
 0x96d   :  { %18848 = vmatpush3.bf16.msra.mxu0 %v23834_v47 }
 0x96e   :  { %18861 = vmatprep.subr.bf16.mxu0 %v25197_v45 }
 0x970   :  { %15411 = vmatmul.mubr.f32.vlgmr.msra.gmra.mrb[36].mxu0 %v23280_v37 }
 0x971   :  { %18863 = vmatpush3.bf16.msra.mxu0 %v23520_v57  ;;  %15464 = vmatprep.mubr.msk.f32.mxu0 %vm19440_vm1, %v25198_v39 }
 0x972   :  { %18864 = vmatprep.subr.bf16.mxu0 %v25197_v45 }
 0x975   :  { %18866 = vmatpush3.bf16.msra.mxu0 %v23540_v0 }
 0x976   :  { %18867 = vmatprep.subr.bf16.mxu0 %v25197_v45 }
 0x979   :  { %18869 = vmatpush3.bf16.msra.mxu0 %v23564_v42 }
 0x97a   :  { %18870 = vmatprep.subr.bf16.mxu0 %v25197_v45 }
 0x97d   :  { %18872 = vmatpush3.bf16.msra.mxu0 %v23584_v19 }
 0x97e   :  { %18873 = vmatprep.subr.bf16.mxu0 %v25197_v45 }
 0x981   :  { %18875 = vmatpush3.bf16.msra.mxu0 %v23604_v35 }
 0x982   :  { %18876 = vmatprep.subr.bf16.mxu0 %v25197_v45 }
 0x985   :  { %18878 = vmatpush3.bf16.msra.mxu0 %v23624_v50 }
 0x986   :  { %18879 = vmatprep.subr.bf16.mxu0 %v25197_v45 }
 0x989   :  { %18881 = vmatpush3.bf16.msra.mxu0 %v23644_v5 }
 0x98a   :  { %18882 = vmatprep.subr.bf16.mxu0 %v25197_v45 }
 0x98d   :  { %18884 = vmatpush3.bf16.msra.mxu0 %v23664_v56 }
 0x98e   :  { %18909 = vmatprep.subr.bf16.mxu0 %v25197_v45 }
 0x990   :  { %15465 = vmatmul.mubr.f32.vlgmr.msra.gmra.mrb[38].mxu0 %v23270_v23  ;;  %v13675_v23 = vld [vmem:[%s25164_s5 + $0x140] sm:$0xff] }
 0x991   :  { %18911 = vmatpush3.bf16.msra.mxu0 %v23684_v2  ;;  %15534 = vmatprep.mubr.msk.f32.mxu0 %vm19440_vm1, %v25198_v39  ;;  %v18850_v25 = vpack.c.bf16 %v13676_v17, %v13675_v23 }
 0x992   :  { %18912 = vmatprep.subr.bf16.mxu0 %v25197_v45 }
 0x993   :  { %18851 = vmatpush3.bf16.msra.mxu1 %v18850_v25 }
 0x994   :  { %18852 = vmatprep.subr.bf16.mxu1 %v25197_v45 }
 0x995   :  { %18914 = vmatpush3.bf16.msra.mxu0 %v23708_v18 }
 0x996   :  { %18915 = vmatprep.subr.bf16.mxu0 %v25197_v45 }
 0x997   :  { %18854 = vmatpush3.bf16.msra.mxu1 %v18853_v63  ;;  %v25204_v63 = vmax.f32 %v25203_v20, 0.0 }
 0x998   :  { %18855 = vmatprep.subr.bf16.mxu1 %v25197_v45 }
 0x999   :  { %18917 = vmatpush3.bf16.msra.mxu0 %v23732_v21 }
 0x99a   :  { %18918 = vmatprep.subr.bf16.mxu0 %v25197_v45 }
 0x99b   :  { %18857 = vmatpush3.bf16.msra.mxu1 %v18856_v9 }
 0x99c   :  { %18858 = vmatprep.subr.bf16.mxu1 %v25197_v45 }
 0x99d   :  { %18920 = vmatpush3.bf16.msra.mxu0 %v23752_v43 }
 0x99e   :  { %18921 = vmatprep.subr.bf16.mxu0 %v25197_v45 }
 0x99f   :  { %18860 = vmatpush3.bf16.msra.mxu1 %v18859_v10  ;;  %v13688_v10 = vld [vmem:[%s25164_s5 + $0x1a0] sm:$0xff] }
 0x9a0   :  { %18885 = vmatprep.subr.bf16.mxu1 %v25197_v45 }
 0x9a1   :  { %18923 = vmatpush3.bf16.msra.mxu0 %v23772_v53 }
 0x9a2   :  { %18924 = vmatprep.subr.bf16.mxu0 %v25197_v45 }
 0x9a5   :  { %18926 = vmatpush3.bf16.msra.mxu0 %v23792_v1 }
 0x9a6   :  { %18927 = vmatprep.subr.bf16.mxu0 %v25197_v45 }
 0x9a9   :  { %18929 = vmatpush3.bf16.msra.mxu0 %v23812_v3 }
 0x9aa   :  { %18930 = vmatprep.subr.bf16.mxu0 %v25197_v45 }
 0x9ad   :  { %18932 = vmatpush3.bf16.msra.mxu0 %v23832_v41 }
 0x9ae   :  { %18957 = vmatprep.subr.bf16.mxu0 %v25197_v45 }
 0x9b0   :  { %15535 = vmatmul.mubr.f32.vlgmr.msra.gmra.mrb[40].mxu0 %v25201_v48  ;;  %v13687_v48 = vld [vmem:[%s25164_s5 + $0x198] sm:$0xff] }
 0x9b1   :  { %15588 = vmatprep.mubr.msk.f32.mxu0 %vm19440_vm1, %v25198_v39  ;;  %v18961_v62 = vpack.c.bf16 %v13687_v48, %v13686_v40  ;;  %v24656_v40 = vld [vmem:[%s25165_s4] ss:$0 sm:$0xff] }
 0xa03   :  { %v9464_v27 = vpop.f32.mrb[32].mxu0 }
 0xa04   :  { %v24531_v13 = vadd.f32 %v9464_v27, %v24413_v33  ;;  %v15272_v34 = vpop.f32.mrb[33].mxu0  ;;  %v13689_v27 = vld [vmem:[%s25164_s5 + $0x1a8] sm:$0xff] }
 0xa05   :  { %v19431_v34 = vunpack.i.h.bf16 %v19429_v61 }
 0xa23   :  { %v9605_v51 = vpop.f32.mrb[34].mxu0 }
 0xa24   :  { %v9606_v59 = vadd.f32 %v9605_v51, %v24434_v44  ;;  %v15342_v16 = vpop.f32.mrb[35].mxu0  ;;  %v25202_v44 = vld [vmem:[#allocation6_spill] sm:$0xff]  ;;  %v19430_v51 = vunpack.i.l.bf16 %v19429_v61 }
 0xa26   :  { %v9679_v38 = vadd.f32 %v24455_v30, %v9606_v59  ;;  %v18964_v59 = vpack.c.bf16 %v13689_v27, %v13688_v10  ;;  %v10353_v16 = vsel %vm7876_vm2, %v19430_v51, %v19431_v34 }
 0xa43   :  { %v9746_v4 = vpop.f32.mrb[36].mxu0 }
 0xa44   :  { %v9750_v12 = vadd.f32 %v9746_v4, %v9679_v38  ;;  %v15412_v23 = vpop.f32.mrb[37].mxu0  ;;  %v13690_v38 = vld [vmem:[%s25164_s5 + $0x1b0] sm:$0xff]  ;;  %v13691_v4 = vld [vmem:[%s25164_s5 + $0x1b8] sm:$0xff] }
 0xa46   :  { %v9751_v17 = vadd.f32 %v24021_v32, %v9750_v12  ;;  %v18967_v12 = vpack.c.bf16 %v13691_v4, %v13690_v38 }
 0xa48   :  { %v9752_v22 = vmax.f32 %v9751_v17, 0.0 }
 0xa4a   :  { %15430 = vmatmul.mubr.msk.f32.vlgmr.msra.gmra.mrb[36].mxu1 %vm7876_vm2, %v9752_v22 }
 0xa4b   :  { %18887 = vmatpush3.bf16.msra.mxu1 %v23522_v58  ;;  %15499 = vmatprep.mubr.msk.f32.mxu1 %vm19440_vm1, %v25198_v39 }
 0xa4c   :  { %18888 = vmatprep.subr.bf16.mxu1 %v25197_v45 }
 0xa4f   :  { %18890 = vmatpush3.bf16.msra.mxu1 %v23542_v24 }
 0xa50   :  { %18891 = vmatprep.subr.bf16.mxu1 %v25197_v45 }
 0xa53   :  { %18893 = vmatpush3.bf16.msra.mxu1 %v23566_v14 }
 0xa54   :  { %18894 = vmatprep.subr.bf16.mxu1 %v25197_v45 }
 0xa57   :  { %18896 = vmatpush3.bf16.msra.mxu1 %v23586_v28 }
 0xa58   :  { %18897 = vmatprep.subr.bf16.mxu1 %v25197_v45 }
 0xa5b   :  { %18899 = vmatpush3.bf16.msra.mxu1 %v23606_v36 }
 0xa5c   :  { %18900 = vmatprep.subr.bf16.mxu1 %v25197_v45 }
 0xa5f   :  { %18902 = vmatpush3.bf16.msra.mxu1 %v23626_v46 }
 0xa60   :  { %18903 = vmatprep.subr.bf16.mxu1 %v25197_v45 }
 0xa63   :  { %18905 = vmatpush3.bf16.msra.mxu1 %v23646_v52  ;;  %v24552_v32 = vpop.f32.mrb[38].mxu0 }
 0xa64   :  { %v15466_v33 = vpop.f32.mrb[39].mxu0  ;;  %18906 = vmatprep.subr.bf16.mxu1 %v25197_v45 }
 0xa67   :  { %18908 = vmatpush3.bf16.msra.mxu1 %v23666_v60 }
 0xa68   :  { %18933 = vmatprep.subr.bf16.mxu1 %v25197_v45 }
 0xa6a   :  { %15500 = vmatmul.mubr.f32.vlgmr.msra.gmra.mrb[38].mxu1 %v25202_v44 }
 0xa6b   :  { %18935 = vmatpush3.bf16.msra.mxu1 %v23686_v8  ;;  %15569 = vmatprep.mubr.msk.f32.mxu1 %vm19440_vm1, %v25198_v39 }
 0xa6c   :  { %18936 = vmatprep.subr.bf16.mxu1 %v25197_v45 }
 0xa6f   :  { %18938 = vmatpush3.bf16.msra.mxu1 %v23710_v26 }
 0xa70   :  { %18939 = vmatprep.subr.bf16.mxu1 %v25197_v45 }
 0xa73   :  { %18941 = vmatpush3.bf16.msra.mxu1 %v23734_v31 }
 0xa74   :  { %18942 = vmatprep.subr.bf16.mxu1 %v25197_v45 }
 0xa77   :  { %18944 = vmatpush3.bf16.msra.mxu1 %v23754_v11 }
 0xa78   :  { %18945 = vmatprep.subr.bf16.mxu1 %v25197_v45 }
 0xa7b   :  { %18947 = vmatpush3.bf16.msra.mxu1 %v23774_v54 }
 0xa7c   :  { %18948 = vmatprep.subr.bf16.mxu1 %v25197_v45 }
 0xa7f   :  { %18950 = vmatpush3.bf16.msra.mxu1 %v23794_v6 }
 0xa80   :  { %18951 = vmatprep.subr.bf16.mxu1 %v25197_v45 }
 0xa83   :  { %18953 = vmatpush3.bf16.msra.mxu1 %v23814_v7  ;;  %v24573_v30 = vpop.f32.mrb[40].mxu0 }
 0xa84   :  { %v15536_v25 = vpop.f32.mrb[41].mxu0  ;;  %18954 = vmatprep.subr.bf16.mxu1 %v25197_v45 }
 0xa87   :  { %18956 = vmatpush3.bf16.msra.mxu1 %v23834_v47 }
 0xa88   :  { %18969 = vmatprep.subr.bf16.mxu1 %v25197_v45 }
 0xa8a   :  { %15570 = vmatmul.mubr.f32.vlgmr.msra.gmra.mrb[40].mxu1 %v25204_v63 }
 0xa8b   :  { %18971 = vmatpush3.bf16.msra.mxu1 %v23520_v57  ;;  %15623 = vmatprep.mubr.msk.f32.mxu1 %vm19440_vm1, %v25198_v39 }
 0xa8c   :  { %18972 = vmatprep.subr.bf16.mxu1 %v25197_v45 }
 0xa8f   :  { %18974 = vmatpush3.bf16.msra.mxu1 %v23540_v0 }
 0xa90   :  { %18975 = vmatprep.subr.bf16.mxu1 %v25197_v45 }
 0xa93   :  { %18977 = vmatpush3.bf16.msra.mxu1 %v23564_v42 }
 0xa94   :  { %18978 = vmatprep.subr.bf16.mxu1 %v25197_v45 }
 0xa97   :  { %18980 = vmatpush3.bf16.msra.mxu1 %v23584_v19 }
 0xa98   :  { %18981 = vmatprep.subr.bf16.mxu1 %v25197_v45 }
 0xa9b   :  { %18983 = vmatpush3.bf16.msra.mxu1 %v23604_v35 }
 0xa9c   :  { %18984 = vmatprep.subr.bf16.mxu1 %v25197_v45 }
 0xa9f   :  { %18986 = vmatpush3.bf16.msra.mxu1 %v23624_v50 }
 0xaa0   :  { %18987 = vmatprep.subr.bf16.mxu1 %v25197_v45 }
 0xaa3   :  { %18989 = vmatpush3.bf16.msra.mxu1 %v23644_v5 }
 0xaa4   :  { %18990 = vmatprep.subr.bf16.mxu1 %v25197_v45 }
 0xaa7   :  { %18992 = vmatpush3.bf16.msra.mxu1 %v23664_v56 }
 0xaa8   :  { %19017 = vmatprep.subr.bf16.mxu1 %v25197_v45 }
 0xaaa   :  { %15624 = vmatmul.mubr.f32.vlgmr.msra.gmra.mrb[42].mxu1 %v24341_v49  ;;  %v13684_v49 = vld [vmem:[%s25164_s5 + $0x180] sm:$0xff] }
 0xaab   :  { %19019 = vmatpush3.bf16.msra.mxu1 %v23684_v2  ;;  %15693 = vmatprep.mubr.msk.f32.mxu1 %vm19440_vm1, %v25198_v39  ;;  %v18958_v9 = vpack.c.bf16 %v13685_v55, %v13684_v49 }
 0xaac   :  { %19020 = vmatprep.subr.bf16.mxu1 %v25197_v45 }
 0xaad   :  { %18959 = vmatpush3.bf16.msra.mxu0 %v18958_v9 }
 0xaae   :  { %18960 = vmatprep.subr.bf16.mxu0 %v25197_v45 }
 0xaaf   :  { %19022 = vmatpush3.bf16.msra.mxu1 %v23708_v18 }
 0xab0   :  { %19023 = vmatprep.subr.bf16.mxu1 %v25197_v45 }
 0xab1   :  { %18962 = vmatpush3.bf16.msra.mxu0 %v18961_v62 }
 0xab2   :  { %18963 = vmatprep.subr.bf16.mxu0 %v25197_v45 }
 0xab3   :  { %19025 = vmatpush3.bf16.msra.mxu1 %v23732_v21 }
 0xab4   :  { %19026 = vmatprep.subr.bf16.mxu1 %v25197_v45 }
 0xab5   :  { %18965 = vmatpush3.bf16.msra.mxu0 %v18964_v59 }
 0xab6   :  { %18966 = vmatprep.subr.bf16.mxu0 %v25197_v45 }
 0xab7   :  { %19028 = vmatpush3.bf16.msra.mxu1 %v23752_v43 }
 0xab8   :  { %19029 = vmatprep.subr.bf16.mxu1 %v25197_v45 }
 0xab9   :  { %18968 = vmatpush3.bf16.msra.mxu0 %v18967_v12 }
 0xaba   :  { %18993 = vmatprep.subr.bf16.mxu0 %v25197_v45 }
 0xabb   :  { %19031 = vmatpush3.bf16.msra.mxu1 %v23772_v53 }
 0xabc   :  { %19032 = vmatprep.subr.bf16.mxu1 %v25197_v45 }
 0xabf   :  { %19034 = vmatpush3.bf16.msra.mxu1 %v23792_v1 }
 0xac0   :  { %19035 = vmatprep.subr.bf16.mxu1 %v25197_v45 }
 0xac3   :  { %19037 = vmatpush3.bf16.msra.mxu1 %v23812_v3 }
 0xac4   :  { %19038 = vmatprep.subr.bf16.mxu1 %v25197_v45 }
 0xac7   :  { %19040 = vmatpush3.bf16.msra.mxu1 %v23832_v41 }
 0xac8   :  { %19065 = vmatprep.subr.bf16.mxu1 %v25197_v45 }
 0xaca   :  { %15694 = vmatmul.mubr.f32.vlgmr.msra.gmra.mrb[44].mxu1 %v10353_v16 }
 0xacb   :  { %15747 = vmatprep.mubr.msk.f32.mxu1 %vm19440_vm1, %v25198_v39 }
 0xb1d   :  { %v9831_v23 = vpop.f32.mrb[36].mxu1 }
 0xb1e   :  { %v24649_v17 = vadd.f32 %v9831_v23, %v24531_v13  ;;  %v15431_v22 = vpop.f32.mrb[37].mxu1 }
 0xb3d   :  { %v9972_v33 = vpop.f32.mrb[38].mxu1 }
 0xb3e   :  { %v9973_v44 = vadd.f32 %v9972_v33, %v24552_v32  ;;  %v15501_v25 = vpop.f32.mrb[39].mxu1  ;;  %v10969_v33 = vld [vmem:[%s25166_s7 + $0x8] sm:$0xff] }
 0xb40   :  { %v10047_v20 = vadd.f32 %v24573_v30, %v9973_v44  ;;  %v10973_v44 = vld [vmem:[%s25166_s7 + $0x28] sm:$0xff] }
 0xb41   :  { %v19185_v25 = vpack.c.bf16 %v10973_v44, %v10969_v33  ;;  %v11216_v33 = vld [vmem:[%s25167_s9 + $0x188] sm:$0xff] }
 0xb5d   :  { %v10115_v63 = vpop.f32.mrb[40].mxu1 }
 0xb5e   :  { %v10119_v49 = vadd.f32 %v10115_v63, %v10047_v20  ;;  %v15571_v55 = vpop.f32.mrb[41].mxu1  ;;  %v10975_v20 = vld [vmem:[%s25166_s7 + $0x38] sm:$0xff]  ;;  %v10968_v63 = vld [vmem:[%s25166_s7] sm:$0xff] }
 0xb60   :  { %v10120_v9 = vadd.f32 %v24656_v40, %v10119_v49  ;;  %v10972_v49 = vld [vmem:[%s25166_s7 + $0x20] sm:$0xff] }
 0xb62   :  { %v10121_v48 = vmax.f32 %v10120_v9, 0.0  ;;  %v19187_v9 = vpack.c.bf16 %v10972_v49, %v10968_v63  ;;  %v11168_v63 = vld [vmem:[%s25167_s9 + $0x8] sm:$0xff] }
 0xb64   :  { %15589 = vmatmul.mubr.msk.f32.vlgmr.msra.gmra.mrb[42].mxu0 %vm7876_vm2, %v10121_v48  ;;  %v10977_v48 = vld [vmem:[%s25166_s7 + $0x48] sm:$0xff] }
 0xb65   :  { %18995 = vmatpush3.bf16.msra.mxu0 %v23522_v58  ;;  %15658 = vmatprep.mubr.msk.f32.mxu0 %vm19440_vm1, %v25198_v39 }
 0xb66   :  { %18996 = vmatprep.subr.bf16.mxu0 %v25197_v45 }
 0xb69   :  { %18998 = vmatpush3.bf16.msra.mxu0 %v23542_v24 }
 0xb6a   :  { %18999 = vmatprep.subr.bf16.mxu0 %v25197_v45 }
 0xb6d   :  { %19001 = vmatpush3.bf16.msra.mxu0 %v23566_v14 }
 0xb6e   :  { %19002 = vmatprep.subr.bf16.mxu0 %v25197_v45 }
 0xb71   :  { %19004 = vmatpush3.bf16.msra.mxu0 %v23586_v28 }
 0xb72   :  { %19005 = vmatprep.subr.bf16.mxu0 %v25197_v45 }
 0xb75   :  { %19007 = vmatpush3.bf16.msra.mxu0 %v23606_v36 }
 0xb76   :  { %19008 = vmatprep.subr.bf16.mxu0 %v25197_v45 }
 0xb79   :  { %19010 = vmatpush3.bf16.msra.mxu0 %v23626_v46 }
 0xb7a   :  { %19011 = vmatprep.subr.bf16.mxu0 %v25197_v45 }
 0xb7d   :  { %19013 = vmatpush3.bf16.msra.mxu0 %v23646_v52  ;;  %v24675_v13 = vpop.f32.mrb[42].mxu1 }
 0xb7e   :  { %v15625_v32 = vpop.f32.mrb[43].mxu1  ;;  %19014 = vmatprep.subr.bf16.mxu0 %v25197_v45 }
 0xb81   :  { %19016 = vmatpush3.bf16.msra.mxu0 %v23666_v60 }
 0xb82   :  { %19041 = vmatprep.subr.bf16.mxu0 %v25197_v45 }
 0xb84   :  { %15659 = vmatmul.mubr.f32.vlgmr.msra.gmra.mrb[44].mxu0 %v24279_v15  ;;  %v19434_v15 = vpop.permute.xlu1 %19433 }
 0xb85   :  { %19043 = vmatpush3.bf16.msra.mxu0 %v23686_v8  ;;  %15728 = vmatprep.mubr.msk.f32.mxu0 %vm19440_vm1, %v25198_v39  ;;  %v19436_v61 = vunpack.i.h.bf16 %v19434_v15  ;;  %v19435_v10 = vunpack.i.l.bf16 %v19434_v15  ;;  %v10976_v15 = vld [vmem:[%s25166_s7 + $0x40] sm:$0xff] }
 0xb86   :  { %19044 = vmatprep.subr.bf16.mxu0 %v25197_v45 }
 0xb87   :  { %v10434_v27 = vsel %vm7876_vm2, %v19435_v10, %v19436_v61  ;;  %v10985_v61 = vld [vmem:[%s25166_s7 + $0x88] sm:$0xff] }
 0xb88   :  { %v10989_v10 = vld [vmem:[%s25166_s7 + $0xa8] sm:$0xff] }
 0xb89   :  { %19046 = vmatpush3.bf16.msra.mxu0 %v23710_v26 }
 0xb8a   :  { %19047 = vmatprep.subr.bf16.mxu0 %v25197_v45 }
 0xb8d   :  { %19049 = vmatpush3.bf16.msra.mxu0 %v23734_v31 }
 0xb8e   :  { %19050 = vmatprep.subr.bf16.mxu0 %v25197_v45 }
 0xb91   :  { %19052 = vmatpush3.bf16.msra.mxu0 %v23754_v11 }
 0xb92   :  { %19053 = vmatprep.subr.bf16.mxu0 %v25197_v45 }
 0xb95   :  { %19055 = vmatpush3.bf16.msra.mxu0 %v23774_v54 }
 0xb96   :  { %19056 = vmatprep.subr.bf16.mxu0 %v25197_v45 }
 0xb99   :  { %19058 = vmatpush3.bf16.msra.mxu0 %v23794_v6 }
 0xb9a   :  { %19059 = vmatprep.subr.bf16.mxu0 %v25197_v45 }
 0xb9d   :  { %19061 = vmatpush3.bf16.msra.mxu0 %v23814_v7  ;;  %v24696_v30 = vpop.f32.mrb[44].mxu1 }
 0xb9e   :  { %v15695_v62 = vpop.f32.mrb[45].mxu1  ;;  %19062 = vmatprep.subr.bf16.mxu0 %v25197_v45 }
 0xba1   :  { %19064 = vmatpush3.bf16.msra.mxu0 %v23834_v47 }
 0xba2   :  { %19077 = vmatprep.subr.bf16.mxu0 %v25197_v45 }
 0xba4   :  { %15729 = vmatmul.mubr.f32.vlgmr.msra.gmra.mrb[46].mxu0 %v10434_v27  ;;  %v19193_v27 = vpack.c.bf16 %v10989_v10, %v10985_v61 }
 0xba5   :  { %19079 = vmatpush3.bf16.msra.mxu0 %v23520_v57  ;;  %15782 = vmatprep.mubr.msk.f32.mxu0 %vm19440_vm1, %v25198_v39  ;;  %v13694_v57 = vld [vmem:[%s25164_s5 + $0x1c8] sm:$0xff] }
 0xba6   :  { %19080 = vmatprep.subr.bf16.mxu0 %v25197_v45 }
 0xba9   :  { %19082 = vmatpush3.bf16.msra.mxu0 %v23540_v0  ;;  %v13695_v0 = vld [vmem:[%s25164_s5 + $0x1d0] sm:$0xff] }
 0xbaa   :  { %19083 = vmatprep.subr.bf16.mxu0 %v25197_v45 }
 0xbad   :  { %19085 = vmatpush3.bf16.msra.mxu0 %v23564_v42 }
 0xbae   :  { %19086 = vmatprep.subr.bf16.mxu0 %v25197_v45 }
 0xbb1   :  { %19088 = vmatpush3.bf16.msra.mxu0 %v23584_v19  ;;  %v13696_v19 = vld [vmem:[%s25164_s5 + $0x1d8] sm:$0xff] }
 0xbb2   :  { %19089 = vmatprep.subr.bf16.mxu0 %v25197_v45 }
 0xbb5   :  { %19091 = vmatpush3.bf16.msra.mxu0 %v23604_v35  ;;  %v19069_v35 = vpack.c.bf16 %v13696_v19, %v13695_v0 }
 0xbb6   :  { %19092 = vmatprep.subr.bf16.mxu0 %v25197_v45 }
 0xbb9   :  { %19094 = vmatpush3.bf16.msra.mxu0 %v23624_v50  ;;  %v13697_v50 = vld [vmem:[%s25164_s5 + $0x1e0] sm:$0xff] }
 0xbba   :  { %19095 = vmatprep.subr.bf16.mxu0 %v25197_v45 }
 0xbbd   :  { %19097 = vmatpush3.bf16.msra.mxu0 %v23644_v5  ;;  %v13698_v5 = vld [vmem:[%s25164_s5 + $0x1e8] sm:$0xff] }
 0xbbe   :  { %19098 = vmatprep.subr.bf16.mxu0 %v25197_v45 }
 0xbc1   :  { %19100 = vmatpush3.bf16.msra.mxu0 %v23664_v56  ;;  %v19072_v56 = vpack.c.bf16 %v13698_v5, %v13697_v50 }
 0xbc2   :  { %19125 = vmatprep.subr.bf16.mxu0 %v25197_v45 }
 0xbc4   :  { %15783 = vmatmul.mubr.f32.vlgmr.msra.gmra.mrb[48].mxu0 %v23280_v37  ;;  %v13693_v37 = vld [vmem:[%s25164_s5 + $0x1c0] sm:$0xff] }
 0xbc5   :  { %19127 = vmatpush3.bf16.msra.mxu0 %v23684_v2  ;;  %15852 = vmatprep.mubr.msk.f32.mxu0 %vm19440_vm1, %v25198_v39  ;;  %v19066_v42 = vpack.c.bf16 %v13694_v57, %v13693_v37  ;;  %v25205_v2 = vld [vmem:[#allocation8_spill] sm:$0xff] }
 0xbc6   :  { %19128 = vmatprep.subr.bf16.mxu0 %v25197_v45 }
 0xbc7   :  { %19067 = vmatpush3.bf16.msra.mxu1 %v19066_v42 }
 0xbc8   :  { %19068 = vmatprep.subr.bf16.mxu1 %v25197_v45 }
 0xbc9   :  { %19130 = vmatpush3.bf16.msra.mxu0 %v23708_v18  ;;  %v25206_v18 = vmax.f32 %v25205_v2, 0.0 }
 0xbca   :  { %19131 = vmatprep.subr.bf16.mxu0 %v25197_v45 }
 0xbcb   :  { %19070 = vmatpush3.bf16.msra.mxu1 %v19069_v35 }
 0xbcc   :  { %19071 = vmatprep.subr.bf16.mxu1 %v25197_v45 }
 0xbcd   :  { %19133 = vmatpush3.bf16.msra.mxu0 %v23732_v21  ;;  %v13699_v21 = vld [vmem:[%s25164_s5 + $0x1f0] sm:$0xff] }
 0xbce   :  { %19134 = vmatprep.subr.bf16.mxu0 %v25197_v45 }
 0xbcf   :  { %19073 = vmatpush3.bf16.msra.mxu1 %v19072_v56 }
 0xbd0   :  { %19074 = vmatprep.subr.bf16.mxu1 %v25197_v45 }
 0xbd1   :  { %19136 = vmatpush3.bf16.msra.mxu0 %v23752_v43  ;;  %v13700_v43 = vld [vmem:[%s25164_s5 + $0x1f8] sm:$0xff] }
 0xbd2   :  { %19137 = vmatprep.subr.bf16.mxu0 %v25197_v45 }
 0xbd5   :  { %19139 = vmatpush3.bf16.msra.mxu0 %v23772_v53  ;;  %v19075_v53 = vpack.c.bf16 %v13700_v43, %v13699_v21  ;;  %v10974_v21 = vld [vmem:[%s25166_s7 + $0x30] sm:$0xff]  ;;  %v10979_v43 = vld [vmem:[%s25166_s7 + $0x58] sm:$0xff] }
 0xbd6   :  { %19140 = vmatprep.subr.bf16.mxu0 %v25197_v45 }
 0xbd7   :  { %19076 = vmatpush3.bf16.msra.mxu1 %v19075_v53  ;;  %v10983_v53 = vld [vmem:[%s25166_s7 + $0x78] sm:$0xff] }
 0xbd8   :  { %19101 = vmatprep.subr.bf16.mxu1 %v25197_v45 }
 0xbd9   :  { %19142 = vmatpush3.bf16.msra.mxu0 %v23792_v1 }
 0xbda   :  { %19143 = vmatprep.subr.bf16.mxu0 %v25197_v45 }
 0xbdd   :  { %19145 = vmatpush3.bf16.msra.mxu0 %v23812_v3 }
 0xbde   :  { %19146 = vmatprep.subr.bf16.mxu0 %v25197_v45 }
 0xbe1   :  { %19148 = vmatpush3.bf16.msra.mxu0 %v23832_v41 }
 0xbe2   :  { %19173 = vmatprep.subr.bf16.mxu0 %v25197_v45 }
 0xbe4   :  { %15853 = vmatmul.mubr.f32.vlgmr.msra.gmra.mrb[50].mxu0 %v25206_v18  ;;  %v10970_v18 = vld [vmem:[%s25166_s7 + $0x10] sm:$0xff] }
 0xbe5   :  { %15906 = vmatprep.mubr.msk.f32.mxu0 %vm19440_vm1, %v25198_v39 }
 0xc37   :  { %v10200_v1 = vpop.f32.mrb[42].mxu0 }
 0xc38   :  { %v24772_v3 = vadd.f32 %v10200_v1, %v24649_v17  ;;  %v15590_v41 = vpop.f32.mrb[43].mxu0 }
 0xc57   :  { %v10341_v34 = vpop.f32.mrb[44].mxu0 }
 0xc58   :  { %v10342_v51 = vadd.f32 %v10341_v34, %v24675_v13  ;;  %v15660_v59 = vpop.f32.mrb[45].mxu0  ;;  %v10981_v13 = vld [vmem:[%s25166_s7 + $0x68] sm:$0xff]  ;;  %v19205_v34 = vpack.c.bf16 %v10983_v53, %v10979_v43  ;;  %v11171_v43 = vld [vmem:[%s25167_s9 + $0x20] sm:$0xff] }
 0xc59   :  { %v19189_v32 = vpack.c.bf16 %v10981_v13, %v10977_v48  ;;  %v10982_v59 = vld [vmem:[%s25166_s7 + $0x70] sm:$0xff]  ;;  %v11200_v48 = vld [vmem:[%s25167_s9 + $0x108] sm:$0xff] }
 0xc5a   :  { %v10425_v16 = vadd.f32 %v24696_v30, %v10342_v51  ;;  %v10980_v30 = vld [vmem:[%s25166_s7 + $0x60] sm:$0xff]  ;;  %v10978_v51 = vld [vmem:[%s25166_s7 + $0x50] sm:$0xff]  ;;  %v11172_v53 = vld [vmem:[%s25167_s9 + $0x28] sm:$0xff] }
 0xc5b   :  { %v19191_v62 = vpack.c.bf16 %v10980_v30, %v10976_v15  ;;  %v11185_v13 = vld [vmem:[%s25167_s9 + $0x90] sm:$0xff]  ;;  %v11218_v30 = vld [vmem:[%s25167_s9 + $0x198] sm:$0xff] }
 0xc5c   :  { %v11217_v15 = vld [vmem:[%s25167_s9 + $0x190] sm:$0xff] }
 0xc77   :  { %v10502_v38 = vpop.f32.mrb[46].mxu0 }
 0xc78   :  { %v10506_v4 = vadd.f32 %v10502_v38, %v10425_v16  ;;  %v15730_v12 = vpop.f32.mrb[47].mxu0  ;;  %v10987_v16 = vld [vmem:[%s25166_s7 + $0x98] sm:$0xff] }
 0xc79   :  { %v10991_v38 = vld [vmem:[%s25166_s7 + $0xb8] sm:$0xff]  ;;  %v10984_v12 = vld [vmem:[%s25166_s7 + $0x80] sm:$0xff] }
 0xc7a   :  { %v10507_v23 = vadd.f32 %v24656_v40, %v10506_v4  ;;  %v19209_v4 = vpack.c.bf16 %v10991_v38, %v10987_v16  ;;  %v11221_v16 = vld [vmem:[%s25167_s9 + $0x1b0] sm:$0xff]  ;;  %v11222_v38 = vld [vmem:[%s25167_s9 + $0x1b8] sm:$0xff] }
 0xc7c   :  { %v10508_v22 = vmax.f32 %v10507_v23, 0.0  ;;  %v10988_v23 = vld [vmem:[%s25166_s7 + $0xa0] sm:$0xff] }
 0xc7e   :  { %15748 = vmatmul.mubr.msk.f32.vlgmr.msra.gmra.mrb[46].mxu1 %vm7876_vm2, %v10508_v22  ;;  %v10986_v22 = vld [vmem:[%s25166_s7 + $0x90] sm:$0xff] }
 0xc7f   :  { %19103 = vmatpush3.bf16.msra.mxu1 %v23522_v58  ;;  %15817 = vmatprep.mubr.msk.f32.mxu1 %vm19440_vm1, %v25198_v39 }
 0xc80   :  { %19104 = vmatprep.subr.bf16.mxu1 %v25197_v45 }
 0xc83   :  { %19106 = vmatpush3.bf16.msra.mxu1 %v23542_v24 }
 0xc84   :  { %19107 = vmatprep.subr.bf16.mxu1 %v25197_v45 }
 0xc87   :  { %19109 = vmatpush3.bf16.msra.mxu1 %v23566_v14 }
 0xc88   :  { %19110 = vmatprep.subr.bf16.mxu1 %v25197_v45 }
 0xc8b   :  { %19112 = vmatpush3.bf16.msra.mxu1 %v23586_v28  ;;  %v25207_v28 = vld [vmem:[#allocation9_spill] sm:$0xff] }
 0xc8c   :  { %19113 = vmatprep.subr.bf16.mxu1 %v25197_v45 }
 0xc8f   :  { %19115 = vmatpush3.bf16.msra.mxu1 %v23606_v36  ;;  %v25208_v36 = vmax.f32 %v25207_v28, 0.0  ;;  %v10995_v28 = vld [vmem:[%s25166_s7 + $0xd8] sm:$0xff] }
 0xc90   :  { %19116 = vmatprep.subr.bf16.mxu1 %v25197_v45 }
 0xc93   :  { %19118 = vmatpush3.bf16.msra.mxu1 %v23626_v46  ;;  %v13702_v46 = vld [vmem:[%s25164_s5 + $0x200] sm:$0xff] }
 0xc94   :  { %19119 = vmatprep.subr.bf16.mxu1 %v25197_v45 }
 0xc97   :  { %19121 = vmatpush3.bf16.msra.mxu1 %v23646_v52  ;;  %v24793_v58 = vpop.f32.mrb[48].mxu0  ;;  %v13703_v52 = vld [vmem:[%s25164_s5 + $0x208] sm:$0xff] }
 0xc98   :  { %v15784_v24 = vpop.f32.mrb[49].mxu0  ;;  %19122 = vmatprep.subr.bf16.mxu1 %v25197_v45 }
 0xc9b   :  { %19124 = vmatpush3.bf16.msra.mxu1 %v23666_v60  ;;  %v13704_v60 = vld [vmem:[%s25164_s5 + $0x210] sm:$0xff] }
 0xc9c   :  { %19149 = vmatprep.subr.bf16.mxu1 %v25197_v45 }
 0xc9e   :  { %15818 = vmatmul.mubr.f32.vlgmr.msra.gmra.mrb[48].mxu1 %v23278_v29 }
 0xc9f   :  { %19151 = vmatpush3.bf16.msra.mxu1 %v23686_v8  ;;  %15887 = vmatprep.mubr.msk.f32.mxu1 %vm19440_vm1, %v25198_v39  ;;  %v19174_v8 = vpack.c.bf16 %v13703_v52, %v13702_v46  ;;  %v10999_v46 = vld [vmem:[%s25166_s7 + $0xf8] sm:$0xff]  ;;  %v10992_v52 = vld [vmem:[%s25166_s7 + $0xc0] sm:$0xff] }
 0xca0   :  { %19152 = vmatprep.subr.bf16.mxu1 %v25197_v45 }
 0xca1   :  { %19175 = vmatpush3.bf16.msra.mxu0 %v19174_v8  ;;  %v10996_v8 = vld [vmem:[%s25166_s7 + $0xe0] sm:$0xff] }
 0xca2   :  { %19176 = vmatprep.subr.bf16.mxu0 %v25197_v45 }
 0xca3   :  { %19154 = vmatpush3.bf16.msra.mxu1 %v23710_v26  ;;  %v13705_v26 = vld [vmem:[%s25164_s5 + $0x218] sm:$0xff] }
 0xca4   :  { %19155 = vmatprep.subr.bf16.mxu1 %v25197_v45 }
 0xca7   :  { %19157 = vmatpush3.bf16.msra.mxu1 %v23734_v31  ;;  %v19177_v31 = vpack.c.bf16 %v13705_v26, %v13704_v60  ;;  %v19213_v60 = vpack.c.bf16 %v10999_v46, %v10995_v28  ;;  %v10994_v26 = vld [vmem:[%s25166_s7 + $0xd0] sm:$0xff]  ;;  %v11223_v28 = vld [vmem:[%s25167_s9 + $0x1c0] sm:$0xff] }
 0xca8   :  { %19158 = vmatprep.subr.bf16.mxu1 %v25197_v45 }
 0xca9   :  { %19178 = vmatpush3.bf16.msra.mxu0 %v19177_v31  ;;  %v10998_v31 = vld [vmem:[%s25166_s7 + $0xf0] sm:$0xff] }
 0xcaa   :  { %19179 = vmatprep.subr.bf16.mxu0 %v25197_v45 }
 0xcab   :  { %19160 = vmatpush3.bf16.msra.mxu1 %v23754_v11  ;;  %v13706_v11 = vld [vmem:[%s25164_s5 + $0x220] sm:$0xff] }
 0xcac   :  { %19161 = vmatprep.subr.bf16.mxu1 %v25197_v45 }
 0xcaf   :  { %19163 = vmatpush3.bf16.msra.mxu1 %v23774_v54  ;;  %v13707_v54 = vld [vmem:[%s25164_s5 + $0x228] sm:$0xff] }
 0xcb0   :  { %19164 = vmatprep.subr.bf16.mxu1 %v25197_v45 }
 0xcb3   :  { %19166 = vmatpush3.bf16.msra.mxu1 %v23794_v6  ;;  %v19180_v6 = vpack.c.bf16 %v13707_v54, %v13706_v11  ;;  %v19199_v11 = vpack.c.bf16 %v10996_v8, %v10992_v52  ;;  %v19215_v54 = vpack.c.bf16 %v10998_v31, %v10994_v26  ;;  %v11176_v8 = vld [vmem:[%s25167_s9 + $0x48] sm:$0xff] }
 0xcb4   :  { %19167 = vmatprep.subr.bf16.mxu1 %v25197_v45 }
 0xcb5   :  { %19181 = vmatpush3.bf16.msra.mxu0 %v19180_v6  ;;  %v11183_v6 = vld [vmem:[%s25167_s9 + $0x80] sm:$0xff] }
 0xcb6   :  { %19182 = vmatprep.subr.bf16.mxu0 %v25197_v45 }
 0xcb7   :  { %19169 = vmatpush3.bf16.msra.mxu1 %v23814_v7  ;;  %v10798_v29 = vpop.f32.mrb[50].mxu0  ;;  %v13708_v7 = vld [vmem:[%s25164_s5 + $0x230] sm:$0xff] }
 0xcb8   :  { %v15854_v14 = vpop.f32.mrb[51].mxu0  ;;  %19170 = vmatprep.subr.bf16.mxu1 %v25197_v45  ;;  %v10971_v45 = vld [vmem:[%s25166_s7 + $0x18] sm:$0xff] }
 0xcb9   :  { %v19201_v55 = vpack.c.bf16 %v10975_v20, %v10971_v45  ;;  %v10997_v14 = vld [vmem:[%s25166_s7 + $0xe8] sm:$0xff]  ;;  %v11167_v20 = vld [vmem:[%s25167_s9] sm:$0xff] }
 0xcba   :  { %v19219_v61 = vpack.c.bf16 %v11168_v63, %v11167_v20 }
 0xcbb   :  { %19172 = vmatpush3.bf16.msra.mxu1 %v23834_v47  ;;  %v13709_v47 = vld [vmem:[%s25164_s5 + $0x238] sm:$0xff] }
 0xcbc   :  { %v19183_v17 = vpack.c.bf16 %v13709_v47, %v13708_v7  ;;  %19186 = vmatprep.subr.bf16.mxu1 %v19185_v25  ;;  %v11184_v7 = vld [vmem:[%s25167_s9 + $0x88] sm:$0xff]  ;;  %v11215_v47 = vld [vmem:[%s25167_s9 + $0x180] sm:$0xff] }
 0xcbd   :  { %v19249_v44 = vpack.c.bf16 %v11216_v33, %v11215_v47  ;;  %v13711_v25 = vld [vmem:[%s25168_s6] ss:$0 sm:$0xff]  ;;  %v11225_v47 = vld [vmem:[%s25167_s9 + $0x1d0] sm:$0xff] }
 0xcbe   :  { %15888 = vmatmul.mubr.f32.vlgmr.msra.gmra.mrb[50].mxu1 %v25208_v36  ;;  %19184 = vmatpush3.bf16.msra.mxu0 %v19183_v17  ;;  %v19217_v17 = vpack.c.bf16 %v11184_v7, %v11183_v6  ;;  %v11193_v6 = vld [vmem:[%s25167_s9 + $0xd0] sm:$0xff]  ;;  %v11194_v7 = vld [vmem:[%s25167_s9 + $0xd8] sm:$0xff] }
 0xcbf   :  { %11089 = vmatprep.mubr.f32.mxu1 %v25198_v39  ;;  %19202 = vmatprep.subr.bf16.mxu0 %v19201_v55  ;;  %v19237_v20 = vpack.c.bf16 %v11194_v7, %v11193_v6 }
 0xcc0   :  { %19188 = vmatpush1.bf16.msra.mxu1 %v19187_v9  ;;  %v11199_v9 = vld [vmem:[%s25167_s9 + $0x100] sm:$0xff] }
 0xcc1   :  { %19190 = vmatprep.subr.bf16.mxu1 %v19189_v32  ;;  %v11186_v32 = vld [vmem:[%s25167_s9 + $0x98] sm:$0xff]  ;;  %v19251_v10 = vpack.c.bf16 %v11200_v48, %v11199_v9  ;;  %v11195_v9 = vld [vmem:[%s25167_s9 + $0xe0] sm:$0xff]  ;;  %v11196_v48 = vld [vmem:[%s25167_s9 + $0xe8] sm:$0xff] }
 0xcc4   :  { %19192 = vmatpush1.bf16.msra.mxu1 %v19191_v62 }
 0xcc5   :  { %19194 = vmatprep.subr.bf16.mxu1 %v19193_v27  ;;  %v11169_v27 = vld [vmem:[%s25167_s9 + $0x10] sm:$0xff] }
 0xd51   :  { %v10587_v37 = vpop.f32.mrb[46].mxu1 }
 0xd52   :  { %v24883_v57 = vadd.f32 %v10587_v37, %v24772_v3  ;;  %v15749_v0 = vpop.f32.mrb[47].mxu1  ;;  %v19203_v3 = vpack.c.bf16 %v10974_v21, %v10970_v18  ;;  %v11170_v37 = vld [vmem:[%s25167_s9 + $0x18] sm:$0xff] }
 0xd53   :  { %v19221_v0 = vpack.c.bf16 %v11186_v32, %v11185_v13  ;;  %v19223_v18 = vpack.c.bf16 %v11170_v37, %v11169_v27  ;;  %v11227_v13 = vld [vmem:[%s25167_s9 + $0x1e0] sm:$0xff]  ;;  %v11228_v32 = vld [vmem:[%s25167_s9 + $0x1e8] sm:$0xff] }
 0xd54   :  { %v11180_v27 = vld [vmem:[%s25167_s9 + $0x68] sm:$0xff]  ;;  %v11211_v37 = vld [vmem:[%s25167_s9 + $0x160] sm:$0xff] }
 0xd71   :  { %v10728_v42 = vpop.f32.mrb[48].mxu1 }
 0xd72   :  { %v10729_v19 = vadd.f32 %v10728_v42, %v24793_v58  ;;  %v15819_v35 = vpop.f32.mrb[49].mxu1  ;;  %v19195_v58 = vpack.c.bf16 %v10988_v23, %v10984_v12  ;;  %v19253_v42 = vpack.c.bf16 %v11218_v30, %v11217_v15  ;;  %v11173_v12 = vld [vmem:[%s25167_s9 + $0x30] sm:$0xff]  ;;  %v11174_v23 = vld [vmem:[%s25167_s9 + $0x38] sm:$0xff] }
 0xd73   :  { %v11202_v35 = vld [vmem:[%s25167_s9 + $0x118] sm:$0xff]  ;;  %v19231_v46 = vpack.c.bf16 %v11174_v23, %v11173_v12 }
 0xd74   :  { %v10802_v50 = vadd.f32 %v10798_v29, %v10729_v19  ;;  %19196 = vmatpush1.bf16.msra.mxu1 %v19195_v58  ;;  %v10993_v29 = vld [vmem:[%s25166_s7 + $0xc8] sm:$0xff]  ;;  %v11201_v19 = vld [vmem:[%s25167_s9 + $0x110] sm:$0xff]  ;;  %v19261_v58 = vpack.c.bf16 %v11222_v38, %v11221_v16 }
 0xd75   :  { %v19197_v36 = vpack.c.bf16 %v10997_v14, %v10993_v29  ;;  %v19255_v21 = vpack.c.bf16 %v11202_v35, %v11201_v19  ;;  %v11191_v29 = vld [vmem:[%s25167_s9 + $0xc0] sm:$0xff]  ;;  %v11192_v14 = vld [vmem:[%s25167_s9 + $0xc8] sm:$0xff]  ;;  %v11197_v19 = vld [vmem:[%s25167_s9 + $0xf0] sm:$0xff] }
 0xd76   :  { %v19233_v26 = vpack.c.bf16 %v11192_v14, %v11191_v29  ;;  %v11198_v35 = vld [vmem:[%s25167_s9 + $0xf8] sm:$0xff]  ;;  %v25210_v16 = vld [vmem:[#allocation5_spill] sm:$0xff] }
 0xd77   :  { %19198 = vmatprep.subr.bf16.mxu1 %v19197_v36  ;;  %v11224_v36 = vld [vmem:[%s25167_s9 + $0x1c8] sm:$0xff] }
 0xd78   :  { %19200 = vmatpush1.bf16.msra.mxu1 %v19199_v11  ;;  %v19265_v31 = vpack.c.bf16 %v11224_v36, %v11223_v28  ;;  %v11207_v11 = vld [vmem:[%s25167_s9 + $0x140] sm:$0xff] }
 0xd79   :  { %19218 = vmatprep.subr.bf16.mxu1 %v19217_v17  ;;  %v11226_v17 = vld [vmem:[%s25167_s9 + $0x1d8] sm:$0xff] }
 0xd7a   :  { %v19269_v63 = vpack.c.bf16 %v11226_v17, %v11225_v47 }
 0xd91   :  { %v10869_v5 = vpop.f32.mrb[50].mxu1 }
 0xd92   :  { %v10873_v56 = vadd.f32 %v10869_v5, %v10802_v50  ;;  %v15889_v2 = vpop.f32.mrb[51].mxu1  ;;  %v11187_v50 = vld [vmem:[%s25167_s9 + $0xa0] sm:$0xff]  ;;  %v11188_v5 = vld [vmem:[%s25167_s9 + $0xa8] sm:$0xff] }
 0xd93   :  { %v11220_v2 = vld [vmem:[%s25167_s9 + $0x1a8] sm:$0xff] }
 0xd94   :  { %v10874_v1 = vadd.f32 %v24656_v40, %v10873_v56  ;;  %v19207_v40 = vpack.c.bf16 %v10982_v59, %v10978_v51  ;;  %v11219_v56 = vld [vmem:[%s25167_s9 + $0x1a0] sm:$0xff]  ;;  %v11189_v51 = vld [vmem:[%s25167_s9 + $0xb0] sm:$0xff]  ;;  %v11190_v59 = vld [vmem:[%s25167_s9 + $0xb8] sm:$0xff] }
 0xd96   :  { %v10875_v41 = vmax.f32 %v10874_v1, 0.0  ;;  %v19225_v1 = vpack.c.bf16 %v11188_v5, %v11187_v50  ;;  %v11229_v50 = vld [vmem:[%s25167_s9 + $0x1f0] sm:$0xff]  ;;  %v19245_v5 = vpack.c.bf16 %v11198_v35, %v11197_v19 }
 0xd98   :  { %15907 = vmatmul.mubr.msk.f32.vlgmr.msra.gmra.mrb[52].mxu0 %vm7876_vm2, %v10875_v41  ;;  %v11203_v41 = vld [vmem:[%s25167_s9 + $0x120] sm:$0xff] }
 0xd99   :  { %19204 = vmatpush1.bf16.msra.mxu0 %v19203_v3  ;;  %11160 = vmatprep.mubr.f32.mxu0 %v25198_v39  ;;  %v10990_v39 = vld [vmem:[%s25166_s7 + $0xb0] sm:$0xff]  ;;  %v19257_v3 = vpack.c.bf16 %v11220_v2, %v11219_v56  ;;  %v11230_v56 = vld [vmem:[%s25167_s9 + $0x1f8] sm:$0xff] }
 0xd9a   :  { %19206 = vmatprep.subr.bf16.mxu0 %v19205_v34  ;;  %v19211_v24 = vpack.c.bf16 %v10990_v39, %v10986_v22  ;;  %v11204_v34 = vld [vmem:[%s25167_s9 + $0x128] sm:$0xff]  ;;  %v19229_v22 = vpack.c.bf16 %v11190_v59, %v11189_v51  ;;  %v11205_v39 = vld [vmem:[%s25167_s9 + $0x130] sm:$0xff]  ;;  %v11000_v51 = vld [vmem:[%s25169_s8] sm:$0xf] }
 0xd9b   :  { %v11181_v2 = vld [vmem:[%s25167_s9 + $0x70] sm:$0xff]  ;;  %v11009_v38 = vrot.slane %v11000_v51, %v25210_v16 }
 0xd9d   :  { %19208 = vmatpush1.bf16.msra.mxu0 %v19207_v40  ;;  %v19227_v40 = vpack.c.bf16 %v11172_v53, %v11171_v43  ;;  %v11213_v53 = vld [vmem:[%s25167_s9 + $0x170] sm:$0xff] }
 0xd9e   :  { %19210 = vmatprep.subr.bf16.mxu0 %v19209_v4  ;;  %v19259_v4 = vpack.c.bf16 %v11204_v34, %v11203_v41  ;;  %v25209_v41 = vld [vmem:[#allocation3_spill] sm:$0xff] }
 0xd9f   :  { %v11016_v34 = vsub.s32 3, %v25209_v41  ;;  %v11012_v59 = vsub.s32 2, %v25209_v41 }
 0xda1   :  { %19212 = vmatpush1.bf16.msra.mxu0 %v19211_v24  ;;  %v11206_v24 = vld [vmem:[%s25167_s9 + $0x138] sm:$0xff]  ;;  %v11013_v23 = vrot.slane %v11000_v51, %v11012_v59 }
 0xda2   :  { %19214 = vmatprep.subr.bf16.mxu0 %v19213_v60  ;;  %v19263_v52 = vpack.c.bf16 %v11206_v24, %v11205_v39  ;;  %v11175_v60 = vld [vmem:[%s25167_s9 + $0x40] sm:$0xff] }
 0xda3   :  { %v19235_v33 = vpack.c.bf16 %v11176_v8, %v11175_v60  ;;  %v13714_v60 = vld [vmem:[%s25170_s10] ss:$0 sm:$0xff] }
 0xda5   :  { %19216 = vmatpush1.bf16.msra.mxu0 %v19215_v54  ;;  %v11208_v54 = vld [vmem:[%s25167_s9 + $0x148] sm:$0xff] }
 0xda6   :  { %19250 = vmatprep.subr.bf16.mxu0 %v19249_v44  ;;  %v19267_v44 = vpack.c.bf16 %v11208_v54, %v11207_v11 }
 0xe6b   :  { %v10954_v45 = vpop.f32.mrb[52].mxu0 }
 0xe6c   :  { %v10958_v49 = vadd.f32 %v10954_v45, %v24883_v57  ;;  %v15908_v55 = vpop.f32.mrb[53].mxu0  ;;  %v11177_v45 = vld [vmem:[%s25167_s9 + $0x50] sm:$0xff] }
 0xe6d   :  { %v11210_v55 = vld [vmem:[%s25167_s9 + $0x158] sm:$0xff] }
 0xe6e   :  { %v10966_v62 = vadd.f32 %v13711_v25, %v10958_v49  ;;  %v11178_v25 = vld [vmem:[%s25167_s9 + $0x58] sm:$0xff]  ;;  %v11209_v49 = vld [vmem:[%s25167_s9 + $0x150] sm:$0xff] }
 0xe6f   :  { %v19239_v15 = vpack.c.bf16 %v11178_v25, %v11177_v45  ;;  %v19271_v30 = vpack.c.bf16 %v11210_v55, %v11209_v49 }
 0xe70   :  { %v10967_v57 = vmax.f32 %v10966_v62, 0.0  ;;  %v11179_v62 = vld [vmem:[%s25167_s9 + $0x60] sm:$0xff] }
 0xe72   :  { %13712 = vmatmul.mubr.msk.f32.vlgmr.msra.gmra.mrb[52].mxu1 %vm7876_vm2, %v10967_v57  ;;  %13713 = vmatmul.mubr.msk.f32.vlgmr.msra.gmra.mrb[54].mxu0 %vm7876_vm2, %v10967_v57  ;;  %v11212_v57 = vld [vmem:[%s25167_s9 + $0x168] sm:$0xff] }
 0xe73   :  { %19220 = vmatpush3.bf16.msra.mxu1 %v19219_v61  ;;  %19252 = vmatpush3.bf16.msra.mxu0 %v19251_v10  ;;  %v19241_v61 = vpack.c.bf16 %v11196_v48, %v11195_v9  ;;  %v19273_v10 = vpack.c.bf16 %v11228_v32, %v11227_v13 }
 0xe74   :  { %19222 = vmatprep.subr.bf16.mxu1 %v19221_v0  ;;  %19254 = vmatprep.subr.bf16.mxu0 %v19253_v42  ;;  %v19243_v0 = vpack.c.bf16 %v11180_v27, %v11179_v62  ;;  %v19275_v42 = vpack.c.bf16 %v11212_v57, %v11211_v37 }
 0xe77   :  { %19224 = vmatpush3.bf16.msra.mxu1 %v19223_v18  ;;  %19256 = vmatpush3.bf16.msra.mxu0 %v19255_v21  ;;  %v11182_v18 = vld [vmem:[%s25167_s9 + $0x78] sm:$0xff]  ;;  %v19277_v21 = vpack.c.bf16 %v11230_v56, %v11229_v50 }
 0xe78   :  { %19226 = vmatprep.subr.bf16.mxu1 %v19225_v1  ;;  %19258 = vmatprep.subr.bf16.mxu0 %v19257_v3  ;;  %v19247_v43 = vpack.c.bf16 %v11182_v18, %v11181_v2  ;;  %v11214_v1 = vld [vmem:[%s25167_s9 + $0x178] sm:$0xff] }
 0xe79   :  { %v19279_v3 = vpack.c.bf16 %v11214_v1, %v11213_v53 }
 0xe7b   :  { %19228 = vmatpush3.bf16.msra.mxu1 %v19227_v40  ;;  %19260 = vmatpush3.bf16.msra.mxu0 %v19259_v4  ;;  %v11017_v40 = vrot.slane %v11000_v51, %v11016_v34  ;;  %v25211_v4 = vld [vmem:[#allocation4_spill] sm:$0xff] }
 0xe7c   :  { %19230 = vmatprep.subr.bf16.mxu1 %v19229_v22  ;;  %19262 = vmatprep.subr.bf16.mxu0 %v19261_v58  ;;  %v11005_v12 = vrot.slane %v11000_v51, %v25211_v4 }
 0xe7f   :  { %19232 = vmatpush3.bf16.msra.mxu1 %v19231_v46  ;;  %19264 = vmatpush3.bf16.msra.mxu0 %v19263_v52 }
 0xe80   :  { %19234 = vmatprep.subr.bf16.mxu1 %v19233_v26  ;;  %19266 = vmatprep.subr.bf16.mxu0 %v19265_v31 }
 0xe83   :  { %19236 = vmatpush3.bf16.msra.mxu1 %v19235_v33  ;;  %19268 = vmatpush3.bf16.msra.mxu0 %v19267_v44 }
 0xe84   :  { %19238 = vmatprep.subr.bf16.mxu1 %v19237_v20  ;;  %19270 = vmatprep.subr.bf16.mxu0 %v19269_v63 }
 0xe87   :  { %19240 = vmatpush3.bf16.msra.mxu1 %v19239_v15  ;;  %19272 = vmatpush3.bf16.msra.mxu0 %v19271_v30 }
 0xe88   :  { %19242 = vmatprep.subr.bf16.mxu1 %v19241_v61  ;;  %19274 = vmatprep.subr.bf16.mxu0 %v19273_v10 }
 0xe8b   :  { %19244 = vmatpush3.bf16.msra.mxu1 %v19243_v0  ;;  %19276 = vmatpush3.bf16.msra.mxu0 %v19275_v42 }
 0xe8c   :  { %19246 = vmatprep.subr.bf16.mxu1 %v19245_v5  ;;  %19278 = vmatprep.subr.bf16.mxu0 %v19277_v21 }
 0xe8f   :  { %19248 = vmatpush3.bf16.msra.mxu1 %v19247_v43  ;;  %19280 = vmatpush3.bf16.msra.mxu0 %v19279_v3 }
 0xf45   :  { %v11091_v22 = vpop.f32.mrb[52].mxu1  ;;  %v11162_v58 = vpop.f32.mrb[54].mxu0 }
 0xf46   :  { %v11093_v39 = vpop.f32.mrb[53].mxu1  ;;  %v11164_v24 = vpop.f32.mrb[55].mxu0  ;;  %v11092_v28 = vadd.f32 %v11091_v22, %v11005_v12  ;;  %v11163_v36 = vadd.f32 %v11162_v58, %v11013_v23 }
 0xf47   :  { %v11094_v29 = vadd.f32 %v11093_v39, %v11009_v38  ;;  %v11165_v14 = vadd.f32 %v11164_v24, %v11017_v40 }
 0xf49   :  { %11302 = vmatprep.mubr.f32.mxu1 %v11094_v29  ;;  %11372 = vmatprep.mubr.f32.mxu0 %v11165_v14 }
 0xf4a   :  { %11303 = vmatmul.mubr.f32.vlgmr.msra.gmra.mrb[54].mxu1 %v11092_v28  ;;  %11373 = vmatmul.mubr.f32.vlgmr.msra.gmra.mrb[56].mxu0 %v11163_v36 }
0x101d   :  { %v14440_v46 = vpop.f32.mrb[54].mxu1  ;;  %v14475_v52 = vpop.f32.mrb[56].mxu0 }
0x101e   :  { %v14441_v8 = vpop.f32.mrb[55].mxu1  ;;  %v14476_v26 = vpop.f32.mrb[57].mxu0 }
0x101f   :  { %v14442_v31 = vadd.f32 %v14441_v8, %v14440_v46  ;;  %v14477_v11 = vadd.f32 %v14476_v26, %v14475_v52 }
0x1021   :  { %v11305_v54 = vadd.f32 %v14442_v31, %v13714_v60 }
0x1023   :  { %v11375_v6 = vadd.f32 %v14477_v11, %v11305_v54 }
0x1025   :  { %11378 = vst [vmem:[%s25171_s11] sm:$0xff] %v11375_v6 }

</bundles_post_ra>
